<compile_context>
chip_gen: v5e
topology: v5e:2x2
jax: 0.10.0
libtpu: 0.0.40
codegen_flags: <defaults>
</compile_context>

<pallas_src>
import jax
import jax.numpy as jnp
from jax.experimental import pallas as pl
from jax.experimental.pallas import tpu as pltpu


def _full_spec(shape):
    # whole-array block at grid point 0 (all arrays here are tiny -> fit VMEM)
    return pl.BlockSpec(shape, lambda *_: (0,) * len(shape))


# ----------------------------------------------------------------------------
# Single fused kernel: conv stack -> LSTM -> dueling head
# ----------------------------------------------------------------------------
def _fused_forward_kernel(x_ref, w1_ref, b1_ref, w2_ref, b2_ref, w3_ref, b3_ref,
                          wih_ref, whh_ref, bl_ref, h0_ref, c0_ref,
                          hw1_ref, hb1_ref, hw2_ref, hb2_ref,
                          q_ref, h_out_ref, c_out_ref):
    f32 = jnp.float32
    B = h0_ref.shape[0]
    Hd = whh_ref.shape[0]
    T = x_ref.shape[0] // B
    A = q_ref.shape[1]

    def mm(x, w_ref, b_ref):
        return jnp.dot(x, w_ref[...], preferred_element_type=f32) + b_ref[...]

    def silu(z):
        return z * jax.nn.sigmoid(z)

    # --- conv stack as dense (Toeplitz-unrolled) matmuls, SiLU fused --------
    a = x_ref[...]                        # (T*B, H*W*C) raw pixels; 1/255 folded into w1
    a = silu(mm(a, w1_ref, b1_ref))       # (T*B, oh1*ow1*16)
    a = silu(mm(a, w2_ref, b2_ref))       # (T*B, oh2*ow2*32)
    a = silu(mm(a, w3_ref, b3_ref))       # (T*B, F)   cols already in NCHW flatten order

    # --- LSTM: input projection hoisted out of the serial recurrence --------
    gates_x = mm(a, wih_ref, bl_ref)      # (T*B, 4H);  bl = b_ih + b_hh
    whh = whh_ref[...]
    h = h0_ref[...]
    c = c0_ref[...]
    for t in range(T):                    # static unroll; rows are time-major (t, b)
        gates = gates_x[t * B:(t + 1) * B, :] + jnp.dot(
            h, whh, preferred_element_type=f32)        # (B, 4H)
        sg = jax.nn.sigmoid(gates)        # whole-vreg EUP pass (4H = 128 lanes)
        th = jnp.tanh(gates)
        i_g = sg[:, 0:Hd]
        f_g = sg[:, Hd:2 * Hd]
        g_g = th[:, 2 * Hd:3 * Hd]
        o_g = sg[:, 3 * Hd:4 * Hd]
        c = f_g * c + i_g * g_g
        h = o_g * jnp.tanh(c)

    # --- dueling head: adv & value branches fused into one 2-matmul MLP -----
    z = silu(mm(h, hw1_ref, hb1_ref))     # (B, 2H): [:H]=adv hidden, [H:]=val hidden
    av = mm(z, hw2_ref, hb2_ref)          # (B, A+1): [:A]=advantage, [A:]=value
    adv = av[:, 0:A]
    val = av[:, A:A + 1]
    # NOTE: PyTorch uses advantage.mean() -> global mean over batch AND actions.
    q_ref[...] = (val + adv - jnp.mean(adv)).astype(q_ref.dtype)
    h_out_ref[...] = h.astype(h_out_ref.dtype)
    c_out_ref[...] = c.astype(c_out_ref.dtype)


def fused_forward(x_flat, prep, h0, c0):
    args = (x_flat, prep["w1"], prep["b1"], prep["w2"], prep["b2"],
            prep["w3"], prep["b3"], prep["wih"], prep["whh"], prep["bl"],
            h0, c0, prep["hw1"], prep["hb1"], prep["hw2"], prep["hb2"])
    B, Hd = h0.shape
    A = prep["hw2"].shape[1] - 1
    out_shape = (jax.ShapeDtypeStruct((B, A), jnp.float32),
                 jax.ShapeDtypeStruct((B, Hd), jnp.float32),
                 jax.ShapeDtypeStruct((B, Hd), jnp.float32))
    return pl.pallas_call(
        _fused_forward_kernel,
        out_shape=out_shape,
        grid=(1,),
        in_specs=[_full_spec(a.shape) for a in args],
        out_specs=tuple(_full_spec(s.shape) for s in out_shape),
        compiler_params=pltpu.CompilerParams(
            dimension_semantics=("arbitrary",),
            vmem_limit_bytes=32 * 1024 * 1024),
    )(*args)


# ----------------------------------------------------------------------------
# One-time parameter preprocessing (pure data movement / weight folding, glue)
# ----------------------------------------------------------------------------
def prepare_params(params):
    C, H, W = params["state_dim"]
    s = params["stride"]

    def conv_to_dense(w_hwio, in_hw, chw_out=False):
        # Exact dense (Toeplitz) matrix of a VALID conv with stride s.
        kh, kw, cin, cout = w_hwio.shape
        Hin, Win = in_hw
        oh = (Hin - kh) // s + 1
        ow = (Win - kw) // s + 1
        oy, ox, ki, kj, ci, co = jnp.meshgrid(
            jnp.arange(oh), jnp.arange(ow), jnp.arange(kh), jnp.arange(kw),
            jnp.arange(cin), jnp.arange(cout), indexing="ij")
        rows = ((oy * s + ki) * Win + (ox * s + kj)) * cin + ci      # HWC input flatten
        if chw_out:
            cols = (co * oh + oy) * ow + ox                          # PyTorch CHW flatten
        else:
            cols = (oy * ow + ox) * cout + co                        # HWC flatten
        vals = w_hwio[ki, kj, ci, co].astype(jnp.float32)
        dense = jnp.zeros((Hin * Win * cin, oh * ow * cout), jnp.float32)
        dense = dense.at[rows.ravel(), cols.ravel()].set(vals.ravel())
        return dense, (oh, ow)

    W1, (oh1, ow1) = conv_to_dense(params["c1_w"], (H, W))
    W2, (oh2, ow2) = conv_to_dense(params["c2_w"], (oh1, ow1))
    W3, (oh3, ow3) = conv_to_dense(params["c3_w"], (oh2, ow2), chw_out=True)
    W1 = W1 / 255.0   # fold x.float()/255.0 into the first conv weights

    b1 = jnp.tile(params["c1_b"].reshape(1, -1), (1, oh1 * ow1))
    b2 = jnp.tile(params["c2_b"].reshape(1, -1), (1, oh2 * ow2))
    b3 = jnp.repeat(params["c3_b"].reshape(-1), oh3 * ow3).reshape(1, -1)

    Hd = params["a_w1"].shape[0]
    A = params["a_w2"].shape[1]
    hw1 = jnp.concatenate([params["a_w1"], params["v_w1"]], axis=1)   # (H, 2H)
    hb1 = jnp.concatenate([params["a_b1"], params["v_b1"]], axis=1)   # (1, 2H)
    hw2 = jnp.zeros((2 * Hd, A + 1), jnp.float32)
    hw2 = hw2.at[:Hd, :A].set(params["a_w2"]).at[Hd:, A:].set(params["v_w2"])
    hb2 = jnp.concatenate([params["a_b2"], params["v_b2"]], axis=1)   # (1, A+1)

    return {
        "state_dim": params["state_dim"],
        "w1": W1, "b1": b1, "w2": W2, "b2": b2, "w3": W3, "b3": b3,
        "wih": params["lstm_w_ih"], "whh": params["lstm_w_hh"],
        "bl": (params["lstm_b_ih"] + params["lstm_b_hh"]).reshape(1, -1),
        "hw1": hw1, "hb1": hb1, "hw2": hw2, "hb2": hb2,
    }


# ----------------------------------------------------------------------------
# Forward (mirrors DuelingVisionDRQN.forward)
# ----------------------------------------------------------------------------
def dueling_vision_drqn_forward(prep, x, batch_size, time_step,
                                hidden_state, cell_state):
    C, H, W = prep["state_dim"]
    x = x.reshape(batch_size, time_step, C, H, W).astype(jnp.float32)
    # time-major rows (t, b), per-sample HWC flatten -- pure data movement
    x_flat = jnp.transpose(x, (1, 0, 3, 4, 2)).reshape(
        time_step * batch_size, H * W * C)
    h0 = hidden_state[0]
    c0 = cell_state[0]
    q, h_last, c_last = fused_forward(x_flat, prep, h0, c0)
    return q, (h_last[None], c_last[None])


# ----------------------------------------------------------------------------
# Deterministic synthetic parameters (shapes follow the module __init__)
# ----------------------------------------------------------------------------
def init_params(key, state_dim, action_dim, kernel_size, stride, hidden_dim):
    C, H, W = state_dim
    ks = jax.random.split(key, 20)

    def w(k, shape, scale=0.05):
        return (scale * jax.random.normal(k, shape)).astype(jnp.float32)

    def osz(n):
        return (n - kernel_size) // stride + 1

    h1, w1 = osz(H), osz(W)
    h2, w2 = osz(h1), osz(w1)
    h3, w3 = osz(h2), osz(w2)
    conv_out_size = 64 * h3 * w3

    p = {"state_dim": state_dim, "stride": stride}
    p["c1_w"] = w(ks[0], (kernel_size, kernel_size, C, 16))
    p["c1_b"] = w(ks[1], (1, 16))
    p["c2_w"] = w(ks[2], (kernel_size, kernel_size, 16, 32))
    p["c2_b"] = w(ks[3], (1, 32))
    p["c3_w"] = w(ks[4], (kernel_size, kernel_size, 32, 64))
    p["c3_b"] = w(ks[5], (1, 64))
    p["lstm_w_ih"] = w(ks[6], (conv_out_size, 4 * hidden_dim))
    p["lstm_w_hh"] = w(ks[7], (hidden_dim, 4 * hidden_dim))
    p["lstm_b_ih"] = w(ks[8], (4 * hidden_dim,))
    p["lstm_b_hh"] = w(ks[9], (4 * hidden_dim,))
    p["a_w1"] = w(ks[10], (hidden_dim, hidden_dim))
    p["a_b1"] = w(ks[11], (1, hidden_dim))
    p["a_w2"] = w(ks[12], (hidden_dim, action_dim))
    p["a_b2"] = w(ks[13], (1, action_dim))
    p["v_w1"] = w(ks[14], (hidden_dim, hidden_dim))
    p["v_b1"] = w(ks[15], (1, hidden_dim))
    p["v_w2"] = w(ks[16], (hidden_dim, 1))
    p["v_b2"] = w(ks[17], (1, 1))
    return p


# ----------------------------------------------------------------------------
# Pure-JAX reference (for correctness check)
# ----------------------------------------------------------------------------
def reference_forward(params, x, batch_size, time_step, hidden_state, cell_state):
    C, H, W = params["state_dim"]
    s = params["stride"]
    x = x.reshape(batch_size * time_step, C, H, W).astype(jnp.float32) / 255.0
    x = jnp.transpose(x, (0, 2, 3, 1))

    def conv(x, w, b):
        y = jax.lax.conv_general_dilated(
            x, w, (s, s), "VALID", dimension_numbers=("NHWC", "HWIO", "NHWC"))
        y = y + b.reshape(1, 1, 1, -1)
        return y * jax.nn.sigmoid(y)

    x = conv(x, params["c1_w"], params["c1_b"])
    x = conv(x, params["c2_w"], params["c2_b"])
    x = conv(x, params["c3_w"], params["c3_b"])
    x = jnp.transpose(x, (0, 3, 1, 2)).reshape(batch_size, time_step, -1)

    h, c = hidden_state[0], cell_state[0]
    Hd = h.shape[1]
    b = (params["lstm_b_ih"] + params["lstm_b_hh"])[None, :]
    for t in range(time_step):
        g = x[:, t, :] @ params["lstm_w_ih"] + h @ params["lstm_w_hh"] + b
        i = jax.nn.sigmoid(g[:, :Hd])
        f = jax.nn.sigmoid(g[:, Hd:2 * Hd])
        gg = jnp.tanh(g[:, 2 * Hd:3 * Hd])
        o = jax.nn.sigmoid(g[:, 3 * Hd:])
        c = f * c + i * gg
        h = o * jnp.tanh(c)

    def mlp(z, w1, b1, w2, b2):
        y = z @ w1 + b1
        y = y * jax.nn.sigmoid(y)
        return y @ w2 + b2

    adv = mlp(h, params["a_w1"], params["a_b1"], params["a_w2"], params["a_b2"])
    val = mlp(h, params["v_w1"], params["v_b1"], params["v_w2"], params["v_b2"])
    return val + adv - jnp.mean(adv), (h[None], c[None])


if __name__ == "__main__":
    key = jax.random.PRNGKey(0)
    k_params, k_x = jax.random.split(key)

    batch, time_step = 2, 8
    state_dim = (4, 16, 16)        # (C, H, W) as in PyTorch
    action_dim = 4
    hidden_dim = 32
    kernel_size, stride = 3, 2

    params = init_params(k_params, state_dim, action_dim, kernel_size, stride,
                         hidden_dim)
    prep = prepare_params(params)   # one-time weight folding / unrolling

    x = jax.random.uniform(k_x, (batch, time_step, *state_dim),
                           minval=0.0, maxval=255.0, dtype=jnp.float32)
    h0 = jnp.zeros((1, batch, hidden_dim), jnp.float32)   # init_hidden_states
    c0 = jnp.zeros((1, batch, hidden_dim), jnp.float32)

    q, (h_n, c_n) = dueling_vision_drqn_forward(prep, x, batch, time_step, h0, c0)
    jax.block_until_ready((q, h_n, c_n))

    q_ref, (h_ref, c_ref) = reference_forward(params, x, batch, time_step, h0, c0)
    assert q.shape == (batch, action_dim)
    assert h_n.shape == (1, batch, hidden_dim) and c_n.shape == (1, batch, hidden_dim)
    assert jnp.allclose(q, q_ref, atol=2e-3, rtol=2e-3)
    assert jnp.allclose(h_n, h_ref, atol=2e-3, rtol=2e-3)
    assert jnp.allclose(c_n, c_ref, atol=2e-3, rtol=2e-3)

    print("KERNEL_OK")
</pallas_src>

<mosaic_0001>
module attributes {stable_mosaic.version = 11 : i64} {
  func.func @_fused_forward_kernel(%arg0: i32, %arg1: memref<16x1024xf32, #tpu.memory_space<vmem>>, %arg2: memref<1024x784xf32, #tpu.memory_space<vmem>>, %arg3: memref<1x784xf32, #tpu.memory_space<vmem>>, %arg4: memref<784x288xf32, #tpu.memory_space<vmem>>, %arg5: memref<1x288xf32, #tpu.memory_space<vmem>>, %arg6: memref<288x64xf32, #tpu.memory_space<vmem>>, %arg7: memref<1x64xf32, #tpu.memory_space<vmem>>, %arg8: memref<64x128xf32, #tpu.memory_space<vmem>>, %arg9: memref<32x128xf32, #tpu.memory_space<vmem>>, %arg10: memref<1x128xf32, #tpu.memory_space<vmem>>, %arg11: memref<2x32xf32, #tpu.memory_space<vmem>>, %arg12: memref<2x32xf32, #tpu.memory_space<vmem>>, %arg13: memref<32x64xf32, #tpu.memory_space<vmem>>, %arg14: memref<1x64xf32, #tpu.memory_space<vmem>>, %arg15: memref<64x5xf32, #tpu.memory_space<vmem>>, %arg16: memref<1x5xf32, #tpu.memory_space<vmem>>, %arg17: memref<2x4xf32, #tpu.memory_space<vmem>>, %arg18: memref<2x32xf32, #tpu.memory_space<vmem>>, %arg19: memref<2x32xf32, #tpu.memory_space<vmem>>) attributes {dimension_semantics = [#tpu.dimension_semantics<arbitrary>], iteration_bounds = array<i64: 1>, scalar_prefetch = 0 : i64, scratch_operands = 0 : i64, tpu.core_type = #tpu.core_type<tc>, window_params = [{pipeline_mode = #tpu.pipeline_mode<synchronous>, transform_indices = @transform_0, window_bounds = array<i64: 16, 1024>}, {pipeline_mode = #tpu.pipeline_mode<synchronous>, transform_indices = @transform_1, window_bounds = array<i64: 1024, 784>}, {pipeline_mode = #tpu.pipeline_mode<synchronous>, transform_indices = @transform_2, window_bounds = array<i64: 1, 784>}, {pipeline_mode = #tpu.pipeline_mode<synchronous>, transform_indices = @transform_3, window_bounds = array<i64: 784, 288>}, {pipeline_mode = #tpu.pipeline_mode<synchronous>, transform_indices = @transform_4, window_bounds = array<i64: 1, 288>}, {pipeline_mode = #tpu.pipeline_mode<synchronous>, transform_indices = @transform_5, window_bounds = array<i64: 288, 64>}, {pipeline_mode = #tpu.pipeline_mode<synchronous>, transform_indices = @transform_6, window_bounds = array<i64: 1, 64>}, {pipeline_mode = #tpu.pipeline_mode<synchronous>, transform_indices = @transform_7, window_bounds = array<i64: 64, 128>}, {pipeline_mode = #tpu.pipeline_mode<synchronous>, transform_indices = @transform_8, window_bounds = array<i64: 32, 128>}, {pipeline_mode = #tpu.pipeline_mode<synchronous>, transform_indices = @transform_9, window_bounds = array<i64: 1, 128>}, {pipeline_mode = #tpu.pipeline_mode<synchronous>, transform_indices = @transform_10, window_bounds = array<i64: 2, 32>}, {pipeline_mode = #tpu.pipeline_mode<synchronous>, transform_indices = @transform_11, window_bounds = array<i64: 2, 32>}, {pipeline_mode = #tpu.pipeline_mode<synchronous>, transform_indices = @transform_12, window_bounds = array<i64: 32, 64>}, {pipeline_mode = #tpu.pipeline_mode<synchronous>, transform_indices = @transform_13, window_bounds = array<i64: 1, 64>}, {pipeline_mode = #tpu.pipeline_mode<synchronous>, transform_indices = @transform_14, window_bounds = array<i64: 64, 5>}, {pipeline_mode = #tpu.pipeline_mode<synchronous>, transform_indices = @transform_15, window_bounds = array<i64: 1, 5>}, {pipeline_mode = #tpu.pipeline_mode<synchronous>, transform_indices = @transform_16, window_bounds = array<i64: 2, 4>}, {pipeline_mode = #tpu.pipeline_mode<synchronous>, transform_indices = @transform_17, window_bounds = array<i64: 2, 32>}, {pipeline_mode = #tpu.pipeline_mode<synchronous>, transform_indices = @transform_18, window_bounds = array<i64: 2, 32>}]} {
    %c0 = arith.constant 0 : index
    %c0_0 = arith.constant 0 : index
    %0 = vector.load %arg1[%c0, %c0_0] : memref<16x1024xf32, #tpu.memory_space<vmem>>, vector<16x1024xf32>
    %c0_1 = arith.constant 0 : index
    %c0_2 = arith.constant 0 : index
    %1 = vector.load %arg2[%c0_1, %c0_2] : memref<1024x784xf32, #tpu.memory_space<vmem>>, vector<1024x784xf32>
    %cst = arith.constant dense<0.000000e+00> : vector<16x784xf32>
    %2 = tpu.matmul %0, %1, %cst {dimension_numbers = #tpu.dot_dimension_numbers<[1], [0], [0], [1], [0, 0, 1, 1], [], []>} : vector<16x1024xf32>, vector<1024x784xf32>, vector<16x784xf32> -> vector<16x784xf32>
    %c0_3 = arith.constant 0 : index
    %c0_4 = arith.constant 0 : index
    %3 = vector.load %arg3[%c0_3, %c0_4] : memref<1x784xf32, #tpu.memory_space<vmem>>, vector<1x784xf32>
    %4 = vector.broadcast %3 : vector<1x784xf32> to vector<16x784xf32>
    %5 = arith.addf %2, %4 : vector<16x784xf32>
    %6 = arith.negf %5 : vector<16x784xf32>
    %7 = math.exp %6 : vector<16x784xf32>
    %cst_5 = arith.constant 1.000000e+00 : f32
    %8 = vector.broadcast %cst_5 : f32 to vector<16x784xf32>
    %9 = arith.addf %8, %7 : vector<16x784xf32>
    %10 = arith.divf %8, %9 : vector<16x784xf32>
    %11 = arith.mulf %5, %10 : vector<16x784xf32>
    %c0_6 = arith.constant 0 : index
    %c0_7 = arith.constant 0 : index
    %12 = vector.load %arg4[%c0_6, %c0_7] : memref<784x288xf32, #tpu.memory_space<vmem>>, vector<784x288xf32>
    %cst_8 = arith.constant dense<0.000000e+00> : vector<16x288xf32>
    %13 = tpu.matmul %11, %12, %cst_8 {dimension_numbers = #tpu.dot_dimension_numbers<[1], [0], [0], [1], [0, 0, 1, 1], [], []>} : vector<16x784xf32>, vector<784x288xf32>, vector<16x288xf32> -> vector<16x288xf32>
    %c0_9 = arith.constant 0 : index
    %c0_10 = arith.constant 0 : index
    %14 = vector.load %arg5[%c0_9, %c0_10] : memref<1x288xf32, #tpu.memory_space<vmem>>, vector<1x288xf32>
    %15 = vector.broadcast %14 : vector<1x288xf32> to vector<16x288xf32>
    %16 = arith.addf %13, %15 : vector<16x288xf32>
    %17 = arith.negf %16 : vector<16x288xf32>
    %18 = math.exp %17 : vector<16x288xf32>
    %cst_11 = arith.constant 1.000000e+00 : f32
    %19 = vector.broadcast %cst_11 : f32 to vector<16x288xf32>
    %20 = arith.addf %19, %18 : vector<16x288xf32>
    %21 = arith.divf %19, %20 : vector<16x288xf32>
    %22 = arith.mulf %16, %21 : vector<16x288xf32>
    %c0_12 = arith.constant 0 : index
    %c0_13 = arith.constant 0 : index
    %23 = vector.load %arg6[%c0_12, %c0_13] : memref<288x64xf32, #tpu.memory_space<vmem>>, vector<288x64xf32>
    %cst_14 = arith.constant dense<0.000000e+00> : vector<16x64xf32>
    %24 = tpu.matmul %22, %23, %cst_14 {dimension_numbers = #tpu.dot_dimension_numbers<[1], [0], [0], [1], [0, 0, 1, 1], [], []>} : vector<16x288xf32>, vector<288x64xf32>, vector<16x64xf32> -> vector<16x64xf32>
    %c0_15 = arith.constant 0 : index
    %c0_16 = arith.constant 0 : index
    %25 = vector.load %arg7[%c0_15, %c0_16] : memref<1x64xf32, #tpu.memory_space<vmem>>, vector<1x64xf32>
    %26 = vector.broadcast %25 : vector<1x64xf32> to vector<16x64xf32>
    %27 = arith.addf %24, %26 : vector<16x64xf32>
    %28 = arith.negf %27 : vector<16x64xf32>
    %29 = math.exp %28 : vector<16x64xf32>
    %cst_17 = arith.constant 1.000000e+00 : f32
    %30 = vector.broadcast %cst_17 : f32 to vector<16x64xf32>
    %31 = arith.addf %30, %29 : vector<16x64xf32>
    %32 = arith.divf %30, %31 : vector<16x64xf32>
    %33 = arith.mulf %27, %32 : vector<16x64xf32>
    %c0_18 = arith.constant 0 : index
    %c0_19 = arith.constant 0 : index
    %34 = vector.load %arg8[%c0_18, %c0_19] : memref<64x128xf32, #tpu.memory_space<vmem>>, vector<64x128xf32>
    %cst_20 = arith.constant dense<0.000000e+00> : vector<16x128xf32>
    %35 = tpu.matmul %33, %34, %cst_20 {dimension_numbers = #tpu.dot_dimension_numbers<[1], [0], [0], [1], [0, 0, 1, 1], [], []>} : vector<16x64xf32>, vector<64x128xf32>, vector<16x128xf32> -> vector<16x128xf32>
    %c0_21 = arith.constant 0 : index
    %c0_22 = arith.constant 0 : index
    %36 = vector.load %arg10[%c0_21, %c0_22] : memref<1x128xf32, #tpu.memory_space<vmem>>, vector<1x128xf32>
    %37 = vector.broadcast %36 : vector<1x128xf32> to vector<16x128xf32>
    %38 = arith.addf %35, %37 : vector<16x128xf32>
    %c0_23 = arith.constant 0 : index
    %c0_24 = arith.constant 0 : index
    %39 = vector.load %arg9[%c0_23, %c0_24] : memref<32x128xf32, #tpu.memory_space<vmem>>, vector<32x128xf32>
    %c0_25 = arith.constant 0 : index
    %c0_26 = arith.constant 0 : index
    %40 = vector.load %arg11[%c0_25, %c0_26] : memref<2x32xf32, #tpu.memory_space<vmem>>, vector<2x32xf32>
    %c0_27 = arith.constant 0 : index
    %c0_28 = arith.constant 0 : index
    %41 = vector.load %arg12[%c0_27, %c0_28] : memref<2x32xf32, #tpu.memory_space<vmem>>, vector<2x32xf32>
    %42 = vector.extract_strided_slice %38 {offsets = [0, 0], sizes = [2, 128], strides = [1, 1]} : vector<16x128xf32> to vector<2x128xf32>
    %cst_29 = arith.constant dense<0.000000e+00> : vector<2x128xf32>
    %43 = tpu.matmul %40, %39, %cst_29 {dimension_numbers = #tpu.dot_dimension_numbers<[1], [0], [0], [1], [0, 0, 1, 1], [], []>} : vector<2x32xf32>, vector<32x128xf32>, vector<2x128xf32> -> vector<2x128xf32>
    %44 = arith.addf %42, %43 : vector<2x128xf32>
    %45 = arith.negf %44 : vector<2x128xf32>
    %46 = math.exp %45 : vector<2x128xf32>
    %cst_30 = arith.constant 1.000000e+00 : f32
    %47 = vector.broadcast %cst_30 : f32 to vector<2x128xf32>
    %48 = arith.addf %47, %46 : vector<2x128xf32>
    %49 = arith.divf %47, %48 : vector<2x128xf32>
    %50 = math.tanh %44 : vector<2x128xf32>
    %51 = vector.extract_strided_slice %49 {offsets = [0, 0], sizes = [2, 32], strides = [1, 1]} : vector<2x128xf32> to vector<2x32xf32>
    %52 = vector.extract_strided_slice %49 {offsets = [0, 32], sizes = [2, 32], strides = [1, 1]} : vector<2x128xf32> to vector<2x32xf32>
    %53 = vector.extract_strided_slice %50 {offsets = [0, 64], sizes = [2, 32], strides = [1, 1]} : vector<2x128xf32> to vector<2x32xf32>
    %54 = vector.extract_strided_slice %49 {offsets = [0, 96], sizes = [2, 32], strides = [1, 1]} : vector<2x128xf32> to vector<2x32xf32>
    %55 = arith.mulf %52, %41 : vector<2x32xf32>
    %56 = arith.mulf %51, %53 : vector<2x32xf32>
    %57 = arith.addf %55, %56 : vector<2x32xf32>
    %58 = math.tanh %57 : vector<2x32xf32>
    %59 = arith.mulf %54, %58 : vector<2x32xf32>
    %60 = vector.extract_strided_slice %38 {offsets = [2, 0], sizes = [2, 128], strides = [1, 1]} : vector<16x128xf32> to vector<2x128xf32>
    %cst_31 = arith.constant dense<0.000000e+00> : vector<2x128xf32>
    %61 = tpu.matmul %59, %39, %cst_31 {dimension_numbers = #tpu.dot_dimension_numbers<[1], [0], [0], [1], [0, 0, 1, 1], [], []>} : vector<2x32xf32>, vector<32x128xf32>, vector<2x128xf32> -> vector<2x128xf32>
    %62 = arith.addf %60, %61 : vector<2x128xf32>
    %63 = arith.negf %62 : vector<2x128xf32>
    %64 = math.exp %63 : vector<2x128xf32>
    %cst_32 = arith.constant 1.000000e+00 : f32
    %65 = vector.broadcast %cst_32 : f32 to vector<2x128xf32>
    %66 = arith.addf %65, %64 : vector<2x128xf32>
    %67 = arith.divf %65, %66 : vector<2x128xf32>
    %68 = math.tanh %62 : vector<2x128xf32>
    %69 = vector.extract_strided_slice %67 {offsets = [0, 0], sizes = [2, 32], strides = [1, 1]} : vector<2x128xf32> to vector<2x32xf32>
    %70 = vector.extract_strided_slice %67 {offsets = [0, 32], sizes = [2, 32], strides = [1, 1]} : vector<2x128xf32> to vector<2x32xf32>
    %71 = vector.extract_strided_slice %68 {offsets = [0, 64], sizes = [2, 32], strides = [1, 1]} : vector<2x128xf32> to vector<2x32xf32>
    %72 = vector.extract_strided_slice %67 {offsets = [0, 96], sizes = [2, 32], strides = [1, 1]} : vector<2x128xf32> to vector<2x32xf32>
    %73 = arith.mulf %70, %57 : vector<2x32xf32>
    %74 = arith.mulf %69, %71 : vector<2x32xf32>
    %75 = arith.addf %73, %74 : vector<2x32xf32>
    %76 = math.tanh %75 : vector<2x32xf32>
    %77 = arith.mulf %72, %76 : vector<2x32xf32>
    %78 = vector.extract_strided_slice %38 {offsets = [4, 0], sizes = [2, 128], strides = [1, 1]} : vector<16x128xf32> to vector<2x128xf32>
    %cst_33 = arith.constant dense<0.000000e+00> : vector<2x128xf32>
    %79 = tpu.matmul %77, %39, %cst_33 {dimension_numbers = #tpu.dot_dimension_numbers<[1], [0], [0], [1], [0, 0, 1, 1], [], []>} : vector<2x32xf32>, vector<32x128xf32>, vector<2x128xf32> -> vector<2x128xf32>
    %80 = arith.addf %78, %79 : vector<2x128xf32>
    %81 = arith.negf %80 : vector<2x128xf32>
    %82 = math.exp %81 : vector<2x128xf32>
    %cst_34 = arith.constant 1.000000e+00 : f32
    %83 = vector.broadcast %cst_34 : f32 to vector<2x128xf32>
    %84 = arith.addf %83, %82 : vector<2x128xf32>
    %85 = arith.divf %83, %84 : vector<2x128xf32>
    %86 = math.tanh %80 : vector<2x128xf32>
    %87 = vector.extract_strided_slice %85 {offsets = [0, 0], sizes = [2, 32], strides = [1, 1]} : vector<2x128xf32> to vector<2x32xf32>
    %88 = vector.extract_strided_slice %85 {offsets = [0, 32], sizes = [2, 32], strides = [1, 1]} : vector<2x128xf32> to vector<2x32xf32>
    %89 = vector.extract_strided_slice %86 {offsets = [0, 64], sizes = [2, 32], strides = [1, 1]} : vector<2x128xf32> to vector<2x32xf32>
    %90 = vector.extract_strided_slice %85 {offsets = [0, 96], sizes = [2, 32], strides = [1, 1]} : vector<2x128xf32> to vector<2x32xf32>
    %91 = arith.mulf %88, %75 : vector<2x32xf32>
    %92 = arith.mulf %87, %89 : vector<2x32xf32>
    %93 = arith.addf %91, %92 : vector<2x32xf32>
    %94 = math.tanh %93 : vector<2x32xf32>
    %95 = arith.mulf %90, %94 : vector<2x32xf32>
    %96 = vector.extract_strided_slice %38 {offsets = [6, 0], sizes = [2, 128], strides = [1, 1]} : vector<16x128xf32> to vector<2x128xf32>
    %cst_35 = arith.constant dense<0.000000e+00> : vector<2x128xf32>
    %97 = tpu.matmul %95, %39, %cst_35 {dimension_numbers = #tpu.dot_dimension_numbers<[1], [0], [0], [1], [0, 0, 1, 1], [], []>} : vector<2x32xf32>, vector<32x128xf32>, vector<2x128xf32> -> vector<2x128xf32>
    %98 = arith.addf %96, %97 : vector<2x128xf32>
    %99 = arith.negf %98 : vector<2x128xf32>
    %100 = math.exp %99 : vector<2x128xf32>
    %cst_36 = arith.constant 1.000000e+00 : f32
    %101 = vector.broadcast %cst_36 : f32 to vector<2x128xf32>
    %102 = arith.addf %101, %100 : vector<2x128xf32>
    %103 = arith.divf %101, %102 : vector<2x128xf32>
    %104 = math.tanh %98 : vector<2x128xf32>
    %105 = vector.extract_strided_slice %103 {offsets = [0, 0], sizes = [2, 32], strides = [1, 1]} : vector<2x128xf32> to vector<2x32xf32>
    %106 = vector.extract_strided_slice %103 {offsets = [0, 32], sizes = [2, 32], strides = [1, 1]} : vector<2x128xf32> to vector<2x32xf32>
    %107 = vector.extract_strided_slice %104 {offsets = [0, 64], sizes = [2, 32], strides = [1, 1]} : vector<2x128xf32> to vector<2x32xf32>
    %108 = vector.extract_strided_slice %103 {offsets = [0, 96], sizes = [2, 32], strides = [1, 1]} : vector<2x128xf32> to vector<2x32xf32>
    %109 = arith.mulf %106, %93 : vector<2x32xf32>
    %110 = arith.mulf %105, %107 : vector<2x32xf32>
    %111 = arith.addf %109, %110 : vector<2x32xf32>
    %112 = math.tanh %111 : vector<2x32xf32>
    %113 = arith.mulf %108, %112 : vector<2x32xf32>
    %114 = vector.extract_strided_slice %38 {offsets = [8, 0], sizes = [2, 128], strides = [1, 1]} : vector<16x128xf32> to vector<2x128xf32>
    %cst_37 = arith.constant dense<0.000000e+00> : vector<2x128xf32>
    %115 = tpu.matmul %113, %39, %cst_37 {dimension_numbers = #tpu.dot_dimension_numbers<[1], [0], [0], [1], [0, 0, 1, 1], [], []>} : vector<2x32xf32>, vector<32x128xf32>, vector<2x128xf32> -> vector<2x128xf32>
    %116 = arith.addf %114, %115 : vector<2x128xf32>
    %117 = arith.negf %116 : vector<2x128xf32>
    %118 = math.exp %117 : vector<2x128xf32>
    %cst_38 = arith.constant 1.000000e+00 : f32
    %119 = vector.broadcast %cst_38 : f32 to vector<2x128xf32>
    %120 = arith.addf %119, %118 : vector<2x128xf32>
    %121 = arith.divf %119, %120 : vector<2x128xf32>
    %122 = math.tanh %116 : vector<2x128xf32>
    %123 = vector.extract_strided_slice %121 {offsets = [0, 0], sizes = [2, 32], strides = [1, 1]} : vector<2x128xf32> to vector<2x32xf32>
    %124 = vector.extract_strided_slice %121 {offsets = [0, 32], sizes = [2, 32], strides = [1, 1]} : vector<2x128xf32> to vector<2x32xf32>
    %125 = vector.extract_strided_slice %122 {offsets = [0, 64], sizes = [2, 32], strides = [1, 1]} : vector<2x128xf32> to vector<2x32xf32>
    %126 = vector.extract_strided_slice %121 {offsets = [0, 96], sizes = [2, 32], strides = [1, 1]} : vector<2x128xf32> to vector<2x32xf32>
    %127 = arith.mulf %124, %111 : vector<2x32xf32>
    %128 = arith.mulf %123, %125 : vector<2x32xf32>
    %129 = arith.addf %127, %128 : vector<2x32xf32>
    %130 = math.tanh %129 : vector<2x32xf32>
    %131 = arith.mulf %126, %130 : vector<2x32xf32>
    %132 = vector.extract_strided_slice %38 {offsets = [10, 0], sizes = [2, 128], strides = [1, 1]} : vector<16x128xf32> to vector<2x128xf32>
    %cst_39 = arith.constant dense<0.000000e+00> : vector<2x128xf32>
    %133 = tpu.matmul %131, %39, %cst_39 {dimension_numbers = #tpu.dot_dimension_numbers<[1], [0], [0], [1], [0, 0, 1, 1], [], []>} : vector<2x32xf32>, vector<32x128xf32>, vector<2x128xf32> -> vector<2x128xf32>
    %134 = arith.addf %132, %133 : vector<2x128xf32>
    %135 = arith.negf %134 : vector<2x128xf32>
    %136 = math.exp %135 : vector<2x128xf32>
    %cst_40 = arith.constant 1.000000e+00 : f32
    %137 = vector.broadcast %cst_40 : f32 to vector<2x128xf32>
    %138 = arith.addf %137, %136 : vector<2x128xf32>
    %139 = arith.divf %137, %138 : vector<2x128xf32>
    %140 = math.tanh %134 : vector<2x128xf32>
    %141 = vector.extract_strided_slice %139 {offsets = [0, 0], sizes = [2, 32], strides = [1, 1]} : vector<2x128xf32> to vector<2x32xf32>
    %142 = vector.extract_strided_slice %139 {offsets = [0, 32], sizes = [2, 32], strides = [1, 1]} : vector<2x128xf32> to vector<2x32xf32>
    %143 = vector.extract_strided_slice %140 {offsets = [0, 64], sizes = [2, 32], strides = [1, 1]} : vector<2x128xf32> to vector<2x32xf32>
    %144 = vector.extract_strided_slice %139 {offsets = [0, 96], sizes = [2, 32], strides = [1, 1]} : vector<2x128xf32> to vector<2x32xf32>
    %145 = arith.mulf %142, %129 : vector<2x32xf32>
    %146 = arith.mulf %141, %143 : vector<2x32xf32>
    %147 = arith.addf %145, %146 : vector<2x32xf32>
    %148 = math.tanh %147 : vector<2x32xf32>
    %149 = arith.mulf %144, %148 : vector<2x32xf32>
    %150 = vector.extract_strided_slice %38 {offsets = [12, 0], sizes = [2, 128], strides = [1, 1]} : vector<16x128xf32> to vector<2x128xf32>
    %cst_41 = arith.constant dense<0.000000e+00> : vector<2x128xf32>
    %151 = tpu.matmul %149, %39, %cst_41 {dimension_numbers = #tpu.dot_dimension_numbers<[1], [0], [0], [1], [0, 0, 1, 1], [], []>} : vector<2x32xf32>, vector<32x128xf32>, vector<2x128xf32> -> vector<2x128xf32>
    %152 = arith.addf %150, %151 : vector<2x128xf32>
    %153 = arith.negf %152 : vector<2x128xf32>
    %154 = math.exp %153 : vector<2x128xf32>
    %cst_42 = arith.constant 1.000000e+00 : f32
    %155 = vector.broadcast %cst_42 : f32 to vector<2x128xf32>
    %156 = arith.addf %155, %154 : vector<2x128xf32>
    %157 = arith.divf %155, %156 : vector<2x128xf32>
    %158 = math.tanh %152 : vector<2x128xf32>
    %159 = vector.extract_strided_slice %157 {offsets = [0, 0], sizes = [2, 32], strides = [1, 1]} : vector<2x128xf32> to vector<2x32xf32>
    %160 = vector.extract_strided_slice %157 {offsets = [0, 32], sizes = [2, 32], strides = [1, 1]} : vector<2x128xf32> to vector<2x32xf32>
    %161 = vector.extract_strided_slice %158 {offsets = [0, 64], sizes = [2, 32], strides = [1, 1]} : vector<2x128xf32> to vector<2x32xf32>
    %162 = vector.extract_strided_slice %157 {offsets = [0, 96], sizes = [2, 32], strides = [1, 1]} : vector<2x128xf32> to vector<2x32xf32>
    %163 = arith.mulf %160, %147 : vector<2x32xf32>
    %164 = arith.mulf %159, %161 : vector<2x32xf32>
    %165 = arith.addf %163, %164 : vector<2x32xf32>
    %166 = math.tanh %165 : vector<2x32xf32>
    %167 = arith.mulf %162, %166 : vector<2x32xf32>
    %168 = vector.extract_strided_slice %38 {offsets = [14, 0], sizes = [2, 128], strides = [1, 1]} : vector<16x128xf32> to vector<2x128xf32>
    %cst_43 = arith.constant dense<0.000000e+00> : vector<2x128xf32>
    %169 = tpu.matmul %167, %39, %cst_43 {dimension_numbers = #tpu.dot_dimension_numbers<[1], [0], [0], [1], [0, 0, 1, 1], [], []>} : vector<2x32xf32>, vector<32x128xf32>, vector<2x128xf32> -> vector<2x128xf32>
    %170 = arith.addf %168, %169 : vector<2x128xf32>
    %171 = arith.negf %170 : vector<2x128xf32>
    %172 = math.exp %171 : vector<2x128xf32>
    %cst_44 = arith.constant 1.000000e+00 : f32
    %173 = vector.broadcast %cst_44 : f32 to vector<2x128xf32>
    %174 = arith.addf %173, %172 : vector<2x128xf32>
    %175 = arith.divf %173, %174 : vector<2x128xf32>
    %176 = math.tanh %170 : vector<2x128xf32>
    %177 = vector.extract_strided_slice %175 {offsets = [0, 0], sizes = [2, 32], strides = [1, 1]} : vector<2x128xf32> to vector<2x32xf32>
    %178 = vector.extract_strided_slice %175 {offsets = [0, 32], sizes = [2, 32], strides = [1, 1]} : vector<2x128xf32> to vector<2x32xf32>
    %179 = vector.extract_strided_slice %176 {offsets = [0, 64], sizes = [2, 32], strides = [1, 1]} : vector<2x128xf32> to vector<2x32xf32>
    %180 = vector.extract_strided_slice %175 {offsets = [0, 96], sizes = [2, 32], strides = [1, 1]} : vector<2x128xf32> to vector<2x32xf32>
    %181 = arith.mulf %178, %165 : vector<2x32xf32>
    %182 = arith.mulf %177, %179 : vector<2x32xf32>
    %183 = arith.addf %181, %182 : vector<2x32xf32>
    %184 = math.tanh %183 : vector<2x32xf32>
    %185 = arith.mulf %180, %184 : vector<2x32xf32>
    %c0_45 = arith.constant 0 : index
    %c0_46 = arith.constant 0 : index
    %186 = vector.load %arg13[%c0_45, %c0_46] : memref<32x64xf32, #tpu.memory_space<vmem>>, vector<32x64xf32>
    %cst_47 = arith.constant dense<0.000000e+00> : vector<2x64xf32>
    %187 = tpu.matmul %185, %186, %cst_47 {dimension_numbers = #tpu.dot_dimension_numbers<[1], [0], [0], [1], [0, 0, 1, 1], [], []>} : vector<2x32xf32>, vector<32x64xf32>, vector<2x64xf32> -> vector<2x64xf32>
    %c0_48 = arith.constant 0 : index
    %c0_49 = arith.constant 0 : index
    %188 = vector.load %arg14[%c0_48, %c0_49] : memref<1x64xf32, #tpu.memory_space<vmem>>, vector<1x64xf32>
    %189 = vector.broadcast %188 : vector<1x64xf32> to vector<2x64xf32>
    %190 = arith.addf %187, %189 : vector<2x64xf32>
    %191 = arith.negf %190 : vector<2x64xf32>
    %192 = math.exp %191 : vector<2x64xf32>
    %cst_50 = arith.constant 1.000000e+00 : f32
    %193 = vector.broadcast %cst_50 : f32 to vector<2x64xf32>
    %194 = arith.addf %193, %192 : vector<2x64xf32>
    %195 = arith.divf %193, %194 : vector<2x64xf32>
    %196 = arith.mulf %190, %195 : vector<2x64xf32>
    %c0_51 = arith.constant 0 : index
    %c0_52 = arith.constant 0 : index
    %197 = vector.load %arg15[%c0_51, %c0_52] : memref<64x5xf32, #tpu.memory_space<vmem>>, vector<64x5xf32>
    %cst_53 = arith.constant dense<0.000000e+00> : vector<2x5xf32>
    %198 = tpu.matmul %196, %197, %cst_53 {dimension_numbers = #tpu.dot_dimension_numbers<[1], [0], [0], [1], [0, 0, 1, 1], [], []>} : vector<2x64xf32>, vector<64x5xf32>, vector<2x5xf32> -> vector<2x5xf32>
    %c0_54 = arith.constant 0 : index
    %c0_55 = arith.constant 0 : index
    %199 = vector.load %arg16[%c0_54, %c0_55] : memref<1x5xf32, #tpu.memory_space<vmem>>, vector<1x5xf32>
    %200 = vector.broadcast %199 : vector<1x5xf32> to vector<2x5xf32>
    %201 = arith.addf %198, %200 : vector<2x5xf32>
    %202 = vector.extract_strided_slice %201 {offsets = [0, 0], sizes = [2, 4], strides = [1, 1]} : vector<2x5xf32> to vector<2x4xf32>
    %203 = vector.extract_strided_slice %201 {offsets = [0, 4], sizes = [2, 1], strides = [1, 1]} : vector<2x5xf32> to vector<2x1xf32>
    %204 = vector.broadcast %203 : vector<2x1xf32> to vector<2x4xf32>
    %205 = arith.addf %204, %202 : vector<2x4xf32>
    %206 = vector.shape_cast %202 : vector<2x4xf32> to vector<1x2x4xf32>
    %cst_56 = arith.constant dense<0.000000e+00> : vector<1xf32>
    %207 = vector.multi_reduction <add>, %206, %cst_56 [1, 2] : vector<1x2x4xf32> to vector<1xf32>
    %208 = vector.shape_cast %207 : vector<1xf32> to vector<1x1x1xf32>
    %209 = vector.extract %208[0, 0, 0] : f32 from vector<1x1x1xf32>
    %cst_57 = arith.constant 8.000000e+00 : f32
    %210 = arith.divf %209, %cst_57 : f32
    %211 = vector.broadcast %210 : f32 to vector<2x4xf32>
    %212 = arith.subf %205, %211 : vector<2x4xf32>
    %c0_58 = arith.constant 0 : index
    %c0_59 = arith.constant 0 : index
    %213 = vector.load %arg17[%c0_58, %c0_59] : memref<2x4xf32, #tpu.memory_space<vmem>>, vector<2x4xf32>
    tpu.vector_store %arg17[%c0_58, %c0_59], %212 {strides = array<i32>} : memref<2x4xf32, #tpu.memory_space<vmem>>, vector<2x4xf32>,
    %c0_60 = arith.constant 0 : index
    %c0_61 = arith.constant 0 : index
    %214 = vector.load %arg18[%c0_60, %c0_61] : memref<2x32xf32, #tpu.memory_space<vmem>>, vector<2x32xf32>
    tpu.vector_store %arg18[%c0_60, %c0_61], %185 {strides = array<i32>} : memref<2x32xf32, #tpu.memory_space<vmem>>, vector<2x32xf32>,
    %c0_62 = arith.constant 0 : index
    %c0_63 = arith.constant 0 : index
    %215 = vector.load %arg19[%c0_62, %c0_63] : memref<2x32xf32, #tpu.memory_space<vmem>>, vector<2x32xf32>
    tpu.vector_store %arg19[%c0_62, %c0_63], %183 {strides = array<i32>} : memref<2x32xf32, #tpu.memory_space<vmem>>, vector<2x32xf32>,
    return
  }
  func.func @transform_0(%arg0: i32) -> (i32, i32) {
    %c0_i32 = arith.constant 0 : i32
    %c0_i32_0 = arith.constant 0 : i32
    %c0_i32_1 = arith.constant 0 : i32
    return %c0_i32, %c0_i32_0 : i32, i32
  }
  func.func @transform_1(%arg0: i32) -> (i32, i32) {
    %c0_i32 = arith.constant 0 : i32
    %c0_i32_0 = arith.constant 0 : i32
    %c0_i32_1 = arith.constant 0 : i32
    return %c0_i32, %c0_i32_0 : i32, i32
  }
  func.func @transform_2(%arg0: i32) -> (i32, i32) {
    %c0_i32 = arith.constant 0 : i32
    %c0_i32_0 = arith.constant 0 : i32
    %c0_i32_1 = arith.constant 0 : i32
    return %c0_i32, %c0_i32_0 : i32, i32
  }
  func.func @transform_3(%arg0: i32) -> (i32, i32) {
    %c0_i32 = arith.constant 0 : i32
    %c0_i32_0 = arith.constant 0 : i32
    %c0_i32_1 = arith.constant 0 : i32
    return %c0_i32, %c0_i32_0 : i32, i32
  }
  func.func @transform_4(%arg0: i32) -> (i32, i32) {
    %c0_i32 = arith.constant 0 : i32
    %c0_i32_0 = arith.constant 0 : i32
    %c0_i32_1 = arith.constant 0 : i32
    return %c0_i32, %c0_i32_0 : i32, i32
  }
  func.func @transform_5(%arg0: i32) -> (i32, i32) {
    %c0_i32 = arith.constant 0 : i32
    %c0_i32_0 = arith.constant 0 : i32
    %c0_i32_1 = arith.constant 0 : i32
    return %c0_i32, %c0_i32_0 : i32, i32
  }
  func.func @transform_6(%arg0: i32) -> (i32, i32) {
    %c0_i32 = arith.constant 0 : i32
    %c0_i32_0 = arith.constant 0 : i32
    %c0_i32_1 = arith.constant 0 : i32
    return %c0_i32, %c0_i32_0 : i32, i32
  }
  func.func @transform_7(%arg0: i32) -> (i32, i32) {
    %c0_i32 = arith.constant 0 : i32
    %c0_i32_0 = arith.constant 0 : i32
    %c0_i32_1 = arith.constant 0 : i32
    return %c0_i32, %c0_i32_0 : i32, i32
  }
  func.func @transform_8(%arg0: i32) -> (i32, i32) {
    %c0_i32 = arith.constant 0 : i32
    %c0_i32_0 = arith.constant 0 : i32
    %c0_i32_1 = arith.constant 0 : i32
    return %c0_i32, %c0_i32_0 : i32, i32
  }
  func.func @transform_9(%arg0: i32) -> (i32, i32) {
    %c0_i32 = arith.constant 0 : i32
    %c0_i32_0 = arith.constant 0 : i32
    %c0_i32_1 = arith.constant 0 : i32
    return %c0_i32, %c0_i32_0 : i32, i32
  }
  func.func @transform_10(%arg0: i32) -> (i32, i32) {
    %c0_i32 = arith.constant 0 : i32
    %c0_i32_0 = arith.constant 0 : i32
    %c0_i32_1 = arith.constant 0 : i32
    return %c0_i32, %c0_i32_0 : i32, i32
  }
  func.func @transform_11(%arg0: i32) -> (i32, i32) {
    %c0_i32 = arith.constant 0 : i32
    %c0_i32_0 = arith.constant 0 : i32
    %c0_i32_1 = arith.constant 0 : i32
    return %c0_i32, %c0_i32_0 : i32, i32
  }
  func.func @transform_12(%arg0: i32) -> (i32, i32) {
    %c0_i32 = arith.constant 0 : i32
    %c0_i32_0 = arith.constant 0 : i32
    %c0_i32_1 = arith.constant 0 : i32
    return %c0_i32, %c0_i32_0 : i32, i32
  }
  func.func @transform_13(%arg0: i32) -> (i32, i32) {
    %c0_i32 = arith.constant 0 : i32
    %c0_i32_0 = arith.constant 0 : i32
    %c0_i32_1 = arith.constant 0 : i32
    return %c0_i32, %c0_i32_0 : i32, i32
  }
  func.func @transform_14(%arg0: i32) -> (i32, i32) {
    %c0_i32 = arith.constant 0 : i32
    %c0_i32_0 = arith.constant 0 : i32
    %c0_i32_1 = arith.constant 0 : i32
    return %c0_i32, %c0_i32_0 : i32, i32
  }
  func.func @transform_15(%arg0: i32) -> (i32, i32) {
    %c0_i32 = arith.constant 0 : i32
    %c0_i32_0 = arith.constant 0 : i32
    %c0_i32_1 = arith.constant 0 : i32
    return %c0_i32, %c0_i32_0 : i32, i32
  }
  func.func @transform_16(%arg0: i32) -> (i32, i32) {
    %c0_i32 = arith.constant 0 : i32
    %c0_i32_0 = arith.constant 0 : i32
    %c0_i32_1 = arith.constant 0 : i32
    return %c0_i32, %c0_i32_0 : i32, i32
  }
  func.func @transform_17(%arg0: i32) -> (i32, i32) {
    %c0_i32 = arith.constant 0 : i32
    %c0_i32_0 = arith.constant 0 : i32
    %c0_i32_1 = arith.constant 0 : i32
    return %c0_i32, %c0_i32_0 : i32, i32
  }
  func.func @transform_18(%arg0: i32) -> (i32, i32) {
    %c0_i32 = arith.constant 0 : i32
    %c0_i32_0 = arith.constant 0 : i32
    %c0_i32_1 = arith.constant 0 : i32
    return %c0_i32, %c0_i32_0 : i32, i32
  }
}

</mosaic_0001>

<bundles_post_ra>
// kernel: tpu_custom_call.1
= control target key start
LH: loop header
LB: loop body
LE: loop exit
PB: predicated region body
PF: predicated region fallthrough
CT: control target
= control target key end

     0   :  { %s9837_s0 = inlined_call_operand.vmem [shape: f32[16,1024], index: 0, kind: input, shape index: {}]   ;;  %s9838_s1 = inlined_call_operand.vmem [shape: f32[1024,784], index: 1, kind: input, shape index: {}]   ;;  %s9839_s2 = inlined_call_operand.vmem [shape: f32[1,784], index: 2, kind: input, shape index: {}]   ;;  %s9840_s3 = inlined_call_operand.vmem [shape: f32[784,288], index: 3, kind: input, shape index: {}]   ;;  %s9841_s4 = inlined_call_operand.vmem [shape: f32[1,288], index: 4, kind: input, shape index: {}]   ;;  %s9842_s5 = inlined_call_operand.vmem [shape: f32[288,64], index: 5, kind: input, shape index: {}]   ;;  %s9843_s6 = inlined_call_operand.vmem [shape: f32[1,64], index: 6, kind: input, shape index: {}]   ;;  %s9844_s7 = inlined_call_operand.vmem [shape: f32[64,128], index: 7, kind: input, shape index: {}]   ;;  %s9845_s8 = inlined_call_operand.vmem [shape: f32[32,128], index: 8, kind: input, shape index: {}]   ;;  %s9846_s9 = inlined_call_operand.vmem [shape: f32[1,128], index: 9, kind: input, shape index: {}]   ;;  %s9847_s10 = inlined_call_operand.vmem [shape: f32[2,32], index: 10, kind: input, shape index: {}]   ;;  %s9848_s11 = inlined_call_operand.vmem [shape: f32[2,32], index: 11, kind: input, shape index: {}]   ;;  %s9849_s12 = inlined_call_operand.vmem [shape: f32[32,64], index: 12, kind: input, shape index: {}]   ;;  %s9850_s13 = inlined_call_operand.vmem [shape: f32[1,64], index: 13, kind: input, shape index: {}]   ;;  %s9851_s14 = inlined_call_operand.vmem [shape: f32[64,5], index: 14, kind: input, shape index: {}]   ;;  %s9852_s15 = inlined_call_operand.vmem [shape: f32[1,5], index: 15, kind: input, shape index: {}]   ;;  %s9853_s16 = inlined_call_operand.hbm [shape: f32[2,4], index: 16, kind: output, shape index: {0}]   ;;  %s9854_s17 = inlined_call_operand.hbm [shape: f32[2,32], index: 17, kind: output, shape index: {1}]   ;;  %s9855_s18 = inlined_call_operand.hbm [shape: f32[2,32], index: 18, kind: output, shape index: {2}]  }
   0x1   :  { %9860 = sst [smem:[#allocation9_spill]] %s9837_s0 }
   0x2   :  { %9861 = sst [smem:[#allocation10_spill]] %s9838_s1 }
   0x3   :  { %9862 = sst [smem:[#allocation11_spill]] %s9839_s2 }
   0x4   :  { %24 = vsyncpa [#allocation3], 0  ;;  %s9863_s29 = sld [smem:[#allocation10_spill]] }
   0x5   :  { %s9864_s25 = sld [smem:[#allocation9_spill]] }
   0xa   :  { %v179_v0 = vld [vmem:[%s9863_s29 + $0x348] sm:$0xff]  ;;  %v172_v4 = vld [vmem:[%s9863_s29 + $0x310] sm:$0xff]  ;;  %v165_v8 = vld [vmem:[%s9863_s29 + $0x2d8] sm:$0xff] }
   0xb   :  { %v291_v1 = vld [vmem:[%s9863_s29 + $0x6c8] sm:$0xff]  ;;  %986 = vmatpush.msra.mxu0 %v179_v0  ;;  %v284_v5 = vld [vmem:[%s9863_s29 + $0x690] sm:$0xff]  ;;  %v277_v9 = vld [vmem:[%s9863_s29 + $0x658] sm:$0xff] }
   0xc   :  { %v403_v2 = vld [vmem:[%s9863_s29 + $0xa48] sm:$0xff]  ;;  %1009 = vmatpush.msra.mxu1 %v291_v1  ;;  %v396_v6 = vld [vmem:[%s9863_s29 + $0xa10] sm:$0xff]  ;;  %v389_v10 = vld [vmem:[%s9863_s29 + $0x9d8] sm:$0xff] }
   0xd   :  { %v515_v3 = vld [vmem:[%s9863_s29 + $0xdc8] sm:$0xff]  ;;  %1032 = vmatpush.msra.mxu2 %v403_v2  ;;  %v508_v7 = vld [vmem:[%s9863_s29 + $0xd90] sm:$0xff]  ;;  %987 = vmatpush.msra.mxu0 %v172_v4  ;;  %v501_v11 = vld [vmem:[%s9863_s29 + $0xd58] sm:$0xff] }
   0xe   :  { %1055 = vmatpush.msra.mxu3 %v515_v3  ;;  %1010 = vmatpush.msra.mxu1 %v284_v5  ;;  %v158_v12 = vld [vmem:[%s9863_s29 + $0x2a0] sm:$0xff]  ;;  %v151_v16 = vld [vmem:[%s9863_s29 + $0x268] sm:$0xff]  ;;  %v144_v20 = vld [vmem:[%s9863_s29 + $0x230] sm:$0xff] }
   0xf   :  { %1033 = vmatpush.msra.mxu2 %v396_v6  ;;  %v270_v13 = vld [vmem:[%s9863_s29 + $0x620] sm:$0xff]  ;;  %988 = vmatpush.msra.mxu0 %v165_v8  ;;  %v263_v17 = vld [vmem:[%s9863_s29 + $0x5e8] sm:$0xff]  ;;  %v256_v21 = vld [vmem:[%s9863_s29 + $0x5b0] sm:$0xff] }
  0x10   :  { %1056 = vmatpush.msra.mxu3 %v508_v7  ;;  %1011 = vmatpush.msra.mxu1 %v277_v9  ;;  %v382_v14 = vld [vmem:[%s9863_s29 + $0x9a0] sm:$0xff]  ;;  %v375_v18 = vld [vmem:[%s9863_s29 + $0x968] sm:$0xff]  ;;  %v368_v22 = vld [vmem:[%s9863_s29 + $0x930] sm:$0xff] }
  0x11   :  { %v494_v15 = vld [vmem:[%s9863_s29 + $0xd20] sm:$0xff]  ;;  %1034 = vmatpush.msra.mxu2 %v389_v10  ;;  %989 = vmatpush.msra.mxu0 %v158_v12  ;;  %v487_v19 = vld [vmem:[%s9863_s29 + $0xce8] sm:$0xff]  ;;  %v480_v23 = vld [vmem:[%s9863_s29 + $0xcb0] sm:$0xff] }
  0x12   :  { %1057 = vmatpush.msra.mxu3 %v501_v11  ;;  %1012 = vmatpush.msra.mxu1 %v270_v13  ;;  %v137_v24 = vld [vmem:[%s9863_s29 + $0x1f8] sm:$0xff]  ;;  %v130_v28 = vld [vmem:[%s9863_s29 + $0x1c0] sm:$0xff]  ;;  %v123_v32 = vld [vmem:[%s9863_s29 + $0x188] sm:$0xff] }
  0x13   :  { %1035 = vmatpush.msra.mxu2 %v382_v14  ;;  %990 = vmatpush.msra.mxu0 %v151_v16  ;;  %v249_v25 = vld [vmem:[%s9863_s29 + $0x578] sm:$0xff]  ;;  %v242_v29 = vld [vmem:[%s9863_s29 + $0x540] sm:$0xff]  ;;  %v235_v33 = vld [vmem:[%s9863_s29 + $0x508] sm:$0xff] }
  0x14   :  { %1058 = vmatpush.msra.mxu3 %v494_v15  ;;  %1013 = vmatpush.msra.mxu1 %v263_v17  ;;  %v361_v26 = vld [vmem:[%s9863_s29 + $0x8f8] sm:$0xff]  ;;  %v354_v30 = vld [vmem:[%s9863_s29 + $0x8c0] sm:$0xff]  ;;  %v347_v34 = vld [vmem:[%s9863_s29 + $0x888] sm:$0xff] }
  0x15   :  { %1036 = vmatpush.msra.mxu2 %v375_v18  ;;  %991 = vmatpush.msra.mxu0 %v144_v20  ;;  %v473_v27 = vld [vmem:[%s9863_s29 + $0xc78] sm:$0xff]  ;;  %v466_v31 = vld [vmem:[%s9863_s29 + $0xc40] sm:$0xff]  ;;  %v459_v35 = vld [vmem:[%s9863_s29 + $0xc08] sm:$0xff] }
  0x16   :  { %1059 = vmatpush.msra.mxu3 %v487_v19  ;;  %1014 = vmatpush.msra.mxu1 %v256_v21  ;;  %v116_v36 = vld [vmem:[%s9863_s29 + $0x150] sm:$0xff]  ;;  %v109_v40 = vld [vmem:[%s9863_s29 + $0x118] sm:$0xff]  ;;  %v102_v44 = vld [vmem:[%s9863_s29 + $0xe0] sm:$0xff] }
  0x17   :  { %1037 = vmatpush.msra.mxu2 %v368_v22  ;;  %992 = vmatpush.msra.mxu0 %v137_v24  ;;  %v228_v37 = vld [vmem:[%s9863_s29 + $0x4d0] sm:$0xff]  ;;  %v221_v41 = vld [vmem:[%s9863_s29 + $0x498] sm:$0xff]  ;;  %v214_v45 = vld [vmem:[%s9863_s29 + $0x460] sm:$0xff] }
  0x18   :  { %1060 = vmatpush.msra.mxu3 %v480_v23  ;;  %1015 = vmatpush.msra.mxu1 %v249_v25  ;;  %v340_v38 = vld [vmem:[%s9863_s29 + $0x850] sm:$0xff]  ;;  %v333_v42 = vld [vmem:[%s9863_s29 + $0x818] sm:$0xff]  ;;  %v326_v46 = vld [vmem:[%s9863_s29 + $0x7e0] sm:$0xff] }
  0x19   :  { %1038 = vmatpush.msra.mxu2 %v361_v26  ;;  %993 = vmatpush.msra.mxu0 %v130_v28  ;;  %v452_v39 = vld [vmem:[%s9863_s29 + $0xbd0] sm:$0xff]  ;;  %v445_v43 = vld [vmem:[%s9863_s29 + $0xb98] sm:$0xff]  ;;  %v438_v47 = vld [vmem:[%s9863_s29 + $0xb60] sm:$0xff] }
  0x1a   :  { %1061 = vmatpush.msra.mxu3 %v473_v27  ;;  %1016 = vmatpush.msra.mxu1 %v242_v29  ;;  %v95_v48 = vld [vmem:[%s9863_s29 + $0xa8] sm:$0xff]  ;;  %v88_v52 = vld [vmem:[%s9863_s29 + $0x70] sm:$0xff]  ;;  %v81_v56 = vld [vmem:[%s9863_s29 + $0x38] sm:$0xff] }
  0x1b   :  { %1039 = vmatpush.msra.mxu2 %v354_v30  ;;  %994 = vmatpush.msra.mxu0 %v123_v32  ;;  %v207_v49 = vld [vmem:[%s9863_s29 + $0x428] sm:$0xff]  ;;  %v200_v53 = vld [vmem:[%s9863_s29 + $0x3f0] sm:$0xff]  ;;  %v193_v57 = vld [vmem:[%s9863_s29 + $0x3b8] sm:$0xff] }
  0x1c   :  { %1062 = vmatpush.msra.mxu3 %v466_v31  ;;  %1017 = vmatpush.msra.mxu1 %v235_v33  ;;  %v319_v50 = vld [vmem:[%s9863_s29 + $0x7a8] sm:$0xff]  ;;  %v312_v54 = vld [vmem:[%s9863_s29 + $0x770] sm:$0xff]  ;;  %v305_v58 = vld [vmem:[%s9863_s29 + $0x738] sm:$0xff] }
  0x1d   :  { %1040 = vmatpush.msra.mxu2 %v347_v34  ;;  %995 = vmatpush.msra.mxu0 %v116_v36  ;;  %v431_v51 = vld [vmem:[%s9863_s29 + $0xb28] sm:$0xff]  ;;  %v424_v55 = vld [vmem:[%s9863_s29 + $0xaf0] sm:$0xff]  ;;  %v417_v59 = vld [vmem:[%s9863_s29 + $0xab8] sm:$0xff] }
  0x1e   :  { %1063 = vmatpush.msra.mxu3 %v459_v35  ;;  %1018 = vmatpush.msra.mxu1 %v228_v37  ;;  %v74_v60 = vld [vmem:[%s9863_s29] sm:$0xff]  ;;  %v627_v0 = vld [vmem:[%s9863_s29 + $0x1148] sm:$0xff]  ;;  %v620_v4 = vld [vmem:[%s9863_s29 + $0x1110] sm:$0xff] }
  0x1f   :  { %1041 = vmatpush.msra.mxu2 %v340_v38  ;;  %996 = vmatpush.msra.mxu0 %v109_v40  ;;  %v186_v61 = vld [vmem:[%s9863_s29 + $0x380] sm:$0xff]  ;;  %v739_v1 = vld [vmem:[%s9863_s29 + $0x14c8] sm:$0xff]  ;;  %v732_v5 = vld [vmem:[%s9863_s29 + $0x1490] sm:$0xff] }
  0x20   :  { %1064 = vmatpush.msra.mxu3 %v452_v39  ;;  %1019 = vmatpush.msra.mxu1 %v221_v41  ;;  %v298_v62 = vld [vmem:[%s9863_s29 + $0x700] sm:$0xff]  ;;  %v851_v2 = vld [vmem:[%s9863_s29 + $0x1848] sm:$0xff]  ;;  %v844_v6 = vld [vmem:[%s9863_s29 + $0x1810] sm:$0xff] }
  0x21   :  { %1042 = vmatpush.msra.mxu2 %v333_v42  ;;  %997 = vmatpush.msra.mxu0 %v102_v44  ;;  %v410_v63 = vld [vmem:[%s9863_s29 + $0xa80] sm:$0xff]  ;;  %v963_v3 = vld [vmem:[%s9863_s29 + $0x1bc8] sm:$0xff]  ;;  %v956_v7 = vld [vmem:[%s9863_s29 + $0x1b90] sm:$0xff] }
  0x22   :  { %1065 = vmatpush.msra.mxu3 %v445_v43  ;;  %1020 = vmatpush.msra.mxu1 %v214_v45  ;;  %v613_v8 = vld [vmem:[%s9863_s29 + $0x10d8] sm:$0xff]  ;;  %v606_v12 = vld [vmem:[%s9863_s29 + $0x10a0] sm:$0xff]  ;;  %v599_v16 = vld [vmem:[%s9863_s29 + $0x1068] sm:$0xff] }
  0x23   :  { %1043 = vmatpush.msra.mxu2 %v326_v46  ;;  %998 = vmatpush.msra.mxu0 %v95_v48  ;;  %v725_v9 = vld [vmem:[%s9863_s29 + $0x1458] sm:$0xff]  ;;  %v718_v13 = vld [vmem:[%s9863_s29 + $0x1420] sm:$0xff]  ;;  %v711_v17 = vld [vmem:[%s9863_s29 + $0x13e8] sm:$0xff] }
  0x24   :  { %1066 = vmatpush.msra.mxu3 %v438_v47  ;;  %1021 = vmatpush.msra.mxu1 %v207_v49  ;;  %v837_v10 = vld [vmem:[%s9863_s29 + $0x17d8] sm:$0xff]  ;;  %v830_v14 = vld [vmem:[%s9863_s29 + $0x17a0] sm:$0xff]  ;;  %v823_v18 = vld [vmem:[%s9863_s29 + $0x1768] sm:$0xff] }
  0x25   :  { %1044 = vmatpush.msra.mxu2 %v319_v50  ;;  %999 = vmatpush.msra.mxu0 %v88_v52  ;;  %v949_v11 = vld [vmem:[%s9863_s29 + $0x1b58] sm:$0xff]  ;;  %v942_v15 = vld [vmem:[%s9863_s29 + $0x1b20] sm:$0xff]  ;;  %v935_v19 = vld [vmem:[%s9863_s29 + $0x1ae8] sm:$0xff] }
  0x26   :  { %1067 = vmatpush.msra.mxu3 %v431_v51  ;;  %1022 = vmatpush.msra.mxu1 %v200_v53  ;;  %v592_v20 = vld [vmem:[%s9863_s29 + $0x1030] sm:$0xff]  ;;  %v585_v24 = vld [vmem:[%s9863_s29 + $0xff8] sm:$0xff]  ;;  %v578_v28 = vld [vmem:[%s9863_s29 + $0xfc0] sm:$0xff] }
  0x27   :  { %1045 = vmatpush.msra.mxu2 %v312_v54  ;;  %1000 = vmatpush.msra.mxu0 %v81_v56  ;;  %v704_v21 = vld [vmem:[%s9863_s29 + $0x13b0] sm:$0xff]  ;;  %v697_v25 = vld [vmem:[%s9863_s29 + $0x1378] sm:$0xff]  ;;  %v690_v29 = vld [vmem:[%s9863_s29 + $0x1340] sm:$0xff] }
  0x28   :  { %1068 = vmatpush.msra.mxu3 %v424_v55  ;;  %1023 = vmatpush.msra.mxu1 %v193_v57  ;;  %v816_v22 = vld [vmem:[%s9863_s29 + $0x1730] sm:$0xff]  ;;  %v809_v26 = vld [vmem:[%s9863_s29 + $0x16f8] sm:$0xff]  ;;  %v802_v30 = vld [vmem:[%s9863_s29 + $0x16c0] sm:$0xff] }
  0x29   :  { %1046 = vmatpush.msra.mxu2 %v305_v58  ;;  %1001 = vmatpush.msra.mxu0 %v74_v60  ;;  %v928_v23 = vld [vmem:[%s9863_s29 + $0x1ab0] sm:$0xff]  ;;  %v921_v27 = vld [vmem:[%s9863_s29 + $0x1a78] sm:$0xff]  ;;  %v914_v31 = vld [vmem:[%s9863_s29 + $0x1a40] sm:$0xff] }
  0x2a   :  { %1069 = vmatpush.msra.mxu3 %v417_v59  ;;  %1024 = vmatpush.msra.mxu1 %v186_v61  ;;  %v5141_v32 = vld [vmem:[%s9864_s25 + $0x10] sm:$0xff]  ;;  %v571_v33 = vld [vmem:[%s9863_s29 + $0xf88] sm:$0xff]  ;;  %v5158_v37 = vld [vmem:[%s9864_s25] sm:$0xff] }
  0x2b   :  { %1047 = vmatpush.msra.mxu2 %v298_v62  ;;  %1078 = vmatpush.msrb.mxu0 %v627_v0  ;;  %v683_v34 = vld [vmem:[%s9863_s29 + $0x1308] sm:$0xff]  ;;  %v5164_v38 = vld [vmem:[%s9864_s25 + $0x18] sm:$0xff]  ;;  %v564_v39 = vld [vmem:[%s9863_s29 + $0xf50] sm:$0xff] }
  0x2c   :  { %1070 = vmatpush.msra.mxu3 %v410_v63  ;;  %1101 = vmatpush.msrb.mxu1 %v739_v1  ;;  %v795_v35 = vld [vmem:[%s9863_s29 + $0x1688] sm:$0xff]  ;;  %v676_v40 = vld [vmem:[%s9863_s29 + $0x12d0] sm:$0xff]  ;;  %v557_v44 = vld [vmem:[%s9863_s29 + $0xf18] sm:$0xff] }
  0x2d   :  { %1124 = vmatpush.msrb.mxu2 %v851_v2  ;;  %1079 = vmatpush.msrb.mxu0 %v620_v4  ;;  %v907_v36 = vld [vmem:[%s9863_s29 + $0x1a08] sm:$0xff]  ;;  %v788_v41 = vld [vmem:[%s9863_s29 + $0x1650] sm:$0xff]  ;;  %v669_v45 = vld [vmem:[%s9863_s29 + $0x1298] sm:$0xff] }
  0x2e   :  { %1147 = vmatpush.msrb.mxu3 %v963_v3  ;;  %1102 = vmatpush.msrb.mxu1 %v732_v5  ;;  %v900_v42 = vld [vmem:[%s9863_s29 + $0x19d0] sm:$0xff]  ;;  %v5182_v43 = vld [vmem:[%s9864_s25 + $0x8] sm:$0xff]  ;;  %v781_v46 = vld [vmem:[%s9863_s29 + $0x1618] sm:$0xff] }
  0x2f   :  { %1125 = vmatpush.msrb.mxu2 %v844_v6  ;;  %1080 = vmatpush.msrb.mxu0 %v613_v8  ;;  %v893_v47 = vld [vmem:[%s9863_s29 + $0x1998] sm:$0xff]  ;;  %v550_v48 = vld [vmem:[%s9863_s29 + $0xee0] sm:$0xff]  ;;  %v5213_v52 = vld [vmem:[%s9864_s25 + $0x50] sm:$0xff] }
  0x30   :  { %1148 = vmatpush.msrb.mxu3 %v956_v7  ;;  %1103 = vmatpush.msrb.mxu1 %v725_v9  ;;  %v662_v49 = vld [vmem:[%s9863_s29 + $0x1260] sm:$0xff]  ;;  %v543_v53 = vld [vmem:[%s9863_s29 + $0xea8] sm:$0xff]  ;;  %v5236_v58 = vld [vmem:[%s9864_s25 + $0x58] sm:$0xff] }
  0x31   :  { %1126 = vmatpush.msrb.mxu2 %v837_v10  ;;  %1081 = vmatpush.msrb.mxu0 %v606_v12  ;;  %v774_v50 = vld [vmem:[%s9863_s29 + $0x15e0] sm:$0xff]  ;;  %v655_v54 = vld [vmem:[%s9863_s29 + $0x1228] sm:$0xff]  ;;  %v536_v59 = vld [vmem:[%s9863_s29 + $0xe70] sm:$0xff] }
  0x32   :  { %1149 = vmatpush.msrb.mxu3 %v949_v11  ;;  %1104 = vmatpush.msrb.mxu1 %v718_v13  ;;  %v886_v51 = vld [vmem:[%s9863_s29 + $0x1960] sm:$0xff]  ;;  %v767_v55 = vld [vmem:[%s9863_s29 + $0x15a8] sm:$0xff]  ;;  %v648_v60 = vld [vmem:[%s9863_s29 + $0x11f0] sm:$0xff] }
  0x33   :  { %1127 = vmatpush.msrb.mxu2 %v830_v14  ;;  %1082 = vmatpush.msrb.mxu0 %v599_v16  ;;  %v879_v56 = vld [vmem:[%s9863_s29 + $0x1928] sm:$0xff]  ;;  %v5230_v57 = vld [vmem:[%s9864_s25 + $0x40] sm:$0xff]  ;;  %v760_v61 = vld [vmem:[%s9863_s29 + $0x1570] sm:$0xff] }
  0x34   :  { %1150 = vmatpush.msrb.mxu3 %v942_v15  ;;  %1105 = vmatpush.msrb.mxu1 %v711_v17  ;;  %v872_v62 = vld [vmem:[%s9863_s29 + $0x18f0] sm:$0xff]  ;;  %v5254_v63 = vld [vmem:[%s9864_s25 + $0x48] sm:$0xff]  ;;  %v529_v0 = vld [vmem:[%s9863_s29 + $0xe38] sm:$0xff] }
  0x35   :  { %1128 = vmatpush.msrb.mxu2 %v823_v18  ;;  %1083 = vmatpush.msrb.mxu0 %v592_v20  ;;  %v641_v1 = vld [vmem:[%s9863_s29 + $0x11b8] sm:$0xff]  ;;  %v522_v4 = vld [vmem:[%s9863_s29 + $0xe00] sm:$0xff]  ;;  %v5285_v8 = vld [vmem:[%s9864_s25 + $0x30] sm:$0xff] }
  0x36   :  { %1151 = vmatpush.msrb.mxu3 %v935_v19  ;;  %1106 = vmatpush.msrb.mxu1 %v704_v21  ;;  %v753_v2 = vld [vmem:[%s9863_s29 + $0x1538] sm:$0xff]  ;;  %v634_v5 = vld [vmem:[%s9863_s29 + $0x1180] sm:$0xff]  ;;  %v180_v9 = vld [vmem:[%s9863_s29 + $0x350] sm:$0xff] }
  0x37   :  { %1129 = vmatpush.msrb.mxu2 %v816_v22  ;;  %1084 = vmatpush.msrb.mxu0 %v585_v24  ;;  %v865_v3 = vld [vmem:[%s9863_s29 + $0x18b8] sm:$0xff]  ;;  %v746_v6 = vld [vmem:[%s9863_s29 + $0x1500] sm:$0xff]  ;;  %v292_v10 = vld [vmem:[%s9863_s29 + $0x6d0] sm:$0xff] }
  0x38   :  { %1152 = vmatpush.msrb.mxu3 %v928_v23  ;;  %1107 = vmatpush.msrb.mxu1 %v697_v25  ;;  %v858_v7 = vld [vmem:[%s9863_s29 + $0x1880] sm:$0xff]  ;;  %v404_v11 = vld [vmem:[%s9863_s29 + $0xa50] sm:$0xff] }
  0x39   :  { %1130 = vmatpush.msrb.mxu2 %v809_v26  ;;  %1085 = vmatpush.msrb.mxu0 %v578_v28  ;;  %v516_v12 = vld [vmem:[%s9863_s29 + $0xdd0] sm:$0xff]  ;;  %v5302_v13 = vld [vmem:[%s9864_s25 + $0x20] sm:$0xff] }
  0x3a   :  { %1153 = vmatpush.msrb.mxu3 %v921_v27  ;;  %1108 = vmatpush.msrb.mxu1 %v690_v29 }
  0x3b   :  { %1131 = vmatpush.msrb.mxu2 %v802_v30  ;;  %1086 = vmatpush.msrb.mxu0 %v571_v33 }
  0x3c   :  { %1154 = vmatpush.msrb.mxu3 %v914_v31  ;;  %1048 = vmatmul.f32.vlgmr.msra.gmra.mxu2 %v5141_v32 }
  0x3d   :  { %1109 = vmatpush.msrb.mxu1 %v683_v34  ;;  %1132 = vmatpush.msrb.mxu2 %v795_v35 }
  0x3e   :  { %1155 = vmatpush.msrb.mxu3 %v907_v36  ;;  %1002 = vmatmul.f32.vlgmr.msra.gmra.mxu0 %v5158_v37 }
  0x3f   :  { %1071 = vmatmul.f32.vlgmr.msra.gmra.mxu3 %v5164_v38  ;;  %1087 = vmatpush.msrb.mxu0 %v564_v39 }
  0x40   :  { %1110 = vmatpush.msrb.mxu1 %v676_v40  ;;  %1133 = vmatpush.msrb.mxu2 %v788_v41 }
  0x41   :  { %1156 = vmatpush.msrb.mxu3 %v900_v42  ;;  %1025 = vmatmul.f32.vlgmr.msra.gmra.mxu1 %v5182_v43 }
  0x42   :  { %1088 = vmatpush.msrb.mxu0 %v557_v44  ;;  %1111 = vmatpush.msrb.mxu1 %v669_v45 }
  0x43   :  { %1134 = vmatpush.msrb.mxu2 %v781_v46  ;;  %1157 = vmatpush.msrb.mxu3 %v893_v47 }
  0x44   :  { %1089 = vmatpush.msrb.mxu0 %v550_v48  ;;  %1112 = vmatpush.msrb.mxu1 %v662_v49 }
  0x45   :  { %1135 = vmatpush.msrb.mxu2 %v774_v50  ;;  %1158 = vmatpush.msrb.mxu3 %v886_v51 }
  0x46   :  { %1051 = vmatmul.f32.gmra.mxu2 %v5213_v52  ;;  %1090 = vmatpush.msrb.mxu0 %v543_v53 }
  0x47   :  { %1113 = vmatpush.msrb.mxu1 %v655_v54  ;;  %1136 = vmatpush.msrb.mxu2 %v767_v55 }
  0x48   :  { %1159 = vmatpush.msrb.mxu3 %v879_v56  ;;  %1005 = vmatmul.f32.gmra.mxu0 %v5230_v57 }
  0x49   :  { %1074 = vmatmul.f32.gmra.mxu3 %v5236_v58  ;;  %1091 = vmatpush.msrb.mxu0 %v536_v59 }
  0x4a   :  { %1114 = vmatpush.msrb.mxu1 %v648_v60  ;;  %1137 = vmatpush.msrb.mxu2 %v760_v61 }
  0x4b   :  { %1160 = vmatpush.msrb.mxu3 %v872_v62  ;;  %1028 = vmatmul.f32.gmra.mxu1 %v5254_v63 }
  0x4c   :  { %1092 = vmatpush.msrb.mxu0 %v529_v0  ;;  %1115 = vmatpush.msrb.mxu1 %v641_v1 }
  0x4d   :  { %1138 = vmatpush.msrb.mxu2 %v753_v2  ;;  %1161 = vmatpush.msrb.mxu3 %v865_v3 }
  0x4e   :  { %1093 = vmatpush.msrb.mxu0 %v522_v4  ;;  %1116 = vmatpush.msrb.mxu1 %v634_v5 }
  0x4f   :  { %1139 = vmatpush.msrb.mxu2 %v746_v6  ;;  %1162 = vmatpush.msrb.mxu3 %v858_v7 }
  0x50   :  { %25 = vsyncpa [#allocation5], 0  ;;  %1140 = vmatmul.f32.vlgmr.msrb.gmra.mxu2 %v5285_v8  ;;  %1170 = vmatpush.msra.mxu0 %v180_v9  ;;  %v5308_v14 = vld [vmem:[%s9864_s25 + $0x38] sm:$0xff]  ;;  %v5326_v19 = vld [vmem:[%s9864_s25 + $0x28] sm:$0xff]  ;;  %s9865_s21 = sld [smem:[#allocation11_spill]]  ;;  %s4366_s2 = sshll.u32 %s9854_s17, 4  ;;  %s4367_s2 = int_to_ptr.hbm [resolvable:$true] %s4366_s2 }
  0x51   :  { %v173_v15 = vld [vmem:[%s9863_s29 + $0x318] sm:$0xff]  ;;  %1193 = vmatpush.msra.mxu1 %v292_v10  ;;  %1216 = vmatpush.msra.mxu2 %v404_v11  ;;  %v166_v20 = vld [vmem:[%s9863_s29 + $0x2e0] sm:$0xff]  ;;  %v159_v24 = vld [vmem:[%s9863_s29 + $0x2a8] sm:$0xff]  ;;  %s4751_s23 = smov [#allocation4]   ;;  %s4355_s0 = sshll.u32 %s9853_s16, 4  ;;  %s4356_s0 = int_to_ptr.hbm [resolvable:$true] %s4355_s0 }
  0x52   :  { %v285_v16 = vld [vmem:[%s9863_s29 + $0x698] sm:$0xff]  ;;  %1239 = vmatpush.msra.mxu3 %v516_v12  ;;  %1094 = vmatmul.f32.vlgmr.msrb.gmra.mxu0 %v5302_v13  ;;  %v278_v21 = vld [vmem:[%s9863_s29 + $0x660] sm:$0xff]  ;;  %v271_v25 = vld [vmem:[%s9863_s29 + $0x628] sm:$0xff]  ;;  %s4364_s24 = sshll.u32 %s4751_s23, 4  ;;  %s4365_s24 = int_to_ptr.vmem [resolvable:$true] %s4364_s24 }
  0x53   :  { %v397_v17 = vld [vmem:[%s9863_s29 + $0xa18] sm:$0xff]  ;;  %1163 = vmatmul.f32.vlgmr.msrb.gmra.mxu3 %v5308_v14  ;;  %1171 = vmatpush.msra.mxu0 %v173_v15  ;;  %v390_v22 = vld [vmem:[%s9863_s29 + $0x9e0] sm:$0xff]  ;;  %v383_v26 = vld [vmem:[%s9863_s29 + $0x9a8] sm:$0xff] }
  0x54   :  { %v509_v18 = vld [vmem:[%s9863_s29 + $0xd98] sm:$0xff]  ;;  %1194 = vmatpush.msra.mxu1 %v285_v16  ;;  %1217 = vmatpush.msra.mxu2 %v397_v17  ;;  %v502_v23 = vld [vmem:[%s9863_s29 + $0xd60] sm:$0xff]  ;;  %v495_v27 = vld [vmem:[%s9863_s29 + $0xd28] sm:$0xff] }
  0x55   :  { %1240 = vmatpush.msra.mxu3 %v509_v18  ;;  %1117 = vmatmul.f32.vlgmr.msrb.gmra.mxu1 %v5326_v19  ;;  %v5357_v28 = vld [vmem:[%s9864_s25 + $0x70] sm:$0xff]  ;;  %v5374_v34 = vld [vmem:[%s9864_s25 + $0x60] sm:$0xff]  ;;  %v5380_v35 = vld [vmem:[%s9864_s25 + $0x78] sm:$0xff] }
  0x56   :  { %1172 = vmatpush.msra.mxu0 %v166_v20  ;;  %1195 = vmatpush.msra.mxu1 %v278_v21  ;;  %v152_v29 = vld [vmem:[%s9863_s29 + $0x270] sm:$0xff]  ;;  %v145_v36 = vld [vmem:[%s9863_s29 + $0x238] sm:$0xff]  ;;  %v5398_v42 = vld [vmem:[%s9864_s25 + $0x68] sm:$0xff] }
  0x57   :  { %1218 = vmatpush.msra.mxu2 %v390_v22  ;;  %1241 = vmatpush.msra.mxu3 %v502_v23  ;;  %v264_v30 = vld [vmem:[%s9863_s29 + $0x5f0] sm:$0xff]  ;;  %v257_v39 = vld [vmem:[%s9863_s29 + $0x5b8] sm:$0xff]  ;;  %v138_v44 = vld [vmem:[%s9863_s29 + $0x200] sm:$0xff] }
  0x58   :  { %1173 = vmatpush.msra.mxu0 %v159_v24  ;;  %1196 = vmatpush.msra.mxu1 %v271_v25  ;;  %v376_v31 = vld [vmem:[%s9863_s29 + $0x970] sm:$0xff]  ;;  %v369_v40 = vld [vmem:[%s9863_s29 + $0x938] sm:$0xff]  ;;  %v250_v45 = vld [vmem:[%s9863_s29 + $0x580] sm:$0xff] }
  0x59   :  { %1219 = vmatpush.msra.mxu2 %v383_v26  ;;  %1242 = vmatpush.msra.mxu3 %v495_v27  ;;  %v488_v33 = vld [vmem:[%s9863_s29 + $0xcf0] sm:$0xff]  ;;  %v481_v41 = vld [vmem:[%s9863_s29 + $0xcb8] sm:$0xff]  ;;  %v362_v46 = vld [vmem:[%s9863_s29 + $0x900] sm:$0xff] }
  0x5a   :  { %1143 = vmatmul.f32.gmra.mxu2 %v5357_v28  ;;  %1174 = vmatpush.msra.mxu0 %v152_v29  ;;  %v474_v47 = vld [vmem:[%s9863_s29 + $0xc80] sm:$0xff]  ;;  %v131_v48 = vld [vmem:[%s9863_s29 + $0x1c8] sm:$0xff]  ;;  %v124_v53 = vld [vmem:[%s9863_s29 + $0x190] sm:$0xff] }
  0x5b   :  { %1197 = vmatpush.msra.mxu1 %v264_v30  ;;  %1220 = vmatpush.msra.mxu2 %v376_v31  ;;  %v243_v49 = vld [vmem:[%s9863_s29 + $0x548] sm:$0xff]  ;;  %v236_v54 = vld [vmem:[%s9863_s29 + $0x510] sm:$0xff]  ;;  %v117_v59 = vld [vmem:[%s9863_s29 + $0x158] sm:$0xff] }
  0x5c   :  { %1243 = vmatpush.msra.mxu3 %v488_v33  ;;  %1097 = vmatmul.f32.gmra.mxu0 %v5374_v34  ;;  %v355_v50 = vld [vmem:[%s9863_s29 + $0x8c8] sm:$0xff]  ;;  %v348_v55 = vld [vmem:[%s9863_s29 + $0x890] sm:$0xff]  ;;  %v229_v60 = vld [vmem:[%s9863_s29 + $0x4d8] sm:$0xff] }
  0x5d   :  { %1166 = vmatmul.f32.gmra.mxu3 %v5380_v35  ;;  %1175 = vmatpush.msra.mxu0 %v145_v36  ;;  %v467_v51 = vld [vmem:[%s9863_s29 + $0xc48] sm:$0xff]  ;;  %v460_v56 = vld [vmem:[%s9863_s29 + $0xc10] sm:$0xff]  ;;  %v341_v61 = vld [vmem:[%s9863_s29 + $0x858] sm:$0xff] }
  0x5e   :  { %1198 = vmatpush.msra.mxu1 %v257_v39  ;;  %1221 = vmatpush.msra.mxu2 %v369_v40  ;;  %v453_v62 = vld [vmem:[%s9863_s29 + $0xbd8] sm:$0xff]  ;;  %v110_v0 = vld [vmem:[%s9863_s29 + $0x120] sm:$0xff]  ;;  %v103_v4 = vld [vmem:[%s9863_s29 + $0xe8] sm:$0xff] }
  0x5f   :  { %1244 = vmatpush.msra.mxu3 %v481_v41  ;;  %1120 = vmatmul.f32.gmra.mxu1 %v5398_v42  ;;  %v222_v1 = vld [vmem:[%s9863_s29 + $0x4a0] sm:$0xff]  ;;  %v215_v5 = vld [vmem:[%s9863_s29 + $0x468] sm:$0xff]  ;;  %v96_v9 = vld [vmem:[%s9863_s29 + $0xb0] sm:$0xff] }
  0x60   :  { %1176 = vmatpush.msra.mxu0 %v138_v44  ;;  %1199 = vmatpush.msra.mxu1 %v250_v45  ;;  %v334_v2 = vld [vmem:[%s9863_s29 + $0x820] sm:$0xff]  ;;  %v327_v6 = vld [vmem:[%s9863_s29 + $0x7e8] sm:$0xff]  ;;  %v208_v10 = vld [vmem:[%s9863_s29 + $0x430] sm:$0xff] }
  0x61   :  { %1222 = vmatpush.msra.mxu2 %v362_v46  ;;  %1245 = vmatpush.msra.mxu3 %v474_v47  ;;  %v446_v3 = vld [vmem:[%s9863_s29 + $0xba0] sm:$0xff]  ;;  %v439_v7 = vld [vmem:[%s9863_s29 + $0xb68] sm:$0xff]  ;;  %v320_v11 = vld [vmem:[%s9863_s29 + $0x7b0] sm:$0xff] }
  0x62   :  { %1177 = vmatpush.msra.mxu0 %v131_v48  ;;  %1200 = vmatpush.msra.mxu1 %v243_v49  ;;  %v432_v12 = vld [vmem:[%s9863_s29 + $0xb30] sm:$0xff]  ;;  %v89_v15 = vld [vmem:[%s9863_s29 + $0x78] sm:$0xff]  ;;  %v82_v20 = vld [vmem:[%s9863_s29 + $0x40] sm:$0xff] }
  0x63   :  { %1223 = vmatpush.msra.mxu2 %v355_v50  ;;  %1246 = vmatpush.msra.mxu3 %v467_v51  ;;  %v201_v16 = vld [vmem:[%s9863_s29 + $0x3f8] sm:$0xff]  ;;  %v194_v21 = vld [vmem:[%s9863_s29 + $0x3c0] sm:$0xff]  ;;  %v75_v24 = vld [vmem:[%s9863_s29 + $0x8] sm:$0xff] }
  0x64   :  { %1178 = vmatpush.msra.mxu0 %v124_v53  ;;  %1201 = vmatpush.msra.mxu1 %v236_v54  ;;  %v313_v17 = vld [vmem:[%s9863_s29 + $0x778] sm:$0xff]  ;;  %v306_v22 = vld [vmem:[%s9863_s29 + $0x740] sm:$0xff]  ;;  %v187_v25 = vld [vmem:[%s9863_s29 + $0x388] sm:$0xff] }
  0x65   :  { %1224 = vmatpush.msra.mxu2 %v348_v55  ;;  %1247 = vmatpush.msra.mxu3 %v460_v56  ;;  %v425_v18 = vld [vmem:[%s9863_s29 + $0xaf8] sm:$0xff]  ;;  %v418_v23 = vld [vmem:[%s9863_s29 + $0xac0] sm:$0xff]  ;;  %v299_v26 = vld [vmem:[%s9863_s29 + $0x708] sm:$0xff] }
  0x66   :  { %1179 = vmatpush.msra.mxu0 %v117_v59  ;;  %1202 = vmatpush.msra.mxu1 %v229_v60  ;;  %v411_v27 = vld [vmem:[%s9863_s29 + $0xa88] sm:$0xff]  ;;  %v628_v29 = vld [vmem:[%s9863_s29 + $0x1150] sm:$0xff]  ;;  %v621_v36 = vld [vmem:[%s9863_s29 + $0x1118] sm:$0xff] }
  0x67   :  { %1225 = vmatpush.msra.mxu2 %v341_v61  ;;  %1248 = vmatpush.msra.mxu3 %v453_v62  ;;  %v740_v30 = vld [vmem:[%s9863_s29 + $0x14d0] sm:$0xff]  ;;  %v733_v39 = vld [vmem:[%s9863_s29 + $0x1498] sm:$0xff]  ;;  %v614_v44 = vld [vmem:[%s9863_s29 + $0x10e0] sm:$0xff] }
  0x68   :  { %1180 = vmatpush.msra.mxu0 %v110_v0  ;;  %1203 = vmatpush.msra.mxu1 %v222_v1  ;;  %v852_v31 = vld [vmem:[%s9863_s29 + $0x1850] sm:$0xff]  ;;  %v845_v40 = vld [vmem:[%s9863_s29 + $0x1818] sm:$0xff]  ;;  %v726_v45 = vld [vmem:[%s9863_s29 + $0x1460] sm:$0xff] }
  0x69   :  { %1226 = vmatpush.msra.mxu2 %v334_v2  ;;  %1249 = vmatpush.msra.mxu3 %v446_v3  ;;  %v964_v33 = vld [vmem:[%s9863_s29 + $0x1bd0] sm:$0xff]  ;;  %v957_v41 = vld [vmem:[%s9863_s29 + $0x1b98] sm:$0xff]  ;;  %v838_v46 = vld [vmem:[%s9863_s29 + $0x17e0] sm:$0xff] }
  0x6a   :  { %1181 = vmatpush.msra.mxu0 %v103_v4  ;;  %1204 = vmatpush.msra.mxu1 %v215_v5  ;;  %v950_v47 = vld [vmem:[%s9863_s29 + $0x1b60] sm:$0xff]  ;;  %v607_v48 = vld [vmem:[%s9863_s29 + $0x10a8] sm:$0xff]  ;;  %v600_v53 = vld [vmem:[%s9863_s29 + $0x1070] sm:$0xff] }
  0x6b   :  { %1227 = vmatpush.msra.mxu2 %v327_v6  ;;  %1250 = vmatpush.msra.mxu3 %v439_v7  ;;  %v719_v49 = vld [vmem:[%s9863_s29 + $0x1428] sm:$0xff]  ;;  %v712_v54 = vld [vmem:[%s9863_s29 + $0x13f0] sm:$0xff]  ;;  %v593_v59 = vld [vmem:[%s9863_s29 + $0x1038] sm:$0xff] }
  0x6c   :  { %1182 = vmatpush.msra.mxu0 %v96_v9  ;;  %1205 = vmatpush.msra.mxu1 %v208_v10  ;;  %v831_v50 = vld [vmem:[%s9863_s29 + $0x17a8] sm:$0xff]  ;;  %v824_v55 = vld [vmem:[%s9863_s29 + $0x1770] sm:$0xff]  ;;  %v705_v60 = vld [vmem:[%s9863_s29 + $0x13b8] sm:$0xff] }
  0x6d   :  { %1228 = vmatpush.msra.mxu2 %v320_v11  ;;  %1251 = vmatpush.msra.mxu3 %v432_v12  ;;  %v943_v51 = vld [vmem:[%s9863_s29 + $0x1b28] sm:$0xff]  ;;  %v936_v56 = vld [vmem:[%s9863_s29 + $0x1af0] sm:$0xff]  ;;  %v817_v61 = vld [vmem:[%s9863_s29 + $0x1738] sm:$0xff] }
  0x6e   :  { %1183 = vmatpush.msra.mxu0 %v89_v15  ;;  %1206 = vmatpush.msra.mxu1 %v201_v16  ;;  %v929_v62 = vld [vmem:[%s9863_s29 + $0x1ab8] sm:$0xff]  ;;  %v586_v0 = vld [vmem:[%s9863_s29 + $0x1000] sm:$0xff]  ;;  %v579_v4 = vld [vmem:[%s9863_s29 + $0xfc8] sm:$0xff] }
  0x6f   :  { %1229 = vmatpush.msra.mxu2 %v313_v17  ;;  %1252 = vmatpush.msra.mxu3 %v425_v18  ;;  %v698_v1 = vld [vmem:[%s9863_s29 + $0x1380] sm:$0xff]  ;;  %v691_v5 = vld [vmem:[%s9863_s29 + $0x1348] sm:$0xff]  ;;  %v572_v9 = vld [vmem:[%s9863_s29 + $0xf90] sm:$0xff] }
  0x70   :  { %1184 = vmatpush.msra.mxu0 %v82_v20  ;;  %1207 = vmatpush.msra.mxu1 %v194_v21  ;;  %v810_v2 = vld [vmem:[%s9863_s29 + $0x1700] sm:$0xff]  ;;  %v803_v6 = vld [vmem:[%s9863_s29 + $0x16c8] sm:$0xff]  ;;  %v684_v10 = vld [vmem:[%s9863_s29 + $0x1310] sm:$0xff] }
  0x71   :  { %1230 = vmatpush.msra.mxu2 %v306_v22  ;;  %1253 = vmatpush.msra.mxu3 %v418_v23  ;;  %v922_v3 = vld [vmem:[%s9863_s29 + $0x1a80] sm:$0xff]  ;;  %v915_v7 = vld [vmem:[%s9863_s29 + $0x1a48] sm:$0xff]  ;;  %v796_v11 = vld [vmem:[%s9863_s29 + $0x1690] sm:$0xff] }
  0x72   :  { %1185 = vmatpush.msra.mxu0 %v75_v24  ;;  %1208 = vmatpush.msra.mxu1 %v187_v25  ;;  %v908_v12 = vld [vmem:[%s9863_s29 + $0x1a10] sm:$0xff]  ;;  %v565_v15 = vld [vmem:[%s9863_s29 + $0xf58] sm:$0xff]  ;;  %v558_v18 = vld [vmem:[%s9863_s29 + $0xf20] sm:$0xff] }
  0x73   :  { %1231 = vmatpush.msra.mxu2 %v299_v26  ;;  %1254 = vmatpush.msra.mxu3 %v411_v27  ;;  %v677_v16 = vld [vmem:[%s9863_s29 + $0x12d8] sm:$0xff]  ;;  %v670_v20 = vld [vmem:[%s9863_s29 + $0x12a0] sm:$0xff]  ;;  %v663_v22 = vld [vmem:[%s9863_s29 + $0x1268] sm:$0xff] }
  0x74   :  { %1262 = vmatpush.msrb.mxu0 %v628_v29  ;;  %1285 = vmatpush.msrb.mxu1 %v740_v30  ;;  %v789_v17 = vld [vmem:[%s9863_s29 + $0x1658] sm:$0xff]  ;;  %v894_v21 = vld [vmem:[%s9863_s29 + $0x19a0] sm:$0xff]  ;;  %v775_v23 = vld [vmem:[%s9863_s29 + $0x15e8] sm:$0xff] }
  0x75   :  { %1308 = vmatpush.msrb.mxu2 %v852_v31  ;;  %1331 = vmatpush.msrb.mxu3 %v964_v33  ;;  %v887_v24 = vld [vmem:[%s9863_s29 + $0x1968] sm:$0xff]  ;;  %v656_v25 = vld [vmem:[%s9863_s29 + $0x1230] sm:$0xff]  ;;  %v537_v29 = vld [vmem:[%s9863_s29 + $0xe78] sm:$0xff] }
  0x76   :  { %1263 = vmatpush.msrb.mxu0 %v621_v36  ;;  %1286 = vmatpush.msrb.mxu1 %v733_v39  ;;  %v768_v26 = vld [vmem:[%s9863_s29 + $0x15b0] sm:$0xff]  ;;  %v649_v30 = vld [vmem:[%s9863_s29 + $0x11f8] sm:$0xff]  ;;  %v530_v33 = vld [vmem:[%s9863_s29 + $0xe40] sm:$0xff] }
  0x77   :  { %1309 = vmatpush.msrb.mxu2 %v845_v40  ;;  %1332 = vmatpush.msrb.mxu3 %v957_v41  ;;  %v880_v27 = vld [vmem:[%s9863_s29 + $0x1930] sm:$0xff]  ;;  %v761_v31 = vld [vmem:[%s9863_s29 + $0x1578] sm:$0xff]  ;;  %v642_v36 = vld [vmem:[%s9863_s29 + $0x11c0] sm:$0xff] }
  0x78   :  { %1264 = vmatpush.msrb.mxu0 %v614_v44  ;;  %1287 = vmatpush.msrb.mxu1 %v726_v45  ;;  %v866_v39 = vld [vmem:[%s9863_s29 + $0x18c0] sm:$0xff]  ;;  %v635_v40 = vld [vmem:[%s9863_s29 + $0x1188] sm:$0xff]  ;;  %v293_v45 = vld [vmem:[%s9863_s29 + $0x6d8] sm:$0xff] }
  0x79   :  { %1310 = vmatpush.msrb.mxu2 %v838_v46  ;;  %1333 = vmatpush.msrb.mxu3 %v950_v47  ;;  %v747_v41 = vld [vmem:[%s9863_s29 + $0x1508] sm:$0xff]  ;;  %v405_v46 = vld [vmem:[%s9863_s29 + $0xa58] sm:$0xff] }
  0x7a   :  { %1265 = vmatpush.msrb.mxu0 %v607_v48  ;;  %1288 = vmatpush.msrb.mxu1 %v719_v49  ;;  %v859_v44 = vld [vmem:[%s9863_s29 + $0x1888] sm:$0xff]  ;;  %v517_v47 = vld [vmem:[%s9863_s29 + $0xdd8] sm:$0xff]  ;;  %v174_v48 = vld [vmem:[%s9863_s29 + $0x320] sm:$0xff] }
  0x7b   :  { %1311 = vmatpush.msrb.mxu2 %v831_v50  ;;  %1334 = vmatpush.msrb.mxu3 %v943_v51  ;;  %v286_v49 = vld [vmem:[%s9863_s29 + $0x6a0] sm:$0xff]  ;;  %v167_v51 = vld [vmem:[%s9863_s29 + $0x2e8] sm:$0xff] }
  0x7c   :  { %1266 = vmatpush.msrb.mxu0 %v600_v53  ;;  %1289 = vmatpush.msrb.mxu1 %v712_v54  ;;  %v398_v50 = vld [vmem:[%s9863_s29 + $0xa20] sm:$0xff]  ;;  %v279_v53 = vld [vmem:[%s9863_s29 + $0x668] sm:$0xff] }
  0x7d   :  { %1312 = vmatpush.msrb.mxu2 %v824_v55  ;;  %1335 = vmatpush.msrb.mxu3 %v936_v56  ;;  %v503_v54 = vld [vmem:[%s9863_s29 + $0xd68] sm:$0xff]  ;;  %v272_v55 = vld [vmem:[%s9863_s29 + $0x630] sm:$0xff] }
  0x7e   :  { %1267 = vmatpush.msrb.mxu0 %v593_v59  ;;  %1290 = vmatpush.msrb.mxu1 %v705_v60  ;;  %v384_v56 = vld [vmem:[%s9863_s29 + $0x9b0] sm:$0xff]  ;;  %v265_v60 = vld [vmem:[%s9863_s29 + $0x5f8] sm:$0xff] }
  0x7f   :  { %1313 = vmatpush.msrb.mxu2 %v817_v61  ;;  %1336 = vmatpush.msrb.mxu3 %v929_v62  ;;  %v496_v59 = vld [vmem:[%s9863_s29 + $0xd30] sm:$0xff]  ;;  %v377_v61 = vld [vmem:[%s9863_s29 + $0x978] sm:$0xff] }
  0x80   :  { %1268 = vmatpush.msrb.mxu0 %v586_v0  ;;  %1291 = vmatpush.msrb.mxu1 %v698_v1  ;;  %v489_v62 = vld [vmem:[%s9863_s29 + $0xcf8] sm:$0xff]  ;;  %v146_v0 = vld [vmem:[%s9863_s29 + $0x240] sm:$0xff] }
  0x81   :  { %1314 = vmatpush.msrb.mxu2 %v810_v2  ;;  %1337 = vmatpush.msrb.mxu3 %v922_v3  ;;  %v258_v1 = vld [vmem:[%s9863_s29 + $0x5c0] sm:$0xff]  ;;  %v139_v3 = vld [vmem:[%s9863_s29 + $0x208] sm:$0xff] }
  0x82   :  { %1269 = vmatpush.msrb.mxu0 %v579_v4  ;;  %1292 = vmatpush.msrb.mxu1 %v691_v5  ;;  %v370_v2 = vld [vmem:[%s9863_s29 + $0x940] sm:$0xff]  ;;  %v251_v4 = vld [vmem:[%s9863_s29 + $0x588] sm:$0xff] }
  0x83   :  { %1315 = vmatpush.msrb.mxu2 %v803_v6  ;;  %1338 = vmatpush.msrb.mxu3 %v915_v7  ;;  %v475_v5 = vld [vmem:[%s9863_s29 + $0xc88] sm:$0xff]  ;;  %v244_v6 = vld [vmem:[%s9863_s29 + $0x550] sm:$0xff] }
  0x84   :  { %1232 = vmatmul.f32.vlgmr.msra.gmra.mxu2 %v5141_v32  ;;  %1270 = vmatpush.msrb.mxu0 %v572_v9  ;;  %v901_v32 = vld [vmem:[%s9863_s29 + $0x19d8] sm:$0xff]  ;;  %v356_v7 = vld [vmem:[%s9863_s29 + $0x8d0] sm:$0xff] }
  0x85   :  { %1293 = vmatpush.msrb.mxu1 %v684_v10  ;;  %1316 = vmatpush.msrb.mxu2 %v796_v11  ;;  %v468_v9 = vld [vmem:[%s9863_s29 + $0xc50] sm:$0xff]  ;;  %v237_v10 = vld [vmem:[%s9863_s29 + $0x518] sm:$0xff] }
  0x86   :  { %1339 = vmatpush.msrb.mxu3 %v908_v12  ;;  %1186 = vmatmul.f32.vlgmr.msra.gmra.mxu0 %v5158_v37  ;;  %v782_v37 = vld [vmem:[%s9863_s29 + $0x1620] sm:$0xff]  ;;  %v349_v11 = vld [vmem:[%s9863_s29 + $0x898] sm:$0xff] }
  0x87   :  { %1255 = vmatmul.f32.vlgmr.msra.gmra.mxu3 %v5164_v38  ;;  %1271 = vmatpush.msrb.mxu0 %v565_v15  ;;  %v551_v38 = vld [vmem:[%s9863_s29 + $0xee8] sm:$0xff]  ;;  %v461_v12 = vld [vmem:[%s9863_s29 + $0xc18] sm:$0xff]  ;;  %v118_v15 = vld [vmem:[%s9863_s29 + $0x160] sm:$0xff] }
  0x88   :  { %1294 = vmatpush.msrb.mxu1 %v677_v16  ;;  %1317 = vmatpush.msrb.mxu2 %v789_v17  ;;  %v230_v16 = vld [vmem:[%s9863_s29 + $0x4e0] sm:$0xff] }
  0x89   :  { %1340 = vmatpush.msrb.mxu3 %v901_v32  ;;  %1209 = vmatmul.f32.vlgmr.msra.gmra.mxu1 %v5182_v43  ;;  %v544_v43 = vld [vmem:[%s9863_s29 + $0xeb0] sm:$0xff]  ;;  %v342_v17 = vld [vmem:[%s9863_s29 + $0x860] sm:$0xff] }
  0x8a   :  { %1272 = vmatpush.msrb.mxu0 %v558_v18  ;;  %1295 = vmatpush.msrb.mxu1 %v670_v20  ;;  %v454_v32 = vld [vmem:[%s9863_s29 + $0xbe0] sm:$0xff]  ;;  %v111_v18 = vld [vmem:[%s9863_s29 + $0x128] sm:$0xff] }
  0x8b   :  { %1318 = vmatpush.msrb.mxu2 %v782_v37  ;;  %1341 = vmatpush.msrb.mxu3 %v894_v21  ;;  %v223_v20 = vld [vmem:[%s9863_s29 + $0x4a8] sm:$0xff] }
  0x8c   :  { %1273 = vmatpush.msrb.mxu0 %v551_v38  ;;  %1296 = vmatpush.msrb.mxu1 %v663_v22  ;;  %v335_v37 = vld [vmem:[%s9863_s29 + $0x828] sm:$0xff]  ;;  %v104_v38 = vld [vmem:[%s9863_s29 + $0xf0] sm:$0xff] }
  0x8d   :  { %1319 = vmatpush.msrb.mxu2 %v775_v23  ;;  %1342 = vmatpush.msrb.mxu3 %v887_v24  ;;  %v447_v21 = vld [vmem:[%s9863_s29 + $0xba8] sm:$0xff]  ;;  %v216_v22 = vld [vmem:[%s9863_s29 + $0x470] sm:$0xff] }
  0x8e   :  { %1235 = vmatmul.f32.gmra.mxu2 %v5213_v52  ;;  %1274 = vmatpush.msrb.mxu0 %v544_v43  ;;  %v873_v52 = vld [vmem:[%s9863_s29 + $0x18f8] sm:$0xff]  ;;  %v328_v23 = vld [vmem:[%s9863_s29 + $0x7f0] sm:$0xff] }
  0x8f   :  { %1297 = vmatpush.msrb.mxu1 %v656_v25  ;;  %1320 = vmatpush.msrb.mxu2 %v768_v26  ;;  %v440_v24 = vld [vmem:[%s9863_s29 + $0xb70] sm:$0xff]  ;;  %v97_v43 = vld [vmem:[%s9863_s29 + $0xb8] sm:$0xff] }
  0x90   :  { %1343 = vmatpush.msrb.mxu3 %v880_v27  ;;  %1189 = vmatmul.f32.gmra.mxu0 %v5230_v57  ;;  %v754_v57 = vld [vmem:[%s9863_s29 + $0x1540] sm:$0xff]  ;;  %v209_v25 = vld [vmem:[%s9863_s29 + $0x438] sm:$0xff] }
  0x91   :  { %1258 = vmatmul.f32.gmra.mxu3 %v5236_v58  ;;  %1275 = vmatpush.msrb.mxu0 %v537_v29  ;;  %v523_v58 = vld [vmem:[%s9863_s29 + $0xe08] sm:$0xff]  ;;  %v321_v26 = vld [vmem:[%s9863_s29 + $0x7b8] sm:$0xff]  ;;  %v90_v29 = vld [vmem:[%s9863_s29 + $0x80] sm:$0xff] }
  0x92   :  { %1298 = vmatpush.msrb.mxu1 %v649_v30  ;;  %1321 = vmatpush.msrb.mxu2 %v761_v31  ;;  %v433_v27 = vld [vmem:[%s9863_s29 + $0xb38] sm:$0xff]  ;;  %v202_v30 = vld [vmem:[%s9863_s29 + $0x400] sm:$0xff] }
  0x93   :  { %1344 = vmatpush.msrb.mxu3 %v873_v52  ;;  %1212 = vmatmul.f32.gmra.mxu1 %v5254_v63  ;;  %v181_v63 = vld [vmem:[%s9863_s29 + $0x358] sm:$0xff]  ;;  %v314_v31 = vld [vmem:[%s9863_s29 + $0x780] sm:$0xff] }
  0x94   :  { %1276 = vmatpush.msrb.mxu0 %v530_v33  ;;  %1299 = vmatpush.msrb.mxu1 %v642_v36  ;;  %v426_v52 = vld [vmem:[%s9863_s29 + $0xb00] sm:$0xff]  ;;  %v83_v33 = vld [vmem:[%s9863_s29 + $0x48] sm:$0xff] }
  0x95   :  { %1322 = vmatpush.msrb.mxu2 %v754_v57  ;;  %1345 = vmatpush.msrb.mxu3 %v866_v39  ;;  %v195_v36 = vld [vmem:[%s9863_s29 + $0x3c8] sm:$0xff] }
  0x96   :  { %1277 = vmatpush.msrb.mxu0 %v523_v58  ;;  %1300 = vmatpush.msrb.mxu1 %v635_v40  ;;  %v307_v57 = vld [vmem:[%s9863_s29 + $0x748] sm:$0xff]  ;;  %v76_v58 = vld [vmem:[%s9863_s29 + $0x10] sm:$0xff] }
  0x97   :  { %1323 = vmatpush.msrb.mxu2 %v747_v41  ;;  %1346 = vmatpush.msrb.mxu3 %v859_v44  ;;  %v419_v39 = vld [vmem:[%s9863_s29 + $0xac8] sm:$0xff]  ;;  %v188_v40 = vld [vmem:[%s9863_s29 + $0x390] sm:$0xff] }
  0x98   :  { %1324 = vmatmul.f32.vlgmr.msrb.gmra.mxu2 %v5285_v8  ;;  %1354 = vmatpush.msra.mxu0 %v181_v63  ;;  %v510_v8 = vld [vmem:[%s9863_s29 + $0xda0] sm:$0xff]  ;;  %v300_v41 = vld [vmem:[%s9863_s29 + $0x710] sm:$0xff]  ;;  %v629_v63 = vld [vmem:[%s9863_s29 + $0x1158] sm:$0xff] }
  0x99   :  { %1377 = vmatpush.msra.mxu1 %v293_v45  ;;  %1400 = vmatpush.msra.mxu2 %v405_v46  ;;  %v412_v44 = vld [vmem:[%s9863_s29 + $0xa90] sm:$0xff]  ;;  %v741_v45 = vld [vmem:[%s9863_s29 + $0x14d8] sm:$0xff] }
  0x9a   :  { %1423 = vmatpush.msra.mxu3 %v517_v47  ;;  %1278 = vmatmul.f32.vlgmr.msrb.gmra.mxu0 %v5302_v13  ;;  %v391_v13 = vld [vmem:[%s9863_s29 + $0x9e8] sm:$0xff]  ;;  %v853_v46 = vld [vmem:[%s9863_s29 + $0x1858] sm:$0xff] }
  0x9b   :  { %1347 = vmatmul.f32.vlgmr.msrb.gmra.mxu3 %v5308_v14  ;;  %1355 = vmatpush.msra.mxu0 %v174_v48  ;;  %v160_v14 = vld [vmem:[%s9863_s29 + $0x2b0] sm:$0xff]  ;;  %v965_v47 = vld [vmem:[%s9863_s29 + $0x1bd8] sm:$0xff]  ;;  %v622_v48 = vld [vmem:[%s9863_s29 + $0x1120] sm:$0xff] }
  0x9c   :  { %1378 = vmatpush.msra.mxu1 %v286_v49  ;;  %1401 = vmatpush.msra.mxu2 %v398_v50  ;;  %v734_v49 = vld [vmem:[%s9863_s29 + $0x14a0] sm:$0xff] }
  0x9d   :  { %1424 = vmatpush.msra.mxu3 %v510_v8  ;;  %1301 = vmatmul.f32.vlgmr.msrb.gmra.mxu1 %v5326_v19  ;;  %v153_v19 = vld [vmem:[%s9863_s29 + $0x278] sm:$0xff]  ;;  %v846_v50 = vld [vmem:[%s9863_s29 + $0x1820] sm:$0xff] }
  0x9e   :  { %1356 = vmatpush.msra.mxu0 %v167_v51  ;;  %1379 = vmatpush.msra.mxu1 %v279_v53  ;;  %v958_v8 = vld [vmem:[%s9863_s29 + $0x1ba0] sm:$0xff]  ;;  %v615_v51 = vld [vmem:[%s9863_s29 + $0x10e8] sm:$0xff] }
  0x9f   :  { %1402 = vmatpush.msra.mxu2 %v391_v13  ;;  %1425 = vmatpush.msra.mxu3 %v503_v54  ;;  %v727_v53 = vld [vmem:[%s9863_s29 + $0x1468] sm:$0xff] }
  0xa0   :  { %1357 = vmatpush.msra.mxu0 %v160_v14  ;;  %1380 = vmatpush.msra.mxu1 %v272_v55  ;;  %v839_v13 = vld [vmem:[%s9863_s29 + $0x17e8] sm:$0xff]  ;;  %v608_v14 = vld [vmem:[%s9863_s29 + $0x10b0] sm:$0xff] }
  0xa1   :  { %1403 = vmatpush.msra.mxu2 %v384_v56  ;;  %1426 = vmatpush.msra.mxu3 %v496_v59  ;;  %v951_v54 = vld [vmem:[%s9863_s29 + $0x1b68] sm:$0xff]  ;;  %v720_v55 = vld [vmem:[%s9863_s29 + $0x1430] sm:$0xff] }
  0xa2   :  { %1327 = vmatmul.f32.gmra.mxu2 %v5357_v28  ;;  %1358 = vmatpush.msra.mxu0 %v153_v19  ;;  %v482_v28 = vld [vmem:[%s9863_s29 + $0xcc0] sm:$0xff]  ;;  %v832_v56 = vld [vmem:[%s9863_s29 + $0x17b0] sm:$0xff]  ;;  %v601_v19 = vld [vmem:[%s9863_s29 + $0x1078] sm:$0xff] }
  0xa3   :  { %1381 = vmatpush.msra.mxu1 %v265_v60  ;;  %1404 = vmatpush.msra.mxu2 %v377_v61  ;;  %v944_v59 = vld [vmem:[%s9863_s29 + $0x1b30] sm:$0xff]  ;;  %v713_v60 = vld [vmem:[%s9863_s29 + $0x13f8] sm:$0xff] }
  0xa4   :  { %1427 = vmatpush.msra.mxu3 %v489_v62  ;;  %1281 = vmatmul.f32.gmra.mxu0 %v5374_v34  ;;  %v363_v34 = vld [vmem:[%s9863_s29 + $0x908] sm:$0xff]  ;;  %v825_v61 = vld [vmem:[%s9863_s29 + $0x1778] sm:$0xff] }
  0xa5   :  { %1350 = vmatmul.f32.gmra.mxu3 %v5380_v35  ;;  %1359 = vmatpush.msra.mxu0 %v146_v0  ;;  %v132_v35 = vld [vmem:[%s9863_s29 + $0x1d0] sm:$0xff]  ;;  %v937_v62 = vld [vmem:[%s9863_s29 + $0x1af8] sm:$0xff]  ;;  %v594_v0 = vld [vmem:[%s9863_s29 + $0x1040] sm:$0xff] }
  0xa6   :  { %1382 = vmatpush.msra.mxu1 %v258_v1  ;;  %1405 = vmatpush.msra.mxu2 %v370_v2  ;;  %v706_v1 = vld [vmem:[%s9863_s29 + $0x13c0] sm:$0xff] }
  0xa7   :  { %1428 = vmatpush.msra.mxu3 %v482_v28  ;;  %1304 = vmatmul.f32.gmra.mxu1 %v5398_v42  ;;  %v125_v42 = vld [vmem:[%s9863_s29 + $0x198] sm:$0xff]  ;;  %v818_v2 = vld [vmem:[%s9863_s29 + $0x1740] sm:$0xff] }
  0xa8   :  { %1360 = vmatpush.msra.mxu0 %v139_v3  ;;  %1383 = vmatpush.msra.mxu1 %v251_v4  ;;  %v930_v28 = vld [vmem:[%s9863_s29 + $0x1ac0] sm:$0xff]  ;;  %v587_v3 = vld [vmem:[%s9863_s29 + $0x1008] sm:$0xff] }
  0xa9   :  { %1406 = vmatpush.msra.mxu2 %v363_v34  ;;  %1429 = vmatpush.msra.mxu3 %v475_v5  ;;  %v699_v4 = vld [vmem:[%s9863_s29 + $0x1388] sm:$0xff] }
  0xaa   :  { %1361 = vmatpush.msra.mxu0 %v132_v35  ;;  %1384 = vmatpush.msra.mxu1 %v244_v6  ;;  %v811_v34 = vld [vmem:[%s9863_s29 + $0x1708] sm:$0xff]  ;;  %v580_v35 = vld [vmem:[%s9863_s29 + $0xfd0] sm:$0xff] }
  0xab   :  { %1407 = vmatpush.msra.mxu2 %v356_v7  ;;  %1430 = vmatpush.msra.mxu3 %v468_v9  ;;  %v923_v5 = vld [vmem:[%s9863_s29 + $0x1a88] sm:$0xff]  ;;  %v692_v6 = vld [vmem:[%s9863_s29 + $0x1350] sm:$0xff] }
  0xac   :  { %1362 = vmatpush.msra.mxu0 %v125_v42  ;;  %1385 = vmatpush.msra.mxu1 %v237_v10  ;;  %v804_v7 = vld [vmem:[%s9863_s29 + $0x16d0] sm:$0xff]  ;;  %v573_v42 = vld [vmem:[%s9863_s29 + $0xf98] sm:$0xff] }
  0xad   :  { %1408 = vmatpush.msra.mxu2 %v349_v11  ;;  %1431 = vmatpush.msra.mxu3 %v461_v12  ;;  %v916_v9 = vld [vmem:[%s9863_s29 + $0x1a50] sm:$0xff]  ;;  %v685_v10 = vld [vmem:[%s9863_s29 + $0x1318] sm:$0xff] }
  0xae   :  { %1363 = vmatpush.msra.mxu0 %v118_v15  ;;  %1386 = vmatpush.msra.mxu1 %v230_v16  ;;  %v797_v11 = vld [vmem:[%s9863_s29 + $0x1698] sm:$0xff]  ;;  %v6033_v15 = vld [vmem:[%s9864_s25 + $0x10] sm:$0xff]  ;;  %v566_v16 = vld [vmem:[%s9863_s29 + $0xf60] sm:$0xff] }
  0xaf   :  { %1409 = vmatpush.msra.mxu2 %v342_v17  ;;  %1432 = vmatpush.msra.mxu3 %v454_v32  ;;  %v909_v12 = vld [vmem:[%s9863_s29 + $0x1a18] sm:$0xff]  ;;  %v678_v17 = vld [vmem:[%s9863_s29 + $0x12e0] sm:$0xff] }
  0xb0   :  { %1364 = vmatpush.msra.mxu0 %v111_v18  ;;  %1387 = vmatpush.msra.mxu1 %v223_v20  ;;  %v790_v32 = vld [vmem:[%s9863_s29 + $0x1660] sm:$0xff] }
  0xb1   :  { %1410 = vmatpush.msra.mxu2 %v335_v37  ;;  %1433 = vmatpush.msra.mxu3 %v447_v21  ;;  %v6048_v18 = vld [vmem:[%s9864_s25] sm:$0xff]  ;;  %v6057_v37 = vld [vmem:[%s9864_s25 + $0x18] sm:$0xff]  ;;  %v559_v21 = vld [vmem:[%s9863_s29 + $0xf28] sm:$0xff] }
  0xb2   :  { %1365 = vmatpush.msra.mxu0 %v104_v38  ;;  %1388 = vmatpush.msra.mxu1 %v216_v22  ;;  %v902_v20 = vld [vmem:[%s9863_s29 + $0x19e0] sm:$0xff]  ;;  %v671_v38 = vld [vmem:[%s9863_s29 + $0x12a8] sm:$0xff] }
  0xb3   :  { %1411 = vmatpush.msra.mxu2 %v328_v23  ;;  %1434 = vmatpush.msra.mxu3 %v440_v24  ;;  %v783_v22 = vld [vmem:[%s9863_s29 + $0x1628] sm:$0xff] }
  0xb4   :  { %1366 = vmatpush.msra.mxu0 %v97_v43  ;;  %1389 = vmatpush.msra.mxu1 %v209_v25  ;;  %v895_v23 = vld [vmem:[%s9863_s29 + $0x19a8] sm:$0xff]  ;;  %v552_v43 = vld [vmem:[%s9863_s29 + $0xef0] sm:$0xff] }
  0xb5   :  { %1412 = vmatpush.msra.mxu2 %v321_v26  ;;  %1435 = vmatpush.msra.mxu3 %v433_v27  ;;  %v6075_v24 = vld [vmem:[%s9864_s25 + $0x8] sm:$0xff]  ;;  %v664_v25 = vld [vmem:[%s9863_s29 + $0x1270] sm:$0xff] }
  0xb6   :  { %1367 = vmatpush.msra.mxu0 %v90_v29  ;;  %1390 = vmatpush.msra.mxu1 %v202_v30  ;;  %v776_v26 = vld [vmem:[%s9863_s29 + $0x15f0] sm:$0xff]  ;;  %v545_v29 = vld [vmem:[%s9863_s29 + $0xeb8] sm:$0xff] }
  0xb7   :  { %1413 = vmatpush.msra.mxu2 %v314_v31  ;;  %1436 = vmatpush.msra.mxu3 %v426_v52  ;;  %v888_v27 = vld [vmem:[%s9863_s29 + $0x1970] sm:$0xff]  ;;  %v657_v30 = vld [vmem:[%s9863_s29 + $0x1238] sm:$0xff] }
  0xb8   :  { %1368 = vmatpush.msra.mxu0 %v83_v33  ;;  %1391 = vmatpush.msra.mxu1 %v195_v36  ;;  %v769_v31 = vld [vmem:[%s9863_s29 + $0x15b8] sm:$0xff]  ;;  %v6105_v33 = vld [vmem:[%s9864_s25 + $0x50] sm:$0xff]  ;;  %v538_v36 = vld [vmem:[%s9863_s29 + $0xe80] sm:$0xff] }
  0xb9   :  { %1414 = vmatpush.msra.mxu2 %v307_v57  ;;  %1437 = vmatpush.msra.mxu3 %v419_v39  ;;  %v881_v52 = vld [vmem:[%s9863_s29 + $0x1938] sm:$0xff]  ;;  %v650_v57 = vld [vmem:[%s9863_s29 + $0x1200] sm:$0xff] }
  0xba   :  { %1369 = vmatpush.msra.mxu0 %v76_v58  ;;  %1392 = vmatpush.msra.mxu1 %v188_v40  ;;  %v762_v39 = vld [vmem:[%s9863_s29 + $0x1580] sm:$0xff] }
  0xbb   :  { %1415 = vmatpush.msra.mxu2 %v300_v41  ;;  %1438 = vmatpush.msra.mxu3 %v412_v44  ;;  %v6120_v58 = vld [vmem:[%s9864_s25 + $0x40] sm:$0xff]  ;;  %v6129_v41 = vld [vmem:[%s9864_s25 + $0x58] sm:$0xff]  ;;  %v531_v44 = vld [vmem:[%s9863_s29 + $0xe48] sm:$0xff] }
  0xbc   :  { %1446 = vmatpush.msrb.mxu0 %v629_v63  ;;  %1469 = vmatpush.msrb.mxu1 %v741_v45  ;;  %v874_v40 = vld [vmem:[%s9863_s29 + $0x1900] sm:$0xff]  ;;  %v643_v63 = vld [vmem:[%s9863_s29 + $0x11c8] sm:$0xff] }
  0xbd   :  { %1492 = vmatpush.msrb.mxu2 %v853_v46  ;;  %1515 = vmatpush.msrb.mxu3 %v965_v47  ;;  %v755_v45 = vld [vmem:[%s9863_s29 + $0x1548] sm:$0xff] }
  0xbe   :  { %1447 = vmatpush.msrb.mxu0 %v622_v48  ;;  %1470 = vmatpush.msrb.mxu1 %v734_v49  ;;  %v867_v46 = vld [vmem:[%s9863_s29 + $0x18c8] sm:$0xff]  ;;  %v524_v48 = vld [vmem:[%s9863_s29 + $0xe10] sm:$0xff] }
  0xbf   :  { %1493 = vmatpush.msrb.mxu2 %v846_v50  ;;  %1516 = vmatpush.msrb.mxu3 %v958_v8  ;;  %v6147_v47 = vld [vmem:[%s9864_s25 + $0x48] sm:$0xff]  ;;  %v636_v49 = vld [vmem:[%s9863_s29 + $0x1190] sm:$0xff] }
  0xc0   :  { %1448 = vmatpush.msrb.mxu0 %v615_v51  ;;  %1471 = vmatpush.msrb.mxu1 %v727_v53  ;;  %v748_v50 = vld [vmem:[%s9863_s29 + $0x1510] sm:$0xff]  ;;  %v182_v51 = vld [vmem:[%s9863_s29 + $0x360] sm:$0xff] }
  0xc1   :  { %1494 = vmatpush.msrb.mxu2 %v839_v13  ;;  %1517 = vmatpush.msrb.mxu3 %v951_v54  ;;  %v860_v8 = vld [vmem:[%s9863_s29 + $0x1890] sm:$0xff]  ;;  %v294_v53 = vld [vmem:[%s9863_s29 + $0x6e0] sm:$0xff] }
  0xc2   :  { %1449 = vmatpush.msrb.mxu0 %v608_v14  ;;  %1472 = vmatpush.msrb.mxu1 %v720_v55  ;;  %v406_v13 = vld [vmem:[%s9863_s29 + $0xa60] sm:$0xff]  ;;  %v6177_v14 = vld [vmem:[%s9864_s25 + $0x30] sm:$0xff]  ;;  %v175_v55 = vld [vmem:[%s9863_s29 + $0x328] sm:$0xff] }
  0xc3   :  { %1495 = vmatpush.msrb.mxu2 %v832_v56  ;;  %1518 = vmatpush.msrb.mxu3 %v944_v59  ;;  %v518_v54 = vld [vmem:[%s9863_s29 + $0xde0] sm:$0xff]  ;;  %v287_v56 = vld [vmem:[%s9863_s29 + $0x6a8] sm:$0xff] }
  0xc4   :  { %1450 = vmatpush.msrb.mxu0 %v601_v19  ;;  %1473 = vmatpush.msrb.mxu1 %v713_v60  ;;  %v399_v59 = vld [vmem:[%s9863_s29 + $0xa28] sm:$0xff]  ;;  %v6192_v19 = vld [vmem:[%s9864_s25 + $0x20] sm:$0xff] }
  0xc5   :  { %1496 = vmatpush.msrb.mxu2 %v825_v61  ;;  %1519 = vmatpush.msrb.mxu3 %v937_v62  ;;  %v511_v60 = vld [vmem:[%s9863_s29 + $0xda8] sm:$0xff]  ;;  %v6201_v61 = vld [vmem:[%s9864_s25 + $0x38] sm:$0xff]  ;;  %v168_v62 = vld [vmem:[%s9863_s29 + $0x2f0] sm:$0xff] }
  0xc6   :  { %1451 = vmatpush.msrb.mxu0 %v594_v0  ;;  %1474 = vmatpush.msrb.mxu1 %v706_v1  ;;  %v280_v0 = vld [vmem:[%s9863_s29 + $0x670] sm:$0xff] }
  0xc7   :  { %1497 = vmatpush.msrb.mxu2 %v818_v2  ;;  %1520 = vmatpush.msrb.mxu3 %v930_v28  ;;  %v392_v1 = vld [vmem:[%s9863_s29 + $0x9f0] sm:$0xff]  ;;  %v6219_v28 = vld [vmem:[%s9864_s25 + $0x28] sm:$0xff] }
  0xc8   :  { %1452 = vmatpush.msrb.mxu0 %v587_v3  ;;  %1475 = vmatpush.msrb.mxu1 %v699_v4  ;;  %v504_v2 = vld [vmem:[%s9863_s29 + $0xd70] sm:$0xff]  ;;  %v161_v3 = vld [vmem:[%s9863_s29 + $0x2b8] sm:$0xff] }
  0xc9   :  { %1498 = vmatpush.msrb.mxu2 %v811_v34  ;;  %1521 = vmatpush.msrb.mxu3 %v923_v5  ;;  %v273_v4 = vld [vmem:[%s9863_s29 + $0x638] sm:$0xff] }
  0xca   :  { %1453 = vmatpush.msrb.mxu0 %v580_v35  ;;  %1476 = vmatpush.msrb.mxu1 %v692_v6  ;;  %v385_v34 = vld [vmem:[%s9863_s29 + $0x9b8] sm:$0xff]  ;;  %v154_v35 = vld [vmem:[%s9863_s29 + $0x280] sm:$0xff] }
  0xcb   :  { %1499 = vmatpush.msrb.mxu2 %v804_v7  ;;  %1522 = vmatpush.msrb.mxu3 %v916_v9  ;;  %v497_v5 = vld [vmem:[%s9863_s29 + $0xd38] sm:$0xff]  ;;  %v266_v6 = vld [vmem:[%s9863_s29 + $0x600] sm:$0xff] }
  0xcc   :  { %1416 = vmatmul.f32.vlgmr.msra.gmra.mxu2 %v6033_v15  ;;  %1454 = vmatpush.msrb.mxu0 %v573_v42  ;;  %v378_v7 = vld [vmem:[%s9863_s29 + $0x980] sm:$0xff]  ;;  %v6249_v42 = vld [vmem:[%s9864_s25 + $0x70] sm:$0xff] }
  0xcd   :  { %1477 = vmatpush.msrb.mxu1 %v685_v10  ;;  %1500 = vmatpush.msrb.mxu2 %v797_v11  ;;  %v490_v9 = vld [vmem:[%s9863_s29 + $0xd00] sm:$0xff]  ;;  %v147_v10 = vld [vmem:[%s9863_s29 + $0x248] sm:$0xff] }
  0xce   :  { %1523 = vmatpush.msrb.mxu3 %v909_v12  ;;  %1370 = vmatmul.f32.vlgmr.msra.gmra.mxu0 %v6048_v18  ;;  %v259_v11 = vld [vmem:[%s9863_s29 + $0x5c8] sm:$0xff] }
  0xcf   :  { %1439 = vmatmul.f32.vlgmr.msra.gmra.mxu3 %v6057_v37  ;;  %1455 = vmatpush.msrb.mxu0 %v566_v16  ;;  %v371_v12 = vld [vmem:[%s9863_s29 + $0x948] sm:$0xff]  ;;  %v6264_v16 = vld [vmem:[%s9864_s25 + $0x60] sm:$0xff] }
  0xd0   :  { %1478 = vmatpush.msrb.mxu1 %v678_v17  ;;  %1501 = vmatpush.msrb.mxu2 %v790_v32  ;;  %v483_v17 = vld [vmem:[%s9863_s29 + $0xcc8] sm:$0xff]  ;;  %v6273_v32 = vld [vmem:[%s9864_s25 + $0x78] sm:$0xff] }
  0xd1   :  { %1524 = vmatpush.msrb.mxu3 %v902_v20  ;;  %1393 = vmatmul.f32.vlgmr.msra.gmra.mxu1 %v6075_v24  ;;  %v140_v20 = vld [vmem:[%s9863_s29 + $0x210] sm:$0xff] }
  0xd2   :  { %1456 = vmatpush.msrb.mxu0 %v559_v21  ;;  %1479 = vmatpush.msrb.mxu1 %v671_v38  ;;  %v252_v21 = vld [vmem:[%s9863_s29 + $0x590] sm:$0xff] }
  0xd3   :  { %1502 = vmatpush.msrb.mxu2 %v783_v22  ;;  %1525 = vmatpush.msrb.mxu3 %v895_v23  ;;  %v364_v38 = vld [vmem:[%s9863_s29 + $0x910] sm:$0xff]  ;;  %v6291_v23 = vld [vmem:[%s9864_s25 + $0x68] sm:$0xff] }
  0xd4   :  { %1457 = vmatpush.msrb.mxu0 %v552_v43  ;;  %1480 = vmatpush.msrb.mxu1 %v664_v25  ;;  %v476_v22 = vld [vmem:[%s9863_s29 + $0xc90] sm:$0xff]  ;;  %v133_v43 = vld [vmem:[%s9863_s29 + $0x1d8] sm:$0xff] }
  0xd5   :  { %1503 = vmatpush.msrb.mxu2 %v776_v26  ;;  %1526 = vmatpush.msrb.mxu3 %v888_v27  ;;  %v245_v25 = vld [vmem:[%s9863_s29 + $0x558] sm:$0xff] }
  0xd6   :  { %1419 = vmatmul.f32.gmra.mxu2 %v6105_v33  ;;  %1458 = vmatpush.msrb.mxu0 %v545_v29  ;;  %v357_v26 = vld [vmem:[%s9863_s29 + $0x8d8] sm:$0xff]  ;;  %v126_v29 = vld [vmem:[%s9863_s29 + $0x1a0] sm:$0xff] }
  0xd7   :  { %1481 = vmatpush.msrb.mxu1 %v657_v30  ;;  %1504 = vmatpush.msrb.mxu2 %v769_v31  ;;  %v469_v27 = vld [vmem:[%s9863_s29 + $0xc58] sm:$0xff]  ;;  %v238_v30 = vld [vmem:[%s9863_s29 + $0x520] sm:$0xff] }
  0xd8   :  { %1527 = vmatpush.msrb.mxu3 %v881_v52  ;;  %1373 = vmatmul.f32.gmra.mxu0 %v6120_v58  ;;  %v350_v31 = vld [vmem:[%s9863_s29 + $0x8a0] sm:$0xff] }
  0xd9   :  { %1442 = vmatmul.f32.gmra.mxu3 %v6129_v41  ;;  %1459 = vmatpush.msrb.mxu0 %v538_v36  ;;  %v462_v52 = vld [vmem:[%s9863_s29 + $0xc20] sm:$0xff]  ;;  %v119_v36 = vld [vmem:[%s9863_s29 + $0x168] sm:$0xff] }
  0xda   :  { %1482 = vmatpush.msrb.mxu1 %v650_v57  ;;  %1505 = vmatpush.msrb.mxu2 %v762_v39  ;;  %v231_v57 = vld [vmem:[%s9863_s29 + $0x4e8] sm:$0xff] }
  0xdb   :  { %1528 = vmatpush.msrb.mxu3 %v874_v40  ;;  %1396 = vmatmul.f32.gmra.mxu1 %v6147_v47  ;;  %v343_v39 = vld [vmem:[%s9863_s29 + $0x868] sm:$0xff] }
  0xdc   :  { %1460 = vmatpush.msrb.mxu0 %v531_v44  ;;  %1483 = vmatpush.msrb.mxu1 %v643_v63  ;;  %v455_v40 = vld [vmem:[%s9863_s29 + $0xbe8] sm:$0xff]  ;;  %v112_v44 = vld [vmem:[%s9863_s29 + $0x130] sm:$0xff] }
  0xdd   :  { %1506 = vmatpush.msrb.mxu2 %v755_v45  ;;  %1529 = vmatpush.msrb.mxu3 %v867_v46  ;;  %v224_v63 = vld [vmem:[%s9863_s29 + $0x4b0] sm:$0xff] }
  0xde   :  { %1461 = vmatpush.msrb.mxu0 %v524_v48  ;;  %1484 = vmatpush.msrb.mxu1 %v636_v49  ;;  %v336_v45 = vld [vmem:[%s9863_s29 + $0x830] sm:$0xff]  ;;  %v105_v48 = vld [vmem:[%s9863_s29 + $0xf8] sm:$0xff] }
  0xdf   :  { %1507 = vmatpush.msrb.mxu2 %v748_v50  ;;  %1530 = vmatpush.msrb.mxu3 %v860_v8  ;;  %v448_v46 = vld [vmem:[%s9863_s29 + $0xbb0] sm:$0xff]  ;;  %v217_v49 = vld [vmem:[%s9863_s29 + $0x478] sm:$0xff] }
  0xe0   :  { %1508 = vmatmul.f32.vlgmr.msrb.gmra.mxu2 %v6177_v14  ;;  %1538 = vmatpush.msra.mxu0 %v182_v51  ;;  %v329_v50 = vld [vmem:[%s9863_s29 + $0x7f8] sm:$0xff]  ;;  %v98_v51 = vld [vmem:[%s9863_s29 + $0xc0] sm:$0xff] }
  0xe1   :  { %1561 = vmatpush.msra.mxu1 %v294_v53  ;;  %1584 = vmatpush.msra.mxu2 %v406_v13  ;;  %v441_v8 = vld [vmem:[%s9863_s29 + $0xb78] sm:$0xff]  ;;  %v210_v53 = vld [vmem:[%s9863_s29 + $0x440] sm:$0xff] }
  0xe2   :  { %1607 = vmatpush.msra.mxu3 %v518_v54  ;;  %1462 = vmatmul.f32.vlgmr.msrb.gmra.mxu0 %v6192_v19  ;;  %v322_v13 = vld [vmem:[%s9863_s29 + $0x7c0] sm:$0xff] }
  0xe3   :  { %1531 = vmatmul.f32.vlgmr.msrb.gmra.mxu3 %v6201_v61  ;;  %1539 = vmatpush.msra.mxu0 %v175_v55  ;;  %v434_v54 = vld [vmem:[%s9863_s29 + $0xb40] sm:$0xff]  ;;  %v91_v55 = vld [vmem:[%s9863_s29 + $0x88] sm:$0xff] }
  0xe4   :  { %1562 = vmatpush.msra.mxu1 %v287_v56  ;;  %1585 = vmatpush.msra.mxu2 %v399_v59  ;;  %v203_v56 = vld [vmem:[%s9863_s29 + $0x408] sm:$0xff] }
  0xe5   :  { %1608 = vmatpush.msra.mxu3 %v511_v60  ;;  %1485 = vmatmul.f32.vlgmr.msrb.gmra.mxu1 %v6219_v28  ;;  %v315_v59 = vld [vmem:[%s9863_s29 + $0x788] sm:$0xff] }
  0xe6   :  { %1540 = vmatpush.msra.mxu0 %v168_v62  ;;  %1563 = vmatpush.msra.mxu1 %v280_v0  ;;  %v427_v60 = vld [vmem:[%s9863_s29 + $0xb08] sm:$0xff]  ;;  %v84_v62 = vld [vmem:[%s9863_s29 + $0x50] sm:$0xff] }
  0xe7   :  { %1586 = vmatpush.msra.mxu2 %v392_v1  ;;  %1609 = vmatpush.msra.mxu3 %v504_v2  ;;  %v196_v0 = vld [vmem:[%s9863_s29 + $0x3d0] sm:$0xff] }
  0xe8   :  { %1541 = vmatpush.msra.mxu0 %v161_v3  ;;  %1564 = vmatpush.msra.mxu1 %v273_v4  ;;  %v308_v1 = vld [vmem:[%s9863_s29 + $0x750] sm:$0xff]  ;;  %v77_v3 = vld [vmem:[%s9863_s29 + $0x18] sm:$0xff] }
  0xe9   :  { %1587 = vmatpush.msra.mxu2 %v385_v34  ;;  %1610 = vmatpush.msra.mxu3 %v497_v5  ;;  %v420_v2 = vld [vmem:[%s9863_s29 + $0xad0] sm:$0xff]  ;;  %v189_v4 = vld [vmem:[%s9863_s29 + $0x398] sm:$0xff] }
  0xea   :  { %1511 = vmatmul.f32.gmra.mxu2 %v6249_v42  ;;  %1542 = vmatpush.msra.mxu0 %v154_v35  ;;  %v301_v34 = vld [vmem:[%s9863_s29 + $0x718] sm:$0xff]  ;;  %v630_v35 = vld [vmem:[%s9863_s29 + $0x1160] sm:$0xff] }
  0xeb   :  { %1565 = vmatpush.msra.mxu1 %v266_v6  ;;  %1588 = vmatpush.msra.mxu2 %v378_v7  ;;  %v413_v5 = vld [vmem:[%s9863_s29 + $0xa98] sm:$0xff]  ;;  %v742_v6 = vld [vmem:[%s9863_s29 + $0x14e0] sm:$0xff] }
  0xec   :  { %1611 = vmatpush.msra.mxu3 %v490_v9  ;;  %1465 = vmatmul.f32.gmra.mxu0 %v6264_v16  ;;  %v854_v7 = vld [vmem:[%s9863_s29 + $0x1860] sm:$0xff] }
  0xed   :  { %1534 = vmatmul.f32.gmra.mxu3 %v6273_v32  ;;  %1543 = vmatpush.msra.mxu0 %v147_v10  ;;  %v966_v9 = vld [vmem:[%s9863_s29 + $0x1be0] sm:$0xff]  ;;  %v623_v10 = vld [vmem:[%s9863_s29 + $0x1128] sm:$0xff] }
  0xee   :  { %1566 = vmatpush.msra.mxu1 %v259_v11  ;;  %1589 = vmatpush.msra.mxu2 %v371_v12  ;;  %v735_v11 = vld [vmem:[%s9863_s29 + $0x14a8] sm:$0xff] }
  0xef   :  { %1612 = vmatpush.msra.mxu3 %v483_v17  ;;  %1488 = vmatmul.f32.gmra.mxu1 %v6291_v23  ;;  %v847_v12 = vld [vmem:[%s9863_s29 + $0x1828] sm:$0xff] }
  0xf0   :  { %1544 = vmatpush.msra.mxu0 %v140_v20  ;;  %1567 = vmatpush.msra.mxu1 %v252_v21  ;;  %v959_v17 = vld [vmem:[%s9863_s29 + $0x1ba8] sm:$0xff]  ;;  %v616_v20 = vld [vmem:[%s9863_s29 + $0x10f0] sm:$0xff] }
  0xf1   :  { %1590 = vmatpush.msra.mxu2 %v364_v38  ;;  %1613 = vmatpush.msra.mxu3 %v476_v22  ;;  %v728_v21 = vld [vmem:[%s9863_s29 + $0x1470] sm:$0xff] }
  0xf2   :  { %1545 = vmatpush.msra.mxu0 %v133_v43  ;;  %1568 = vmatpush.msra.mxu1 %v245_v25  ;;  %v840_v38 = vld [vmem:[%s9863_s29 + $0x17f0] sm:$0xff]  ;;  %v609_v43 = vld [vmem:[%s9863_s29 + $0x10b8] sm:$0xff] }
  0xf3   :  { %1591 = vmatpush.msra.mxu2 %v357_v26  ;;  %1614 = vmatpush.msra.mxu3 %v469_v27  ;;  %v952_v22 = vld [vmem:[%s9863_s29 + $0x1b70] sm:$0xff]  ;;  %v721_v25 = vld [vmem:[%s9863_s29 + $0x1438] sm:$0xff] }
  0xf4   :  { %1546 = vmatpush.msra.mxu0 %v126_v29  ;;  %1569 = vmatpush.msra.mxu1 %v238_v30  ;;  %v833_v26 = vld [vmem:[%s9863_s29 + $0x17b8] sm:$0xff]  ;;  %v602_v29 = vld [vmem:[%s9863_s29 + $0x1080] sm:$0xff] }
  0xf5   :  { %1592 = vmatpush.msra.mxu2 %v350_v31  ;;  %1615 = vmatpush.msra.mxu3 %v462_v52  ;;  %v945_v27 = vld [vmem:[%s9863_s29 + $0x1b38] sm:$0xff]  ;;  %v714_v30 = vld [vmem:[%s9863_s29 + $0x1400] sm:$0xff] }
  0xf6   :  { %1547 = vmatpush.msra.mxu0 %v119_v36  ;;  %1570 = vmatpush.msra.mxu1 %v231_v57  ;;  %v826_v31 = vld [vmem:[%s9863_s29 + $0x1780] sm:$0xff]  ;;  %v595_v36 = vld [vmem:[%s9863_s29 + $0x1048] sm:$0xff] }
  0xf7   :  { %1593 = vmatpush.msra.mxu2 %v343_v39  ;;  %1616 = vmatpush.msra.mxu3 %v455_v40  ;;  %v938_v52 = vld [vmem:[%s9863_s29 + $0x1b00] sm:$0xff]  ;;  %v707_v57 = vld [vmem:[%s9863_s29 + $0x13c8] sm:$0xff] }
  0xf8   :  { %1548 = vmatpush.msra.mxu0 %v112_v44  ;;  %1571 = vmatpush.msra.mxu1 %v224_v63  ;;  %v819_v39 = vld [vmem:[%s9863_s29 + $0x1748] sm:$0xff]  ;;  %v588_v44 = vld [vmem:[%s9863_s29 + $0x1010] sm:$0xff] }
  0xf9   :  { %1594 = vmatpush.msra.mxu2 %v336_v45  ;;  %1617 = vmatpush.msra.mxu3 %v448_v46  ;;  %v931_v40 = vld [vmem:[%s9863_s29 + $0x1ac8] sm:$0xff]  ;;  %v700_v63 = vld [vmem:[%s9863_s29 + $0x1390] sm:$0xff] }
  0xfa   :  { %1549 = vmatpush.msra.mxu0 %v105_v48  ;;  %1572 = vmatpush.msra.mxu1 %v217_v49  ;;  %v812_v45 = vld [vmem:[%s9863_s29 + $0x1710] sm:$0xff]  ;;  %v581_v48 = vld [vmem:[%s9863_s29 + $0xfd8] sm:$0xff] }
  0xfb   :  { %1595 = vmatpush.msra.mxu2 %v329_v50  ;;  %1618 = vmatpush.msra.mxu3 %v441_v8  ;;  %v924_v46 = vld [vmem:[%s9863_s29 + $0x1a90] sm:$0xff]  ;;  %v693_v49 = vld [vmem:[%s9863_s29 + $0x1358] sm:$0xff] }
  0xfc   :  { %1550 = vmatpush.msra.mxu0 %v98_v51  ;;  %1573 = vmatpush.msra.mxu1 %v210_v53  ;;  %v805_v50 = vld [vmem:[%s9863_s29 + $0x16d8] sm:$0xff]  ;;  %v574_v51 = vld [vmem:[%s9863_s29 + $0xfa0] sm:$0xff] }
  0xfd   :  { %1596 = vmatpush.msra.mxu2 %v322_v13  ;;  %1619 = vmatpush.msra.mxu3 %v434_v54  ;;  %v917_v8 = vld [vmem:[%s9863_s29 + $0x1a58] sm:$0xff]  ;;  %v686_v53 = vld [vmem:[%s9863_s29 + $0x1320] sm:$0xff] }
  0xfe   :  { %1551 = vmatpush.msra.mxu0 %v91_v55  ;;  %1574 = vmatpush.msra.mxu1 %v203_v56  ;;  %v798_v13 = vld [vmem:[%s9863_s29 + $0x16a0] sm:$0xff]  ;;  %v567_v55 = vld [vmem:[%s9863_s29 + $0xf68] sm:$0xff] }
  0xff   :  { %1597 = vmatpush.msra.mxu2 %v315_v59  ;;  %1620 = vmatpush.msra.mxu3 %v427_v60  ;;  %v910_v54 = vld [vmem:[%s9863_s29 + $0x1a20] sm:$0xff]  ;;  %v679_v56 = vld [vmem:[%s9863_s29 + $0x12e8] sm:$0xff]  ;;  %v560_v60 = vld [vmem:[%s9863_s29 + $0xf30] sm:$0xff] }
 0x100   :  { %1552 = vmatpush.msra.mxu0 %v84_v62  ;;  %1575 = vmatpush.msra.mxu1 %v196_v0  ;;  %v791_v59 = vld [vmem:[%s9863_s29 + $0x1668] sm:$0xff]  ;;  %v672_v62 = vld [vmem:[%s9863_s29 + $0x12b0] sm:$0xff] }
 0x101   :  { %1598 = vmatpush.msra.mxu2 %v308_v1  ;;  %1621 = vmatpush.msra.mxu3 %v420_v2  ;;  %v896_v0 = vld [vmem:[%s9863_s29 + $0x19b0] sm:$0xff]  ;;  %v665_v1 = vld [vmem:[%s9863_s29 + $0x1278] sm:$0xff] }
 0x102   :  { %1553 = vmatpush.msra.mxu0 %v77_v3  ;;  %1576 = vmatpush.msra.mxu1 %v189_v4  ;;  %v777_v2 = vld [vmem:[%s9863_s29 + $0x15f8] sm:$0xff]  ;;  %v658_v4 = vld [vmem:[%s9863_s29 + $0x1240] sm:$0xff] }
 0x103   :  { %1599 = vmatpush.msra.mxu2 %v301_v34  ;;  %1622 = vmatpush.msra.mxu3 %v413_v5  ;;  %v889_v3 = vld [vmem:[%s9863_s29 + $0x1978] sm:$0xff]  ;;  %v770_v34 = vld [vmem:[%s9863_s29 + $0x15c0] sm:$0xff] }
 0x104   :  { %1630 = vmatpush.msrb.mxu0 %v630_v35  ;;  %1653 = vmatpush.msrb.mxu1 %v742_v6  ;;  %v882_v5 = vld [vmem:[%s9863_s29 + $0x1940] sm:$0xff]  ;;  %v539_v35 = vld [vmem:[%s9863_s29 + $0xe88] sm:$0xff] }
 0x105   :  { %1676 = vmatpush.msrb.mxu2 %v854_v7  ;;  %1699 = vmatpush.msrb.mxu3 %v966_v9  ;;  %v651_v6 = vld [vmem:[%s9863_s29 + $0x1208] sm:$0xff]  ;;  %v532_v9 = vld [vmem:[%s9863_s29 + $0xe50] sm:$0xff] }
 0x106   :  { %1631 = vmatpush.msrb.mxu0 %v623_v10  ;;  %1654 = vmatpush.msrb.mxu1 %v735_v11  ;;  %v763_v7 = vld [vmem:[%s9863_s29 + $0x1588] sm:$0xff]  ;;  %v644_v10 = vld [vmem:[%s9863_s29 + $0x11d0] sm:$0xff] }
 0x107   :  { %1677 = vmatpush.msrb.mxu2 %v847_v12  ;;  %1700 = vmatpush.msrb.mxu3 %v959_v17  ;;  %v868_v11 = vld [vmem:[%s9863_s29 + $0x18d0] sm:$0xff]  ;;  %v637_v12 = vld [vmem:[%s9863_s29 + $0x1198] sm:$0xff] }
 0x108   :  { %1632 = vmatpush.msrb.mxu0 %v616_v20  ;;  %1655 = vmatpush.msrb.mxu1 %v728_v21  ;;  %v749_v17 = vld [vmem:[%s9863_s29 + $0x1518] sm:$0xff]  ;;  %v295_v21 = vld [vmem:[%s9863_s29 + $0x6e8] sm:$0xff] }
 0x109   :  { %1678 = vmatpush.msrb.mxu2 %v840_v38  ;;  %1701 = vmatpush.msrb.mxu3 %v952_v22  ;;  %v861_v20 = vld [vmem:[%s9863_s29 + $0x1898] sm:$0xff]  ;;  %v407_v38 = vld [vmem:[%s9863_s29 + $0xa68] sm:$0xff] }
 0x10a   :  { %1633 = vmatpush.msrb.mxu0 %v609_v43  ;;  %1656 = vmatpush.msrb.mxu1 %v721_v25  ;;  %v519_v22 = vld [vmem:[%s9863_s29 + $0xde8] sm:$0xff]  ;;  %v176_v43 = vld [vmem:[%s9863_s29 + $0x330] sm:$0xff] }
 0x10b   :  { %1679 = vmatpush.msrb.mxu2 %v833_v26  ;;  %1702 = vmatpush.msrb.mxu3 %v945_v27  ;;  %v288_v25 = vld [vmem:[%s9863_s29 + $0x6b0] sm:$0xff]  ;;  %v169_v27 = vld [vmem:[%s9863_s29 + $0x2f8] sm:$0xff] }
 0x10c   :  { %1634 = vmatpush.msrb.mxu0 %v602_v29  ;;  %1657 = vmatpush.msrb.mxu1 %v714_v30  ;;  %v400_v26 = vld [vmem:[%s9863_s29 + $0xa30] sm:$0xff]  ;;  %v281_v29 = vld [vmem:[%s9863_s29 + $0x678] sm:$0xff] }
 0x10d   :  { %1680 = vmatpush.msrb.mxu2 %v826_v31  ;;  %1703 = vmatpush.msrb.mxu3 %v938_v52  ;;  %v505_v30 = vld [vmem:[%s9863_s29 + $0xd78] sm:$0xff]  ;;  %v274_v31 = vld [vmem:[%s9863_s29 + $0x640] sm:$0xff] }
 0x10e   :  { %1635 = vmatpush.msrb.mxu0 %v595_v36  ;;  %1658 = vmatpush.msrb.mxu1 %v707_v57  ;;  %v386_v52 = vld [vmem:[%s9863_s29 + $0x9c0] sm:$0xff]  ;;  %v267_v57 = vld [vmem:[%s9863_s29 + $0x608] sm:$0xff] }
 0x10f   :  { %1681 = vmatpush.msrb.mxu2 %v819_v39  ;;  %1704 = vmatpush.msrb.mxu3 %v931_v40  ;;  %v498_v36 = vld [vmem:[%s9863_s29 + $0xd40] sm:$0xff]  ;;  %v379_v39 = vld [vmem:[%s9863_s29 + $0x988] sm:$0xff] }
 0x110   :  { %1636 = vmatpush.msrb.mxu0 %v588_v44  ;;  %1659 = vmatpush.msrb.mxu1 %v700_v63  ;;  %v491_v40 = vld [vmem:[%s9863_s29 + $0xd08] sm:$0xff]  ;;  %v148_v44 = vld [vmem:[%s9863_s29 + $0x250] sm:$0xff] }
 0x111   :  { %1682 = vmatpush.msrb.mxu2 %v812_v45  ;;  %1705 = vmatpush.msrb.mxu3 %v924_v46  ;;  %v260_v63 = vld [vmem:[%s9863_s29 + $0x5d0] sm:$0xff]  ;;  %v141_v46 = vld [vmem:[%s9863_s29 + $0x218] sm:$0xff] }
 0x112   :  { %1637 = vmatpush.msrb.mxu0 %v581_v48  ;;  %1660 = vmatpush.msrb.mxu1 %v693_v49  ;;  %v372_v45 = vld [vmem:[%s9863_s29 + $0x950] sm:$0xff]  ;;  %v253_v48 = vld [vmem:[%s9863_s29 + $0x598] sm:$0xff] }
 0x113   :  { %1683 = vmatpush.msrb.mxu2 %v805_v50  ;;  %1706 = vmatpush.msrb.mxu3 %v917_v8  ;;  %v477_v49 = vld [vmem:[%s9863_s29 + $0xc98] sm:$0xff]  ;;  %v246_v50 = vld [vmem:[%s9863_s29 + $0x560] sm:$0xff] }
 0x114   :  { %1600 = vmatmul.f32.vlgmr.msra.gmra.mxu2 %v6033_v15  ;;  %1638 = vmatpush.msrb.mxu0 %v574_v51  ;;  %v903_v15 = vld [vmem:[%s9863_s29 + $0x19e8] sm:$0xff]  ;;  %v358_v8 = vld [vmem:[%s9863_s29 + $0x8e0] sm:$0xff] }
 0x115   :  { %1661 = vmatpush.msrb.mxu1 %v686_v53  ;;  %1684 = vmatpush.msrb.mxu2 %v798_v13  ;;  %v470_v51 = vld [vmem:[%s9863_s29 + $0xc60] sm:$0xff]  ;;  %v239_v53 = vld [vmem:[%s9863_s29 + $0x528] sm:$0xff] }
 0x116   :  { %1707 = vmatpush.msrb.mxu3 %v910_v54  ;;  %1554 = vmatmul.f32.vlgmr.msra.gmra.mxu0 %v6048_v18  ;;  %v784_v18 = vld [vmem:[%s9863_s29 + $0x1630] sm:$0xff]  ;;  %v351_v13 = vld [vmem:[%s9863_s29 + $0x8a8] sm:$0xff] }
 0x117   :  { %1623 = vmatmul.f32.vlgmr.msra.gmra.mxu3 %v6057_v37  ;;  %1639 = vmatpush.msrb.mxu0 %v567_v55  ;;  %v553_v37 = vld [vmem:[%s9863_s29 + $0xef8] sm:$0xff]  ;;  %v463_v54 = vld [vmem:[%s9863_s29 + $0xc28] sm:$0xff]  ;;  %v120_v55 = vld [vmem:[%s9863_s29 + $0x170] sm:$0xff] }
 0x118   :  { %1662 = vmatpush.msrb.mxu1 %v679_v56  ;;  %1685 = vmatpush.msrb.mxu2 %v791_v59  ;;  %v232_v56 = vld [vmem:[%s9863_s29 + $0x4f0] sm:$0xff] }
 0x119   :  { %1708 = vmatpush.msrb.mxu3 %v903_v15  ;;  %1577 = vmatmul.f32.vlgmr.msra.gmra.mxu1 %v6075_v24  ;;  %v546_v24 = vld [vmem:[%s9863_s29 + $0xec0] sm:$0xff]  ;;  %v344_v59 = vld [vmem:[%s9863_s29 + $0x870] sm:$0xff] }
 0x11a   :  { %1640 = vmatpush.msrb.mxu0 %v560_v60  ;;  %1663 = vmatpush.msrb.mxu1 %v672_v62  ;;  %v456_v15 = vld [vmem:[%s9863_s29 + $0xbf0] sm:$0xff]  ;;  %v113_v60 = vld [vmem:[%s9863_s29 + $0x138] sm:$0xff] }
 0x11b   :  { %1686 = vmatpush.msrb.mxu2 %v784_v18  ;;  %1709 = vmatpush.msrb.mxu3 %v896_v0  ;;  %v225_v62 = vld [vmem:[%s9863_s29 + $0x4b8] sm:$0xff] }
 0x11c   :  { %1641 = vmatpush.msrb.mxu0 %v553_v37  ;;  %1664 = vmatpush.msrb.mxu1 %v665_v1  ;;  %v337_v18 = vld [vmem:[%s9863_s29 + $0x838] sm:$0xff]  ;;  %v106_v37 = vld [vmem:[%s9863_s29 + $0x100] sm:$0xff] }
 0x11d   :  { %1687 = vmatpush.msrb.mxu2 %v777_v2  ;;  %1710 = vmatpush.msrb.mxu3 %v889_v3  ;;  %v449_v0 = vld [vmem:[%s9863_s29 + $0xbb8] sm:$0xff]  ;;  %v218_v1 = vld [vmem:[%s9863_s29 + $0x480] sm:$0xff] }
 0x11e   :  { %1603 = vmatmul.f32.gmra.mxu2 %v6105_v33  ;;  %1642 = vmatpush.msrb.mxu0 %v546_v24  ;;  %v875_v33 = vld [vmem:[%s9863_s29 + $0x1908] sm:$0xff]  ;;  %v330_v2 = vld [vmem:[%s9863_s29 + $0x800] sm:$0xff] }
 0x11f   :  { %1665 = vmatpush.msrb.mxu1 %v658_v4  ;;  %1688 = vmatpush.msrb.mxu2 %v770_v34  ;;  %v442_v3 = vld [vmem:[%s9863_s29 + $0xb80] sm:$0xff]  ;;  %v99_v24 = vld [vmem:[%s9863_s29 + $0xc8] sm:$0xff] }
 0x120   :  { %1711 = vmatpush.msrb.mxu3 %v882_v5  ;;  %1557 = vmatmul.f32.gmra.mxu0 %v6120_v58  ;;  %v756_v58 = vld [vmem:[%s9863_s29 + $0x1550] sm:$0xff]  ;;  %v211_v4 = vld [vmem:[%s9863_s29 + $0x448] sm:$0xff] }
 0x121   :  { %1626 = vmatmul.f32.gmra.mxu3 %v6129_v41  ;;  %1643 = vmatpush.msrb.mxu0 %v539_v35  ;;  %v525_v41 = vld [vmem:[%s9863_s29 + $0xe18] sm:$0xff]  ;;  %v323_v34 = vld [vmem:[%s9863_s29 + $0x7c8] sm:$0xff]  ;;  %v92_v35 = vld [vmem:[%s9863_s29 + $0x90] sm:$0xff] }
 0x122   :  { %1666 = vmatpush.msrb.mxu1 %v651_v6  ;;  %1689 = vmatpush.msrb.mxu2 %v763_v7  ;;  %v435_v5 = vld [vmem:[%s9863_s29 + $0xb48] sm:$0xff]  ;;  %v204_v6 = vld [vmem:[%s9863_s29 + $0x410] sm:$0xff] }
 0x123   :  { %1712 = vmatpush.msrb.mxu3 %v875_v33  ;;  %1580 = vmatmul.f32.gmra.mxu1 %v6147_v47  ;;  %v183_v47 = vld [vmem:[%s9863_s29 + $0x368] sm:$0xff]  ;;  %v316_v7 = vld [vmem:[%s9863_s29 + $0x790] sm:$0xff] }
 0x124   :  { %1644 = vmatpush.msrb.mxu0 %v532_v9  ;;  %1667 = vmatpush.msrb.mxu1 %v644_v10  ;;  %v428_v33 = vld [vmem:[%s9863_s29 + $0xb10] sm:$0xff]  ;;  %v85_v9 = vld [vmem:[%s9863_s29 + $0x58] sm:$0xff] }
 0x125   :  { %1690 = vmatpush.msrb.mxu2 %v756_v58  ;;  %1713 = vmatpush.msrb.mxu3 %v868_v11  ;;  %v197_v10 = vld [vmem:[%s9863_s29 + $0x3d8] sm:$0xff] }
 0x126   :  { %1645 = vmatpush.msrb.mxu0 %v525_v41  ;;  %1668 = vmatpush.msrb.mxu1 %v637_v12  ;;  %v309_v58 = vld [vmem:[%s9863_s29 + $0x758] sm:$0xff]  ;;  %v78_v41 = vld [vmem:[%s9863_s29 + $0x20] sm:$0xff] }
 0x127   :  { %1691 = vmatpush.msrb.mxu2 %v749_v17  ;;  %1714 = vmatpush.msrb.mxu3 %v861_v20  ;;  %v421_v11 = vld [vmem:[%s9863_s29 + $0xad8] sm:$0xff]  ;;  %v190_v12 = vld [vmem:[%s9863_s29 + $0x3a0] sm:$0xff] }
 0x128   :  { %1692 = vmatmul.f32.vlgmr.msrb.gmra.mxu2 %v6177_v14  ;;  %1722 = vmatpush.msra.mxu0 %v183_v47  ;;  %v512_v14 = vld [vmem:[%s9863_s29 + $0xdb0] sm:$0xff]  ;;  %v302_v17 = vld [vmem:[%s9863_s29 + $0x720] sm:$0xff]  ;;  %v631_v47 = vld [vmem:[%s9863_s29 + $0x1168] sm:$0xff] }
 0x129   :  { %1745 = vmatpush.msra.mxu1 %v295_v21  ;;  %1768 = vmatpush.msra.mxu2 %v407_v38  ;;  %v414_v20 = vld [vmem:[%s9863_s29 + $0xaa0] sm:$0xff]  ;;  %v743_v21 = vld [vmem:[%s9863_s29 + $0x14e8] sm:$0xff] }
 0x12a   :  { %1791 = vmatpush.msra.mxu3 %v519_v22  ;;  %1646 = vmatmul.f32.vlgmr.msrb.gmra.mxu0 %v6192_v19  ;;  %v393_v19 = vld [vmem:[%s9863_s29 + $0x9f8] sm:$0xff]  ;;  %v855_v38 = vld [vmem:[%s9863_s29 + $0x1868] sm:$0xff] }
 0x12b   :  { %1715 = vmatmul.f32.vlgmr.msrb.gmra.mxu3 %v6201_v61  ;;  %1723 = vmatpush.msra.mxu0 %v176_v43  ;;  %v162_v61 = vld [vmem:[%s9863_s29 + $0x2c0] sm:$0xff]  ;;  %v967_v22 = vld [vmem:[%s9863_s29 + $0x1be8] sm:$0xff]  ;;  %v624_v43 = vld [vmem:[%s9863_s29 + $0x1130] sm:$0xff] }
 0x12c   :  { %1746 = vmatpush.msra.mxu1 %v288_v25  ;;  %1769 = vmatpush.msra.mxu2 %v400_v26  ;;  %v736_v25 = vld [vmem:[%s9863_s29 + $0x14b0] sm:$0xff] }
 0x12d   :  { %1792 = vmatpush.msra.mxu3 %v512_v14  ;;  %1669 = vmatmul.f32.vlgmr.msrb.gmra.mxu1 %v6219_v28  ;;  %v155_v28 = vld [vmem:[%s9863_s29 + $0x288] sm:$0xff]  ;;  %v848_v26 = vld [vmem:[%s9863_s29 + $0x1830] sm:$0xff] }
 0x12e   :  { %1724 = vmatpush.msra.mxu0 %v169_v27  ;;  %1747 = vmatpush.msra.mxu1 %v281_v29  ;;  %v960_v14 = vld [vmem:[%s9863_s29 + $0x1bb0] sm:$0xff]  ;;  %v617_v27 = vld [vmem:[%s9863_s29 + $0x10f8] sm:$0xff] }
 0x12f   :  { %1770 = vmatpush.msra.mxu2 %v393_v19  ;;  %1793 = vmatpush.msra.mxu3 %v505_v30  ;;  %v729_v29 = vld [vmem:[%s9863_s29 + $0x1478] sm:$0xff] }
 0x130   :  { %1725 = vmatpush.msra.mxu0 %v162_v61  ;;  %1748 = vmatpush.msra.mxu1 %v274_v31  ;;  %v841_v19 = vld [vmem:[%s9863_s29 + $0x17f8] sm:$0xff]  ;;  %v610_v61 = vld [vmem:[%s9863_s29 + $0x10c0] sm:$0xff] }
 0x131   :  { %1771 = vmatpush.msra.mxu2 %v386_v52  ;;  %1794 = vmatpush.msra.mxu3 %v498_v36  ;;  %v953_v30 = vld [vmem:[%s9863_s29 + $0x1b78] sm:$0xff]  ;;  %v722_v31 = vld [vmem:[%s9863_s29 + $0x1440] sm:$0xff] }
 0x132   :  { %1695 = vmatmul.f32.gmra.mxu2 %v6249_v42  ;;  %1726 = vmatpush.msra.mxu0 %v155_v28  ;;  %v484_v42 = vld [vmem:[%s9863_s29 + $0xcd0] sm:$0xff]  ;;  %v834_v52 = vld [vmem:[%s9863_s29 + $0x17c0] sm:$0xff]  ;;  %v603_v28 = vld [vmem:[%s9863_s29 + $0x1088] sm:$0xff] }
 0x133   :  { %1749 = vmatpush.msra.mxu1 %v267_v57  ;;  %1772 = vmatpush.msra.mxu2 %v379_v39  ;;  %v946_v36 = vld [vmem:[%s9863_s29 + $0x1b40] sm:$0xff]  ;;  %v715_v57 = vld [vmem:[%s9863_s29 + $0x1408] sm:$0xff] }
 0x134   :  { %1795 = vmatpush.msra.mxu3 %v491_v40  ;;  %1649 = vmatmul.f32.gmra.mxu0 %v6264_v16  ;;  %v365_v16 = vld [vmem:[%s9863_s29 + $0x918] sm:$0xff]  ;;  %v827_v39 = vld [vmem:[%s9863_s29 + $0x1788] sm:$0xff] }
 0x135   :  { %1718 = vmatmul.f32.gmra.mxu3 %v6273_v32  ;;  %1727 = vmatpush.msra.mxu0 %v148_v44  ;;  %v134_v32 = vld [vmem:[%s9863_s29 + $0x1e0] sm:$0xff]  ;;  %v939_v40 = vld [vmem:[%s9863_s29 + $0x1b08] sm:$0xff]  ;;  %v6862_v44 = vpop.f32.mrf.mxu0 }
 0x136   :  { %1750 = vmatpush.msra.mxu1 %v260_v63  ;;  %1773 = vmatpush.msra.mxu2 %v372_v45  ;;  %v596_v63 = vld [vmem:[%s9863_s29 + $0x1050] sm:$0xff] }
 0x137   :  { %1796 = vmatpush.msra.mxu3 %v484_v42  ;;  %1672 = vmatmul.f32.gmra.mxu1 %v6291_v23  ;;  %v127_v23 = vld [vmem:[%s9863_s29 + $0x1a8] sm:$0xff]  ;;  %v708_v45 = vld [vmem:[%s9863_s29 + $0x13d0] sm:$0xff] }
 0x138   :  { %1728 = vmatpush.msra.mxu0 %v141_v46  ;;  %1751 = vmatpush.msra.mxu1 %v253_v48  ;;  %v820_v42 = vld [vmem:[%s9863_s29 + $0x1750] sm:$0xff]  ;;  %v589_v48 = vld [vmem:[%s9863_s29 + $0x1018] sm:$0xff] }
 0x139   :  { %1774 = vmatpush.msra.mxu2 %v365_v16  ;;  %1797 = vmatpush.msra.mxu3 %v477_v49  ;;  %v932_v46 = vld [vmem:[%s9863_s29 + $0x1ad0] sm:$0xff]  ;;  %v701_v16 = vld [vmem:[%s9863_s29 + $0x1398] sm:$0xff] }
 0x13a   :  { %1729 = vmatpush.msra.mxu0 %v134_v32  ;;  %1752 = vmatpush.msra.mxu1 %v246_v50  ;;  %v813_v49 = vld [vmem:[%s9863_s29 + $0x1718] sm:$0xff]  ;;  %v6888_v50 = vpop.f32.mrf.mxu1 }
 0x13b   :  { %1775 = vmatpush.msra.mxu2 %v358_v8  ;;  %1798 = vmatpush.msra.mxu3 %v470_v51  ;;  %v925_v32 = vld [vmem:[%s9863_s29 + $0x1a98] sm:$0xff]  ;;  %v582_v8 = vld [vmem:[%s9863_s29 + $0xfe0] sm:$0xff] }
 0x13c   :  { %1730 = vmatpush.msra.mxu0 %v127_v23  ;;  %1753 = vmatpush.msra.mxu1 %v239_v53  ;;  %v694_v51 = vld [vmem:[%s9863_s29 + $0x1360] sm:$0xff] }
 0x13d   :  { %1776 = vmatpush.msra.mxu2 %v351_v13  ;;  %1799 = vmatpush.msra.mxu3 %v463_v54  ;;  %v806_v23 = vld [vmem:[%s9863_s29 + $0x16e0] sm:$0xff]  ;;  %v575_v13 = vld [vmem:[%s9863_s29 + $0xfa8] sm:$0xff] }
 0x13e   :  { %1731 = vmatpush.msra.mxu0 %v120_v55  ;;  %1754 = vmatpush.msra.mxu1 %v232_v56  ;;  %v918_v53 = vld [vmem:[%s9863_s29 + $0x1a60] sm:$0xff]  ;;  %v687_v54 = vld [vmem:[%s9863_s29 + $0x1328] sm:$0xff]  ;;  %v6911_v56 = vpop.f32.mrf.mxu2 }
 0x13f   :  { %1777 = vmatpush.msra.mxu2 %v344_v59  ;;  %1800 = vmatpush.msra.mxu3 %v456_v15  ;;  %v799_v55 = vld [vmem:[%s9863_s29 + $0x16a8] sm:$0xff]  ;;  %v6919_v15 = vld [vmem:[%s9864_s25 + $0x10] sm:$0xff] }
 0x140   :  { %1732 = vmatpush.msra.mxu0 %v113_v60  ;;  %1755 = vmatpush.msra.mxu1 %v225_v62  ;;  %v911_v59 = vld [vmem:[%s9863_s29 + $0x1a28] sm:$0xff]  ;;  %v568_v60 = vld [vmem:[%s9863_s29 + $0xf70] sm:$0xff]  ;;  %v6925_v62 = vpop.f32.mrf.mxu0 }
 0x141   :  { %1778 = vmatpush.msra.mxu2 %v337_v18  ;;  %1801 = vmatpush.msra.mxu3 %v449_v0  ;;  %v680_v18 = vld [vmem:[%s9863_s29 + $0x12f0] sm:$0xff] }
 0x142   :  { %1733 = vmatpush.msra.mxu0 %v106_v37  ;;  %1756 = vmatpush.msra.mxu1 %v218_v1  ;;  %v792_v0 = vld [vmem:[%s9863_s29 + $0x1670] sm:$0xff]  ;;  %v6936_v37 = vld [vmem:[%s9864_s25] sm:$0xff] }
 0x143   :  { %1779 = vmatpush.msra.mxu2 %v330_v2  ;;  %1802 = vmatpush.msra.mxu3 %v442_v3  ;;  %v904_v1 = vld [vmem:[%s9863_s29 + $0x19f0] sm:$0xff]  ;;  %v6942_v2 = vpop.f32.mrf.mxu3  ;;  %v6947_v3 = vld [vmem:[%s9864_s25 + $0x18] sm:$0xff] }
 0x144   :  { %1734 = vmatpush.msra.mxu0 %v99_v24  ;;  %1757 = vmatpush.msra.mxu1 %v211_v4  ;;  %v561_v24 = vld [vmem:[%s9863_s29 + $0xf38] sm:$0xff] }
 0x145   :  { %1780 = vmatpush.msra.mxu2 %v323_v34  ;;  %1803 = vmatpush.msra.mxu3 %v435_v5  ;;  %v673_v4 = vld [vmem:[%s9863_s29 + $0x12b8] sm:$0xff] }
 0x146   :  { %1735 = vmatpush.msra.mxu0 %v92_v35  ;;  %1758 = vmatpush.msra.mxu1 %v204_v6  ;;  %v785_v34 = vld [vmem:[%s9863_s29 + $0x1638] sm:$0xff]  ;;  %v6962_v35 = vpop.f32.mrf.mxu1  ;;  %v6967_v6 = vld [vmem:[%s9864_s25 + $0x8] sm:$0xff] }
 0x147   :  { %1781 = vmatpush.msra.mxu2 %v316_v7  ;;  %1804 = vmatpush.msra.mxu3 %v428_v33  ;;  %v897_v5 = vld [vmem:[%s9863_s29 + $0x19b8] sm:$0xff]  ;;  %v554_v7 = vld [vmem:[%s9863_s29 + $0xf00] sm:$0xff] }
 0x148   :  { %1736 = vmatpush.msra.mxu0 %v85_v9  ;;  %1759 = vmatpush.msra.mxu1 %v197_v10  ;;  %v666_v33 = vld [vmem:[%s9863_s29 + $0x1280] sm:$0xff] }
 0x149   :  { %1782 = vmatpush.msra.mxu2 %v309_v58  ;;  %1805 = vmatpush.msra.mxu3 %v421_v11  ;;  %v778_v9 = vld [vmem:[%s9863_s29 + $0x1600] sm:$0xff]  ;;  %v547_v58 = vld [vmem:[%s9863_s29 + $0xec8] sm:$0xff] }
 0x14a   :  { %1737 = vmatpush.msra.mxu0 %v78_v41  ;;  %1760 = vmatpush.msra.mxu1 %v190_v12  ;;  %v890_v10 = vld [vmem:[%s9863_s29 + $0x1980] sm:$0xff]  ;;  %v659_v11 = vld [vmem:[%s9863_s29 + $0x1248] sm:$0xff]  ;;  %v6991_v12 = vpop.f32.mrf.mxu2 }
 0x14b   :  { %1783 = vmatpush.msra.mxu2 %v302_v17  ;;  %1806 = vmatpush.msra.mxu3 %v414_v20  ;;  %v771_v41 = vld [vmem:[%s9863_s29 + $0x15c8] sm:$0xff]  ;;  %v6999_v20 = vld [vmem:[%s9864_s25 + $0x50] sm:$0xff] }
 0x14c   :  { %1814 = vmatpush.msrb.mxu0 %v631_v47  ;;  %1837 = vmatpush.msrb.mxu1 %v743_v21  ;;  %v883_v17 = vld [vmem:[%s9863_s29 + $0x1948] sm:$0xff]  ;;  %v540_v47 = vld [vmem:[%s9863_s29 + $0xe90] sm:$0xff]  ;;  %v7005_v21 = vpop.f32.mrf.mxu0 }
 0x14d   :  { %1860 = vmatpush.msrb.mxu2 %v855_v38  ;;  %1883 = vmatpush.msrb.mxu3 %v967_v22  ;;  %v652_v38 = vld [vmem:[%s9863_s29 + $0x1210] sm:$0xff] }
 0x14e   :  { %1815 = vmatpush.msrb.mxu0 %v624_v43  ;;  %1838 = vmatpush.msrb.mxu1 %v736_v25  ;;  %v764_v22 = vld [vmem:[%s9863_s29 + $0x1590] sm:$0xff]  ;;  %v7016_v43 = vld [vmem:[%s9864_s25 + $0x40] sm:$0xff] }
 0x14f   :  { %1861 = vmatpush.msrb.mxu2 %v848_v26  ;;  %1884 = vmatpush.msrb.mxu3 %v960_v14  ;;  %v876_v25 = vld [vmem:[%s9863_s29 + $0x1910] sm:$0xff]  ;;  %v7022_v26 = vpop.f32.mrf.mxu3  ;;  %v7027_v14 = vld [vmem:[%s9864_s25 + $0x58] sm:$0xff] }
 0x150   :  { %1816 = vmatpush.msrb.mxu0 %v617_v27  ;;  %1839 = vmatpush.msrb.mxu1 %v729_v29  ;;  %v533_v27 = vld [vmem:[%s9863_s29 + $0xe58] sm:$0xff] }
 0x151   :  { %1862 = vmatpush.msrb.mxu2 %v841_v19  ;;  %1885 = vmatpush.msrb.mxu3 %v953_v30  ;;  %v645_v29 = vld [vmem:[%s9863_s29 + $0x11d8] sm:$0xff] }
 0x152   :  { %1817 = vmatpush.msrb.mxu0 %v610_v61  ;;  %1840 = vmatpush.msrb.mxu1 %v722_v31  ;;  %v757_v19 = vld [vmem:[%s9863_s29 + $0x1558] sm:$0xff]  ;;  %v7042_v61 = vpop.f32.mrf.mxu1  ;;  %v7047_v31 = vld [vmem:[%s9864_s25 + $0x48] sm:$0xff] }
 0x153   :  { %1863 = vmatpush.msrb.mxu2 %v834_v52  ;;  %1886 = vmatpush.msrb.mxu3 %v946_v36  ;;  %v869_v30 = vld [vmem:[%s9863_s29 + $0x18d8] sm:$0xff]  ;;  %v526_v52 = vld [vmem:[%s9863_s29 + $0xe20] sm:$0xff] }
 0x154   :  { %1818 = vmatpush.msrb.mxu0 %v603_v28  ;;  %1841 = vmatpush.msrb.mxu1 %v715_v57  ;;  %v638_v36 = vld [vmem:[%s9863_s29 + $0x11a0] sm:$0xff] }
 0x155   :  { %1864 = vmatpush.msrb.mxu2 %v827_v39  ;;  %1887 = vmatpush.msrb.mxu3 %v939_v40  ;;  %v750_v28 = vld [vmem:[%s9863_s29 + $0x1520] sm:$0xff]  ;;  %v184_v39 = vld [vmem:[%s9863_s29 + $0x370] sm:$0xff] }
 0x156   :  { %1819 = vmatpush.msrb.mxu0 %v596_v63  ;;  %1842 = vmatpush.msrb.mxu1 %v708_v45  ;;  %v862_v57 = vld [vmem:[%s9863_s29 + $0x18a0] sm:$0xff]  ;;  %v296_v40 = vld [vmem:[%s9863_s29 + $0x6f0] sm:$0xff]  ;;  %v7071_v45 = vpop.f32.mrf.mxu2 }
 0x157   :  { %1865 = vmatpush.msrb.mxu2 %v820_v42  ;;  %1888 = vmatpush.msrb.mxu3 %v932_v46  ;;  %v408_v63 = vld [vmem:[%s9863_s29 + $0xa70] sm:$0xff] }
 0x158   :  { %1820 = vmatpush.msrb.mxu0 %v589_v48  ;;  %1843 = vmatpush.msrb.mxu1 %v701_v16  ;;  %v520_v42 = vld [vmem:[%s9863_s29 + $0xdf0] sm:$0xff]  ;;  %v177_v48 = vld [vmem:[%s9863_s29 + $0x338] sm:$0xff]  ;;  %v7085_v16 = vpop.f32.mrf.mxu0 }
 0x159   :  { %1866 = vmatpush.msrb.mxu2 %v813_v49  ;;  %1889 = vmatpush.msrb.mxu3 %v925_v32  ;;  %v7079_v46 = vld [vmem:[%s9864_s25 + $0x30] sm:$0xff]  ;;  %v289_v49 = vld [vmem:[%s9863_s29 + $0x6b8] sm:$0xff] }
 0x15a   :  { %1821 = vmatpush.msrb.mxu0 %v582_v8  ;;  %1844 = vmatpush.msrb.mxu1 %v694_v51  ;;  %v401_v32 = vld [vmem:[%s9863_s29 + $0xa38] sm:$0xff]  ;;  %v7096_v8 = vld [vmem:[%s9864_s25 + $0x20] sm:$0xff] }
 0x15b   :  { %1867 = vmatpush.msrb.mxu2 %v806_v23  ;;  %1890 = vmatpush.msrb.mxu3 %v918_v53  ;;  %v513_v51 = vld [vmem:[%s9863_s29 + $0xdb8] sm:$0xff]  ;;  %v7102_v23 = vpop.f32.mrf.mxu3 }
 0x15c   :  { %1784 = vmatmul.f32.vlgmr.msra.gmra.mxu2 %v6919_v15  ;;  %1822 = vmatpush.msrb.mxu0 %v575_v13  ;;  %v7107_v53 = vld [vmem:[%s9864_s25 + $0x38] sm:$0xff]  ;;  %v170_v13 = vld [vmem:[%s9863_s29 + $0x300] sm:$0xff] }
 0x15d   :  { %1845 = vmatpush.msrb.mxu1 %v687_v54  ;;  %1868 = vmatpush.msrb.mxu2 %v799_v55  ;;  %v282_v54 = vld [vmem:[%s9863_s29 + $0x680] sm:$0xff] }
 0x15e   :  { %1891 = vmatpush.msrb.mxu3 %v911_v59  ;;  %1738 = vmatmul.f32.vlgmr.msra.gmra.mxu0 %v6936_v37  ;;  %v394_v55 = vld [vmem:[%s9863_s29 + $0xa00] sm:$0xff] }
 0x15f   :  { %1807 = vmatmul.f32.vlgmr.msra.gmra.mxu3 %v6947_v3  ;;  %1823 = vmatpush.msrb.mxu0 %v568_v60  ;;  %v506_v59 = vld [vmem:[%s9863_s29 + $0xd80] sm:$0xff]  ;;  %v7122_v60 = vpop.f32.mrf.mxu1 }
 0x160   :  { %1846 = vmatpush.msrb.mxu1 %v680_v18  ;;  %1869 = vmatpush.msrb.mxu2 %v792_v0  ;;  %v7127_v18 = vld [vmem:[%s9864_s25 + $0x28] sm:$0xff] }
 0x161   :  { %1892 = vmatpush.msrb.mxu3 %v904_v1  ;;  %1761 = vmatmul.f32.vlgmr.msra.gmra.mxu1 %v6967_v6  ;;  %v163_v0 = vld [vmem:[%s9863_s29 + $0x2c8] sm:$0xff] }
 0x162   :  { %1824 = vmatpush.msrb.mxu0 %v561_v24  ;;  %1847 = vmatpush.msrb.mxu1 %v673_v4  ;;  %v275_v1 = vld [vmem:[%s9863_s29 + $0x648] sm:$0xff] }
 0x163   :  { %1870 = vmatpush.msrb.mxu2 %v785_v34  ;;  %1893 = vmatpush.msrb.mxu3 %v897_v5  ;;  %v387_v24 = vld [vmem:[%s9863_s29 + $0x9c8] sm:$0xff]  ;;  %v156_v34 = vld [vmem:[%s9863_s29 + $0x290] sm:$0xff] }
 0x164   :  { %1825 = vmatpush.msrb.mxu0 %v554_v7  ;;  %1848 = vmatpush.msrb.mxu1 %v666_v33  ;;  %v499_v4 = vld [vmem:[%s9863_s29 + $0xd48] sm:$0xff]  ;;  %v268_v5 = vld [vmem:[%s9863_s29 + $0x610] sm:$0xff]  ;;  %v7151_v33 = vpop.f32.mrf.mxu2 }
 0x165   :  { %1871 = vmatpush.msrb.mxu2 %v778_v9  ;;  %1894 = vmatpush.msrb.mxu3 %v890_v10  ;;  %v380_v7 = vld [vmem:[%s9863_s29 + $0x990] sm:$0xff]  ;;  %v7153_v9 = vpop.f32.mrf.mxu0 }
 0x166   :  { %1787 = vmatmul.f32.gmra.mxu2 %v6999_v20  ;;  %1826 = vmatpush.msrb.mxu0 %v547_v58  ;;  %v492_v10 = vld [vmem:[%s9863_s29 + $0xd10] sm:$0xff] }
 0x167   :  { %1849 = vmatpush.msrb.mxu1 %v659_v11  ;;  %1872 = vmatpush.msrb.mxu2 %v771_v41  ;;  %v7161_v58 = vld [vmem:[%s9864_s25 + $0x70] sm:$0xff]  ;;  %v149_v11 = vld [vmem:[%s9863_s29 + $0x258] sm:$0xff] }
 0x168   :  { %1895 = vmatpush.msrb.mxu3 %v883_v17  ;;  %1741 = vmatmul.f32.gmra.mxu0 %v7016_v43  ;;  %v261_v41 = vld [vmem:[%s9863_s29 + $0x5d8] sm:$0xff] }
 0x169   :  { %1810 = vmatmul.f32.gmra.mxu3 %v7027_v14  ;;  %1827 = vmatpush.msrb.mxu0 %v540_v47  ;;  %v373_v17 = vld [vmem:[%s9863_s29 + $0x958] sm:$0xff]  ;;  %v7176_v47 = vld [vmem:[%s9864_s25 + $0x60] sm:$0xff] }
 0x16a   :  { %1850 = vmatpush.msrb.mxu1 %v652_v38  ;;  %1873 = vmatpush.msrb.mxu2 %v764_v22  ;;  %v485_v38 = vld [vmem:[%s9863_s29 + $0xcd8] sm:$0xff]  ;;  %v7182_v22 = vpop.f32.mrf.mxu3 }
 0x16b   :  { %1896 = vmatpush.msrb.mxu3 %v876_v25  ;;  %1764 = vmatmul.f32.gmra.mxu1 %v7047_v31  ;;  %v7184_v25 = vpop.f32.mrf.mxu1 }
 0x16c   :  { %1828 = vmatpush.msrb.mxu0 %v533_v27  ;;  %1851 = vmatpush.msrb.mxu1 %v645_v29  ;;  %v7189_v27 = vld [vmem:[%s9864_s25 + $0x78] sm:$0xff]  ;;  %v142_v29 = vld [vmem:[%s9863_s29 + $0x220] sm:$0xff] }
 0x16d   :  { %1874 = vmatpush.msrb.mxu2 %v757_v19  ;;  %1897 = vmatpush.msrb.mxu3 %v869_v30  ;;  %v254_v19 = vld [vmem:[%s9863_s29 + $0x5a0] sm:$0xff] }
 0x16e   :  { %1829 = vmatpush.msrb.mxu0 %v526_v52  ;;  %1852 = vmatpush.msrb.mxu1 %v638_v36  ;;  %v366_v30 = vld [vmem:[%s9863_s29 + $0x920] sm:$0xff]  ;;  %v7207_v36 = vld [vmem:[%s9864_s25 + $0x68] sm:$0xff] }
 0x16f   :  { %1875 = vmatpush.msrb.mxu2 %v750_v28  ;;  %1898 = vmatpush.msrb.mxu3 %v862_v57  ;;  %v478_v52 = vld [vmem:[%s9863_s29 + $0xca0] sm:$0xff]  ;;  %v135_v28 = vld [vmem:[%s9863_s29 + $0x1e8] sm:$0xff] }
 0x170   :  { %1876 = vmatmul.f32.vlgmr.msrb.gmra.mxu2 %v7079_v46  ;;  %1906 = vmatpush.msra.mxu0 %v184_v39  ;;  %v247_v57 = vld [vmem:[%s9863_s29 + $0x568] sm:$0xff] }
 0x171   :  { %1929 = vmatpush.msra.mxu1 %v296_v40  ;;  %1952 = vmatpush.msra.mxu2 %v408_v63  ;;  %v359_v39 = vld [vmem:[%s9863_s29 + $0x8e8] sm:$0xff]  ;;  %v7222_v63 = vpop.f32.mrf.mxu2 }
 0x172   :  { %1975 = vmatpush.msra.mxu3 %v520_v42  ;;  %1830 = vmatmul.f32.vlgmr.msrb.gmra.mxu0 %v7096_v8  ;;  %v471_v40 = vld [vmem:[%s9863_s29 + $0xc68] sm:$0xff]  ;;  %v128_v42 = vld [vmem:[%s9863_s29 + $0x1b0] sm:$0xff] }
 0x173   :  { %1899 = vmatmul.f32.vlgmr.msrb.gmra.mxu3 %v7107_v53  ;;  %1907 = vmatpush.msra.mxu0 %v177_v48  ;;  %v240_v48 = vld [vmem:[%s9863_s29 + $0x530] sm:$0xff] }
 0x174   :  { %1930 = vmatpush.msra.mxu1 %v289_v49  ;;  %1953 = vmatpush.msra.mxu2 %v401_v32  ;;  %v352_v49 = vld [vmem:[%s9863_s29 + $0x8b0] sm:$0xff] }
 0x175   :  { %1976 = vmatpush.msra.mxu3 %v513_v51  ;;  %1853 = vmatmul.f32.vlgmr.msrb.gmra.mxu1 %v7127_v18  ;;  %v464_v32 = vld [vmem:[%s9863_s29 + $0xc30] sm:$0xff]  ;;  %v7236_v51 = vpop.f32.mrf.mxu0 }
 0x176   :  { %1908 = vmatpush.msra.mxu0 %v170_v13  ;;  %1931 = vmatpush.msra.mxu1 %v282_v54  ;;  %v121_v13 = vld [vmem:[%s9863_s29 + $0x178] sm:$0xff] }
 0x177   :  { %1954 = vmatpush.msra.mxu2 %v394_v55  ;;  %1977 = vmatpush.msra.mxu3 %v506_v59  ;;  %v233_v54 = vld [vmem:[%s9863_s29 + $0x4f8] sm:$0xff] }
 0x178   :  { %1909 = vmatpush.msra.mxu0 %v163_v0  ;;  %1932 = vmatpush.msra.mxu1 %v275_v1  ;;  %v345_v55 = vld [vmem:[%s9863_s29 + $0x878] sm:$0xff]  ;;  %v7250_v0 = vpop.f32.mrf.mxu3  ;;  %v114_v1 = vld [vmem:[%s9863_s29 + $0x140] sm:$0xff] }
 0x179   :  { %1955 = vmatpush.msra.mxu2 %v387_v24  ;;  %1978 = vmatpush.msra.mxu3 %v499_v4  ;;  %v457_v59 = vld [vmem:[%s9863_s29 + $0xbf8] sm:$0xff]  ;;  %v226_v24 = vld [vmem:[%s9863_s29 + $0x4c0] sm:$0xff] }
 0x17a   :  { %1879 = vmatmul.f32.gmra.mxu2 %v7161_v58  ;;  %1910 = vmatpush.msra.mxu0 %v156_v34  ;;  %v338_v4 = vld [vmem:[%s9863_s29 + $0x840] sm:$0xff] }
 0x17b   :  { %1933 = vmatpush.msra.mxu1 %v268_v5  ;;  %1956 = vmatpush.msra.mxu2 %v380_v7  ;;  %v450_v34 = vld [vmem:[%s9863_s29 + $0xbc0] sm:$0xff]  ;;  %v7264_v5 = vpop.f32.mrf.mxu1  ;;  %v107_v7 = vld [vmem:[%s9863_s29 + $0x108] sm:$0xff] }
 0x17c   :  { %1979 = vmatpush.msra.mxu3 %v492_v10  ;;  %1833 = vmatmul.f32.gmra.mxu0 %v7176_v47  ;;  %v219_v10 = vld [vmem:[%s9863_s29 + $0x488] sm:$0xff] }
 0x17d   :  { %1902 = vmatmul.f32.gmra.mxu3 %v7189_v27  ;;  %1911 = vmatpush.msra.mxu0 %v149_v11  ;;  %v331_v11 = vld [vmem:[%s9863_s29 + $0x808] sm:$0xff] }
 0x17e   :  { %1934 = vmatpush.msra.mxu1 %v261_v41  ;;  %1957 = vmatpush.msra.mxu2 %v373_v17  ;;  %v443_v41 = vld [vmem:[%s9863_s29 + $0xb88] sm:$0xff]  ;;  %v100_v17 = vld [vmem:[%s9863_s29 + $0xd0] sm:$0xff] }
 0x17f   :  { %1980 = vmatpush.msra.mxu3 %v485_v38  ;;  %1856 = vmatmul.f32.gmra.mxu1 %v7207_v36  ;;  %v212_v38 = vld [vmem:[%s9863_s29 + $0x450] sm:$0xff] }
 0x180   :  { %1912 = vmatpush.msra.mxu0 %v142_v29  ;;  %1935 = vmatpush.msra.mxu1 %v254_v19  ;;  %v324_v29 = vld [vmem:[%s9863_s29 + $0x7d0] sm:$0xff] }
 0x181   :  { %1958 = vmatpush.msra.mxu2 %v366_v30  ;;  %1981 = vmatpush.msra.mxu3 %v478_v52  ;;  %v436_v19 = vld [vmem:[%s9863_s29 + $0xb50] sm:$0xff]  ;;  %v7290_v30 = vpop.f32.mrf.mxu2  ;;  %v93_v52 = vld [vmem:[%s9863_s29 + $0x98] sm:$0xff] }
 0x182   :  { %1913 = vmatpush.msra.mxu0 %v135_v28  ;;  %1936 = vmatpush.msra.mxu1 %v247_v57  ;;  %v205_v28 = vld [vmem:[%s9863_s29 + $0x418] sm:$0xff] }
 0x183   :  { %1959 = vmatpush.msra.mxu2 %v359_v39  ;;  %1982 = vmatpush.msra.mxu3 %v471_v40  ;;  %v317_v57 = vld [vmem:[%s9863_s29 + $0x798] sm:$0xff]  ;;  %v7304_v40 = vpop.f32.mrf.mxu0 }
 0x184   :  { %1914 = vmatpush.msra.mxu0 %v128_v42  ;;  %1937 = vmatpush.msra.mxu1 %v240_v48  ;;  %v429_v39 = vld [vmem:[%s9863_s29 + $0xb18] sm:$0xff]  ;;  %v86_v42 = vld [vmem:[%s9863_s29 + $0x60] sm:$0xff] }
 0x185   :  { %1960 = vmatpush.msra.mxu2 %v352_v49  ;;  %1983 = vmatpush.msra.mxu3 %v464_v32  ;;  %v198_v48 = vld [vmem:[%s9863_s29 + $0x3e0] sm:$0xff] }
 0x186   :  { %1915 = vmatpush.msra.mxu0 %v121_v13  ;;  %1938 = vmatpush.msra.mxu1 %v233_v54  ;;  %v310_v49 = vld [vmem:[%s9863_s29 + $0x760] sm:$0xff]  ;;  %v7318_v13 = vpop.f32.mrf.mxu3  ;;  %v79_v54 = vld [vmem:[%s9863_s29 + $0x28] sm:$0xff] }
 0x187   :  { %1961 = vmatpush.msra.mxu2 %v345_v55  ;;  %1984 = vmatpush.msra.mxu3 %v457_v59  ;;  %v422_v32 = vld [vmem:[%s9863_s29 + $0xae0] sm:$0xff]  ;;  %v191_v55 = vld [vmem:[%s9863_s29 + $0x3a8] sm:$0xff] }
 0x188   :  { %1916 = vmatpush.msra.mxu0 %v114_v1  ;;  %1939 = vmatpush.msra.mxu1 %v226_v24  ;;  %v303_v59 = vld [vmem:[%s9863_s29 + $0x728] sm:$0xff]  ;;  %v7332_v24 = vpop.f32.mrf.mxu1 }
 0x189   :  { %1962 = vmatpush.msra.mxu2 %v338_v4  ;;  %1985 = vmatpush.msra.mxu3 %v450_v34  ;;  %v415_v1 = vld [vmem:[%s9863_s29 + $0xaa8] sm:$0xff]  ;;  %v632_v4 = vld [vmem:[%s9863_s29 + $0x1170] sm:$0xff] }
 0x18a   :  { %1917 = vmatpush.msra.mxu0 %v107_v7  ;;  %1940 = vmatpush.msra.mxu1 %v219_v10  ;;  %v744_v34 = vld [vmem:[%s9863_s29 + $0x14f0] sm:$0xff] }
 0x18b   :  { %1963 = vmatpush.msra.mxu2 %v331_v11  ;;  %1986 = vmatpush.msra.mxu3 %v443_v41  ;;  %v856_v7 = vld [vmem:[%s9863_s29 + $0x1870] sm:$0xff]  ;;  %v625_v11 = vld [vmem:[%s9863_s29 + $0x1138] sm:$0xff] }
 0x18c   :  { %1918 = vmatpush.msra.mxu0 %v100_v17  ;;  %1941 = vmatpush.msra.mxu1 %v212_v38  ;;  %v968_v10 = vld [vmem:[%s9863_s29 + $0x1bf0] sm:$0xff]  ;;  %v737_v41 = vld [vmem:[%s9863_s29 + $0x14b8] sm:$0xff] }
 0x18d   :  { %1964 = vmatpush.msra.mxu2 %v324_v29  ;;  %1987 = vmatpush.msra.mxu3 %v436_v19  ;;  %v849_v17 = vld [vmem:[%s9863_s29 + $0x1838] sm:$0xff]  ;;  %v7358_v29 = vpop.f32.mrf.mxu2  ;;  %v618_v19 = vld [vmem:[%s9863_s29 + $0x1100] sm:$0xff] }
 0x18e   :  { %1919 = vmatpush.msra.mxu0 %v93_v52  ;;  %1942 = vmatpush.msra.mxu1 %v205_v28  ;;  %v961_v38 = vld [vmem:[%s9863_s29 + $0x1bb8] sm:$0xff]  ;;  %v730_v52 = vld [vmem:[%s9863_s29 + $0x1480] sm:$0xff] }
 0x18f   :  { %1965 = vmatpush.msra.mxu2 %v317_v57  ;;  %1988 = vmatpush.msra.mxu3 %v429_v39  ;;  %v842_v28 = vld [vmem:[%s9863_s29 + $0x1800] sm:$0xff]  ;;  %v7372_v39 = vpop.f32.mrf.mxu0 }
 0x190   :  { %1920 = vmatpush.msra.mxu0 %v86_v42  ;;  %1943 = vmatpush.msra.mxu1 %v198_v48  ;;  %v954_v57 = vld [vmem:[%s9863_s29 + $0x1b80] sm:$0xff]  ;;  %v611_v42 = vld [vmem:[%s9863_s29 + $0x10c8] sm:$0xff] }
 0x191   :  { %1966 = vmatpush.msra.mxu2 %v310_v49  ;;  %1989 = vmatpush.msra.mxu3 %v422_v32  ;;  %v723_v48 = vld [vmem:[%s9863_s29 + $0x1448] sm:$0xff] }
 0x192   :  { %1921 = vmatpush.msra.mxu0 %v79_v54  ;;  %1944 = vmatpush.msra.mxu1 %v191_v55  ;;  %v835_v49 = vld [vmem:[%s9863_s29 + $0x17c8] sm:$0xff]  ;;  %v7386_v54 = vpop.f32.mrf.mxu3  ;;  %v604_v55 = vld [vmem:[%s9863_s29 + $0x1090] sm:$0xff] }
 0x193   :  { %1967 = vmatpush.msra.mxu2 %v303_v59  ;;  %1990 = vmatpush.msra.mxu3 %v415_v1  ;;  %v947_v32 = vld [vmem:[%s9863_s29 + $0x1b48] sm:$0xff]  ;;  %v716_v59 = vld [vmem:[%s9863_s29 + $0x1410] sm:$0xff] }
 0x194   :  { %1998 = vmatpush.msrb.mxu0 %v632_v4  ;;  %2021 = vmatpush.msrb.mxu1 %v744_v34  ;;  %v828_v1 = vld [vmem:[%s9863_s29 + $0x1790] sm:$0xff]  ;;  %v7400_v34 = vpop.f32.mrf.mxu1 }
 0x195   :  { %2044 = vmatpush.msrb.mxu2 %v856_v7  ;;  %2067 = vmatpush.msrb.mxu3 %v968_v10  ;;  %v940_v4 = vld [vmem:[%s9863_s29 + $0x1b10] sm:$0xff]  ;;  %v597_v7 = vld [vmem:[%s9863_s29 + $0x1058] sm:$0xff] }
 0x196   :  { %1999 = vmatpush.msrb.mxu0 %v625_v11  ;;  %2022 = vmatpush.msrb.mxu1 %v737_v41  ;;  %v709_v10 = vld [vmem:[%s9863_s29 + $0x13d8] sm:$0xff] }
 0x197   :  { %2045 = vmatpush.msrb.mxu2 %v849_v17  ;;  %2068 = vmatpush.msrb.mxu3 %v961_v38  ;;  %v821_v11 = vld [vmem:[%s9863_s29 + $0x1758] sm:$0xff]  ;;  %v590_v17 = vld [vmem:[%s9863_s29 + $0x1020] sm:$0xff] }
 0x198   :  { %2000 = vmatpush.msrb.mxu0 %v618_v19  ;;  %2023 = vmatpush.msrb.mxu1 %v730_v52  ;;  %v933_v41 = vld [vmem:[%s9863_s29 + $0x1ad8] sm:$0xff]  ;;  %v702_v38 = vld [vmem:[%s9863_s29 + $0x13a0] sm:$0xff] }
 0x199   :  { %2046 = vmatpush.msrb.mxu2 %v842_v28  ;;  %2069 = vmatpush.msrb.mxu3 %v954_v57  ;;  %v814_v19 = vld [vmem:[%s9863_s29 + $0x1720] sm:$0xff]  ;;  %v7426_v28 = vpop.f32.mrf.mxu2  ;;  %v7428_v57 = vpop.f32.mrf.mxu0 }
 0x19a   :  { %2001 = vmatpush.msrb.mxu0 %v611_v42  ;;  %2024 = vmatpush.msrb.mxu1 %v723_v48  ;;  %v926_v52 = vld [vmem:[%s9863_s29 + $0x1aa0] sm:$0xff]  ;;  %v583_v42 = vld [vmem:[%s9863_s29 + $0xfe8] sm:$0xff] }
 0x19b   :  { %2047 = vmatpush.msrb.mxu2 %v835_v49  ;;  %2070 = vmatpush.msrb.mxu3 %v947_v32  ;;  %v695_v48 = vld [vmem:[%s9863_s29 + $0x1368] sm:$0xff] }
 0x19c   :  { %2002 = vmatpush.msrb.mxu0 %v604_v55  ;;  %2025 = vmatpush.msrb.mxu1 %v716_v59  ;;  %v807_v49 = vld [vmem:[%s9863_s29 + $0x16e8] sm:$0xff]  ;;  %v576_v55 = vld [vmem:[%s9863_s29 + $0xfb0] sm:$0xff] }
 0x19d   :  { %2048 = vmatpush.msrb.mxu2 %v828_v1  ;;  %2071 = vmatpush.msrb.mxu3 %v940_v4  ;;  %v919_v32 = vld [vmem:[%s9863_s29 + $0x1a68] sm:$0xff]  ;;  %v688_v59 = vld [vmem:[%s9863_s29 + $0x1330] sm:$0xff]  ;;  %v7451_v4 = vpop.f32.mrf.mxu3 }
 0x19e   :  { %2003 = vmatpush.msrb.mxu0 %v597_v7  ;;  %2026 = vmatpush.msrb.mxu1 %v709_v10  ;;  %v800_v1 = vld [vmem:[%s9863_s29 + $0x16b0] sm:$0xff]  ;;  %v7453_v7 = vpop.f32.mrf.mxu1 }
 0x19f   :  { %2049 = vmatpush.msrb.mxu2 %v821_v11  ;;  %2072 = vmatpush.msrb.mxu3 %v933_v41  ;;  %v912_v10 = vld [vmem:[%s9863_s29 + $0x1a30] sm:$0xff]  ;;  %v569_v11 = vld [vmem:[%s9863_s29 + $0xf78] sm:$0xff] }
 0x1a0   :  { %2004 = vmatpush.msrb.mxu0 %v590_v17  ;;  %2027 = vmatpush.msrb.mxu1 %v702_v38  ;;  %v681_v41 = vld [vmem:[%s9863_s29 + $0x12f8] sm:$0xff] }
 0x1a1   :  { %2050 = vmatpush.msrb.mxu2 %v814_v19  ;;  %2073 = vmatpush.msrb.mxu3 %v926_v52  ;;  %v793_v17 = vld [vmem:[%s9863_s29 + $0x1678] sm:$0xff]  ;;  %v7472_v38 = vpop.f32.mrf.mxu2  ;;  %v562_v19 = vld [vmem:[%s9863_s29 + $0xf40] sm:$0xff] }
 0x1a2   :  { %2005 = vmatpush.msrb.mxu0 %v583_v42  ;;  %2028 = vmatpush.msrb.mxu1 %v695_v48  ;;  %v674_v52 = vld [vmem:[%s9863_s29 + $0x12c0] sm:$0xff]  ;;  %v555_v48 = vld [vmem:[%s9863_s29 + $0xf08] sm:$0xff] }
 0x1a3   :  { %2051 = vmatpush.msrb.mxu2 %v807_v49  ;;  %2074 = vmatpush.msrb.mxu3 %v919_v32  ;;  %v898_v42 = vld [vmem:[%s9863_s29 + $0x19c0] sm:$0xff]  ;;  %v667_v49 = vld [vmem:[%s9863_s29 + $0x1288] sm:$0xff] }
 0x1a4   :  { %1968 = vmatmul.f32.vlgmr.msra.gmra.mxu2 %v6919_v15  ;;  %2006 = vmatpush.msrb.mxu0 %v576_v55  ;;  %v905_v15 = vld [vmem:[%s9863_s29 + $0x19f8] sm:$0xff]  ;;  %v779_v32 = vld [vmem:[%s9863_s29 + $0x1608] sm:$0xff] }
 0x1a5   :  { %2029 = vmatpush.msrb.mxu1 %v688_v59  ;;  %2052 = vmatpush.msrb.mxu2 %v800_v1  ;;  %v891_v55 = vld [vmem:[%s9863_s29 + $0x1988] sm:$0xff]  ;;  %v7502_v59 = vpop.f32.mrf.mxu3  ;;  %v660_v1 = vld [vmem:[%s9863_s29 + $0x1250] sm:$0xff] }
 0x1a6   :  { %2075 = vmatpush.msrb.mxu3 %v912_v10  ;;  %1922 = vmatmul.f32.vlgmr.msra.gmra.mxu0 %v6936_v37  ;;  %v786_v37 = vld [vmem:[%s9863_s29 + $0x1640] sm:$0xff]  ;;  %v772_v10 = vld [vmem:[%s9863_s29 + $0x15d0] sm:$0xff] }
 0x1a7   :  { %1991 = vmatmul.f32.vlgmr.msra.gmra.mxu3 %v6947_v3  ;;  %2007 = vmatpush.msrb.mxu0 %v569_v11  ;;  %v7487_v3 = vpop.f32.mrf.mxu0  ;;  %v7513_v11 = vpop.f32.mrf.mxu1 }
 0x1a8   :  { %2030 = vmatpush.msrb.mxu1 %v681_v41  ;;  %2053 = vmatpush.msrb.mxu2 %v793_v17  ;;  %v884_v41 = vld [vmem:[%s9863_s29 + $0x1950] sm:$0xff]  ;;  %v541_v17 = vld [vmem:[%s9863_s29 + $0xe98] sm:$0xff] }
 0x1a9   :  { %2076 = vmatpush.msrb.mxu3 %v905_v15  ;;  %1945 = vmatmul.f32.vlgmr.msra.gmra.mxu1 %v6967_v6  ;;  %v548_v6 = vld [vmem:[%s9863_s29 + $0xed0] sm:$0xff]  ;;  %v653_v15 = vld [vmem:[%s9863_s29 + $0x1218] sm:$0xff] }
 0x1aa   :  { %2008 = vmatpush.msrb.mxu0 %v562_v19  ;;  %2031 = vmatpush.msrb.mxu1 %v674_v52  ;;  %v765_v19 = vld [vmem:[%s9863_s29 + $0x1598] sm:$0xff]  ;;  %v7532_v52 = vpop.f32.mrf.mxu2 }
 0x1ab   :  { %2054 = vmatpush.msrb.mxu2 %v786_v37  ;;  %2077 = vmatpush.msrb.mxu3 %v898_v42  ;;  %v534_v37 = vld [vmem:[%s9863_s29 + $0xe60] sm:$0xff] }
 0x1ac   :  { %2009 = vmatpush.msrb.mxu0 %v555_v48  ;;  %2032 = vmatpush.msrb.mxu1 %v667_v49  ;;  %v646_v42 = vld [vmem:[%s9863_s29 + $0x11e0] sm:$0xff]  ;;  %v527_v49 = vld [vmem:[%s9863_s29 + $0xe28] sm:$0xff] }
 0x1ad   :  { %2055 = vmatpush.msrb.mxu2 %v779_v32  ;;  %2078 = vmatpush.msrb.mxu3 %v891_v55  ;;  %v870_v48 = vld [vmem:[%s9863_s29 + $0x18e0] sm:$0xff]  ;;  %v639_v32 = vld [vmem:[%s9863_s29 + $0x11a8] sm:$0xff] }
 0x1ae   :  { %1971 = vmatmul.f32.gmra.mxu2 %v6999_v20  ;;  %2010 = vmatpush.msrb.mxu0 %v548_v6  ;;  %v877_v20 = vld [vmem:[%s9863_s29 + $0x1918] sm:$0xff]  ;;  %v751_v55 = vld [vmem:[%s9863_s29 + $0x1528] sm:$0xff] }
 0x1af   :  { %2033 = vmatpush.msrb.mxu1 %v660_v1  ;;  %2056 = vmatpush.msrb.mxu2 %v772_v10  ;;  %v863_v6 = vld [vmem:[%s9863_s29 + $0x18a8] sm:$0xff]  ;;  %v7562_v1 = vpop.f32.mrf.mxu3  ;;  %v297_v10 = vld [vmem:[%s9863_s29 + $0x6f8] sm:$0xff] }
 0x1b0   :  { %2079 = vmatpush.msrb.mxu3 %v884_v41  ;;  %1925 = vmatmul.f32.gmra.mxu0 %v7016_v43  ;;  %v758_v43 = vld [vmem:[%s9863_s29 + $0x1560] sm:$0xff]  ;;  %v409_v41 = vld [vmem:[%s9863_s29 + $0xa78] sm:$0xff] }
 0x1b1   :  { %1994 = vmatmul.f32.gmra.mxu3 %v7027_v14  ;;  %2011 = vmatpush.msrb.mxu0 %v541_v17  ;;  %v7547_v14 = vpop.f32.mrf.mxu0  ;;  %v7573_v17 = vpop.f32.mrf.mxu1 }
 0x1b2   :  { %2034 = vmatpush.msrb.mxu1 %v653_v15  ;;  %2057 = vmatpush.msrb.mxu2 %v765_v19  ;;  %v521_v15 = vld [vmem:[%s9863_s29 + $0xdf8] sm:$0xff]  ;;  %v178_v19 = vld [vmem:[%s9863_s29 + $0x340] sm:$0xff] }
 0x1b3   :  { %2080 = vmatpush.msrb.mxu3 %v877_v20  ;;  %1948 = vmatmul.f32.gmra.mxu1 %v7047_v31  ;;  %v185_v31 = vld [vmem:[%s9863_s29 + $0x378] sm:$0xff]  ;;  %v290_v20 = vld [vmem:[%s9863_s29 + $0x6c0] sm:$0xff] }
 0x1b4   :  { %2012 = vmatpush.msrb.mxu0 %v534_v37  ;;  %2035 = vmatpush.msrb.mxu1 %v646_v42  ;;  %v402_v37 = vld [vmem:[%s9863_s29 + $0xa40] sm:$0xff]  ;;  %v7592_v42 = vpop.f32.mrf.mxu2 }
 0x1b5   :  { %2058 = vmatpush.msrb.mxu2 %v758_v43  ;;  %2081 = vmatpush.msrb.mxu3 %v870_v48  ;;  %v171_v43 = vld [vmem:[%s9863_s29 + $0x308] sm:$0xff] }
 0x1b6   :  { %2013 = vmatpush.msrb.mxu0 %v527_v49  ;;  %2036 = vmatpush.msrb.mxu1 %v639_v32  ;;  %v283_v48 = vld [vmem:[%s9863_s29 + $0x688] sm:$0xff] }
 0x1b7   :  { %2059 = vmatpush.msrb.mxu2 %v751_v55  ;;  %2082 = vmatpush.msrb.mxu3 %v863_v6  ;;  %v507_v49 = vld [vmem:[%s9863_s29 + $0xd88] sm:$0xff]  ;;  %v164_v55 = vld [vmem:[%s9863_s29 + $0x2d0] sm:$0xff] }
 0x1b8   :  { %2060 = vmatmul.f32.vlgmr.msrb.gmra.mxu2 %v7079_v46  ;;  %2090 = vmatpush.msra.mxu0 %v185_v31  ;;  %v514_v46 = vld [vmem:[%s9863_s29 + $0xdc0] sm:$0xff]  ;;  %v276_v6 = vld [vmem:[%s9863_s29 + $0x650] sm:$0xff] }
 0x1b9   :  { %2113 = vmatpush.msra.mxu1 %v297_v10  ;;  %2136 = vmatpush.msra.mxu2 %v409_v41  ;;  %v7612_v32 = vpop.f32.mrf.mxu0  ;;  %v388_v31 = vld [vmem:[%s9863_s29 + $0x9d0] sm:$0xff]  ;;  %v7627_v41 = vpop.f32.mrf.mxu3 }
 0x1ba   :  { %2159 = vmatpush.msra.mxu3 %v521_v15  ;;  %2014 = vmatmul.f32.vlgmr.msrb.gmra.mxu0 %v7096_v8  ;;  %v395_v8 = vld [vmem:[%s9863_s29 + $0xa08] sm:$0xff]  ;;  %v500_v10 = vld [vmem:[%s9863_s29 + $0xd50] sm:$0xff] }
 0x1bb   :  { %2083 = vmatmul.f32.vlgmr.msrb.gmra.mxu3 %v7107_v53  ;;  %2091 = vmatpush.msra.mxu0 %v178_v19  ;;  %v7610_v53 = vld [vmem:[%s9865_s21] sm:$0x7f]  ;;  %v269_v19 = vld [vmem:[%s9863_s29 + $0x618] sm:$0xff] }
 0x1bc   :  { %2114 = vmatpush.msra.mxu1 %v290_v20  ;;  %2137 = vmatpush.msra.mxu2 %v402_v37  ;;  %v972_v15 = vperm.slane %v7610_v53, 0  ;;  %v381_v20 = vld [vmem:[%s9863_s29 + $0x998] sm:$0xff]  ;;  %v7639_v37 = vpop.f32.mrf.mxu1 }
 0x1bd   :  { %2160 = vmatpush.msra.mxu3 %v514_v46  ;;  %2037 = vmatmul.f32.vlgmr.msrb.gmra.mxu1 %v7127_v18  ;;  %v157_v18 = vld [vmem:[%s9863_s29 + $0x298] sm:$0xff] }
 0x1be   :  { %2092 = vmatpush.msra.mxu0 %v171_v43  ;;  %2115 = vmatpush.msra.mxu1 %v283_v48  ;;  %v493_v46 = vld [vmem:[%s9863_s29 + $0xd18] sm:$0xff]  ;;  %v150_v43 = vld [vmem:[%s9863_s29 + $0x260] sm:$0xff] }
 0x1bf   :  { %2138 = vmatpush.msra.mxu2 %v395_v8  ;;  %2161 = vmatpush.msra.mxu3 %v507_v49  ;;  %v262_v48 = vld [vmem:[%s9863_s29 + $0x5e0] sm:$0xff]  ;;  %v1004_v49 = vadd.f32 %v6862_v44, %v972_v15  ;;  %v143_v44 = vld [vmem:[%s9863_s29 + $0x228] sm:$0xff] }
 0x1c0   :  { %2093 = vmatpush.msra.mxu0 %v164_v55  ;;  %2116 = vmatpush.msra.mxu1 %v276_v6  ;;  %v374_v8 = vld [vmem:[%s9863_s29 + $0x960] sm:$0xff]  ;;  %v9859_v55 = vperm.slane %v7610_v53, 1  ;;  %v7662_v6 = vpop.f32.mrf.mxu2 }
 0x1c1   :  { %2139 = vmatpush.msra.mxu2 %v388_v31  ;;  %2162 = vmatpush.msra.mxu3 %v500_v10  ;;  %v7664_v31 = vpop.f32.mrf.mxu0  ;;  %v367_v10 = vld [vmem:[%s9863_s29 + $0x928] sm:$0xff] }
 0x1c2   :  { %2063 = vmatmul.f32.gmra.mxu2 %v7161_v58  ;;  %2094 = vmatpush.msra.mxu0 %v157_v18  ;;  %v486_v58 = vld [vmem:[%s9863_s29 + $0xce0] sm:$0xff]  ;;  %v479_v18 = vld [vmem:[%s9863_s29 + $0xca8] sm:$0xff] }
 0x1c3   :  { %2117 = vmatpush.msra.mxu1 %v269_v19  ;;  %2140 = vmatpush.msra.mxu2 %v381_v20  ;;  %v248_v19 = vld [vmem:[%s9863_s29 + $0x570] sm:$0xff]  ;;  %v1027_v20 = vadd.f32 %v6888_v50, %v1004_v49  ;;  %v129_v50 = vld [vmem:[%s9863_s29 + $0x1b8] sm:$0xff] }
 0x1c4   :  { %2163 = vmatpush.msra.mxu3 %v493_v46  ;;  %2017 = vmatmul.f32.gmra.mxu0 %v7176_v47  ;;  %v255_v47 = vld [vmem:[%s9863_s29 + $0x5a8] sm:$0xff]  ;;  %v360_v46 = vld [vmem:[%s9863_s29 + $0x8f0] sm:$0xff]  ;;  %v241_v49 = vld [vmem:[%s9863_s29 + $0x538] sm:$0xff] }
 0x1c5   :  { %2086 = vmatmul.f32.gmra.mxu3 %v7189_v27  ;;  %2095 = vmatpush.msra.mxu0 %v150_v43  ;;  %v136_v27 = vld [vmem:[%s9863_s29 + $0x1f0] sm:$0xff]  ;;  %v1188_v43 = vadd.f32 %v7153_v9, %v9859_v55  ;;  %v353_v9 = vld [vmem:[%s9863_s29 + $0x8b8] sm:$0xff] }
 0x1c6   :  { %2118 = vmatpush.msra.mxu1 %v262_v48  ;;  %2141 = vmatpush.msra.mxu2 %v374_v8  ;;  %v7696_v48 = vpop.f32.mrf.mxu3  ;;  %v7698_v8 = vpop.f32.mrf.mxu1 }
 0x1c7   :  { %2164 = vmatpush.msra.mxu3 %v486_v58  ;;  %2040 = vmatmul.f32.gmra.mxu1 %v7207_v36  ;;  %v472_v36 = vld [vmem:[%s9863_s29 + $0xc70] sm:$0xff]  ;;  %v465_v58 = vld [vmem:[%s9863_s29 + $0xc38] sm:$0xff] }
 0x1c8   :  { %2096 = vmatpush.msra.mxu0 %v143_v44  ;;  %2119 = vmatpush.msra.mxu1 %v255_v47  ;;  %v122_v44 = vld [vmem:[%s9863_s29 + $0x180] sm:$0xff] }
 0x1c9   :  { %2142 = vmatpush.msra.mxu2 %v367_v10  ;;  %2165 = vmatpush.msra.mxu3 %v479_v18  ;;  %v234_v47 = vld [vmem:[%s9863_s29 + $0x500] sm:$0xff]  ;;  %v1050_v10 = vadd.f32 %v6911_v56, %v1027_v20  ;;  %v115_v56 = vld [vmem:[%s9863_s29 + $0x148] sm:$0xff] }
 0x1ca   :  { %2097 = vmatpush.msra.mxu0 %v136_v27  ;;  %2120 = vmatpush.msra.mxu1 %v248_v19  ;;  %v346_v18 = vld [vmem:[%s9863_s29 + $0x880] sm:$0xff]  ;;  %v1211_v19 = vadd.f32 %v7184_v25, %v1188_v43  ;;  %v227_v20 = vld [vmem:[%s9863_s29 + $0x4c8] sm:$0xff] }
 0x1cb   :  { %2143 = vmatpush.msra.mxu2 %v360_v46  ;;  %2166 = vmatpush.msra.mxu3 %v472_v36  ;;  %v458_v27 = vld [vmem:[%s9863_s29 + $0xc00] sm:$0xff]  ;;  %v7726_v46 = vpop.f32.mrf.mxu2  ;;  %v974_v36 = vperm.slane %v7610_v53, 2  ;;  %v339_v25 = vld [vmem:[%s9863_s29 + $0x848] sm:$0xff] }
 0x1cc   :  { %2098 = vmatpush.msra.mxu0 %v129_v50  ;;  %2121 = vmatpush.msra.mxu1 %v241_v49  ;;  %v451_v43 = vld [vmem:[%s9863_s29 + $0xbc8] sm:$0xff]  ;;  %v975_v50 = vperm.slane %v7610_v53, 3  ;;  %v7742_v49 = vpop.f32.mrf.mxu0 }
 0x1cd   :  { %2144 = vmatpush.msra.mxu2 %v353_v9  ;;  %2167 = vmatpush.msra.mxu3 %v465_v58  ;;  %v108_v9 = vld [vmem:[%s9863_s29 + $0x110] sm:$0xff] }
 0x1ce   :  { %2099 = vmatpush.msra.mxu0 %v122_v44  ;;  %2122 = vmatpush.msra.mxu1 %v234_v47  ;;  %v220_v58 = vld [vmem:[%s9863_s29 + $0x490] sm:$0xff]  ;;  %v1073_v44 = vadd.f32 %v6942_v2, %v1050_v10  ;;  %v7758_v55 = vpop.f32.mrf.mxu3  ;;  %v101_v2 = vld [vmem:[%s9863_s29 + $0xd8] sm:$0xff] }
 0x1cf   :  { %2145 = vmatpush.msra.mxu2 %v346_v18  ;;  %2168 = vmatpush.msra.mxu3 %v458_v27  ;;  %v332_v47 = vld [vmem:[%s9863_s29 + $0x810] sm:$0xff]  ;;  %v1234_v27 = vadd.f32 %v7222_v63, %v1211_v19  ;;  %v213_v10 = vld [vmem:[%s9863_s29 + $0x458] sm:$0xff] }
 0x1d0   :  { %2100 = vmatpush.msra.mxu0 %v115_v56  ;;  %2123 = vmatpush.msra.mxu1 %v227_v20  ;;  %v444_v18 = vld [vmem:[%s9863_s29 + $0xb90] sm:$0xff]  ;;  %v1372_v56 = vadd.f32 %v7428_v57, %v974_v36  ;;  %v325_v63 = vld [vmem:[%s9863_s29 + $0x7d8] sm:$0xff]  ;;  %v1556_v20 = vadd.f32 %v7664_v31, %v975_v50  ;;  %v94_v57 = vld [vmem:[%s9863_s29 + $0xa0] sm:$0xff] }
 0x1d1   :  { %2146 = vmatpush.msra.mxu2 %v339_v25  ;;  %2169 = vmatpush.msra.mxu3 %v451_v43  ;;  %v437_v19 = vld [vmem:[%s9863_s29 + $0xb58] sm:$0xff]  ;;  %v7778_v25 = vpop.f32.mrf.mxu1  ;;  %v206_v43 = vld [vmem:[%s9863_s29 + $0x420] sm:$0xff] }
 0x1d2   :  { %2101 = vmatpush.msra.mxu0 %v108_v9  ;;  %2124 = vmatpush.msra.mxu1 %v220_v58  ;;  %v1007_v9 = vadd.f32 %v6925_v62, %v972_v15  ;;  %v1096_v58 = vadd.f32 %v7005_v21, %v1073_v44  ;;  %v318_v31 = vld [vmem:[%s9863_s29 + $0x7a0] sm:$0xff]  ;;  %v87_v62 = vld [vmem:[%s9863_s29 + $0x68] sm:$0xff]  ;;  %v1395_v15 = vadd.f32 %v7453_v7, %v1372_v56  ;;  %v80_v7 = vld [vmem:[%s9863_s29 + $0x30] sm:$0xff] }
 0x1d3   :  { %2147 = vmatpush.msra.mxu2 %v332_v47  ;;  %2170 = vmatpush.msra.mxu3 %v444_v18  ;;  %v430_v47 = vld [vmem:[%s9863_s29 + $0xb20] sm:$0xff]  ;;  %v1257_v18 = vadd.f32 %v7250_v0, %v1234_v27  ;;  %v199_v21 = vld [vmem:[%s9863_s29 + $0x3e8] sm:$0xff]  ;;  %v1579_v27 = vadd.f32 %v7698_v8, %v1556_v20  ;;  %v304_v8 = vld [vmem:[%s9863_s29 + $0x730] sm:$0xff]  ;;  %v9866_v20 = vperm.slane %v7610_v53, 1 }
 0x1d4   :  { %2102 = vmatpush.msra.mxu0 %v101_v2  ;;  %2125 = vmatpush.msra.mxu1 %v213_v10  ;;  %v311_v44 = vld [vmem:[%s9863_s29 + $0x768] sm:$0xff]  ;;  %v7811_v2 = vpop.f32.mrf.mxu2  ;;  %v192_v10 = vld [vmem:[%s9863_s29 + $0x3b0] sm:$0xff]  ;;  %v1030_v56 = vadd.f32 %v6962_v35, %v1007_v9  ;;  %v633_v35 = vld [vmem:[%s9863_s29 + $0x1178] sm:$0xff]  ;;  %v1418_v9 = vadd.f32 %v7472_v38, %v1395_v15 }
 0x1d5   :  { %2148 = vmatpush.msra.mxu2 %v325_v63  ;;  %2171 = vmatpush.msra.mxu3 %v437_v19  ;;  %v423_v0 = vld [vmem:[%s9863_s29 + $0xae8] sm:$0xff]  ;;  %v1119_v63 = vadd.f32 %v7042_v61, %v1096_v58  ;;  %v416_v19 = vld [vmem:[%s9863_s29 + $0xab0] sm:$0xff]  ;;  %v745_v61 = vld [vmem:[%s9863_s29 + $0x14f8] sm:$0xff]  ;;  %v1375_v58 = vadd.f32 %v7487_v3, %v974_v36  ;;  %v1559_v3 = vadd.f32 %v7742_v49, %v975_v50 }
 0x1d6   :  { %2103 = vmatpush.msra.mxu0 %v94_v57  ;;  %2126 = vmatpush.msra.mxu1 %v206_v43  ;;  %v1191_v57 = vadd.f32 %v7236_v51, %v9866_v20  ;;  %v1280_v43 = vadd.f32 %v7304_v40, %v1257_v18  ;;  %v857_v51 = vld [vmem:[%s9863_s29 + $0x1878] sm:$0xff]  ;;  %v7848_v18 = vpop.f32.mrf.mxu3  ;;  %v626_v38 = vld [vmem:[%s9863_s29 + $0x1140] sm:$0xff]  ;;  %v731_v50 = vld [vmem:[%s9863_s29 + $0x1488] sm:$0xff]  ;;  %v1441_v49 = vadd.f32 %v7502_v59, %v1418_v9 }
 0x1d7   :  { %2149 = vmatpush.msra.mxu2 %v318_v31  ;;  %2172 = vmatpush.msra.mxu3 %v430_v47  ;;  %v1647_v31 = vpop.f32.mrf.mxu0  ;;  %v969_v40 = vld [vmem:[%s9863_s29 + $0x1bf8] sm:$0xff]  ;;  %v1602_v47 = vadd.f32 %v7726_v46, %v1579_v27  ;;  %v1142_v15 = vadd.f32 %v7071_v45, %v1119_v63  ;;  %v850_v46 = vld [vmem:[%s9863_s29 + $0x1840] sm:$0xff]  ;;  %v619_v45 = vld [vmem:[%s9863_s29 + $0x1108] sm:$0xff]  ;;  %v1398_v27 = vadd.f32 %v7513_v11, %v1375_v58 }
 0x1d8   :  { %2104 = vmatpush.msra.mxu0 %v87_v62  ;;  %2127 = vmatpush.msra.mxu1 %v199_v21  ;;  %v738_v62 = vld [vmem:[%s9863_s29 + $0x14c0] sm:$0xff]  ;;  %v1053_v21 = vadd.f32 %v6991_v12, %v1030_v56  ;;  %v1303_v12 = vadd.f32 %v7332_v24, %v1280_v43  ;;  %v955_v24 = vld [vmem:[%s9863_s29 + $0x1b88] sm:$0xff]  ;;  %v612_v59 = vld [vmem:[%s9863_s29 + $0x10d0] sm:$0xff] }
 0x1d9   :  { %2150 = vmatpush.msra.mxu2 %v311_v44  ;;  %2173 = vmatpush.msra.mxu3 %v423_v0  ;;  %v962_v36 = vld [vmem:[%s9863_s29 + $0x1bc0] sm:$0xff]  ;;  %v1214_v44 = vadd.f32 %v7264_v5, %v1191_v57  ;;  %v1670_v0 = vpop.f32.mrf.mxu1  ;;  %v843_v5 = vld [vmem:[%s9863_s29 + $0x1808] sm:$0xff]  ;;  %v7892_v63 = vadd.f32 %v7102_v23, %v1142_v15  ;;  %v836_v11 = vld [vmem:[%s9863_s29 + $0x17d0] sm:$0xff]  ;;  %v1464_v57 = vadd.f32 %v7547_v14, %v1441_v49 }
 0x1da   :  { %2105 = vmatpush.msra.mxu0 %v80_v7  ;;  %2128 = vmatpush.msra.mxu1 %v192_v10  ;;  %v1625_v7 = vadd.f32 %v7758_v55, %v1602_v47  ;;  %v724_v10 = vld [vmem:[%s9863_s29 + $0x1450] sm:$0xff]  ;;  %v1076_v56 = vadd.f32 %v7022_v26, %v1053_v21  ;;  %v1326_v20 = vadd.f32 %v7358_v29, %v1303_v12  ;;  %v605_v23 = vld [vmem:[%s9863_s29 + $0x1098] sm:$0xff]  ;;  %v598_v14 = vld [vmem:[%s9863_s29 + $0x1060] sm:$0xff] }
 0x1db   :  { %2151 = vmatpush.msra.mxu2 %v304_v8  ;;  %2174 = vmatpush.msra.mxu3 %v416_v19  ;;  %v1582_v8 = vadd.f32 %v7778_v25, %v1559_v3  ;;  %v948_v55 = vld [vmem:[%s9863_s29 + $0x1b50] sm:$0xff]  ;;  %v1237_v19 = vadd.f32 %v7290_v30, %v1214_v44  ;;  %v717_v25 = vld [vmem:[%s9863_s29 + $0x1418] sm:$0xff]  ;;  %v1421_v43 = vadd.f32 %v7532_v52, %v1398_v27  ;;  %v710_v9 = vld [vmem:[%s9863_s29 + $0x13e0] sm:$0xff] }
 0x1dc   :  { %2182 = vmatpush.msrb.mxu0 %v633_v35  ;;  %2205 = vmatpush.msrb.mxu1 %v745_v61  ;;  %v1693_v26 = vpop.f32.mrf.mxu2  ;;  %v829_v30 = vld [vmem:[%s9863_s29 + $0x1798] sm:$0xff]  ;;  %v1648_v35 = vadd.f32 %v1647_v31, %v1625_v7  ;;  %v822_v52 = vld [vmem:[%s9863_s29 + $0x1760] sm:$0xff]  ;;  %v1487_v21 = vadd.f32 %v7573_v17, %v1464_v57  ;;  %v584_v17 = vld [vmem:[%s9863_s29 + $0xff0] sm:$0xff] }
 0x1dd   :  { %2228 = vmatpush.msrb.mxu2 %v857_v51  ;;  %2251 = vmatpush.msrb.mxu3 %v969_v40  ;;  %v941_v29 = vld [vmem:[%s9863_s29 + $0x1b18] sm:$0xff]  ;;  %v4395_v51 = vmul.f32 -1.442695, %v7892_v63  ;;  %v1099_v40 = vadd.f32 %v7085_v16, %v1076_v56  ;;  %v1605_v58 = vadd.f32 %v7811_v2, %v1582_v8  ;;  %v934_v31 = vld [vmem:[%s9863_s29 + $0x1ae0] sm:$0xff]  ;;  %v1260_v47 = vadd.f32 %v7318_v13, %v1237_v19  ;;  %v591_v16 = vld [vmem:[%s9863_s29 + $0x1028] sm:$0xff] }
 0x1de   :  { %2183 = vmatpush.msrb.mxu0 %v626_v38  ;;  %2206 = vmatpush.msrb.mxu1 %v738_v62  ;;  %v7934_v38 = vadd.f32 %v7386_v54, %v1326_v20  ;;  %v1716_v62 = vpop.f32.mrf.mxu3  ;;  %v703_v2 = vld [vmem:[%s9863_s29 + $0x13a8] sm:$0xff]  ;;  %v1444_v15 = vadd.f32 %v7562_v1, %v1421_v43  ;;  %v1671_v3 = vadd.f32 %v1670_v0, %v1648_v35  ;;  %v808_v1 = vld [vmem:[%s9863_s29 + $0x16f0] sm:$0xff]  ;;  %v689_v49 = vld [vmem:[%s9863_s29 + $0x1338] sm:$0xff] }
 0x1df   :  { %2229 = vmatpush.msrb.mxu2 %v850_v46  ;;  %2252 = vmatpush.msrb.mxu3 %v962_v36  ;;  %v1650_v61 = vpop.f32.mrf.mxu0  ;;  %v815_v13 = vld [vmem:[%s9863_s29 + $0x1728] sm:$0xff]  ;;  %v696_v36 = vld [vmem:[%s9863_s29 + $0x1370] sm:$0xff]  ;;  %4464 = vpow2.f32 %v4395_v51  ;;  %v1122_v44 = vadd.f32 %v7122_v60, %v1099_v40  ;;  %v1628_v12 = vadd.f32 %v7848_v18, %v1605_v58  ;;  %v1510_v60 = vadd.f32 %v7592_v42, %v1487_v21  ;;  %v577_v18 = vld [vmem:[%s9863_s29 + $0xfb8] sm:$0xff] }
 0x1e0   :  { %2184 = vmatpush.msrb.mxu0 %v619_v45  ;;  %2207 = vmatpush.msrb.mxu1 %v731_v50  ;;  %v927_v54 = vld [vmem:[%s9863_s29 + $0x1aa8] sm:$0xff]  ;;  %v920_v0 = vld [vmem:[%s9863_s29 + $0x1a70] sm:$0xff]  ;;  %v4396_v45 = vmul.f32 -1.442695, %v7934_v38  ;;  %v1283_v50 = vadd.f32 %v7372_v39, %v1260_v47  ;;  %v801_v39 = vld [vmem:[%s9863_s29 + $0x16b8] sm:$0xff] }
 0x1e1   :  { %2230 = vmatpush.msrb.mxu2 %v843_v5  ;;  %2253 = vmatpush.msrb.mxu3 %v955_v24  ;;  %v1673_v46 = vpop.f32.mrf.mxu1  ;;  %v1467_v5 = vadd.f32 %v7612_v32, %v1444_v15  ;;  %v1694_v24 = vadd.f32 %v1693_v26, %v1671_v3  ;;  %v913_v42 = vld [vmem:[%s9863_s29 + $0x1a38] sm:$0xff]  ;;  %v4654_v32 = vld [vmem:[%s9864_s25] sm:$0xff]  ;;  %v4655_v56 = vld [vmem:[%s9864_s25 + $0x10] sm:$0xff]  ;;  %v7995_v19 = vadd.f32 %v7627_v41, %v1510_v60 }
 0x1e2   :  { %2185 = vmatpush.msrb.mxu0 %v612_v59  ;;  %2208 = vmatpush.msrb.mxu1 %v724_v10  ;;  %v1145_v59 = vadd.f32 %v7151_v33, %v1122_v44  ;;  %v1651_v10 = vadd.f32 %v1650_v61, %v1628_v12  ;;  %4466 = vpow2.f32 %v4396_v45  ;;  %v1306_v8 = vadd.f32 %v7400_v34, %v1283_v50  ;;  %v570_v33 = vld [vmem:[%s9863_s29 + $0xf80] sm:$0xff]  ;;  %v4656_v41 = vld [vmem:[%s9864_s25 + $0x8] sm:$0xff]  ;;  %v4657_v57 = vld [vmem:[%s9864_s25 + $0x18] sm:$0xff] }
 0x1e3   :  { %2231 = vmatpush.msrb.mxu2 %v836_v11  ;;  %2254 = vmatpush.msrb.mxu3 %v948_v55  ;;  %v682_v11 = vld [vmem:[%s9863_s29 + $0x1300] sm:$0xff]  ;;  %v1490_v26 = vadd.f32 %v7639_v37, %v1467_v5  ;;  %v675_v37 = vld [vmem:[%s9863_s29 + $0x12c8] sm:$0xff]  ;;  %v976_v61 = vperm.slane %v7610_v53, 4  ;;  %v668_v58 = vld [vmem:[%s9863_s29 + $0x1290] sm:$0xff] }
 0x1e4   :  { %2186 = vmatpush.msrb.mxu0 %v605_v23  ;;  %2209 = vmatpush.msrb.mxu1 %v717_v25  ;;  %v1696_v27 = vpop.f32.mrf.mxu2  ;;  %v794_v34 = vld [vmem:[%s9863_s29 + $0x1680] sm:$0xff]  ;;  %v8004_v23 = vadd.f32 %v1716_v62, %v1694_v24  ;;  %v8019_v43 = vadd.f32 %v7182_v22, %v1145_v59  ;;  %v1674_v35 = vadd.f32 %v1673_v46, %v1651_v10  ;;  %v556_v22 = vld [vmem:[%s9863_s29 + $0xf10] sm:$0xff]  ;;  %v549_v15 = vld [vmem:[%s9863_s29 + $0xed8] sm:$0xff] }
 0x1e5   :  { %2232 = vmatpush.msrb.mxu2 %v829_v30  ;;  %2255 = vmatpush.msrb.mxu3 %v941_v29  ;;  %v4465_v55 = vpop.eup %4464  ;;  %v906_v20 = vld [vmem:[%s9863_s29 + $0x1a00] sm:$0xff]  ;;  %v563_v29 = vld [vmem:[%s9863_s29 + $0xf48] sm:$0xff]  ;;  %v1329_v40 = vadd.f32 %v7426_v28, %v1306_v8  ;;  %v892_v28 = vld [vmem:[%s9863_s29 + $0x1990] sm:$0xff]  ;;  %v1513_v62 = vadd.f32 %v7662_v6, %v1490_v26 }
 0x1e6   :  { %2187 = vmatpush.msrb.mxu0 %v598_v14  ;;  %2210 = vmatpush.msrb.mxu1 %v710_v9  ;;  %v1719_v25 = vpop.f32.mrf.mxu3  ;;  %v787_v14 = vld [vmem:[%s9863_s29 + $0x1648] sm:$0xff]  ;;  %v8028_v51 = vadd.f32 1.0, %v4465_v55  ;;  %v4402_v21 = vmul.f32 -1.442695, %v8019_v43  ;;  %v661_v6 = vld [vmem:[%s9863_s29 + $0x1258] sm:$0xff]  ;;  %v4658_v12 = vld [vmem:[%s9864_s25 + $0x40] sm:$0xff] }
 0x1e7   :  { %2233 = vmatpush.msrb.mxu2 %v822_v52  ;;  %2256 = vmatpush.msrb.mxu3 %v934_v31  ;;  %v1739_v7 = vpop.f32.mrf.mxu0  ;;  %v899_v9 = vld [vmem:[%s9863_s29 + $0x19c8] sm:$0xff]  ;;  %v4397_v52 = vmul.f32 -1.442695, %v7995_v19  ;;  %v780_v31 = vld [vmem:[%s9863_s29 + $0x1610] sm:$0xff]  ;;  %v8057_v3 = vadd.f32 %v7451_v4, %v1329_v40  ;;  %v773_v46 = vld [vmem:[%s9863_s29 + $0x15d8] sm:$0xff] }
 0x1e8   :  { %2188 = vmatpush.msrb.mxu0 %v591_v16  ;;  %2211 = vmatpush.msrb.mxu1 %v703_v2  ;;  %v4467_v47 = vpop.eup %4466  ;;  %v4398_v16 = vmul.f32 -1.442695, %v8004_v23  ;;  %4468 = vrcp.f32 %v8028_v51  ;;  %v4659_v4 = vld [vmem:[%s9864_s25 + $0x50] sm:$0xff]  ;;  %v542_v45 = vld [vmem:[%s9863_s29 + $0xea0] sm:$0xff]  ;;  %v4660_v24 = vld [vmem:[%s9864_s25 + $0x48] sm:$0xff]  ;;  %vm2335_vm0 = vweird.f32 %v8028_v51 }
 0x1e9   :  { %2234 = vmatpush.msrb.mxu2 %v815_v13  ;;  %2257 = vmatpush.msrb.mxu3 %v927_v54  ;;  %v1762_v30 = vpop.f32.mrf.mxu1  ;;  %v1697_v13 = vadd.f32 %v1696_v27, %v1674_v35  ;;  %v1740_v54 = vadd.f32 %v1739_v7, %v976_v61  ;;  %v8065_v44 = vadd.f32 1.0, %v4467_v47  ;;  %4470 = vpow2.f32 %v4397_v52  ;;  %v654_v50 = vld [vmem:[%s9863_s29 + $0x1220] sm:$0xff]  ;;  %v4661_v27 = vld [vmem:[%s9864_s25 + $0x58] sm:$0xff]  ;;  %v647_v7 = vld [vmem:[%s9863_s29 + $0x11e8] sm:$0xff] }
 0x1ea   :  { %2189 = vmatpush.msrb.mxu0 %v584_v17  ;;  %2212 = vmatpush.msrb.mxu1 %v696_v36  ;;  %v885_v17 = vld [vmem:[%s9863_s29 + $0x1958] sm:$0xff]  ;;  %4472 = vpow2.f32 %v4398_v16  ;;  %v4403_v5 = vmul.f32 -1.442695, %v8057_v3  ;;  %v759_v59 = vld [vmem:[%s9863_s29 + $0x1568] sm:$0xff]  ;;  %v528_v8 = vld [vmem:[%s9863_s29 + $0xe30] sm:$0xff] }
 0x1eb   :  { %2235 = vmatpush.msrb.mxu2 %v808_v1  ;;  %2258 = vmatpush.msrb.mxu3 %v920_v0  ;;  %v8074_v1 = vadd.f32 %v7696_v48, %v1513_v62  ;;  %4474 = vpow2.f32 %v4402_v21  ;;  %v8082_v60 = vadd.f32 %v1719_v25, %v1697_v13  ;;  %v766_v48 = vld [vmem:[%s9863_s29 + $0x15a0] sm:$0xff]  ;;  %v871_v10 = vld [vmem:[%s9863_s29 + $0x18e8] sm:$0xff]  ;;  %v752_v26 = vld [vmem:[%s9863_s29 + $0x1530] sm:$0xff]  ;;  %vm2350_vm3 = vweird.f32 %v8065_v44 }
 0x1ec   :  { %2106 = vmatmul.f32.vlgmr.msra.gmra.mxu0 %v4654_v32  ;;  %2152 = vmatmul.f32.vlgmr.msra.gmra.mxu2 %v4655_v56  ;;  %v1785_v2 = vpop.f32.mrf.mxu2  ;;  %4476 = vrcp.f32 %v8065_v44  ;;  %v864_v25 = vld [vmem:[%s9863_s29 + $0x18b0] sm:$0xff]  ;;  %v2599_v53 = vld [vmem:[%s9840_s3 + $0x168] sm:$0xff] }
 0x1ed   :  { %2190 = vmatpush.msrb.mxu0 %v577_v18  ;;  %2213 = vmatpush.msrb.mxu1 %v689_v49  ;;  %v1763_v18 = vadd.f32 %v1762_v30, %v1740_v54  ;;  %v878_v49 = vld [vmem:[%s9863_s29 + $0x1920] sm:$0xff]  ;;  %v4404_v56 = vmul.f32 -1.442695, %v8074_v1  ;;  %v4405_v55 = vmul.f32 -1.442695, %v8082_v60  ;;  %4478 = vpow2.f32 %v4403_v5  ;;  %v2596_v16 = vld [vmem:[%s9840_s3 + $0x150] sm:$0xff] }
 0x1ee   :  { %2236 = vmatpush.msrb.mxu2 %v801_v39  ;;  %2259 = vmatpush.msrb.mxu3 %v913_v42  ;;  %v1808_v0 = vpop.f32.mrf.mxu3  ;;  %v535_v42 = vld [vmem:[%s9863_s29 + $0xe68] sm:$0xff]  ;;  %v8110_v32 = vpop.eup %4468  ;;  %v2692_v21 = vld [vmem:[%s9840_s3 + $0x450] sm:$0xff]  ;;  %v2638_v5 = vld [vmem:[%s9840_s3 + $0x2a0] sm:$0xff] }
 0x1ef   :  { %2129 = vmatmul.f32.vlgmr.msra.gmra.mxu1 %v4656_v41  ;;  %2175 = vmatmul.f32.vlgmr.msra.gmra.mxu3 %v4657_v57  ;;  %v1742_v36 = vpop.f32.mrf.mxu0  ;;  %4480 = vpow2.f32 %v4404_v56  ;;  %v2740_v13 = vld [vmem:[%s9840_s3 + $0x5d0] sm:$0xff]  ;;  %vm2336_vm1 = vweird.f32 %v8110_v32 }
 0x1f0   :  { %2191 = vmatpush.msrb.mxu0 %v570_v33  ;;  %2214 = vmatpush.msrb.mxu1 %v682_v11  ;;  %v640_v33 = vld [vmem:[%s9863_s29 + $0x11b0] sm:$0xff]  ;;  %v4471_v11 = vpop.eup %4470  ;;  %4482 = vpow2.f32 %v4405_v55  ;;  %v2635_v55 = vld [vmem:[%s9840_s3 + $0x288] sm:$0xff]  ;;  %vm8279_vm2 = vmor %vm2335_vm0, %vm2336_vm1 }
 0x1f1   :  { %2237 = vmatpush.msrb.mxu2 %v794_v34  ;;  %2260 = vmatpush.msrb.mxu3 %v906_v20  ;;  %v1765_v39 = vpop.f32.mrf.mxu1  ;;  %v1786_v34 = vadd.f32 %v1785_v2, %v1763_v18  ;;  %v1743_v20 = vadd.f32 %v1742_v36, %v976_v61  ;;  %v4473_v41 = vpop.eup %4472  ;;  %v8136_v35 = vadd.f32 1.0, %v4471_v11  ;;  %v2695_v61 = vld [vmem:[%s9840_s3 + $0x468] sm:$0xff]  ;;  %v2644_v2 = vld [vmem:[%s9840_s3 + $0x2d0] sm:$0xff]  ;;  %v2593_v36 = vld [vmem:[%s9840_s3 + $0x138] sm:$0xff] }
 0x1f2   :  { %2192 = vmatpush.msrb.mxu0 %v563_v29  ;;  %2215 = vmatpush.msrb.mxu1 %v675_v37  ;;  %v4475_v30 = vpop.eup %4474  ;;  %v2647_v29 = vld [vmem:[%s9840_s3 + $0x2e8] sm:$0xff]  ;;  %v2331_v37 = vmul.f32 %v8110_v32, %v8028_v51  ;;  %v2737_v18 = vld [vmem:[%s9840_s3 + $0x5b8] sm:$0xff] }
 0x1f3   :  { %2238 = vmatpush.msrb.mxu2 %v787_v14  ;;  %2261 = vmatpush.msrb.mxu3 %v899_v9  ;;  %v2743_v14 = vld [vmem:[%s9840_s3 + $0x5e8] sm:$0xff]  ;;  %v8144_v40 = vpop.eup %4476  ;;  %v1766_v52 = vadd.f32 %v1765_v39, %v1743_v20  ;;  %v8154_v47 = vadd.f32 1.0, %v4475_v30  ;;  %4484 = vrcp.f32 %v8136_v35  ;;  %v2686_v39 = vld [vmem:[%s9840_s3 + $0x420] sm:$0xff]  ;;  %vm2365_vm9 = vweird.f32 %v8136_v35 }
 0x1f4   :  { %2193 = vmatpush.msrb.mxu0 %v556_v22  ;;  %2216 = vmatpush.msrb.mxu1 %v668_v58  ;;  %v1788_v57 = vpop.f32.mrf.mxu2  ;;  %v8146_v22 = vadd.f32 1.0, %v4473_v41  ;;  %v1809_v58 = vadd.f32 %v1808_v0, %v1786_v34  ;;  %v4479_v54 = vpop.eup %4478  ;;  %v2587_v11 = vld [vmem:[%s9840_s3 + $0x108] sm:$0xff]  ;;  %v4666_v30 = vld [vmem:[%s9864_s25 + $0x60] sm:$0xff]  ;;  %vm2351_vm4 = vweird.f32 %v8144_v40 }
 0x1f5   :  { %2239 = vmatpush.msrb.mxu2 %v780_v31  ;;  %2262 = vmatpush.msrb.mxu3 %v892_v28  ;;  %v4662_v31 = vld [vmem:[%s9864_s25 + $0x20] sm:$0xff]  ;;  %v4663_v28 = vld [vmem:[%s9864_s25 + $0x30] sm:$0xff]  ;;  %v1789_v0 = vadd.f32 %v1788_v57, %v1766_v52  ;;  %vm8341_vm6 = vmor %vm2350_vm3, %vm2351_vm4  ;;  %vm2440_vm7 = vweird.f32 %v8154_v47 }
 0x1f6   :  { %2109 = vmatmul.f32.gmra.mxu0 %v4658_v12  ;;  %2155 = vmatmul.f32.gmra.mxu2 %v4659_v4  ;;  %v1811_v62 = vpop.f32.mrf.mxu3  ;;  %v2641_v12 = vld [vmem:[%s9840_s3 + $0x2b8] sm:$0xff]  ;;  %4486 = vrcp.f32 %v8146_v22  ;;  %v2632_v52 = vld [vmem:[%s9840_s3 + $0x270] sm:$0xff]  ;;  %vm2380_vm11 = vweird.f32 %v8146_v22 }
 0x1f7   :  { %2194 = vmatpush.msrb.mxu0 %v549_v15  ;;  %2217 = vmatpush.msrb.mxu1 %v661_v6  ;;  %v1831_v9 = vpop.f32.mrf.mxu0  ;;  %v2332_v15 = vsub.f32 1.0, %v2331_v37  ;;  %v2346_v6 = vmul.f32 %v8144_v40, %v8065_v44  ;;  %4488 = vrcp.f32 %v8154_v47 }
 0x1f8   :  { %2240 = vmatpush.msrb.mxu2 %v773_v46  ;;  %2263 = vmatpush.msrb.mxu3 %v885_v17  ;;  %v4664_v46 = vld [vmem:[%s9864_s25 + $0x28] sm:$0xff]  ;;  %v4665_v17 = vld [vmem:[%s9864_s25 + $0x38] sm:$0xff] }
 0x1f9   :  { %2132 = vmatmul.f32.gmra.mxu1 %v4660_v24  ;;  %2178 = vmatmul.f32.gmra.mxu3 %v4661_v27  ;;  %v1854_v4 = vpop.f32.mrf.mxu1  ;;  %v8197_v27 = vadd.f32 1.0, %v4479_v54  ;;  %v4668_v54 = vld [vmem:[%s9864_s25 + $0x68] sm:$0xff] }
 0x1fa   :  { %2195 = vmatpush.msrb.mxu0 %v542_v45  ;;  %2218 = vmatpush.msrb.mxu1 %v654_v50  ;;  %v1832_v45 = vadd.f32 %v1831_v9, %v1809_v58  ;;  %v2689_v50 = vld [vmem:[%s9840_s3 + $0x438] sm:$0xff]  ;;  %v2584_v58 = vld [vmem:[%s9840_s3 + $0xf0] sm:$0xff] }
 0x1fb   :  { %2241 = vmatpush.msrb.mxu2 %v766_v48  ;;  %2264 = vmatpush.msrb.mxu3 %v878_v49  ;;  %v4481_v48 = vpop.eup %4480  ;;  %v2590_v49 = vld [vmem:[%s9840_s3 + $0x120] sm:$0xff]  ;;  %4490 = vrcp.f32 %v8197_v27  ;;  %vm2455_vm14 = vweird.f32 %v8197_v27 }
 0x1fc   :  { %2196 = vmatpush.msrb.mxu0 %v535_v42  ;;  %2219 = vmatpush.msrb.mxu1 %v647_v7  ;;  %v4483_v24 = vpop.eup %4482  ;;  %v2734_v42 = vld [vmem:[%s9840_s3 + $0x5a0] sm:$0xff]  ;;  %v2333_v7 = vmul.f32 %v8110_v32, %v2332_v15  ;;  %v8206_v56 = vadd.f32 1.0, %v4481_v48  ;;  %v4669_v15 = vld [vmem:[%s9864_s25 + $0x78] sm:$0xff] }
 0x1fd   :  { %2242 = vmatpush.msrb.mxu2 %v759_v59  ;;  %2265 = vmatpush.msrb.mxu3 %v871_v10  ;;  %v2347_v59 = vsub.f32 1.0, %v2346_v6  ;;  %v1877_v10 = vpop.f32.mrf.mxu2  ;;  %v8214_v34 = vpop.eup %4484  ;;  %v8216_v20 = vadd.f32 1.0, %v4483_v24  ;;  %v2581_v6 = vld [vmem:[%s9840_s3 + $0xd8] sm:$0xff] }
 0x1fe   :  { %2197 = vmatpush.msrb.mxu0 %v528_v8  ;;  %2220 = vmatpush.msrb.mxu1 %v640_v33  ;;  %v1812_v8 = vadd.f32 %v1811_v62, %v1789_v0  ;;  %v1855_v33 = vadd.f32 %v1854_v4, %v1832_v45  ;;  %v8224_v57 = vpop.eup %4486  ;;  %v2334_v37 = vadd.f32 %v8110_v32, %v2333_v7  ;;  %v1900_v9 = vpop.f32.mrf.mxu3  ;;  %4492 = vrcp.f32 %v8206_v56  ;;  %v2680_v62 = vld [vmem:[%s9840_s3 + $0x3f0] sm:$0xff]  ;;  %v2677_v4 = vld [vmem:[%s9840_s3 + $0x3d8] sm:$0xff] }
 0x1ff   :  { %2243 = vmatpush.msrb.mxu2 %v752_v26  ;;  %2266 = vmatpush.msrb.mxu3 %v864_v25  ;;  %v2683_v26 = vld [vmem:[%s9840_s3 + $0x408] sm:$0xff]  ;;  %v1834_v41 = vpop.f32.mrf.mxu0  ;;  %4494 = vrcp.f32 %v8216_v20  ;;  %v2725_v0 = vld [vmem:[%s9840_s3 + $0x558] sm:$0xff]  ;;  %v2356_v7 = vand.u32 2147483648, %v8065_v44  ;;  %vm2366_vm10 = vweird.f32 %v8214_v34  ;;  %vm2381_vm12 = vweird.f32 %v8224_v57 }
 0x200   :  { %2198 = vmatmul.f32.vlgmr.msrb.gmra.mxu0 %v4662_v31  ;;  %2244 = vmatmul.f32.vlgmr.msrb.gmra.mxu2 %v4663_v28  ;;  %v2731_v25 = vld [vmem:[%s9840_s3 + $0x588] sm:$0xff]  ;;  %v8248_v31 = vmul.f32 %v8214_v34, %v8136_v35  ;;  %v1878_v28 = vadd.f32 %v1877_v10, %v1855_v33  ;;  %vm8441_vm15 = vmor %vm2365_vm9, %vm2366_vm10  ;;  %vm2470_vm3 = vweird.f32 %v8206_v56 }
 0x201   :  { %2863 = vmatpush.msra.mxu0 %v2599_v53  ;;  %2886 = vmatpush.msra.mxu1 %v2647_v29  ;;  %v4667_v53 = vld [vmem:[%s9864_s25 + $0x70] sm:$0xff]  ;;  %v8234_v29 = vpop.eup %4488  ;;  %v2623_v33 = vld [vmem:[%s9840_s3 + $0x228] sm:$0xff]  ;;  %vm8463_vm0 = vmor %vm2380_vm11, %vm2381_vm12  ;;  %s4747_s25 = smov 64  }
 0x202   :  { %2909 = vmatpush.msra.mxu2 %v2695_v61  ;;  %2932 = vmatpush.msra.mxu3 %v2743_v14  ;;  %v2341_v61 = vand.u32 2147483648, %v8028_v51  ;;  %v2348_v14 = vmul.f32 %v8144_v40, %v2347_v59  ;;  %v8304_v48 = vpop.eup %4490  ;;  %vm2441_vm13 = vweird.f32 %v8234_v29 }
 0x203   :  { %2221 = vmatmul.f32.vlgmr.msrb.gmra.mxu1 %v4664_v46  ;;  %2267 = vmatmul.f32.vlgmr.msrb.gmra.mxu3 %v4665_v17  ;;  %v2629_v46 = vld [vmem:[%s9840_s3 + $0x258] sm:$0xff]  ;;  %v1857_v17 = vpop.f32.mrf.mxu1  ;;  %vm2456_vm1 = vweird.f32 %v8304_v48 }
 0x204   :  { %2864 = vmatpush.msra.mxu0 %v2596_v16  ;;  %2887 = vmatpush.msra.mxu1 %v2644_v2  ;;  %v2728_v16 = vld [vmem:[%s9840_s3 + $0x570] sm:$0xff]  ;;  %v1835_v2 = vadd.f32 %v1834_v41, %v1812_v8  ;;  %v2342_v45 = vor.u32 1.1754944e-38, %v2341_v61  ;;  %v2575_v8 = vld [vmem:[%s9840_s3 + $0xa8] sm:$0xff]  ;;  %v2384_v61 = vand.u32 2147483647, %v8146_v22 }
 0x205   :  { %2910 = vmatpush.msra.mxu2 %v2692_v21  ;;  %2933 = vmatpush.msra.mxu3 %v2740_v13  ;;  %v2339_v21 = vand.u32 2147483647, %v8028_v51  ;;  %v8260_v13 = vmul.f32 %v8224_v57, %v8146_v22  ;;  %v2338_v51 = vsel %vm8279_vm2, %v8110_v32, %v2334_v37  ;;  %v2362_v32 = vsub.f32 1.0, %v8248_v31  ;;  %v1880_v10 = vpop.f32.mrf.mxu2  ;;  %v2671_v41 = vld [vmem:[%s9840_s3 + $0x3a8] sm:$0xff] }
 0x206   :  { %2865 = vmatpush.msra.mxu0 %v2593_v36  ;;  %2888 = vmatpush.msra.mxu1 %v2641_v12  ;;  %v8285_v12 = vmul.f32 %v8234_v29, %v8154_v47  ;;  %v1858_v24 = vadd.f32 %v1857_v17, %v1835_v2  ;;  %v2444_v37 = vand.u32 2147483647, %v8154_v47  ;;  %v2665_v36 = vld [vmem:[%s9840_s3 + $0x378] sm:$0xff] }
 0x207   :  { %2911 = vmatpush.msra.mxu2 %v2689_v50  ;;  %2934 = vmatpush.msra.mxu3 %v2737_v18  ;;  %v2578_v50 = vld [vmem:[%s9840_s3 + $0xc0] sm:$0xff]  ;;  %vm2340_vm5 = vcmp.eq.f32.partialorder %v2339_v21, 8.507059e+37  ;;  %v2377_v59 = vsub.f32 1.0, %v8260_v13  ;;  %v2357_v21 = vor.u32 1.1754944e-38, %v2356_v7  ;;  %v2563_v7 = vld [vmem:[%s9840_s3 + $0x48] sm:$0xff] }
 0x208   :  { %2866 = vmatpush.msra.mxu0 %v2590_v49  ;;  %2889 = vmatpush.msra.mxu1 %v2638_v5  ;;  %v2626_v18 = vld [vmem:[%s9840_s3 + $0x240] sm:$0xff]  ;;  %v2349_v49 = vadd.f32 %v8144_v40, %v2348_v14  ;;  %v8308_v5 = vadd.f32 %v1900_v9, %v1878_v28  ;;  %v8347_v14 = vmul.f32 %v8304_v48, %v8197_v27  ;;  %v2572_v9 = vld [vmem:[%s9840_s3 + $0x90] sm:$0xff]  ;;  %vm8544_vm11 = vcmp.eq.f32.partialorder %v2444_v37, 8.507059e+37 }
 0x209   :  { %2912 = vmatpush.msra.mxu2 %v2686_v39  ;;  %2935 = vmatpush.msra.mxu3 %v2734_v42  ;;  %v2674_v39 = vld [vmem:[%s9840_s3 + $0x3c0] sm:$0xff]  ;;  %v1881_v28 = vadd.f32 %v1880_v10, %v1858_v24  ;;  %v2378_v13 = vmul.f32 %v8224_v57, %v2377_v59  ;;  %v2611_v59 = vld [vmem:[%s9840_s3 + $0x1c8] sm:$0xff]  ;;  %v2576_v37 = vld [vmem:[%s9840_s3 + $0xb0] sm:$0xff] }
 0x20a   :  { %2201 = vmatmul.f32.gmra.mxu0 %v4666_v30  ;;  %2247 = vmatmul.f32.gmra.mxu2 %v4667_v53  ;;  %v2722_v42 = vld [vmem:[%s9840_s3 + $0x540] sm:$0xff]  ;;  %v2719_v30 = vld [vmem:[%s9840_s3 + $0x528] sm:$0xff]  ;;  %v4399_v31 = vmul.f32 -1.442695, %v8308_v5 }
 0x20b   :  { %2867 = vmatpush.msra.mxu0 %v2587_v11  ;;  %2890 = vmatpush.msra.mxu1 %v2635_v55  ;;  %v8324_v11 = vpop.eup %4492  ;;  %v2343_v55 = vsel %vm2340_vm5, %v2342_v45, %v2338_v51  ;;  %v2369_v51 = vand.u32 2147483647, %v8136_v35  ;;  %v2566_v45 = vld [vmem:[%s9840_s3 + $0x60] sm:$0xff]  ;;  %vm2385_vm5 = vcmp.eq.f32.partialorder %v2384_v61, 8.507059e+37 }
 0x20c   :  { %2913 = vmatpush.msra.mxu2 %v2683_v26  ;;  %2936 = vmatpush.msra.mxu3 %v2731_v25  ;;  %v2437_v26 = vsub.f32 1.0, %v8285_v12  ;;  %v2354_v25 = vand.u32 2147483647, %v8065_v44  ;;  %v8334_v53 = vpop.eup %4494  ;;  %v2353_v44 = vsel %vm8341_vm6, %v8144_v40, %v2349_v49  ;;  %v8367_v2 = vmul.f32 %v2343_v55, %v7892_v63  ;;  %v2713_v12 = vld [vmem:[%s9840_s3 + $0x4f8] sm:$0xff]  ;;  %v2710_v24 = vld [vmem:[%s9840_s3 + $0x4e0] sm:$0xff]  ;;  %v2659_v55 = vld [vmem:[%s9840_s3 + $0x348] sm:$0xff] }
 0x20d   :  { %2224 = vmatmul.f32.gmra.mxu1 %v4668_v54  ;;  %2270 = vmatmul.f32.gmra.mxu3 %v4669_v15  ;;  %v2446_v40 = vand.u32 2147483648, %v8154_v47  ;;  %v1903_v54 = vpop.f32.mrf.mxu3  ;;  %v2569_v15 = vld [vmem:[%s9840_s3 + $0x78] sm:$0xff]  ;;  %v8385_v17 = vmul.f32 %v8334_v53, %v8216_v20  ;;  %4496 = vpow2.f32 %v4399_v31  ;;  %vm2370_vm2 = vcmp.eq.f32.partialorder %v2369_v51, 8.507059e+37  ;;  %vm8505_vm6 = vmor %vm2440_vm7, %vm2441_vm13  ;;  %v2698_v51 = vld [vmem:[%s9840_s3 + $0x480] sm:$0xff] }
 0x20e   :  { %2868 = vmatpush.msra.mxu0 %v2584_v58  ;;  %2891 = vmatpush.msra.mxu1 %v2632_v52  ;;  %v2620_v58 = vld [vmem:[%s9840_s3 + $0x210] sm:$0xff]  ;;  %v2363_v52 = vmul.f32 %v8214_v34, %v2362_v32  ;;  %v2438_v63 = vmul.f32 %v8234_v29, %v2437_v26  ;;  %vm2355_vm8 = vcmp.eq.f32.partialorder %v2354_v25, 8.507059e+37  ;;  %v8404_v49 = vadd.f32 %v1903_v54, %v1881_v28  ;;  %v2662_v32 = vld [vmem:[%s9840_s3 + $0x360] sm:$0xff]  ;;  %v2707_v26 = vld [vmem:[%s9840_s3 + $0x4c8] sm:$0xff] }
 0x20f   :  { %2914 = vmatpush.msra.mxu2 %v2680_v62  ;;  %2937 = vmatpush.msra.mxu3 %v2728_v16  ;;  %v2668_v62 = vld [vmem:[%s9840_s3 + $0x390] sm:$0xff]  ;;  %vm2471_vm4 = vweird.f32 %v8324_v11  ;;  %vm2486_vm9 = vweird.f32 %v8334_v53  ;;  %vm8522_vm7 = vmor %vm2455_vm14, %vm2456_vm1  ;;  %v2791_v47 = vld [vmem:[%s9840_s3 + $0x768] sm:$0xff] }
 0x210   :  { %2869 = vmatpush.msra.mxu0 %v2581_v6  ;;  %2892 = vmatpush.msra.mxu1 %v2629_v46  ;;  %v2716_v16 = vld [vmem:[%s9840_s3 + $0x510] sm:$0xff]  ;;  %v2617_v6 = vld [vmem:[%s9840_s3 + $0x1f8] sm:$0xff]  ;;  %v8381_v46 = vmul.f32 %v8324_v11, %v8206_v56  ;;  %v8433_v25 = vadd.f32 %v8234_v29, %v2438_v63  ;;  %v4406_v31 = vmul.f32 -1.442695, %v8404_v49  ;;  %vm8535_vm10 = vmor %vm2470_vm3, %vm2471_vm4 }
 0x211   :  { %2915 = vmatpush.msra.mxu2 %v2677_v4  ;;  %2938 = vmatpush.msra.mxu3 %v2725_v0  ;;  %v2358_v4 = vsel %vm2355_vm8, %v2357_v21, %v2353_v44  ;;  %v2452_v0 = vsub.f32 1.0, %v8347_v14  ;;  %v2560_v14 = vld [vmem:[%s9840_s3 + $0x30] sm:$0xff]  ;;  %v2605_v21 = vld [vmem:[%s9840_s3 + $0x198] sm:$0xff]  ;;  %vm2485_vm8 = vweird.f32 %v8216_v20 }
 0x212   :  { %2870 = vmatpush.msra.mxu0 %v2578_v50  ;;  %2893 = vmatpush.msra.mxu1 %v2626_v18  ;;  %v2614_v50 = vld [vmem:[%s9840_s3 + $0x1e0] sm:$0xff]  ;;  %v2364_v18 = vadd.f32 %v8214_v34, %v2363_v52  ;;  %v2467_v10 = vsub.f32 1.0, %v8381_v46  ;;  %v2701_v63 = vld [vmem:[%s9840_s3 + $0x498] sm:$0xff]  ;;  %4498 = vpow2.f32 %v4406_v31  ;;  %vm8560_vm12 = vmor %vm2485_vm8, %vm2486_vm9 }
 0x213   :  { %2916 = vmatpush.msra.mxu2 %v2674_v39  ;;  %2939 = vmatpush.msra.mxu3 %v2722_v42  ;;  %v2371_v39 = vand.u32 2147483648, %v8136_v35  ;;  %v2379_v42 = vadd.f32 %v8224_v57, %v2378_v13  ;;  %v2461_v35 = vand.u32 2147483648, %v8197_v27  ;;  %v2453_v28 = vmul.f32 %v8304_v48, %v2452_v0  ;;  %v4497_v13 = vpop.eup %4496  ;;  %v2650_v0 = vld [vmem:[%s9840_s3 + $0x300] sm:$0xff] }
 0x214   :  { %2871 = vmatpush.msra.mxu0 %v2575_v8  ;;  %2894 = vmatpush.msra.mxu1 %v2623_v33  ;;  %v2386_v8 = vand.u32 2147483648, %v8146_v22  ;;  %v2482_v33 = vsub.f32 1.0, %v8385_v17  ;;  %v2368_v44 = vsel %vm8441_vm15, %v8214_v34, %v2364_v18  ;;  %v2704_v34 = vld [vmem:[%s9840_s3 + $0x4b0] sm:$0xff]  ;;  %v2468_v54 = vmul.f32 %v8324_v11, %v2467_v10  ;;  %v2554_v17 = vld [vmem:[%s9840_s3] sm:$0xff] }
 0x215   :  { %2917 = vmatpush.msra.mxu2 %v2671_v41  ;;  %2940 = vmatpush.msra.mxu3 %v2719_v30  ;;  %v2459_v41 = vand.u32 2147483647, %v8197_v27  ;;  %v2372_v22 = vor.u32 1.1754944e-38, %v2371_v39  ;;  %v2476_v18 = vand.u32 2147483648, %v8206_v56  ;;  %v2489_v10 = vand.u32 2147483647, %v8216_v20 }
 0x216   :  { %2872 = vmatpush.msra.mxu0 %v2572_v9  ;;  %2895 = vmatpush.msra.mxu1 %v2620_v58  ;;  %v2608_v9 = vld [vmem:[%s9840_s3 + $0x1b0] sm:$0xff]  ;;  %v8453_v58 = vmul.f32 %v2358_v4, %v7934_v38  ;;  %v2469_v39 = vadd.f32 %v8324_v11, %v2468_v54  ;;  %v2839_v30 = vld [vmem:[%s9840_s3 + $0x8e8] sm:$0xff] }
 0x217   :  { %2918 = vmatpush.msra.mxu2 %v2668_v62  ;;  %2941 = vmatpush.msra.mxu3 %v2716_v16  ;;  %v2656_v38 = vld [vmem:[%s9840_s3 + $0x330] sm:$0xff]  ;;  %v2383_v62 = vsel %vm8463_vm0, %v8224_v57, %v2379_v42  ;;  %v2557_v16 = vld [vmem:[%s9840_s3 + $0x18] sm:$0xff]  ;;  %v2373_v46 = vsel %vm2370_vm2, %v2372_v22, %v2368_v44  ;;  %vm8576_vm13 = vcmp.eq.f32.partialorder %v2459_v41, 8.507059e+37  ;;  %v2477_v41 = vor.u32 1.1754944e-38, %v2476_v18  ;;  %v2827_v18 = vld [vmem:[%s9840_s3 + $0x888] sm:$0xff] }
 0x218   :  { %2873 = vmatpush.msra.mxu0 %v2569_v15  ;;  %2896 = vmatpush.msra.mxu1 %v2617_v6  ;;  %v2387_v15 = vor.u32 1.1754944e-38, %v2386_v8  ;;  %v2483_v6 = vmul.f32 %v8334_v53, %v2482_v33  ;;  %v2653_v57 = vld [vmem:[%s9840_s3 + $0x318] sm:$0xff]  ;;  %v2447_v33 = vor.u32 1.1754944e-38, %v2446_v40  ;;  %v2462_v40 = vor.u32 1.1754944e-38, %v2461_v35  ;;  %v4499_v35 = vpop.eup %4498 }
 0x219   :  { %2919 = vmatpush.msra.mxu2 %v2665_v36  ;;  %2942 = vmatpush.msra.mxu3 %v2713_v12  ;;  %v2602_v36 = vld [vmem:[%s9840_s3 + $0x180] sm:$0xff]  ;;  %vm8615_vm15 = vcmp.eq.f32.partialorder %v2489_v10, 8.507059e+37  ;;  %v2761_v44 = vld [vmem:[%s9840_s3 + $0x678] sm:$0xff] }
 0x21a   :  { %2874 = vmatpush.msra.mxu0 %v2566_v45  ;;  %2897 = vmatpush.msra.mxu1 %v2614_v50  ;;  %v2388_v4 = vsel %vm2385_vm5, %v2387_v15, %v2383_v62  ;;  %v2454_v45 = vadd.f32 %v8304_v48, %v2453_v28  ;;  %v2594_v28 = vld [vmem:[%s9840_s3 + $0x140] sm:$0xff]  ;;  %v8641_v15 = vadd.f32 1.0, %v4499_v35  ;;  %v2585_v50 = vld [vmem:[%s9840_s3 + $0xf8] sm:$0xff]  ;;  %v2815_v35 = vld [vmem:[%s9840_s3 + $0x828] sm:$0xff] }
 0x21b   :  { %2920 = vmatpush.msra.mxu2 %v2662_v32  ;;  %2943 = vmatpush.msra.mxu3 %v2710_v24  ;;  %v2491_v32 = vand.u32 2147483648, %v8216_v20  ;;  %v8528_v24 = vadd.f32 1.0, %v4497_v13  ;;  %v2443_v20 = vsel %vm8505_vm6, %v8234_v29, %v8433_v25  ;;  %v8590_v29 = vld [vmem:[%s9865_s21] sm:$0x7f]  ;;  %s4748_s21 = smov 32  }
 0x21c   :  { %2875 = vmatpush.msra.mxu0 %v2563_v7  ;;  %2898 = vmatpush.msra.mxu1 %v2611_v59  ;;  %v2474_v7 = vand.u32 2147483647, %v8206_v56  ;;  %v2484_v59 = vadd.f32 %v8334_v53, %v2483_v6  ;;  %v8554_v56 = vmul.f32 %v2388_v4, %v8004_v23  ;;  %v977_v25 = vperm.slane %v8590_v29, 5  ;;  %v2782_v6 = vld [vmem:[%s9840_s3 + $0x720] sm:$0xff] }
 0x21d   :  { %2921 = vmatpush.msra.mxu2 %v2659_v55  ;;  %2944 = vmatpush.msra.mxu3 %v2707_v26  ;;  %v8551_v55 = vmul.f32 %v2373_v46, %v7995_v19  ;;  %v2600_v19 = vld [vmem:[%s9840_s3 + $0x170] sm:$0xff]  ;;  %v2458_v27 = vsel %vm8522_vm7, %v8304_v48, %v2454_v45  ;;  %v2492_v61 = vor.u32 1.1754944e-38, %v2491_v32  ;;  %4500 = vrcp.f32 %v8528_v24  ;;  %v2773_v32 = vld [vmem:[%s9840_s3 + $0x6d8] sm:$0xff]  ;;  %v2579_v26 = vld [vmem:[%s9840_s3 + $0xc8] sm:$0xff] }
 0x21e   :  { %2876 = vmatpush.msra.mxu0 %v2560_v14  ;;  %2899 = vmatpush.msra.mxu1 %v2608_v9  ;;  %v2788_v14 = vld [vmem:[%s9840_s3 + $0x750] sm:$0xff]  ;;  %v2597_v9 = vld [vmem:[%s9840_s3 + $0x158] sm:$0xff]  ;;  %v2473_v48 = vsel %vm8535_vm10, %v8324_v11, %v2469_v39  ;;  %vm8608_vm14 = vcmp.eq.f32.partialorder %v2474_v7, 8.507059e+37  ;;  %v2488_v52 = vsel %vm8560_vm12, %v8334_v53, %v2484_v59  ;;  %v2448_v22 = vsel %vm8544_vm11, %v2447_v33, %v2443_v20  ;;  %v2582_v39 = vld [vmem:[%s9840_s3 + $0xe0] sm:$0xff] }
 0x21f   :  { %2922 = vmatpush.msra.mxu2 %v2656_v38  ;;  %2945 = vmatpush.msra.mxu3 %v2704_v34  ;;  %v2836_v38 = vld [vmem:[%s9840_s3 + $0x8d0] sm:$0xff]  ;;  %v2785_v11 = vld [vmem:[%s9840_s3 + $0x738] sm:$0xff]  ;;  %v2463_v62 = vsel %vm8576_vm13, %v2462_v40, %v2458_v27  ;;  %v2478_v13 = vsel %vm8608_vm14, %v2477_v41, %v2473_v48  ;;  %v2493_v54 = vsel %vm8615_vm15, %v2492_v61, %v2488_v52  ;;  %4502 = vrcp.f32 %v8641_v15  ;;  %v2770_v33 = vld [vmem:[%s9840_s3 + $0x6c0] sm:$0xff] }
 0x220   :  { %2877 = vmatpush.msra.mxu0 %v2557_v16  ;;  %2900 = vmatpush.msra.mxu1 %v2605_v21  ;;  %v2833_v16 = vld [vmem:[%s9840_s3 + $0x8b8] sm:$0xff]  ;;  %v8658_v12 = vmul.f32 %v2478_v13, %v8074_v1  ;;  %v8661_v4 = vmul.f32 %v2493_v54, %v8082_v60  ;;  %v2776_v45 = vld [vmem:[%s9840_s3 + $0x6f0] sm:$0xff]  ;;  %v2767_v20 = vld [vmem:[%s9840_s3 + $0x6a8] sm:$0xff]  ;;  %vm2395_vm0 = vweird.f32 %v8528_v24  ;;  %vm2500_vm4 = vweird.f32 %v8641_v15 }
 0x221   :  { %2923 = vmatpush.msra.mxu2 %v2653_v57  ;;  %2946 = vmatpush.msra.mxu3 %v2701_v63  ;;  %v2591_v57 = vld [vmem:[%s9840_s3 + $0x128] sm:$0xff]  ;;  %v2824_v59 = vld [vmem:[%s9840_s3 + $0x870] sm:$0xff]  ;;  %v2570_v52 = vld [vmem:[%s9840_s3 + $0x80] sm:$0xff] }
 0x222   :  { %2878 = vmatpush.msra.mxu0 %v2554_v17  ;;  %2901 = vmatpush.msra.mxu1 %v2602_v36  ;;  %v8652_v17 = vmul.f32 %v2448_v22, %v8019_v43  ;;  %v8655_v36 = vmul.f32 %v2463_v62, %v8057_v3  ;;  %v2588_v43 = vld [vmem:[%s9840_s3 + $0x110] sm:$0xff]  ;;  %v2830_v3 = vld [vmem:[%s9840_s3 + $0x8a0] sm:$0xff] }
 0x223   :  { %2924 = vmatpush.msra.mxu2 %v2650_v0  ;;  %2947 = vmatpush.msra.mxu3 %v2698_v51  ;;  %v1923_v23 = vpop.f32.mrf.mxu0  ;;  %v8649_v46 = vpop.eup %4500  ;;  %v2779_v0 = vld [vmem:[%s9840_s3 + $0x708] sm:$0xff]  ;;  %v2764_v61 = vld [vmem:[%s9840_s3 + $0x690] sm:$0xff] }
 0x224   :  { %2879 = vmatmul.f32.vlgmr.msra.gmra.mxu0 %v8367_v2  ;;  %2902 = vmatmul.f32.vlgmr.msra.gmra.mxu1 %v8453_v58  ;;  %v1924_v21 = vadd.f32 %v1923_v23, %v977_v25  ;;  %v2391_v60 = vmul.f32 %v8649_v46, %v8528_v24  ;;  %v2821_v23 = vld [vmem:[%s9840_s3 + $0x858] sm:$0xff]  ;;  %vm2396_vm1 = vweird.f32 %v8649_v46 }
 0x225   :  { %2925 = vmatmul.f32.vlgmr.msra.gmra.mxu2 %v8551_v55  ;;  %2948 = vmatmul.f32.vlgmr.msra.gmra.mxu3 %v8554_v56  ;;  %vm8764_vm2 = vmor %vm2395_vm0, %vm2396_vm1 }
 0x226   :  { %2955 = vmatpush.msrb.mxu0 %v2791_v47  ;;  %3024 = vmatpush.msrb.mxu3 %v2600_v19  ;;  %v1946_v34 = vpop.f32.mrf.mxu1  ;;  %v2392_v8 = vsub.f32 1.0, %v2391_v60  ;;  %v8705_v19 = vpop.eup %4502  ;;  %v2561_v60 = vld [vmem:[%s9840_s3 + $0x38] sm:$0xff] }
 0x227   :  { %2978 = vmatpush.msrb.mxu1 %v2839_v30  ;;  %v1969_v53 = vpop.f32.mrf.mxu2  ;;  %v1947_v51 = vadd.f32 %v1946_v34, %v1924_v21  ;;  %v2496_v41 = vmul.f32 %v8705_v19, %v8641_v15  ;;  %v2809_v21 = vld [vmem:[%s9840_s3 + $0x7f8] sm:$0xff]  ;;  %vm2501_vm5 = vweird.f32 %v8705_v19 }
 0x228   :  { %2956 = vmatpush.msrb.mxu0 %v2788_v14  ;;  %3025 = vmatpush.msrb.mxu3 %v2597_v9  ;;  %v2393_v27 = vmul.f32 %v8649_v46, %v2392_v8  ;;  %v2573_v14 = vld [vmem:[%s9840_s3 + $0x98] sm:$0xff]  ;;  %vm8811_vm6 = vmor %vm2500_vm4, %vm2501_vm5  ;;  %vm2856_vm4 = vcmask 130048  }
 0x229   :  { %2979 = vmatpush.msrb.mxu1 %v2836_v38  ;;  %v1970_v42 = vadd.f32 %v1969_v53, %v1947_v51  ;;  %v2812_v38 = vld [vmem:[%s9840_s3 + $0x810] sm:$0xff]  ;;  %v2567_v53 = vld [vmem:[%s9840_s3 + $0x68] sm:$0xff] }
 0x22a   :  { %2957 = vmatpush.msrb.mxu0 %v2785_v11  ;;  %3026 = vmatpush.msrb.mxu3 %v2594_v28  ;;  %v1992_v63 = vpop.f32.mrf.mxu3  ;;  %v2394_v34 = vadd.f32 %v8649_v46, %v2393_v27  ;;  %v2497_v11 = vsub.f32 1.0, %v2496_v41  ;;  %v2758_v28 = vld [vmem:[%s9840_s3 + $0x660] sm:$0xff]  ;;  %v2792_v27 = vld [vmem:[%s9840_s3 + $0x770] sm:$0xff] }
 0x22b   :  { %2980 = vmatpush.msrb.mxu1 %v2833_v16  ;;  %v1993_v40 = vadd.f32 %v1992_v63, %v1970_v42  ;;  %v2401_v16 = vand.u32 2147483648, %v8528_v24  ;;  %v2564_v63 = vld [vmem:[%s9840_s3 + $0x50] sm:$0xff]  ;;  %v2558_v42 = vld [vmem:[%s9840_s3 + $0x20] sm:$0xff] }
 0x22c   :  { %2958 = vmatpush.msrb.mxu0 %v2782_v6  ;;  %3027 = vmatpush.msrb.mxu3 %v2591_v57  ;;  %v2399_v6 = vand.u32 2147483647, %v8528_v24  ;;  %v2755_v57 = vld [vmem:[%s9840_s3 + $0x648] sm:$0xff]  ;;  %v2752_v24 = vld [vmem:[%s9840_s3 + $0x630] sm:$0xff] }
 0x22d   :  { %2882 = vmatmul.f32.gmra.mxu0 %v8652_v17  ;;  %2905 = vmatmul.f32.gmra.mxu1 %v8655_v36  ;;  %v1926_v1 = vpop.f32.mrf.mxu0 }
 0x22e   :  { %2928 = vmatmul.f32.gmra.mxu2 %v8658_v12  ;;  %2951 = vmatmul.f32.gmra.mxu3 %v8661_v4  ;;  %v1927_v47 = vadd.f32 %v1926_v1, %v977_v25  ;;  %v2818_v25 = vld [vmem:[%s9840_s3 + $0x840] sm:$0xff]  ;;  %v2498_v1 = vmul.f32 %v8705_v19, %v2497_v11  ;;  %vm2400_vm3 = vcmp.eq.f32.partialorder %v2399_v6, 8.507059e+37  ;;  %v2780_v6 = vld [vmem:[%s9840_s3 + $0x710] sm:$0xff] }
 0x22f   :  { %2959 = vmatpush.msrb.mxu0 %v2779_v0  ;;  %3028 = vmatpush.msrb.mxu3 %v2588_v43  ;;  %v2806_v43 = vld [vmem:[%s9840_s3 + $0x7e0] sm:$0xff] }
 0x230   :  { %2981 = vmatpush.msrb.mxu1 %v2830_v3  ;;  %v1949_v7 = vpop.f32.mrf.mxu1  ;;  %v2398_v3 = vsel %vm8764_vm2, %v8649_v46, %v2394_v34  ;;  %v2803_v46 = vld [vmem:[%s9840_s3 + $0x7c8] sm:$0xff]  ;;  %v2738_v0 = vld [vmem:[%s9840_s3 + $0x5c0] sm:$0xff] }
 0x231   :  { %2960 = vmatpush.msrb.mxu0 %v2776_v45  ;;  %3029 = vmatpush.msrb.mxu3 %v2585_v50  ;;  %v1972_v10 = vpop.f32.mrf.mxu2  ;;  %v1950_v9 = vadd.f32 %v1949_v7, %v1927_v47  ;;  %v2504_v47 = vand.u32 2147483647, %v8641_v15 }
 0x232   :  { %2982 = vmatpush.msrb.mxu1 %v2827_v18  ;;  %v2402_v18 = vor.u32 1.1754944e-38, %v2401_v16 }
 0x233   :  { %2961 = vmatpush.msrb.mxu0 %v2773_v32  ;;  %3030 = vmatpush.msrb.mxu3 %v2582_v39  ;;  %v1973_v22 = vadd.f32 %v1972_v10, %v1950_v9  ;;  %v2749_v39 = vld [vmem:[%s9840_s3 + $0x618] sm:$0xff]  ;;  %v2800_v10 = vld [vmem:[%s9840_s3 + $0x7b0] sm:$0xff]  ;;  %vm2505_vm8 = vcmp.eq.f32.partialorder %v2504_v47, 8.507059e+37  ;;  %v2666_v47 = vld [vmem:[%s9840_s3 + $0x380] sm:$0xff] }
 0x234   :  { %2983 = vmatpush.msrb.mxu1 %v2824_v59  ;;  %v1995_v30 = vpop.f32.mrf.mxu3  ;;  %v2403_v7 = vsel %vm2400_vm3, %v2402_v18, %v2398_v3  ;;  %v2506_v59 = vand.u32 2147483648, %v8641_v15  ;;  %v2735_v3 = vld [vmem:[%s9840_s3 + $0x5a8] sm:$0xff]  ;;  %v2732_v18 = vld [vmem:[%s9840_s3 + $0x590] sm:$0xff] }
 0x235   :  { %2962 = vmatpush.msrb.mxu0 %v2770_v33  ;;  %3031 = vmatpush.msrb.mxu3 %v2579_v26  ;;  %v1996_v45 = vadd.f32 %v1995_v30, %v1973_v22  ;;  %v2499_v26 = vadd.f32 %v8705_v19, %v2498_v1  ;;  %v8816_v30 = vmul.f32 %v2403_v7, %v8308_v5  ;;  %v2687_v22 = vld [vmem:[%s9840_s3 + $0x428] sm:$0xff] }
 0x236   :  { %2984 = vmatpush.msrb.mxu1 %v2821_v23  ;;  %v2746_v23 = vld [vmem:[%s9840_s3 + $0x600] sm:$0xff]  ;;  %v2507_v41 = vor.u32 1.1754944e-38, %v2506_v59  ;;  %v2729_v59 = vld [vmem:[%s9840_s3 + $0x578] sm:$0xff] }
 0x237   :  { %2963 = vmatpush.msrb.mxu0 %v2767_v20  ;;  %3032 = vmatpush.msrb.mxu3 %v2576_v37  ;;  %v2015_v48 = vpop.f32.mrf.mxu0  ;;  %v2555_v20 = vld [vmem:[%s9840_s3 + $0x8] sm:$0xff]  ;;  %v2503_v9 = vsel %vm8811_vm6, %v8705_v19, %v2499_v26  ;;  %v2726_v26 = vld [vmem:[%s9840_s3 + $0x560] sm:$0xff] }
 0x238   :  { %2985 = vmatpush.msrb.mxu1 %v2818_v25  ;;  %v2016_v31 = vadd.f32 %v2015_v48, %v1993_v40  ;;  %v2696_v25 = vld [vmem:[%s9840_s3 + $0x470] sm:$0xff]  ;;  %v2789_v48 = vld [vmem:[%s9840_s3 + $0x758] sm:$0xff]  ;;  %v2508_v11 = vsel %vm2505_vm8, %v2507_v41, %v2503_v9  ;;  %v2663_v40 = vld [vmem:[%s9840_s3 + $0x368] sm:$0xff] }
 0x239   :  { %2964 = vmatpush.msrb.mxu0 %v2764_v61  ;;  %3033 = vmatpush.msrb.mxu3 %v2573_v14  ;;  %v2797_v61 = vld [vmem:[%s9840_s3 + $0x798] sm:$0xff] }
 0x23a   :  { %2986 = vmatpush.msrb.mxu1 %v2815_v35  ;;  %v2038_v62 = vpop.f32.mrf.mxu1  ;;  %v2693_v35 = vld [vmem:[%s9840_s3 + $0x458] sm:$0xff] }
 0x23b   :  { %2965 = vmatpush.msrb.mxu0 %v2761_v44  ;;  %3034 = vmatpush.msrb.mxu3 %v2570_v52  ;;  %v2039_v13 = vadd.f32 %v2038_v62, %v2016_v31  ;;  %v2061_v54 = vpop.f32.mrf.mxu2  ;;  %v2794_v44 = vld [vmem:[%s9840_s3 + $0x780] sm:$0xff]  ;;  %v2783_v62 = vld [vmem:[%s9840_s3 + $0x728] sm:$0xff]  ;;  %v2589_v9 = vld [vmem:[%s9840_s3 + $0x118] sm:$0xff] }
 0x23c   :  { %2987 = vmatpush.msrb.mxu1 %v2812_v38  ;;  %v2690_v52 = vld [vmem:[%s9840_s3 + $0x440] sm:$0xff] }
 0x23d   :  { %2966 = vmatpush.msrb.mxu0 %v2758_v28  ;;  %3035 = vmatpush.msrb.mxu3 %v2567_v53  ;;  %v2062_v51 = vadd.f32 %v2061_v54, %v2039_v13  ;;  %v2786_v31 = vld [vmem:[%s9840_s3 + $0x740] sm:$0xff]  ;;  %v2744_v28 = vld [vmem:[%s9840_s3 + $0x5f0] sm:$0xff]  ;;  %v8862_v13 = vmul.f32 %v2508_v11, %v8404_v49  ;;  %v2681_v49 = vld [vmem:[%s9840_s3 + $0x3f8] sm:$0xff] }
 0x23e   :  { %2988 = vmatpush.msrb.mxu1 %v2809_v21  ;;  %v2084_v50 = vpop.f32.mrf.mxu3  ;;  %v2684_v54 = vld [vmem:[%s9840_s3 + $0x410] sm:$0xff]  ;;  %v2654_v11 = vld [vmem:[%s9840_s3 + $0x320] sm:$0xff] }
 0x23f   :  { %2967 = vmatpush.msrb.mxu0 %v2755_v57  ;;  %3036 = vmatpush.msrb.mxu3 %v2564_v63  ;;  %v8784_v32 = vadd.f32 %v2084_v50, %v2062_v51  ;;  %v2741_v57 = vld [vmem:[%s9840_s3 + $0x5d8] sm:$0xff]  ;;  %v2774_v51 = vld [vmem:[%s9840_s3 + $0x6e0] sm:$0xff] }
 0x240   :  { %2989 = vmatpush.msrb.mxu1 %v2806_v43  ;;  %v2777_v63 = vld [vmem:[%s9840_s3 + $0x6f8] sm:$0xff]  ;;  %v2678_v43 = vld [vmem:[%s9840_s3 + $0x3e0] sm:$0xff] }
 0x241   :  { %2968 = vmatpush.msrb.mxu0 %v2752_v24  ;;  %3037 = vmatpush.msrb.mxu3 %v2561_v60  ;;  %v4400_v8 = vmul.f32 -1.442695, %v8784_v32  ;;  %v2018_v33 = vpop.f32.mrf.mxu0  ;;  %v2675_v24 = vld [vmem:[%s9840_s3 + $0x3c8] sm:$0xff] }
 0x242   :  { %2990 = vmatpush.msrb.mxu1 %v2803_v46  ;;  %v2019_v37 = vadd.f32 %v2018_v33, %v1996_v45  ;;  %v2771_v60 = vld [vmem:[%s9840_s3 + $0x6c8] sm:$0xff]  ;;  %v2672_v46 = vld [vmem:[%s9840_s3 + $0x3b0] sm:$0xff] }
 0x243   :  { %2969 = vmatpush.msrb.mxu0 %v2749_v39  ;;  %3038 = vmatpush.msrb.mxu3 %v2558_v42  ;;  %4504 = vpow2.f32 %v4400_v8  ;;  %v2768_v39 = vld [vmem:[%s9840_s3 + $0x6b0] sm:$0xff]  ;;  %v2765_v8 = vld [vmem:[%s9840_s3 + $0x698] sm:$0xff] }
 0x244   :  { %2991 = vmatpush.msrb.mxu1 %v2800_v10  ;;  %v2041_v15 = vpop.f32.mrf.mxu1  ;;  %v2669_v10 = vld [vmem:[%s9840_s3 + $0x398] sm:$0xff] }
 0x245   :  { %2970 = vmatpush.msrb.mxu0 %v2746_v23  ;;  %3039 = vmatpush.msrb.mxu3 %v2555_v20  ;;  %v2042_v14 = vadd.f32 %v2041_v15, %v2019_v37  ;;  %v2064_v5 = vpop.f32.mrf.mxu2  ;;  %v2762_v23 = vld [vmem:[%s9840_s3 + $0x680] sm:$0xff]  ;;  %v2723_v20 = vld [vmem:[%s9840_s3 + $0x548] sm:$0xff]  ;;  %v2720_v15 = vld [vmem:[%s9840_s3 + $0x530] sm:$0xff] }
 0x246   :  { %2971 = vmatmul.f32.vlgmr.msrb.gmra.mxu0 %v8816_v30  ;;  %3040 = vmatmul.f32.vlgmr.msrb.gmra.mxu3 %v8367_v2 }
 0x247   :  { %3070 = vmatpush.msra.mxu0 %v2696_v25  ;;  %3116 = vmatpush.msra.mxu3 %v2792_v27  ;;  %v2065_v19 = vadd.f32 %v2064_v5, %v2042_v14  ;;  %v2759_v25 = vld [vmem:[%s9840_s3 + $0x668] sm:$0xff]  ;;  %v2660_v14 = vld [vmem:[%s9840_s3 + $0x350] sm:$0xff] }
 0x248   :  { %2992 = vmatpush.msrb.mxu1 %v2797_v61  ;;  %v2087_v38 = vpop.f32.mrf.mxu3  ;;  %v2756_v5 = vld [vmem:[%s9840_s3 + $0x650] sm:$0xff] }
 0x249   :  { %v4505_v34 = vpop.eup %4504  ;;  %3071 = vmatpush.msra.mxu0 %v2693_v35  ;;  %3117 = vmatpush.msra.mxu3 %v2789_v48  ;;  %v8850_v53 = vadd.f32 %v2087_v38, %v2065_v19  ;;  %v2717_v48 = vld [vmem:[%s9840_s3 + $0x518] sm:$0xff] }
 0x24a   :  { %v8858_v16 = vadd.f32 1.0, %v4505_v34  ;;  %2993 = vmatpush.msrb.mxu1 %v2794_v44  ;;  %v2657_v19 = vld [vmem:[%s9840_s3 + $0x338] sm:$0xff]  ;;  %v2714_v34 = vld [vmem:[%s9840_s3 + $0x500] sm:$0xff] }
 0x24b   :  { %3072 = vmatpush.msra.mxu0 %v2690_v52  ;;  %3118 = vmatpush.msra.mxu3 %v2786_v31  ;;  %v4407_v21 = vmul.f32 -1.442695, %v8850_v53  ;;  %v2753_v52 = vld [vmem:[%s9840_s3 + $0x638] sm:$0xff] }
 0x24c   :  { %4506 = vrcp.f32 %v8858_v16  ;;  %3093 = vmatpush.msra.mxu1 %v2744_v28  ;;  %vm2410_vm9 = vweird.f32 %v8858_v16  ;;  %v2416_v27 = vand.u32 2147483648, %v8858_v16  ;;  %v2414_v61 = vand.u32 2147483647, %v8858_v16  ;;  %v2750_v28 = vld [vmem:[%s9840_s3 + $0x620] sm:$0xff] }
 0x24d   :  { %3073 = vmatpush.msra.mxu0 %v2687_v22  ;;  %3119 = vmatpush.msra.mxu3 %v2783_v62  ;;  %4508 = vpow2.f32 %v4407_v21  ;;  %v2711_v21 = vld [vmem:[%s9840_s3 + $0x4e8] sm:$0xff] }
 0x24e   :  { %2974 = vmatmul.f32.gmra.mxu0 %v8862_v13  ;;  %3043 = vmatmul.f32.gmra.mxu3 %v8652_v17  ;;  %v2417_v31 = vor.u32 1.1754944e-38, %v2416_v27  ;;  %vm2415_vm11 = vcmp.eq.f32.partialorder %v2414_v61, 8.507059e+37  ;;  %v2592_v27 = vld [vmem:[%s9840_s3 + $0x130] sm:$0xff]  ;;  %v2645_v61 = vld [vmem:[%s9840_s3 + $0x2d8] sm:$0xff] }
 0x24f   :  { %3074 = vmatpush.msra.mxu0 %v2684_v54  ;;  %3120 = vmatpush.msra.mxu3 %v2780_v6  ;;  %v2651_v6 = vld [vmem:[%s9840_s3 + $0x308] sm:$0xff] }
 0x250   :  { %3094 = vmatpush.msra.mxu1 %v2741_v57  ;;  %v2747_v57 = vld [vmem:[%s9840_s3 + $0x608] sm:$0xff] }
 0x251   :  { %3075 = vmatpush.msra.mxu0 %v2681_v49  ;;  %3121 = vmatpush.msra.mxu3 %v2777_v63 }
 0x252   :  { %v8894_v1 = vpop.eup %4506  ;;  %3095 = vmatpush.msra.mxu1 %v2738_v0 }
 0x253   :  { %v4509_v45 = vpop.eup %4508  ;;  %v2406_v50 = vmul.f32 %v8894_v1, %v8858_v16  ;;  %3076 = vmatpush.msra.mxu0 %v2678_v43  ;;  %3122 = vmatpush.msra.mxu3 %v2774_v51  ;;  %vm2411_vm7 = vweird.f32 %v8894_v1  ;;  %v2649_v43 = vld [vmem:[%s9840_s3 + $0x2f8] sm:$0xff]  ;;  %v2708_v51 = vld [vmem:[%s9840_s3 + $0x4d0] sm:$0xff] }
 0x254   :  { %v8913_v42 = vadd.f32 1.0, %v4509_v45  ;;  %3096 = vmatpush.msra.mxu1 %v2735_v3  ;;  %vm8958_vm10 = vmor %vm2410_vm9, %vm2411_vm7  ;;  %v2702_v45 = vld [vmem:[%s9840_s3 + $0x4a0] sm:$0xff] }
 0x255   :  { %v2407_v7 = vsub.f32 1.0, %v2406_v50  ;;  %3077 = vmatpush.msra.mxu0 %v2675_v24  ;;  %3123 = vmatpush.msra.mxu3 %v2771_v60  ;;  %v2705_v24 = vld [vmem:[%s9840_s3 + $0x4b8] sm:$0xff]  ;;  %v2643_v60 = vld [vmem:[%s9840_s3 + $0x2c8] sm:$0xff] }
 0x256   :  { %4510 = vrcp.f32 %v8913_v42  ;;  %3097 = vmatpush.msra.mxu1 %v2732_v18  ;;  %vm2515_vm12 = vweird.f32 %v8913_v42  ;;  %v2521_v16 = vand.u32 2147483648, %v8913_v42  ;;  %v2519_v54 = vand.u32 2147483647, %v8913_v42 }
 0x257   :  { %v2408_v33 = vmul.f32 %v8894_v1, %v2407_v7  ;;  %3078 = vmatpush.msra.mxu0 %v2672_v46  ;;  %3124 = vmatpush.msra.mxu3 %v2768_v39  ;;  %v2640_v46 = vld [vmem:[%s9840_s3 + $0x2b0] sm:$0xff]  ;;  %v2699_v39 = vld [vmem:[%s9840_s3 + $0x488] sm:$0xff]  ;;  %v2637_v7 = vld [vmem:[%s9840_s3 + $0x298] sm:$0xff] }
 0x258   :  { %3098 = vmatpush.msra.mxu1 %v2729_v59  ;;  %v2522_v3 = vor.u32 1.1754944e-38, %v2521_v16  ;;  %vm2520_vm15 = vcmp.eq.f32.partialorder %v2519_v54, 8.507059e+37  ;;  %v2601_v59 = vld [vmem:[%s9840_s3 + $0x178] sm:$0xff]  ;;  %v2580_v16 = vld [vmem:[%s9840_s3 + $0xd0] sm:$0xff] }
 0x259   :  { %3079 = vmatpush.msra.mxu0 %v2669_v10  ;;  %3125 = vmatpush.msra.mxu3 %v2765_v8  ;;  %v2409_v37 = vadd.f32 %v8894_v1, %v2408_v33  ;;  %v978_v10 = vperm.slane %v8590_v29, 6  ;;  %v2845_v33 = vld [vmem:[%s9840_s3 + $0x918] sm:$0xff] }
 0x25a   :  { %3099 = vmatpush.msra.mxu1 %v2726_v26  ;;  %v2598_v26 = vld [vmem:[%s9840_s3 + $0x160] sm:$0xff]  ;;  %3015 = vmatpush.msrb.mxu2 %v2845_v33 }
 0x25b   :  { %3080 = vmatpush.msra.mxu0 %v2666_v47  ;;  %3126 = vmatpush.msra.mxu3 %v2762_v23  ;;  %v2413_v44 = vsel %vm8958_vm10, %v8894_v1, %v2409_v37  ;;  %v2631_v47 = vld [vmem:[%s9840_s3 + $0x268] sm:$0xff]  ;;  %v2842_v37 = vld [vmem:[%s9840_s3 + $0x900] sm:$0xff] }
 0x25c   :  { %v4511_v41 = vpop.eup %4510  ;;  %3100 = vmatpush.msra.mxu1 %v2723_v20  ;;  %v2418_v22 = vsel %vm2415_vm11, %v2417_v31, %v2413_v44  ;;  %v2595_v23 = vld [vmem:[%s9840_s3 + $0x148] sm:$0xff]  ;;  %3016 = vmatpush.msrb.mxu2 %v2842_v37  ;;  %v2586_v44 = vld [vmem:[%s9840_s3 + $0x100] sm:$0xff] }
 0x25d   :  { %v2511_v35 = vmul.f32 %v4511_v41, %v8913_v42  ;;  %3081 = vmatpush.msra.mxu0 %v2663_v40  ;;  %3127 = vmatpush.msra.mxu3 %v2759_v25  ;;  %vm2516_vm13 = vweird.f32 %v4511_v41  ;;  %v9004_v0 = vmul.f32 %v2418_v22, %v8784_v32  ;;  %v2646_v32 = vld [vmem:[%s9840_s3 + $0x2e0] sm:$0xff]  ;;  %v2648_v40 = vld [vmem:[%s9840_s3 + $0x2f0] sm:$0xff]  ;;  %v2619_v31 = vld [vmem:[%s9840_s3 + $0x208] sm:$0xff] }
 0x25e   :  { %3101 = vmatpush.msra.mxu1 %v2720_v15  ;;  %vm8999_vm14 = vmor %vm2515_vm12, %vm2516_vm13  ;;  %v2628_v25 = vld [vmem:[%s9840_s3 + $0x250] sm:$0xff]  ;;  %3047 = vmatpush.msra.mxu2 %v2648_v40  ;;  %v2838_v40 = vld [vmem:[%s9840_s3 + $0x8e0] sm:$0xff] }
 0x25f   :  { %v2512_v38 = vsub.f32 1.0, %v2511_v35  ;;  %3082 = vmatpush.msra.mxu0 %v2660_v14  ;;  %3128 = vmatpush.msra.mxu3 %v2756_v5  ;;  %v2625_v14 = vld [vmem:[%s9840_s3 + $0x238] sm:$0xff]  ;;  %v2642_v35 = vld [vmem:[%s9840_s3 + $0x2c0] sm:$0xff]  ;;  %v2616_v22 = vld [vmem:[%s9840_s3 + $0x1f0] sm:$0xff] }
 0x260   :  { %3102 = vmatpush.msra.mxu1 %v2717_v48  ;;  %v2622_v48 = vld [vmem:[%s9840_s3 + $0x220] sm:$0xff]  ;;  %3048 = vmatpush.msra.mxu2 %v2645_v61 }
 0x261   :  { %v2513_v62 = vmul.f32 %v4511_v41, %v2512_v38  ;;  %3083 = vmatpush.msra.mxu0 %v2657_v19  ;;  %3129 = vmatpush.msra.mxu3 %v2753_v52  ;;  %v2639_v52 = vld [vmem:[%s9840_s3 + $0x2a8] sm:$0xff]  ;;  %v2618_v61 = vld [vmem:[%s9840_s3 + $0x200] sm:$0xff] }
 0x262   :  { %3103 = vmatpush.msra.mxu1 %v2714_v34  ;;  %v2583_v34 = vld [vmem:[%s9840_s3 + $0xe8] sm:$0xff]  ;;  %3049 = vmatpush.msra.mxu2 %v2642_v35 }
 0x263   :  { %v2514_v49 = vadd.f32 %v4511_v41, %v2513_v62  ;;  %3084 = vmatpush.msra.mxu0 %v2654_v11  ;;  %3130 = vmatpush.msra.mxu3 %v2750_v28  ;;  %v2636_v28 = vld [vmem:[%s9840_s3 + $0x290] sm:$0xff] }
 0x264   :  { %3104 = vmatpush.msra.mxu1 %v2711_v21  ;;  %3050 = vmatpush.msra.mxu2 %v2639_v52  ;;  %v2633_v21 = vld [vmem:[%s9840_s3 + $0x278] sm:$0xff]  ;;  %v2832_v52 = vld [vmem:[%s9840_s3 + $0x8b0] sm:$0xff] }
 0x265   :  { %3085 = vmatpush.msra.mxu0 %v2651_v6  ;;  %3131 = vmatpush.msra.mxu3 %v2747_v57  ;;  %v2518_v1 = vsel %vm8999_vm14, %v4511_v41, %v2514_v49  ;;  %v2613_v6 = vld [vmem:[%s9840_s3 + $0x1d8] sm:$0xff] }
 0x266   :  { %3086 = vmatmul.f32.vlgmr.msra.gmra.mxu0 %v8551_v55  ;;  %3132 = vmatmul.f32.vlgmr.msra.gmra.mxu3 %v8816_v30  ;;  %v2523_v50 = vsel %vm2520_vm15, %v2522_v3, %v2518_v1  ;;  %v2577_v57 = vld [vmem:[%s9840_s3 + $0xb8] sm:$0xff]  ;;  %v2610_v3 = vld [vmem:[%s9840_s3 + $0x1c0] sm:$0xff] }
 0x267   :  { %3208 = vmatpush.msrb.mxu3 %v2649_v43  ;;  %3105 = vmatpush.msra.mxu1 %v2708_v51  ;;  %v9036_v42 = vmul.f32 %v2523_v50, %v8850_v53  ;;  %v2634_v53 = vld [vmem:[%s9840_s3 + $0x280] sm:$0xff]  ;;  %v2571_v50 = vld [vmem:[%s9840_s3 + $0x88] sm:$0xff] }
 0x268   :  { %2994 = vmatmul.f32.vlgmr.msrb.gmra.mxu1 %v9004_v0  ;;  %3051 = vmatpush.msra.mxu2 %v2636_v28  ;;  %v2630_v43 = vld [vmem:[%s9840_s3 + $0x260] sm:$0xff] }
 0x269   :  { %3209 = vmatpush.msrb.mxu3 %v2646_v32  ;;  %3106 = vmatpush.msra.mxu1 %v2705_v24  ;;  %v2107_v18 = vpop.f32.mrf.mxu0  ;;  %v2574_v1 = vld [vmem:[%s9840_s3 + $0xa0] sm:$0xff] }
 0x26a   :  { %v2108_v20 = vadd.f32 %v2107_v18, %v978_v10  ;;  %3052 = vmatpush.msra.mxu2 %v2633_v21  ;;  %v2846_v24 = vld [vmem:[%s9840_s3 + $0x920] sm:$0xff] }
 0x26b   :  { %3210 = vmatpush.msrb.mxu3 %v2643_v60  ;;  %3107 = vmatpush.msra.mxu1 %v2702_v45  ;;  %v2627_v60 = vld [vmem:[%s9840_s3 + $0x248] sm:$0xff]  ;;  %v2826_v21 = vld [vmem:[%s9840_s3 + $0x880] sm:$0xff] }
 0x26c   :  { %v2130_v8 = vpop.f32.mrf.mxu1  ;;  %v2607_v45 = vld [vmem:[%s9840_s3 + $0x1a8] sm:$0xff]  ;;  %3053 = vmatpush.msra.mxu2 %v2630_v43  ;;  %3176 = vmatpush.msrb.mxu0 %v2846_v24 }
 0x26d   :  { %3211 = vmatpush.msrb.mxu3 %v2640_v46  ;;  %3108 = vmatpush.msra.mxu1 %v2699_v39  ;;  %v2131_v5 = vadd.f32 %v2130_v8, %v2108_v20  ;;  %v2843_v46 = vld [vmem:[%s9840_s3 + $0x908] sm:$0xff]  ;;  %v2624_v39 = vld [vmem:[%s9840_s3 + $0x230] sm:$0xff]  ;;  %v2694_v20 = vld [vmem:[%s9840_s3 + $0x460] sm:$0xff] }
 0x26e   :  { %3089 = vmatmul.f32.gmra.mxu0 %v8658_v12  ;;  %3135 = vmatmul.f32.gmra.mxu3 %v8862_v13 }
 0x26f   :  { %3212 = vmatpush.msrb.mxu3 %v2637_v7  ;;  %3185 = vmatpush.msrb.mxu1 %v2601_v59  ;;  %v2153_v29 = vpop.f32.mrf.mxu2  ;;  %v2604_v59 = vld [vmem:[%s9840_s3 + $0x190] sm:$0xff] }
 0x270   :  { %2997 = vmatmul.f32.gmra.mxu1 %v9036_v42  ;;  %v2154_v38 = vadd.f32 %v2153_v29, %v2131_v5  ;;  %3054 = vmatpush.msra.mxu2 %v2627_v60  ;;  %v2565_v29 = vld [vmem:[%s9840_s3 + $0x58] sm:$0xff]  ;;  %v2835_v5 = vld [vmem:[%s9840_s3 + $0x8c8] sm:$0xff]  ;;  %v2820_v60 = vld [vmem:[%s9840_s3 + $0x850] sm:$0xff] }
 0x271   :  { %3213 = vmatpush.msrb.mxu3 %v2634_v53  ;;  %3186 = vmatpush.msrb.mxu1 %v2598_v26  ;;  %v2697_v53 = vld [vmem:[%s9840_s3 + $0x478] sm:$0xff] }
 0x272   :  { %v2176_v15 = vpop.f32.mrf.mxu3  ;;  %v2841_v26 = vld [vmem:[%s9840_s3 + $0x8f8] sm:$0xff]  ;;  %3177 = vmatpush.msrb.mxu0 %v2843_v46  ;;  %3055 = vmatpush.msra.mxu2 %v2624_v39  ;;  %v2603_v46 = vld [vmem:[%s9840_s3 + $0x188] sm:$0xff] }
 0x273   :  { %3214 = vmatpush.msrb.mxu3 %v2631_v47  ;;  %3187 = vmatpush.msrb.mxu1 %v2595_v23  ;;  %v2110_v41 = vpop.f32.mrf.mxu0  ;;  %v2177_v54 = vadd.f32 %v2176_v15, %v2154_v38  ;;  %v2621_v23 = vld [vmem:[%s9840_s3 + $0x218] sm:$0xff] }
 0x274   :  { %v2111_v62 = vadd.f32 %v2110_v41, %v978_v10  ;;  %v2568_v10 = vld [vmem:[%s9840_s3 + $0x70] sm:$0xff]  ;;  %3231 = vmatpush.msra.mxu0 %v2697_v53  ;;  %3056 = vmatpush.msra.mxu2 %v2621_v23  ;;  %v2817_v39 = vld [vmem:[%s9840_s3 + $0x838] sm:$0xff]  ;;  %v2811_v53 = vld [vmem:[%s9840_s3 + $0x808] sm:$0xff] }
 0x275   :  { %3215 = vmatpush.msrb.mxu3 %v2628_v25  ;;  %3188 = vmatpush.msrb.mxu1 %v2592_v27  ;;  %v2562_v25 = vld [vmem:[%s9840_s3 + $0x40] sm:$0xff] }
 0x276   :  { %v2133_v19 = vpop.f32.mrf.mxu1  ;;  %3232 = vmatpush.msra.mxu0 %v2694_v20  ;;  %3057 = vmatpush.msra.mxu2 %v2618_v61  ;;  %v2766_v61 = vld [vmem:[%s9840_s3 + $0x6a0] sm:$0xff] }
 0x277   :  { %3216 = vmatpush.msrb.mxu3 %v2625_v14  ;;  %3189 = vmatpush.msrb.mxu1 %v2589_v9  ;;  %v2134_v51 = vadd.f32 %v2133_v19, %v2111_v62  ;;  %v2691_v14 = vld [vmem:[%s9840_s3 + $0x448] sm:$0xff]  ;;  %v2688_v19 = vld [vmem:[%s9840_s3 + $0x430] sm:$0xff] }
 0x278   :  { %3109 = vmatmul.f32.vlgmr.msra.gmra.mxu1 %v8554_v56  ;;  %v2559_v9 = vld [vmem:[%s9840_s3 + $0x28] sm:$0xff]  ;;  %3233 = vmatpush.msra.mxu0 %v2691_v14  ;;  %v2664_v14 = vld [vmem:[%s9840_s3 + $0x370] sm:$0xff] }
 0x279   :  { %3217 = vmatpush.msrb.mxu3 %v2622_v48  ;;  %3190 = vmatpush.msrb.mxu1 %v2586_v44  ;;  %v2156_v11 = vpop.f32.mrf.mxu2  ;;  %v2615_v44 = vld [vmem:[%s9840_s3 + $0x1e8] sm:$0xff] }
 0x27a   :  { %v2157_v7 = vadd.f32 %v2156_v11, %v2134_v51  ;;  %v2829_v11 = vld [vmem:[%s9840_s3 + $0x898] sm:$0xff]  ;;  %3058 = vmatpush.msra.mxu2 %v2615_v44  ;;  %3234 = vmatpush.msra.mxu0 %v2688_v19  ;;  %v2682_v51 = vld [vmem:[%s9840_s3 + $0x400] sm:$0xff]  ;;  %v2763_v44 = vld [vmem:[%s9840_s3 + $0x688] sm:$0xff] }
 0x27b   :  { %3218 = vmatpush.msrb.mxu3 %v2619_v31  ;;  %3191 = vmatpush.msrb.mxu1 %v2583_v34  ;;  %v2556_v31 = vld [vmem:[%s9840_s3 + $0x10] sm:$0xff]  ;;  %v2793_v34 = vld [vmem:[%s9840_s3 + $0x778] sm:$0xff] }
 0x27c   :  { %v2179_v49 = vpop.f32.mrf.mxu3  ;;  %v2661_v19 = vld [vmem:[%s9840_s3 + $0x358] sm:$0xff] }
 0x27d   :  { %3219 = vmatpush.msrb.mxu3 %v2616_v22  ;;  %3192 = vmatpush.msrb.mxu1 %v2580_v16  ;;  %v2199_v63 = vpop.f32.mrf.mxu0  ;;  %v2180_v37 = vadd.f32 %v2179_v49, %v2157_v7  ;;  %v2790_v22 = vld [vmem:[%s9840_s3 + $0x760] sm:$0xff]  ;;  %v2612_v16 = vld [vmem:[%s9840_s3 + $0x1d0] sm:$0xff]  ;;  %v2609_v49 = vld [vmem:[%s9840_s3 + $0x1b8] sm:$0xff] }
 0x27e   :  { %v2200_v32 = vadd.f32 %v2199_v63, %v2177_v54  ;;  %v2823_v63 = vld [vmem:[%s9840_s3 + $0x868] sm:$0xff]  ;;  %3059 = vmatpush.msra.mxu2 %v2612_v16  ;;  %v2778_v7 = vld [vmem:[%s9840_s3 + $0x700] sm:$0xff] }
 0x27f   :  { %3220 = vmatpush.msrb.mxu3 %v2613_v6  ;;  %3193 = vmatpush.msrb.mxu1 %v2577_v57  ;;  %v2685_v6 = vld [vmem:[%s9840_s3 + $0x418] sm:$0xff]  ;;  %v2787_v57 = vld [vmem:[%s9840_s3 + $0x748] sm:$0xff] }
 0x280   :  { %v2222_v18 = vpop.f32.mrf.mxu1  ;;  %3112 = vmatmul.f32.gmra.mxu1 %v8661_v4  ;;  %3235 = vmatpush.msra.mxu0 %v2685_v6 }
 0x281   :  { %3221 = vmatpush.msrb.mxu3 %v2610_v3  ;;  %3194 = vmatpush.msrb.mxu1 %v2574_v1  ;;  %v2223_v8 = vadd.f32 %v2222_v18, %v2200_v32  ;;  %v2784_v1 = vld [vmem:[%s9840_s3 + $0x730] sm:$0xff]  ;;  %v2606_v32 = vld [vmem:[%s9840_s3 + $0x1a0] sm:$0xff]  ;;  %v2781_v18 = vld [vmem:[%s9840_s3 + $0x718] sm:$0xff] }
 0x282   :  { %3060 = vmatpush.msra.mxu2 %v2609_v49  ;;  %3236 = vmatpush.msra.mxu0 %v2682_v51  ;;  %v2840_v49 = vld [vmem:[%s9840_s3 + $0x8f0] sm:$0xff]  ;;  %v2837_v51 = vld [vmem:[%s9840_s3 + $0x8d8] sm:$0xff] }
 0x283   :  { %3222 = vmatpush.msrb.mxu3 %v2607_v45  ;;  %3195 = vmatpush.msrb.mxu1 %v2571_v50  ;;  %v2245_v33 = vpop.f32.mrf.mxu2  ;;  %v2679_v45 = vld [vmem:[%s9840_s3 + $0x3e8] sm:$0xff] }
 0x284   :  { %v2246_v47 = vadd.f32 %v2245_v33, %v2223_v8  ;;  %3061 = vmatpush.msra.mxu2 %v2606_v32  ;;  %3237 = vmatpush.msra.mxu0 %v2679_v45  ;;  %v2775_v8 = vld [vmem:[%s9840_s3 + $0x6e8] sm:$0xff]  ;;  %v2673_v33 = vld [vmem:[%s9840_s3 + $0x3b8] sm:$0xff]  ;;  %v2834_v45 = vld [vmem:[%s9840_s3 + $0x8c0] sm:$0xff] }
 0x285   :  { %3223 = vmatpush.msrb.mxu3 %v2604_v59  ;;  %3196 = vmatpush.msrb.mxu1 %v2568_v10  ;;  %v2676_v59 = vld [vmem:[%s9840_s3 + $0x3d0] sm:$0xff]  ;;  %v2814_v10 = vld [vmem:[%s9840_s3 + $0x820] sm:$0xff] }
 0x286   :  { %3224 = vmatmul.f32.vlgmr.msrb.gmra.mxu3 %v8453_v58  ;;  %v2268_v27 = vpop.f32.mrf.mxu3  ;;  %3062 = vmatpush.msra.mxu2 %v2603_v46 }
 0x287   :  { %3300 = vmatpush.msra.mxu3 %v2841_v26  ;;  %3197 = vmatpush.msrb.mxu1 %v2565_v29  ;;  %v2202_v15 = vpop.f32.mrf.mxu0  ;;  %v9177_v41 = vadd.f32 %v2268_v27, %v2246_v47  ;;  %v2772_v26 = vld [vmem:[%s9840_s3 + $0x6d0] sm:$0xff]  ;;  %v2805_v27 = vld [vmem:[%s9840_s3 + $0x7d8] sm:$0xff] }
 0x288   :  { %v2203_v35 = vadd.f32 %v2202_v15, %v2180_v37  ;;  %3238 = vmatpush.msra.mxu0 %v2676_v59  ;;  %v2808_v47 = vld [vmem:[%s9840_s3 + $0x7f0] sm:$0xff]  ;;  %v2769_v37 = vld [vmem:[%s9840_s3 + $0x6b8] sm:$0xff] }
 0x289   :  { %3301 = vmatpush.msra.mxu3 %v2838_v40  ;;  %3198 = vmatpush.msrb.mxu1 %v2562_v25  ;;  %v4401_v48 = vmul.f32 -1.442695, %v9177_v41  ;;  %v2667_v40 = vld [vmem:[%s9840_s3 + $0x388] sm:$0xff]  ;;  %v2828_v59 = vld [vmem:[%s9840_s3 + $0x890] sm:$0xff] }
 0x28a   :  { %v2225_v38 = vpop.f32.mrf.mxu1  ;;  %3239 = vmatpush.msra.mxu0 %v2673_v33 }
 0x28b   :  { %3302 = vmatpush.msra.mxu3 %v2835_v5  ;;  %3199 = vmatpush.msrb.mxu1 %v2559_v9  ;;  %4512 = vpow2.f32 %v4401_v48  ;;  %v2226_v28 = vadd.f32 %v2225_v38, %v2203_v35  ;;  %v2802_v9 = vld [vmem:[%s9840_s3 + $0x7c0] sm:$0xff]  ;;  %v2760_v38 = vld [vmem:[%s9840_s3 + $0x670] sm:$0xff] }
 0x28d   :  { %3303 = vmatpush.msra.mxu3 %v2832_v52  ;;  %3200 = vmatpush.msrb.mxu1 %v2556_v31  ;;  %v2248_v62 = vpop.f32.mrf.mxu2  ;;  %v2799_v52 = vld [vmem:[%s9840_s3 + $0x7a8] sm:$0xff] }
 0x28e   :  { %3227 = vmatmul.f32.gmra.mxu3 %v8655_v36  ;;  %v2249_v54 = vadd.f32 %v2248_v62, %v2226_v28  ;;  %3201 = vmatmul.f32.vlgmr.msrb.gmra.mxu1 %v8367_v2  ;;  %v2796_v28 = vld [vmem:[%s9840_s3 + $0x790] sm:$0xff]  ;;  %v2757_v62 = vld [vmem:[%s9840_s3 + $0x658] sm:$0xff] }
 0x28f   :  { %3277 = vmatpush.msra.mxu1 %v2793_v34  ;;  %3304 = vmatpush.msra.mxu3 %v2829_v11  ;;  %v2658_v34 = vld [vmem:[%s9840_s3 + $0x340] sm:$0xff] }
 0x290   :  { %v2271_v43 = vpop.f32.mrf.mxu3 }
 0x291   :  { %3278 = vmatpush.msra.mxu1 %v2790_v22  ;;  %v4513_v2 = vpop.eup %4512  ;;  %3305 = vmatpush.msra.mxu3 %v2826_v21  ;;  %v9236_v3 = vadd.f32 %v2271_v43, %v2249_v54  ;;  %v2751_v43 = vld [vmem:[%s9840_s3 + $0x628] sm:$0xff] }
 0x292   :  { %v9244_v24 = vadd.f32 1.0, %v4513_v2 }
 0x293   :  { %3279 = vmatpush.msra.mxu1 %v2787_v57  ;;  %3306 = vmatpush.msra.mxu3 %v2823_v63  ;;  %v4408_v50 = vmul.f32 -1.442695, %v9236_v3  ;;  %v2754_v57 = vld [vmem:[%s9840_s3 + $0x640] sm:$0xff]  ;;  %v2655_v63 = vld [vmem:[%s9840_s3 + $0x328] sm:$0xff] }
 0x294   :  { %4514 = vrcp.f32 %v9244_v24  ;;  %v2431_v5 = vand.u32 2147483648, %v9244_v24  ;;  %v2429_v48 = vand.u32 2147483647, %v9244_v24  ;;  %vm2425_vm1 = vweird.f32 %v9244_v24 }
 0x295   :  { %3280 = vmatpush.msra.mxu1 %v2784_v1  ;;  %3307 = vmatpush.msra.mxu3 %v2820_v60  ;;  %4516 = vpow2.f32 %v4408_v50  ;;  %v2652_v1 = vld [vmem:[%s9840_s3 + $0x310] sm:$0xff] }
 0x296   :  { %3204 = vmatmul.f32.gmra.mxu1 %v8652_v17  ;;  %v2670_v17 = vld [vmem:[%s9840_s3 + $0x3a0] sm:$0xff]  ;;  %v2432_v11 = vor.u32 1.1754944e-38, %v2431_v5  ;;  %vm2430_vm3 = vcmp.eq.f32.partialorder %v2429_v48, 8.507059e+37  ;;  %v2748_v60 = vld [vmem:[%s9840_s3 + $0x610] sm:$0xff]  ;;  %v2709_v5 = vld [vmem:[%s9840_s3 + $0x4d8] sm:$0xff] }
 0x297   :  { %3281 = vmatpush.msra.mxu1 %v2781_v18  ;;  %3308 = vmatpush.msra.mxu3 %v2817_v39  ;;  %v2831_v18 = vld [vmem:[%s9840_s3 + $0x8a8] sm:$0xff]  ;;  %v2700_v48 = vld [vmem:[%s9840_s3 + $0x490] sm:$0xff] }
 0x298   :  { %3240 = vmatpush.msra.mxu0 %v2670_v17  ;;  %v2847_v39 = vld [vmem:[%s9840_s3 + $0x928] sm:$0xff]  ;;  %v2813_v17 = vld [vmem:[%s9840_s3 + $0x818] sm:$0xff] }
 0x299   :  { %3282 = vmatpush.msra.mxu1 %v2778_v7  ;;  %3309 = vmatpush.msra.mxu3 %v2814_v10  ;;  %v2844_v10 = vld [vmem:[%s9840_s3 + $0x910] sm:$0xff] }
 0x29a   :  { %v4515_v29 = vpop.eup %4514  ;;  %3241 = vmatpush.msra.mxu0 %v2667_v40  ;;  %v2733_v40 = vld [vmem:[%s9840_s3 + $0x598] sm:$0xff] }
 0x29b   :  { %3283 = vmatpush.msra.mxu1 %v2775_v8  ;;  %v4517_v23 = vpop.eup %4516  ;;  %v2421_v20 = vmul.f32 %v4515_v29, %v9244_v24  ;;  %3310 = vmatpush.msra.mxu3 %v2811_v53  ;;  %vm2426_vm0 = vweird.f32 %v4515_v29  ;;  %v2825_v53 = vld [vmem:[%s9840_s3 + $0x878] sm:$0xff] }
 0x29c   :  { %v9298_v25 = vadd.f32 1.0, %v4517_v23  ;;  %3242 = vmatpush.msra.mxu0 %v2664_v14  ;;  %vm2427_vm2 = vmor %vm2425_vm1, %vm2426_vm0  ;;  %v2795_v23 = vld [vmem:[%s9840_s3 + $0x788] sm:$0xff]  ;;  %v2712_v14 = vld [vmem:[%s9840_s3 + $0x4f0] sm:$0xff] }
 0x29d   :  { %3284 = vmatpush.msra.mxu1 %v2772_v26  ;;  %v2422_v15 = vsub.f32 1.0, %v2421_v20  ;;  %3311 = vmatpush.msra.mxu3 %v2808_v47  ;;  %v2819_v26 = vld [vmem:[%s9840_s3 + $0x848] sm:$0xff]  ;;  %v2804_v47 = vld [vmem:[%s9840_s3 + $0x7d0] sm:$0xff]  ;;  %v2745_v20 = vld [vmem:[%s9840_s3 + $0x5f8] sm:$0xff] }
 0x29e   :  { %4518 = vrcp.f32 %v9298_v25  ;;  %3243 = vmatpush.msra.mxu0 %v2661_v19  ;;  %v2536_v2 = vand.u32 2147483648, %v9298_v25  ;;  %v2534_v24 = vand.u32 2147483647, %v9298_v25  ;;  %vm2530_vm6 = vweird.f32 %v9298_v25  ;;  %v9486_v19 = vld [vmem:[%s9841_s4] sm:$0x7] }
 0x29f   :  { %3285 = vmatpush.msra.mxu1 %v2769_v37  ;;  %v2423_v35 = vmul.f32 %v4515_v29, %v2422_v15  ;;  %3312 = vmatpush.msra.mxu3 %v2805_v27  ;;  %v2736_v37 = vld [vmem:[%s9840_s3 + $0x5b0] sm:$0xff]  ;;  %v2721_v15 = vld [vmem:[%s9840_s3 + $0x538] sm:$0xff] }
 0x2a0   :  { %3244 = vmatpush.msra.mxu0 %v2658_v34  ;;  %v2537_v46 = vor.u32 1.1754944e-38, %v2536_v2  ;;  %vm2535_vm9 = vcmp.eq.f32.partialorder %v2534_v24, 8.507059e+37  ;;  %v2724_v27 = vld [vmem:[%s9840_s3 + $0x550] sm:$0xff] }
 0x2a1   :  { %3286 = vmatpush.msra.mxu1 %v2766_v61  ;;  %v2424_v31 = vadd.f32 %v4515_v29, %v2423_v35  ;;  %3313 = vmatpush.msra.mxu3 %v2802_v9  ;;  %v2715_v61 = vld [vmem:[%s9840_s3 + $0x508] sm:$0xff]  ;;  %v2706_v9 = vld [vmem:[%s9840_s3 + $0x4c0] sm:$0xff] }
 0x2a2   :  { %3245 = vmatpush.msra.mxu0 %v2655_v63  ;;  %v2703_v35 = vld [vmem:[%s9840_s3 + $0x4a8] sm:$0xff] }
 0x2a3   :  { %3287 = vmatpush.msra.mxu1 %v2763_v44  ;;  %v2428_v22 = vsel %vm2427_vm2, %v4515_v29, %v2424_v31  ;;  %3314 = vmatpush.msra.mxu3 %v2799_v52  ;;  %v2810_v29 = vld [vmem:[%s9840_s3 + $0x800] sm:$0xff]  ;;  %v2880_v44 = vpop.f32.mrf.mxu0  ;;  %v2903_v52 = vpop.f32.mrf.mxu1  ;;  %v3481_v31 = vld [vmem:[%s9842_s5 + $0x78] sm:$0xff] }
 0x2a4   :  { %v4519_v16 = vpop.eup %4518  ;;  %v2433_v21 = vsel %vm2430_vm3, %v2432_v11, %v2428_v22  ;;  %3246 = vmatpush.msra.mxu0 %v2652_v1  ;;  %v3478_v22 = vld [vmem:[%s9842_s5 + $0x60] sm:$0xff]  ;;  %v3473_v1 = vld [vmem:[%s9842_s5 + $0x38] sm:$0xff] }
 0x2a5   :  { %3288 = vmatpush.msra.mxu1 %v2760_v38  ;;  %v9338_v54 = vmul.f32 %v2433_v21, %v9177_v41  ;;  %v2526_v6 = vmul.f32 %v4519_v16, %v9298_v25  ;;  %3315 = vmatpush.msra.mxu3 %v2796_v28  ;;  %vm2531_vm5 = vweird.f32 %v4519_v16  ;;  %v2727_v25 = vld [vmem:[%s9840_s3 + $0x568] sm:$0xff]  ;;  %v2850_v38 = vperm.slane %v9486_v19, 0 }
 0x2a6   :  { %3316 = vmatmul.f32.vlgmr.msra.gmra.mxu3 %v9004_v0  ;;  %vm2532_vm8 = vmor %vm2530_vm6, %vm2531_vm5 }
 0x2a7   :  { %3289 = vmatpush.msra.mxu1 %v2757_v62  ;;  %v2527_v41 = vsub.f32 1.0, %v2526_v6  ;;  %4409 = vmatmul.msk.f32.vlgmr.msrb.gmra.mxu2 %vm2856_vm4, %v9338_v54  ;;  %v2881_v28 = vadd.f32 %v2880_v44, %v2850_v38  ;;  %v3477_v62 = vld [vmem:[%s9842_s5 + $0x58] sm:$0xff] }
 0x2a8   :  { %4411 = vmatmul.msk.f32.vlgmr.msrb.gmra.mxu0 %vm2856_vm4, %v9338_v54  ;;  %3139 = vmatpush.msrb.mxu2 %v2840_v49  ;;  %v2926_v34 = vpop.f32.mrf.mxu2  ;;  %v3493_v44 = vld [vmem:[%s9842_s5 + $0xd8] sm:$0xff] }
 0x2a9   :  { %3290 = vmatpush.msra.mxu1 %v2754_v57  ;;  %v2528_v32 = vmul.f32 %v4519_v16, %v2527_v41  ;;  %3337 = vmatpush.msrb.mxu0 %v2847_v39  ;;  %v2904_v21 = vadd.f32 %v2903_v52, %v2881_v28  ;;  %v3475_v57 = vld [vmem:[%s9842_s5 + $0x48] sm:$0xff]  ;;  %v3474_v41 = vld [vmem:[%s9842_s5 + $0x40] sm:$0xff] }
 0x2aa   :  { %3140 = vmatpush.msrb.mxu2 %v2837_v51 }
 0x2ab   :  { %3291 = vmatpush.msra.mxu1 %v2751_v43  ;;  %v2529_v50 = vadd.f32 %v4519_v16, %v2528_v32  ;;  %3338 = vmatpush.msrb.mxu0 %v2844_v10  ;;  %v2883_v11 = vpop.f32.mrf.mxu0  ;;  %v2927_v6 = vadd.f32 %v2926_v34, %v2904_v21  ;;  %v2949_v43 = vpop.f32.mrf.mxu3 }
 0x2ac   :  { %3141 = vmatpush.msrb.mxu2 %v2834_v45  ;;  %v2884_v2 = vadd.f32 %v2883_v11, %v2850_v38 }
 0x2ad   :  { %3292 = vmatpush.msra.mxu1 %v2748_v60  ;;  %v2533_v7 = vsel %vm2532_vm8, %v4519_v16, %v2529_v50  ;;  %v2906_v16 = vpop.f32.mrf.mxu1  ;;  %v2950_v51 = vadd.f32 %v2949_v43, %v2927_v6  ;;  %v3472_v60 = vld [vmem:[%s9842_s5 + $0x30] sm:$0xff]  ;;  %v3490_v6 = vld [vmem:[%s9842_s5 + $0xc0] sm:$0xff] }
 0x2ae   :  { %3293 = vmatmul.f32.vlgmr.msra.gmra.mxu1 %v8816_v30  ;;  %v2538_v8 = vsel %vm2535_vm9, %v2537_v46, %v2533_v7  ;;  %3319 = vmatmul.f32.gmra.mxu3 %v9036_v42  ;;  %v2822_v30 = vld [vmem:[%s9840_s3 + $0x860] sm:$0xff]  ;;  %v2907_v45 = vadd.f32 %v2906_v16, %v2884_v2 }
 0x2af   :  { %3142 = vmatpush.msrb.mxu2 %v2831_v18  ;;  %v2553_v33 = vmul.f32 %v2538_v8, %v9236_v3  ;;  %v2816_v3 = vld [vmem:[%s9840_s3 + $0x830] sm:$0xff]  ;;  %v3471_v18 = vld [vmem:[%s9842_s5 + $0x28] sm:$0xff] }
 0x2b1   :  { %3143 = vmatpush.msrb.mxu2 %v2828_v59  ;;  %4412 = vmatmul.msk.f32.gmra.mxu0 %vm2856_vm4, %v2553_v33  ;;  %v2929_v49 = vpop.f32.mrf.mxu2  ;;  %v3470_v59 = vld [vmem:[%s9842_s5 + $0x20] sm:$0xff] }
 0x2b2   :  { %4410 = vmatmul.msk.f32.gmra.mxu2 %vm2856_vm4, %v2553_v33  ;;  %v2930_v39 = vadd.f32 %v2929_v49, %v2907_v45  ;;  %v3488_v45 = vld [vmem:[%s9842_s5 + $0xb0] sm:$0xff] }
 0x2b3   :  { %3144 = vmatpush.msrb.mxu2 %v2825_v53  ;;  %v2952_v53 = vpop.f32.mrf.mxu3 }
 0x2b5   :  { %3145 = vmatpush.msrb.mxu2 %v2822_v30  ;;  %v2953_v30 = vadd.f32 %v2952_v53, %v2930_v39  ;;  %v3487_v39 = vld [vmem:[%s9842_s5 + $0xa8] sm:$0xff]  ;;  %v3486_v53 = vld [vmem:[%s9842_s5 + $0xa0] sm:$0xff] }
 0x2b6   :  { %3296 = vmatmul.f32.gmra.mxu1 %v8862_v13  ;;  %v2807_v13 = vld [vmem:[%s9840_s3 + $0x7e8] sm:$0xff] }
 0x2b7   :  { %3146 = vmatpush.msrb.mxu2 %v2819_v26  ;;  %v3468_v26 = vld [vmem:[%s9842_s5 + $0x10] sm:$0xff] }
 0x2b9   :  { %3147 = vmatpush.msrb.mxu2 %v2816_v3  ;;  %3247 = vmatmul.f32.vlgmr.msra.gmra.mxu0 %v8551_v55  ;;  %v2798_v55 = vld [vmem:[%s9840_s3 + $0x7a0] sm:$0xff] }
 0x2ba   :  { %3063 = vmatmul.f32.vlgmr.msra.gmra.mxu2 %v8453_v58  ;;  %v2801_v58 = vld [vmem:[%s9840_s3 + $0x7b8] sm:$0xff] }
 0x2bb   :  { %3148 = vmatpush.msrb.mxu2 %v2813_v17 }
 0x2bd   :  { %3149 = vmatpush.msrb.mxu2 %v2810_v29  ;;  %v3467_v29 = vld [vmem:[%s9842_s5 + $0x8] sm:$0xff] }
 0x2bf   :  { %3150 = vmatpush.msrb.mxu2 %v2807_v13 }
 0x2c1   :  { %3151 = vmatpush.msrb.mxu2 %v2804_v47  ;;  %3250 = vmatmul.f32.gmra.mxu0 %v8658_v12  ;;  %v2739_v12 = vld [vmem:[%s9840_s3 + $0x5c8] sm:$0xff]  ;;  %v3466_v47 = vld [vmem:[%s9842_s5] sm:$0xff] }
 0x2c2   :  { %3066 = vmatmul.f32.gmra.mxu2 %v8655_v36  ;;  %v2742_v36 = vld [vmem:[%s9840_s3 + $0x5e0] sm:$0xff] }
 0x2c3   :  { %3152 = vmatpush.msrb.mxu2 %v2801_v58  ;;  %v2972_v63 = vpop.f32.mrf.mxu0 }
 0x2c4   :  { %v2973_v24 = vadd.f32 %v2972_v63, %v2950_v51  ;;  %v3489_v51 = vld [vmem:[%s9842_s5 + $0xb8] sm:$0xff] }
 0x2c5   :  { %3153 = vmatpush.msrb.mxu2 %v2798_v55 }
 0x2c7   :  { %3154 = vmatpush.msrb.mxu2 %v2795_v23 }
 0x2c9   :  { %3254 = vmatpush.msra.mxu2 %v2745_v20  ;;  %4413 = vmatmul.msk.f32.vlgmr.msrb.gmra.mxu0 %vm2856_vm4, %v9338_v54  ;;  %v3476_v54 = vld [vmem:[%s9842_s5 + $0x50] sm:$0xff] }
 0x2ca   :  { %3155 = vmatmul.f32.vlgmr.msrb.gmra.mxu2 %v9004_v0  ;;  %v2730_v0 = vld [vmem:[%s9840_s3 + $0x580] sm:$0xff] }
 0x2cb   :  { %3255 = vmatpush.msra.mxu2 %v2742_v36  ;;  %v2975_v10 = vpop.f32.mrf.mxu0  ;;  %v3041_v36 = vpop.f32.mrf.mxu3 }
 0x2cc   :  { %v2976_v17 = vadd.f32 %v2975_v10, %v2953_v30  ;;  %v3485_v30 = vld [vmem:[%s9842_s5 + $0x98] sm:$0xff] }
 0x2cd   :  { %3256 = vmatpush.msra.mxu2 %v2739_v12 }
 0x2cf   :  { %3257 = vmatpush.msra.mxu2 %v2736_v37 }
 0x2d1   :  { %3258 = vmatpush.msra.mxu2 %v2733_v40  ;;  %4414 = vmatmul.msk.f32.gmra.mxu0 %vm2856_vm4, %v2553_v33  ;;  %v3469_v33 = vld [vmem:[%s9842_s5 + $0x18] sm:$0xff] }
 0x2d2   :  { %3158 = vmatmul.f32.gmra.mxu2 %v9036_v42  ;;  %v2718_v42 = vld [vmem:[%s9840_s3 + $0x520] sm:$0xff]  ;;  %v3497_v40 = vld [vmem:[%s9842_s5 + $0xf8] sm:$0xff] }
 0x2d3   :  { %3259 = vmatpush.msra.mxu2 %v2730_v0  ;;  %3536 = vmatpush.msra.mxu0 %v3497_v40  ;;  %v2851_v0 = vperm.slane %v9486_v19, 1  ;;  %v3044_v52 = vpop.f32.mrf.mxu3 }
 0x2d5   :  { %3260 = vmatpush.msra.mxu2 %v2727_v25  ;;  %v3496_v25 = vld [vmem:[%s9842_s5 + $0xf0] sm:$0xff]  ;;  %v3045_v21 = vadd.f32 %v3044_v52, %v2851_v0 }
 0x2d6   :  { %3537 = vmatpush.msra.mxu0 %v3496_v25 }
 0x2d7   :  { %3261 = vmatpush.msra.mxu2 %v2724_v27  ;;  %v3495_v27 = vld [vmem:[%s9842_s5 + $0xe8] sm:$0xff] }
 0x2d8   :  { %3538 = vmatpush.msra.mxu0 %v3495_v27 }
 0x2d9   :  { %3262 = vmatpush.msra.mxu2 %v2721_v15 }
 0x2db   :  { %3263 = vmatpush.msra.mxu2 %v2718_v42  ;;  %v3042_v42 = vadd.f32 %v3041_v36, %v2851_v0  ;;  %v3483_v0 = vld [vmem:[%s9842_s5 + $0x88] sm:$0xff] }
 0x2dd   :  { %3264 = vmatpush.msra.mxu2 %v2715_v61  ;;  %v3494_v61 = vld [vmem:[%s9842_s5 + $0xe0] sm:$0xff] }
 0x2de   :  { %3539 = vmatpush.msra.mxu0 %v3494_v61 }
 0x2df   :  { %3265 = vmatpush.msra.mxu2 %v2712_v14 }
 0x2e0   :  { %3540 = vmatpush.msra.mxu0 %v3493_v44 }
 0x2e1   :  { %3266 = vmatpush.msra.mxu2 %v2709_v5 }
 0x2e3   :  { %3267 = vmatpush.msra.mxu2 %v2706_v9  ;;  %v3087_v58 = vpop.f32.mrf.mxu0 }
 0x2e5   :  { %3268 = vmatpush.msra.mxu2 %v2703_v35  ;;  %v2995_v32 = vpop.f32.mrf.mxu1 }
 0x2e6   :  { %v2996_v50 = vadd.f32 %v2995_v32, %v2973_v24 }
 0x2e7   :  { %3269 = vmatpush.msra.mxu2 %v2700_v48 }
 0x2e8   :  { %3270 = vmatmul.f32.vlgmr.msra.gmra.mxu2 %v8554_v56  ;;  %v3480_v56 = vld [vmem:[%s9842_s5 + $0x70] sm:$0xff] }
 0x2e9   :  { %3513 = vmatpush.msrb.mxu2 %v3481_v31 }
 0x2eb   :  { %3514 = vmatpush.msrb.mxu2 %v3480_v56  ;;  %v3090_v5 = vpop.f32.mrf.mxu0  ;;  %v3492_v56 = vld [vmem:[%s9842_s5 + $0xd0] sm:$0xff] }
 0x2ec   :  { %3541 = vmatpush.msra.mxu0 %v3492_v56 }
 0x2ed   :  { %v2998_v3 = vpop.f32.mrf.mxu1 }
 0x2ee   :  { %v2999_v13 = vadd.f32 %v2998_v3, %v2976_v17 }
 0x2f0   :  { %3273 = vmatmul.f32.gmra.mxu2 %v8661_v4  ;;  %v3479_v4 = vld [vmem:[%s9842_s5 + $0x68] sm:$0xff] }
 0x2f1   :  { %3515 = vmatpush.msrb.mxu2 %v3479_v4 }
 0x2f3   :  { %3516 = vmatpush.msrb.mxu2 %v3478_v22  ;;  %v3491_v22 = vld [vmem:[%s9842_s5 + $0xc8] sm:$0xff] }
 0x2f4   :  { %3542 = vmatpush.msra.mxu0 %v3491_v22 }
 0x2f5   :  { %3517 = vmatpush.msrb.mxu2 %v3477_v62  ;;  %v3110_v62 = vpop.f32.mrf.mxu1 }
 0x2f6   :  { %3543 = vmatpush.msra.mxu0 %v3490_v6 }
 0x2f7   :  { %3518 = vmatpush.msrb.mxu2 %v3476_v54 }
 0x2f8   :  { %3544 = vmatpush.msra.mxu0 %v3489_v51 }
 0x2f9   :  { %3519 = vmatpush.msrb.mxu2 %v3475_v57 }
 0x2fa   :  { %3545 = vmatpush.msra.mxu0 %v3488_v45 }
 0x2fb   :  { %3520 = vmatpush.msrb.mxu2 %v3474_v41 }
 0x2fc   :  { %3546 = vmatpush.msra.mxu0 %v3487_v39 }
 0x2fd   :  { %3521 = vmatpush.msrb.mxu2 %v3473_v1  ;;  %v3133_v1 = vpop.f32.mrf.mxu3 }
 0x2fe   :  { %3547 = vmatpush.msra.mxu0 %v3486_v53 }
 0x2ff   :  { %3522 = vmatpush.msrb.mxu2 %v3472_v60 }
 0x300   :  { %3548 = vmatpush.msra.mxu0 %v3485_v30 }
 0x301   :  { %3523 = vmatpush.msrb.mxu2 %v3471_v18 }
 0x303   :  { %3524 = vmatpush.msrb.mxu2 %v3470_v59 }
 0x305   :  { %3525 = vmatpush.msrb.mxu2 %v3469_v33  ;;  %v3136_v36 = vpop.f32.mrf.mxu3 }
 0x307   :  { %3526 = vmatpush.msrb.mxu2 %v3468_v26  ;;  %v3113_v26 = vpop.f32.mrf.mxu1 }
 0x309   :  { %3527 = vmatpush.msrb.mxu2 %v3467_v29 }
 0x30b   :  { %3528 = vmatpush.msrb.mxu2 %v3466_v47 }
 0x30f   :  { %v3202_v61 = vpop.f32.mrf.mxu1 }
 0x325   :  { %v3179_v57 = vpop.f32.mrf.mxu0 }
 0x32a   :  { %v3018_v46 = vpop.f32.mrf.mxu2 }
 0x32b   :  { %v9522_v7 = vadd.f32 %v3018_v46, %v2996_v50 }
 0x32d   :  { %v4415_v8 = vmul.f32 -1.442695, %v9522_v7 }
 0x32f   :  { %4520 = vpow2.f32 %v4415_v8 }
 0x335   :  { %v3021_v55 = vpop.f32.mrf.mxu2  ;;  %v4521_v23 = vpop.eup %4520 }
 0x336   :  { %v9540_v20 = vadd.f32 %v3021_v55, %v2999_v13  ;;  %v3364_v12 = vadd.f32 1.0, %v4521_v23  ;;  %v3182_v13 = vpop.f32.mrf.mxu0  ;;  %v3484_v23 = vld [vmem:[%s9842_s5 + $0x90] sm:$0xff] }
 0x337   :  { %3549 = vmatpush.msra.mxu0 %v3484_v23 }
 0x338   :  { %v4418_v37 = vmul.f32 -1.442695, %v9540_v20  ;;  %4522 = vrcp.f32 %v3364_v12  ;;  %v3381_v34 = vand.u32 2147483648, %v3364_v12  ;;  %v3379_v11 = vand.u32 2147483647, %v3364_v12 }
 0x339   :  { %vm3375_vm10 = vweird.f32 %v3364_v12  ;;  %3550 = vmatpush.msra.mxu0 %v3483_v0 }
 0x33a   :  { %4524 = vpow2.f32 %v4418_v37  ;;  %v3382_v49 = vor.u32 1.1754944e-38, %v3381_v34  ;;  %vm3380_vm12 = vcmp.eq.f32.partialorder %v3379_v11, 8.507059e+37 }
 0x33d   :  { %v3064_v15 = vpop.f32.mrf.mxu2 }
 0x33e   :  { %v4523_v14 = vpop.eup %4522  ;;  %v3065_v48 = vadd.f32 %v3064_v15, %v3042_v42  ;;  %v3482_v15 = vld [vmem:[%s9842_s5 + $0x80] sm:$0xff] }
 0x33f   :  { %v3371_v35 = vmul.f32 %v4523_v14, %v3364_v12  ;;  %vm3376_vm7 = vweird.f32 %v4523_v14  ;;  %3551 = vmatpush.msra.mxu0 %v3482_v15 }
 0x340   :  { %v4525_v9 = vpop.eup %4524  ;;  %v3088_v28 = vadd.f32 %v3087_v58, %v3065_v48  ;;  %vm3377_vm11 = vmor %vm3375_vm10, %vm3376_vm7  ;;  %v2852_v48 = vperm.slane %v9486_v19, 2 }
 0x341   :  { %v3367_v31 = vadd.f32 1.0, %v4525_v9  ;;  %v3372_v38 = vsub.f32 1.0, %v3371_v35  ;;  %v3248_v9 = vpop.f32.mrf.mxu0 }
 0x342   :  { %v3111_v43 = vadd.f32 %v3110_v62, %v3088_v28  ;;  %v3203_v56 = vadd.f32 %v3202_v61, %v2852_v48 }
 0x343   :  { %4526 = vrcp.f32 %v3367_v31  ;;  %v3373_v4 = vmul.f32 %v4523_v14, %v3372_v38  ;;  %v3426_v59 = vand.u32 2147483648, %v3367_v31  ;;  %vm3420_vm14 = vweird.f32 %v3367_v31 }
 0x344   :  { %v3134_v46 = vadd.f32 %v3133_v1, %v3111_v43 }
 0x345   :  { %v3067_v16 = vpop.f32.mrf.mxu2  ;;  %v3374_v54 = vadd.f32 %v4523_v14, %v3373_v4  ;;  %v3427_v47 = vor.u32 1.1754944e-38, %v3426_v59 }
 0x346   :  { %v3068_v41 = vadd.f32 %v3067_v16, %v3045_v21 }
 0x347   :  { %v3378_v63 = vsel %vm3377_vm11, %v4523_v14, %v3374_v54 }
 0x348   :  { %v3383_v32 = vsel %vm3380_vm12, %v3382_v49, %v3378_v63  ;;  %v3091_v18 = vadd.f32 %v3090_v5, %v3068_v41  ;;  %v3225_v5 = vpop.f32.mrf.mxu3 }
 0x349   :  { %v4527_v2 = vpop.eup %4526  ;;  %v3460_v24 = vmul.f32 %v3383_v32, %v9522_v7  ;;  %v3424_v7 = vand.u32 2147483647, %v3367_v31  ;;  %v3251_v11 = vpop.f32.mrf.mxu0  ;;  %v3226_v62 = vadd.f32 %v3225_v5, %v3203_v56 }
 0x34a   :  { %v3416_v60 = vmul.f32 %v4527_v2, %v3367_v31  ;;  %vm3421_vm13 = vweird.f32 %v4527_v2  ;;  %v3114_v29 = vadd.f32 %v3113_v26, %v3091_v18  ;;  %v3205_v31 = vpop.f32.mrf.mxu1  ;;  %v3499_v26 = vld [vmem:[%s9842_s5 + $0x108] sm:$0xff] }
 0x34b   :  { %3529 = vmatmul.f32.vlgmr.msrb.gmra.mxu2 %v3460_v24  ;;  %vm3422_vm15 = vmor %vm3420_vm14, %vm3421_vm13  ;;  %vm3425_vm0 = vcmp.eq.f32.partialorder %v3424_v7, 8.507059e+37  ;;  %v3249_v54 = vadd.f32 %v3248_v9, %v3226_v62  ;;  %v3206_v19 = vadd.f32 %v3205_v31, %v2852_v48  ;;  %v3500_v7 = vld [vmem:[%s9842_s5 + $0x110] sm:$0xff]  ;;  %vm3506_vm13 = vcmask 261120  }
 0x34c   :  { %v3417_v50 = vsub.f32 1.0, %v3416_v60  ;;  %v3137_v40 = vadd.f32 %v3136_v36, %v3114_v29 }
 0x34d   :  { %v3156_v10 = vpop.f32.mrf.mxu2 }
 0x34e   :  { %v3418_v8 = vmul.f32 %v4527_v2, %v3417_v50  ;;  %v3157_v33 = vadd.f32 %v3156_v10, %v3134_v46 }
 0x350   :  { %v3419_v3 = vadd.f32 %v4527_v2, %v3418_v8  ;;  %v9584_v17 = vadd.f32 %v3179_v57, %v3157_v33  ;;  %v3228_v4 = vpop.f32.mrf.mxu3  ;;  %v3501_v8 = vld [vmem:[%s9842_s5 + $0x118] sm:$0xff] }
 0x351   :  { %v3229_v50 = vadd.f32 %v3228_v4, %v3206_v19  ;;  %v3340_v18 = vpop.f32.mrf.mxu0  ;;  %3571 = vmatpush.msrb.mxu1 %v3501_v8  ;;  %v3623_v8 = vld [vmem:[%s9844_s7 + $0x8] sm:$0xff] }
 0x352   :  { %v3423_v58 = vsel %vm3422_vm15, %v4527_v2, %v3419_v3  ;;  %v4416_v55 = vmul.f32 -1.442695, %v9584_v17  ;;  %v3294_v49 = vpop.f32.mrf.mxu1 }
 0x353   :  { %v3428_v12 = vsel %vm3425_vm0, %v3427_v47, %v3423_v58  ;;  %v3252_v33 = vadd.f32 %v3251_v11, %v3229_v50  ;;  %3572 = vmatpush.msrb.mxu1 %v3500_v7  ;;  %v3498_v58 = vld [vmem:[%s9842_s5 + $0x100] sm:$0xff]  ;;  %v3625_v50 = vld [vmem:[%s9844_s7 + $0x18] sm:$0xff] }
 0x354   :  { %v3463_v37 = vmul.f32 %v3428_v12, %v9540_v20  ;;  %4528 = vpow2.f32 %v4416_v55 }
 0x355   :  { %v3159_v25 = vpop.f32.mrf.mxu2  ;;  %3573 = vmatpush.msrb.mxu1 %v3499_v26 }
 0x356   :  { %v3160_v27 = vadd.f32 %v3159_v25, %v3137_v40  ;;  %3532 = vmatmul.f32.gmra.mxu2 %v3463_v37 }
 0x357   :  { %3574 = vmatpush.msrb.mxu1 %v3498_v58 }
 0x358   :  { %v9597_v42 = vadd.f32 %v3182_v13, %v3160_v27  ;;  %v3317_v1 = vpop.f32.mrf.mxu3 }
 0x359   :  { %v3343_v0 = vpop.f32.mrf.mxu0 }
 0x35a   :  { %v4529_v14 = vpop.eup %4528  ;;  %v4419_v20 = vmul.f32 -1.442695, %v9597_v42  ;;  %v3297_v55 = vpop.f32.mrf.mxu1 }
 0x35b   :  { %v3365_v35 = vadd.f32 1.0, %v4529_v14 }
 0x35c   :  { %4530 = vpow2.f32 %v4419_v20 }
 0x35d   :  { %4532 = vrcp.f32 %v3365_v35  ;;  %v3396_v22 = vand.u32 2147483648, %v3365_v35  ;;  %v3394_v21 = vand.u32 2147483647, %v3365_v35  ;;  %vm3390_vm2 = vweird.f32 %v3365_v35 }
 0x35f   :  { %v3397_v63 = vor.u32 1.1754944e-38, %v3396_v22  ;;  %vm3395_vm4 = vcmp.eq.f32.partialorder %v3394_v21, 8.507059e+37 }
 0x360   :  { %v3320_v37 = vpop.f32.mrf.mxu3 }
 0x362   :  { %v4531_v44 = vpop.eup %4530 }
 0x363   :  { %v4533_v52 = vpop.eup %4532  ;;  %v3368_v38 = vadd.f32 1.0, %v4531_v44 }
 0x364   :  { %v3386_v34 = vmul.f32 %v4533_v52, %v3365_v35  ;;  %vm3391_vm1 = vweird.f32 %v4533_v52 }
 0x365   :  { %4534 = vrcp.f32 %v3368_v38  ;;  %vm3392_vm3 = vmor %vm3390_vm2, %vm3391_vm1  ;;  %v3441_v46 = vand.u32 2147483648, %v3368_v38  ;;  %v3439_v10 = vand.u32 2147483647, %v3368_v38  ;;  %vm3435_vm6 = vweird.f32 %v3368_v38 }
 0x366   :  { %v3387_v28 = vsub.f32 1.0, %v3386_v34 }
 0x367   :  { %vm3440_vm9 = vcmp.eq.f32.partialorder %v3439_v10, 8.507059e+37 }
 0x368   :  { %v3388_v16 = vmul.f32 %v4533_v52, %v3387_v28 }
 0x36a   :  { %v3389_v6 = vadd.f32 %v4533_v52, %v3388_v16 }
 0x36b   :  { %v4535_v57 = vpop.eup %4534  ;;  %v3271_v41 = vpop.f32.mrf.mxu2 }
 0x36c   :  { %v3393_v43 = vsel %vm3392_vm3, %v4533_v52, %v3389_v6  ;;  %v3272_v51 = vadd.f32 %v3271_v41, %v3249_v54  ;;  %v3431_v2 = vmul.f32 %v4535_v57, %v3368_v38  ;;  %vm3436_vm5 = vweird.f32 %v4535_v57  ;;  %v3629_v41 = vld [vmem:[%s9844_s7 + $0x38] sm:$0xff] }
 0x36d   :  { %v3398_v32 = vsel %vm3395_vm4, %v3397_v63, %v3393_v43  ;;  %vm3437_vm8 = vmor %vm3435_vm6, %vm3436_vm5  ;;  %v4460_v63 = vld [vmem:[%s9843_s6] ss:$0 sm:$0xff]  ;;  %3649 = vmatpush.msrb.mxu3 %v3629_v41  ;;  %vm3634_vm6 = vcmask 523264  }
 0x36e   :  { %v3461_v24 = vmul.f32 %v3398_v32, %v9584_v17  ;;  %v3295_v60 = vadd.f32 %v3294_v49, %v3272_v51  ;;  %v3432_v45 = vsub.f32 1.0, %v3431_v2  ;;  %v3442_v17 = vor.u32 1.1754944e-38, %v3441_v46  ;;  %v3628_v51 = vld [vmem:[%s9844_s7 + $0x30] sm:$0xff] }
 0x36f   :  { %3650 = vmatpush.msrb.mxu3 %v3628_v51 }
 0x370   :  { %v3318_v39 = vadd.f32 %v3317_v1, %v3295_v60  ;;  %3552 = vmatmul.f32.vlgmr.msra.gmra.mxu0 %v3461_v24  ;;  %v3433_v59 = vmul.f32 %v4535_v57, %v3432_v45  ;;  %v3627_v1 = vld [vmem:[%s9844_s7 + $0x28] sm:$0xff]  ;;  %v3626_v24 = vld [vmem:[%s9844_s7 + $0x20] sm:$0xff] }
 0x371   :  { %3651 = vmatpush.msrb.mxu3 %v3627_v1 }
 0x372   :  { %v3341_v53 = vadd.f32 %v3340_v18, %v3318_v39  ;;  %v3434_v30 = vadd.f32 %v4535_v57, %v3433_v59  ;;  %v3624_v39 = vld [vmem:[%s9844_s7 + $0x10] sm:$0xff] }
 0x373   :  { %v3274_v3 = vpop.f32.mrf.mxu2  ;;  %3652 = vmatpush.msrb.mxu3 %v3626_v24 }
 0x374   :  { %v4417_v29 = vmul.f32 -1.442695, %v3341_v53  ;;  %v3275_v13 = vadd.f32 %v3274_v3, %v3252_v33  ;;  %v3438_v47 = vsel %vm3437_vm8, %v4535_v57, %v3434_v30  ;;  %v9647_v33 = vld [vmem:[%s9845_s8 + $0x18] sm:$0xff]  ;;  %v3622_v30 = vld [vmem:[%s9844_s7] sm:$0xff] }
 0x375   :  { %v3443_v23 = vsel %vm3440_vm9, %v3442_v17, %v3438_v47  ;;  %3653 = vmatpush.msrb.mxu3 %v3625_v50  ;;  %3685 = vmatpush.msra.mxu1 %v9647_v33  ;;  %v9663_v17 = vld [vmem:[%s9845_s8 + $0x8] sm:$0xff]  ;;  %v9673_v47 = vld [vmem:[%s9845_s8] sm:$0xff] }
 0x376   :  { %4536 = vpow2.f32 %v4417_v29  ;;  %v3298_v36 = vadd.f32 %v3297_v55, %v3275_v13  ;;  %v3464_v12 = vmul.f32 %v3443_v23, %v9597_v42  ;;  %3752 = vmatpush.msra.mxu2 %v9647_v33  ;;  %4098 = vmatpush.msrb.mxu0 %v9647_v33  ;;  %v3668_v55 = vld [vmem:[%s9847_s10] sm:$0x3] }
 0x377   :  { %3654 = vmatpush.msrb.mxu3 %v3624_v39 }
 0x378   :  { %v3321_v40 = vadd.f32 %v3320_v37, %v3298_v36  ;;  %3555 = vmatmul.f32.gmra.mxu0 %v3464_v12 }
 0x379   :  { %3655 = vmatpush.msrb.mxu3 %v3623_v8 }
 0x37a   :  { %v3344_v25 = vadd.f32 %v3343_v0, %v3321_v40 }
 0x37b   :  { %3656 = vmatpush.msrb.mxu3 %v3622_v30 }
 0x37c   :  { %v4537_v27 = vpop.eup %4536  ;;  %v4420_v15 = vmul.f32 -1.442695, %v3344_v25 }
 0x37d   :  { %v3366_v61 = vadd.f32 1.0, %v4537_v27  ;;  %3822 = vmatpush.msra.mxu3 %v9647_v33 }
 0x37e   :  { %4538 = vpow2.f32 %v4420_v15 }
 0x37f   :  { %4540 = vrcp.f32 %v3366_v61  ;;  %v3411_v48 = vand.u32 2147483648, %v3366_v61  ;;  %v3409_v42 = vand.u32 2147483647, %v3366_v61  ;;  %vm3405_vm10 = vweird.f32 %v3366_v61 }
 0x381   :  { %v3412_v38 = vor.u32 1.1754944e-38, %v3411_v48  ;;  %vm3410_vm12 = vcmp.eq.f32.partialorder %v3409_v42, 8.507059e+37 }
 0x384   :  { %v4539_v14 = vpop.eup %4538 }
 0x385   :  { %v4541_v20 = vpop.eup %4540  ;;  %v3369_v5 = vadd.f32 1.0, %v4539_v14 }
 0x386   :  { %v3401_v9 = vmul.f32 %v4541_v20, %v3366_v61  ;;  %vm3406_vm7 = vweird.f32 %v4541_v20 }
 0x387   :  { %4542 = vrcp.f32 %v3369_v5  ;;  %vm3407_vm11 = vmor %vm3405_vm10, %vm3406_vm7  ;;  %v3456_v22 = vand.u32 2147483648, %v3369_v5  ;;  %v3454_v16 = vand.u32 2147483647, %v3369_v5  ;;  %vm3450_vm15 = vweird.f32 %v3369_v5 }
 0x388   :  { %v3402_v35 = vsub.f32 1.0, %v3401_v9 }
 0x389   :  { %v3457_v54 = vor.u32 1.1754944e-38, %v3456_v22  ;;  %vm3455_vm1 = vcmp.eq.f32.partialorder %v3454_v16, 8.507059e+37 }
 0x38a   :  { %v3403_v44 = vmul.f32 %v4541_v20, %v3402_v35 }
 0x38c   :  { %v3404_v52 = vadd.f32 %v4541_v20, %v3403_v44 }
 0x38d   :  { %v4543_v31 = vpop.eup %4542 }
 0x38e   :  { %v3408_v56 = vsel %vm3407_vm11, %v4541_v20, %v3404_v52  ;;  %v3446_v34 = vmul.f32 %v4543_v31, %v3369_v5  ;;  %vm3451_vm14 = vweird.f32 %v4543_v31 }
 0x38f   :  { %v3413_v4 = vsel %vm3410_vm12, %v3412_v38, %v3408_v56  ;;  %vm3452_vm0 = vmor %vm3450_vm15, %vm3451_vm14 }
 0x390   :  { %v3462_v11 = vmul.f32 %v3413_v4, %v3341_v53  ;;  %v3447_v28 = vsub.f32 1.0, %v3446_v34  ;;  %v9652_v53 = vld [vmem:[%s9845_s8 + $0x10] sm:$0xff] }
 0x391   :  { %3686 = vmatpush.msra.mxu1 %v9652_v53  ;;  %3753 = vmatpush.msra.mxu2 %v9652_v53 }
 0x392   :  { %4421 = vmatmul.msk.f32.vlgmr.msrb.gmra.mxu1 %vm3506_vm13, %v3462_v11  ;;  %v3448_v62 = vmul.f32 %v4543_v31, %v3447_v28  ;;  %3823 = vmatpush.msra.mxu3 %v9652_v53  ;;  %v9713_v11 = vld [vmem:[%s9846_s9] ss:$0 sm:$0xff] }
 0x393   :  { %3687 = vmatpush.msra.mxu1 %v9663_v17  ;;  %4099 = vmatpush.msrb.mxu0 %v9652_v53 }
 0x394   :  { %v3449_v21 = vadd.f32 %v4543_v31, %v3448_v62  ;;  %3754 = vmatpush.msra.mxu2 %v9663_v17  ;;  %3824 = vmatpush.msra.mxu3 %v9663_v17 }
 0x395   :  { %3688 = vmatpush.msra.mxu1 %v9673_v47  ;;  %4100 = vmatpush.msrb.mxu0 %v9663_v17 }
 0x396   :  { %v3453_v6 = vsel %vm3452_vm0, %v4543_v31, %v3449_v21  ;;  %3755 = vmatpush.msra.mxu2 %v9673_v47  ;;  %3825 = vmatpush.msra.mxu3 %v9673_v47 }
 0x397   :  { %v3458_v57 = vsel %vm3455_vm1, %v3457_v54, %v3453_v6  ;;  %3892 = vmatpush.msrb.mxu1 %v9647_v33  ;;  %4101 = vmatpush.msrb.mxu0 %v9673_v47  ;;  %v3669_v54 = vld [vmem:[%s9848_s11] sm:$0x3]  ;;  %s4750_s11 = smov 96  }
 0x398   :  { %v3465_v19 = vmul.f32 %v3458_v57, %v3344_v25  ;;  %3962 = vmatpush.msrb.mxu2 %v9647_v33 }
 0x399   :  { %3893 = vmatpush.msrb.mxu1 %v9652_v53 }
 0x39a   :  { %4422 = vmatmul.msk.f32.gmra.mxu1 %vm3506_vm13, %v3465_v19  ;;  %3963 = vmatpush.msrb.mxu2 %v9652_v53 }
 0x39b   :  { %3894 = vmatpush.msrb.mxu1 %v9663_v17 }
 0x39c   :  { %3964 = vmatpush.msrb.mxu2 %v9663_v17 }
 0x39d   :  { %3895 = vmatpush.msrb.mxu1 %v9673_v47 }
 0x39e   :  { %3965 = vmatpush.msrb.mxu2 %v9673_v47 }
 0x3a2   :  { %4427 = vmatmul.msk.f32.vlgmr.msra.gmra.mxu1 %vm3506_vm13, %v3668_v55 }
 0x3a3   :  { %4168 = vmatpush.msra.mxu1 %v9647_v33 }
 0x3a5   :  { %4169 = vmatpush.msra.mxu1 %v9652_v53 }
 0x3a7   :  { %4170 = vmatpush.msra.mxu1 %v9663_v17 }
 0x3a9   :  { %4171 = vmatpush.msra.mxu1 %v9673_v47 }
 0x3ce   :  { %v3530_v49 = vpop.f32.mrf.mxu2 }
 0x3cf   :  { %v3531_v2 = vadd.f32 %v4460_v63, %v3530_v49 }
 0x3d9   :  { %v3533_v18 = vpop.f32.mrf.mxu2 }
 0x3da   :  { %v3534_v10 = vadd.f32 %v4460_v63, %v3533_v18 }
 0x3ed   :  { %v3553_v43 = vpop.f32.mrf.mxu0 }
 0x3ee   :  { %v3554_v32 = vadd.f32 %v3553_v43, %v3531_v2 }
 0x3f5   :  { %v3556_v59 = vpop.f32.mrf.mxu0 }
 0x3f6   :  { %v3557_v7 = vadd.f32 %v3556_v59, %v3534_v10 }
 0x40f   :  { %v3576_v60 = vpop.f32.mrf.mxu1 }
 0x410   :  { %v9632_v45 = vadd.f32 %v3576_v60, %v3554_v32 }
 0x412   :  { %v4423_v46 = vmul.f32 -1.442695, %v9632_v45 }
 0x414   :  { %4544 = vpow2.f32 %v4423_v46 }
 0x417   :  { %v3579_v26 = vpop.f32.mrf.mxu1 }
 0x418   :  { %v9658_v3 = vadd.f32 %v3579_v26, %v3557_v7 }
 0x41a   :  { %v4545_v29 = vpop.eup %4544  ;;  %v4424_v13 = vmul.f32 -1.442695, %v9658_v3 }
 0x41b   :  { %v3588_v58 = vadd.f32 1.0, %v4545_v29 }
 0x41c   :  { %4546 = vpow2.f32 %v4424_v13 }
 0x41d   :  { %4548 = vrcp.f32 %v3588_v58  ;;  %v3601_v0 = vand.u32 2147483648, %v3588_v58  ;;  %v3599_v27 = vand.u32 2147483647, %v3588_v58  ;;  %vm3595_vm3 = vweird.f32 %v3588_v58 }
 0x41f   :  { %v3602_v14 = vor.u32 1.1754944e-38, %v3601_v0  ;;  %vm3600_vm5 = vcmp.eq.f32.partialorder %v3599_v27, 8.507059e+37  ;;  %v3690_v22 = vpop.f32.mrf.mxu1 }
 0x422   :  { %v4547_v23 = vpop.eup %4546 }
 0x423   :  { %v4549_v36 = vpop.eup %4548  ;;  %v3589_v12 = vadd.f32 1.0, %v4547_v23 }
 0x424   :  { %v3591_v37 = vmul.f32 %v4549_v36, %v3588_v58  ;;  %vm3596_vm2 = vweird.f32 %v4549_v36 }
 0x425   :  { %4550 = vrcp.f32 %v3589_v12  ;;  %vm3597_vm4 = vmor %vm3595_vm3, %vm3596_vm2  ;;  %v3616_v44 = vand.u32 2147483648, %v3589_v12  ;;  %v3614_v52 = vand.u32 2147483647, %v3589_v12  ;;  %vm3610_vm9 = vweird.f32 %v3589_v12 }
 0x426   :  { %v3592_v40 = vsub.f32 1.0, %v3591_v37 }
 0x427   :  { %v3617_v38 = vor.u32 1.1754944e-38, %v3616_v44  ;;  %vm3615_vm10 = vcmp.eq.f32.partialorder %v3614_v52, 8.507059e+37 }
 0x428   :  { %v3593_v25 = vmul.f32 %v4549_v36, %v3592_v40 }
 0x42a   :  { %v3594_v15 = vadd.f32 %v4549_v36, %v3593_v25 }
 0x42b   :  { %v4551_v61 = vpop.eup %4550 }
 0x42c   :  { %v3598_v20 = vsel %vm3597_vm4, %v4549_v36, %v3594_v15  ;;  %v3606_v5 = vmul.f32 %v4551_v61, %v3589_v12  ;;  %vm3611_vm8 = vweird.f32 %v4551_v61 }
 0x42d   :  { %v3603_v9 = vsel %vm3600_vm5, %v3602_v14, %v3598_v20  ;;  %vm3612_vm7 = vmor %vm3610_vm9, %vm3611_vm8 }
 0x42e   :  { %v3620_v35 = vmul.f32 %v3603_v9, %v9632_v45  ;;  %v3607_v48 = vsub.f32 1.0, %v3606_v5 }
 0x430   :  { %v3608_v42 = vmul.f32 %v4551_v61, %v3607_v48  ;;  %4425 = vmatmul.msk.f32.vlgmr.msrb.gmra.mxu3 %vm3634_vm6, %v3620_v35 }
 0x431   :  { %4028 = vmatpush.msrb.mxu3 %v9647_v33 }
 0x432   :  { %v3609_v31 = vadd.f32 %v4551_v61, %v3608_v42 }
 0x433   :  { %4029 = vmatpush.msrb.mxu3 %v9652_v53 }
 0x434   :  { %v3613_v56 = vsel %vm3612_vm7, %v4551_v61, %v3609_v31 }
 0x435   :  { %v3618_v34 = vsel %vm3615_vm10, %v3617_v38, %v3613_v56  ;;  %4030 = vmatpush.msrb.mxu3 %v9663_v17 }
 0x436   :  { %v3621_v4 = vmul.f32 %v3618_v34, %v9658_v3 }
 0x437   :  { %4031 = vmatpush.msrb.mxu3 %v9673_v47 }
 0x438   :  { %4426 = vmatmul.msk.f32.gmra.mxu3 %vm3634_vm6, %v3621_v4 }
 0x4b3   :  { %v3658_v28 = vpop.f32.mrf.mxu3 }
 0x4b4   :  { %v9716_v62 = vadd.f32 %v9713_v11, %v3658_v28 }
 0x4b6   :  { %v3693_v16 = vadd.f32 %v3690_v22, %v9716_v62 }
 0x4b8   :  { %4552 = vtanh.f32 %v3693_v16  ;;  %v4428_v6 = vmul.f32 -1.442695, %v3693_v16 }
 0x4ba   :  { %4554 = vpow2.f32 %v4428_v6 }
 0x4bb   :  { %v9734_v52 = vpop.f32.mrf.mxu3 }
 0x4be   :  { %v4553_v21 = vpop.eup %4552 }
 0x4bf   :  { %3720 = vrot.lane.b32.xlu0 %v4553_v21, %s4747_s25 }
 0x4c0   :  { %v4555_v57 = vpop.eup %4554 }
 0x4c1   :  { %v3697_v19 = vadd.f32 1.0, %v4555_v57 }
 0x4c3   :  { %4556 = vrcp.f32 %v3697_v19  ;;  %v3709_v2 = vand.u32 2147483648, %v3697_v19  ;;  %vm3703_vm12 = vweird.f32 %v3697_v19  ;;  %v3707_v1 = vand.u32 2147483647, %v3697_v19 }
 0x4c5   :  { %v3710_v24 = vor.u32 1.1754944e-38, %v3709_v2  ;;  %vm3708_vm15 = vcmp.eq.f32.partialorder %v3707_v1, 8.507059e+37 }
 0x4c7   :  { %3715 = vrot.lane.b32.xlu0 %v3669_v54, %s4748_s21 }
 0x4c9   :  { %v4557_v49 = vpop.eup %4556 }
 0x4ca   :  { %v3699_v63 = vmul.f32 %v4557_v49, %v3697_v19  ;;  %vm3704_vm11 = vweird.f32 %v4557_v49 }
 0x4cb   :  { %vm3705_vm14 = vmor %vm3703_vm12, %vm3704_vm11 }
 0x4cc   :  { %v3700_v41 = vsub.f32 1.0, %v3699_v63 }
 0x4ce   :  { %v3701_v43 = vmul.f32 %v4557_v49, %v3700_v41 }
 0x4d0   :  { %v3702_v51 = vadd.f32 %v4557_v49, %v3701_v43 }
 0x4d2   :  { %v3706_v32 = vsel %vm3705_vm14, %v4557_v49, %v3702_v51 }
 0x4d3   :  { %v3711_v45 = vsel %vm3708_vm15, %v3710_v24, %v3706_v32 }
 0x531   :  { %v3721_v60 = vpop.permute.xlu0 %3720 }
 0x532   :  { %v3723_v50 = vmul.f32 %v3721_v60, %v3711_v45 }
 0x534   :  { %3725 = vrot.lane.b32.xlu1 %v3723_v50, %s4748_s21 }
 0x539   :  { %v3716_v18 = vpop.permute.xlu0 %3715 }
 0x53a   :  { %v3718_v46 = vmul.f32 %v3716_v18, %v3711_v45 }
 0x5a6   :  { %v3726_v39 = vpop.permute.xlu1 %3725 }
 0x5a7   :  { %v3728_v59 = vadd.f32 %v3726_v39, %v3718_v46 }
 0x5a9   :  { %4558 = vtanh.f32 %v3728_v59  ;;  %v3785_v61 = vrot.slane %v3728_v59, 6 }
 0x5af   :  { %v4559_v10 = vpop.eup %4558 }
 0x5b0   :  { %3731 = vrot.lane.b32.xlu1 %v4559_v10, %s4747_s25 }
 0x622   :  { %v3732_v8 = vpop.permute.xlu1 %3731 }
 0x623   :  { %v3734_v7 = vmul.f32 %v3732_v8, %v3711_v45 }
 0x625   :  { %3736 = vrot.lane.b32.xlu2 %v3734_v7, %s4748_s21 }
 0x67f   :  { %v3737_v33 = vpop.permute.xlu2 %3736 }
 0x680   :  { %4429 = vmatmul.msk.f32.vlgmr.msra.gmra.mxu2 %vm3506_vm13, %v3737_v33 }
 0x703   :  { %v3757_v53 = vpop.f32.mrf.mxu2 }
 0x704   :  { %v3761_v30 = vrot.slane %v3757_v53, 6 }
 0x706   :  { %v3763_v26 = vadd.f32 %v3761_v30, %v9716_v62 }
 0x708   :  { %4560 = vtanh.f32 %v3763_v26  ;;  %v4430_v17 = vmul.f32 -1.442695, %v3763_v26 }
 0x70a   :  { %4562 = vpow2.f32 %v4430_v17 }
 0x70e   :  { %v4561_v3 = vpop.eup %4560 }
 0x70f   :  { %3789 = vrot.lane.b32.xlu2 %v4561_v3, %s4747_s25 }
 0x710   :  { %v4563_v29 = vpop.eup %4562 }
 0x711   :  { %v3767_v13 = vadd.f32 1.0, %v4563_v29 }
 0x713   :  { %4564 = vrcp.f32 %v3767_v13  ;;  %v3779_v12 = vand.u32 2147483648, %v3767_v13  ;;  %vm3773_vm1 = vweird.f32 %v3767_v13  ;;  %v3777_v37 = vand.u32 2147483647, %v3767_v13 }
 0x715   :  { %v3780_v0 = vor.u32 1.1754944e-38, %v3779_v12  ;;  %vm3778_vm3 = vcmp.eq.f32.partialorder %v3777_v37, 8.507059e+37 }
 0x719   :  { %v4565_v47 = vpop.eup %4564 }
 0x71a   :  { %v3769_v58 = vmul.f32 %v4565_v47, %v3767_v13  ;;  %vm3774_vm0 = vweird.f32 %v4565_v47 }
 0x71b   :  { %vm3775_vm2 = vmor %vm3773_vm1, %vm3774_vm0 }
 0x71c   :  { %v3770_v55 = vsub.f32 1.0, %v3769_v58 }
 0x71e   :  { %v3771_v23 = vmul.f32 %v4565_v47, %v3770_v55 }
 0x720   :  { %v3772_v36 = vadd.f32 %v4565_v47, %v3771_v23 }
 0x722   :  { %v3776_v40 = vsel %vm3775_vm2, %v4565_v47, %v3772_v36 }
 0x723   :  { %v3781_v27 = vsel %vm3778_vm3, %v3780_v0, %v3776_v40 }
 0x724   :  { %v3787_v14 = vmul.f32 %v3785_v61, %v3781_v27 }
 0x769   :  { %v3790_v25 = vpop.permute.xlu2 %3789 }
 0x76a   :  { %v3792_v15 = vmul.f32 %v3790_v25, %v3781_v27 }
 0x76c   :  { %3794 = vrot.lane.b32.xlu0 %v3792_v15, %s4748_s21 }
 0x7de   :  { %v3795_v20 = vpop.permute.xlu0 %3794 }
 0x7df   :  { %v3797_v5 = vadd.f32 %v3795_v20, %v3787_v14 }
 0x7e1   :  { %4566 = vtanh.f32 %v3797_v5  ;;  %v3855_v1 = vrot.slane %v3797_v5, 6  ;;  %v9750_v5 = vadd.f32 %v9713_v11, %v9734_v52 }
 0x7e7   :  { %v4567_v9 = vpop.eup %4566 }
 0x7e8   :  { %3800 = vrot.lane.b32.xlu1 %v4567_v9, %s4747_s25 }
 0x85a   :  { %v3801_v35 = vpop.permute.xlu1 %3800 }
 0x85b   :  { %v3803_v48 = vmul.f32 %v3801_v35, %v3781_v27 }
 0x85d   :  { %v3805_v44 = vrot.slane %v3803_v48, 2 }
 0x85f   :  { %3806 = vrot.lane.b32.xlu2 %v3805_v44, %s4748_s21 }
 0x8b9   :  { %v3807_v42 = vpop.permute.xlu2 %3806 }
 0x8ba   :  { %4431 = vmatmul.msk.f32.vlgmr.msra.gmra.mxu3 %vm3506_vm13, %v3807_v42 }
 0x93d   :  { %v3827_v31 = vpop.f32.mrf.mxu3 }
 0x93e   :  { %v3831_v38 = vrot.slane %v3827_v31, 4 }
 0x940   :  { %v3833_v56 = vadd.f32 %v3831_v38, %v9716_v62 }
 0x942   :  { %4568 = vtanh.f32 %v3833_v56  ;;  %v4432_v4 = vmul.f32 -1.442695, %v3833_v56 }
 0x944   :  { %4570 = vpow2.f32 %v4432_v4 }
 0x948   :  { %v4569_v34 = vpop.eup %4568 }
 0x949   :  { %3859 = vrot.lane.b32.xlu0 %v4569_v34, %s4747_s25 }
 0x94a   :  { %v4571_v28 = vpop.eup %4570 }
 0x94b   :  { %v3837_v22 = vadd.f32 1.0, %v4571_v28 }
 0x94d   :  { %4572 = vrcp.f32 %v3837_v22  ;;  %v3849_v19 = vand.u32 2147483648, %v3837_v22  ;;  %vm3843_vm5 = vweird.f32 %v3837_v22  ;;  %v3847_v49 = vand.u32 2147483647, %v3837_v22 }
 0x94f   :  { %v3850_v41 = vor.u32 1.1754944e-38, %v3849_v19  ;;  %vm3848_vm9 = vcmp.eq.f32.partialorder %v3847_v49, 8.507059e+37 }
 0x953   :  { %v4573_v16 = vpop.eup %4572 }
 0x954   :  { %v3839_v21 = vmul.f32 %v4573_v16, %v3837_v22  ;;  %vm3844_vm4 = vweird.f32 %v4573_v16 }
 0x955   :  { %vm3845_vm8 = vmor %vm3843_vm5, %vm3844_vm4 }
 0x956   :  { %v3840_v54 = vsub.f32 1.0, %v3839_v21 }
 0x958   :  { %v3841_v6 = vmul.f32 %v4573_v16, %v3840_v54 }
 0x95a   :  { %v3842_v57 = vadd.f32 %v4573_v16, %v3841_v6 }
 0x95c   :  { %v3846_v63 = vsel %vm3845_vm8, %v4573_v16, %v3842_v57 }
 0x95d   :  { %v3851_v51 = vsel %vm3848_vm9, %v3850_v41, %v3846_v63 }
 0x95e   :  { %v3857_v32 = vmul.f32 %v3855_v1, %v3851_v51 }
 0x9bb   :  { %v3860_v43 = vpop.permute.xlu0 %3859 }
 0x9bc   :  { %v3862_v2 = vmul.f32 %v3860_v43, %v3851_v51 }
 0x9be   :  { %3864 = vrot.lane.b32.xlu1 %v3862_v2, %s4748_s21 }
 0xa30   :  { %v3865_v24 = vpop.permute.xlu1 %3864 }
 0xa31   :  { %v3867_v60 = vadd.f32 %v3865_v24, %v3857_v32 }
 0xa33   :  { %4574 = vtanh.f32 %v3867_v60  ;;  %v3925_v37 = vrot.slane %v3867_v60, 6 }
 0xa39   :  { %v4575_v45 = vpop.eup %4574 }
 0xa3a   :  { %3870 = vrot.lane.b32.xlu2 %v4575_v45, %s4747_s25 }
 0xa94   :  { %v3871_v50 = vpop.permute.xlu2 %3870 }
 0xa95   :  { %v3873_v18 = vmul.f32 %v3871_v50, %v3851_v51 }
 0xa97   :  { %v3875_v46 = vrot.slane %v3873_v18, 4 }
 0xa99   :  { %3876 = vrot.lane.b32.xlu0 %v3875_v46, %s4748_s21 }
 0xb0b   :  { %v3877_v39 = vpop.permute.xlu0 %3876 }
 0xb0c   :  { %4433 = vmatmul.msk.f32.vlgmr.msrb.gmra.mxu1 %vm3506_vm13, %v3877_v39 }
 0xb89   :  { %v3897_v59 = vpop.f32.mrf.mxu1 }
 0xb8a   :  { %v3901_v10 = vrot.slane %v3897_v59, 2 }
 0xb8c   :  { %v3903_v8 = vadd.f32 %v3901_v10, %v9716_v62 }
 0xb8e   :  { %4576 = vtanh.f32 %v3903_v8  ;;  %v4434_v33 = vmul.f32 -1.442695, %v3903_v8 }
 0xb90   :  { %4578 = vpow2.f32 %v4434_v33 }
 0xb94   :  { %v4577_v7 = vpop.eup %4576 }
 0xb95   :  { %3929 = vrot.lane.b32.xlu1 %v4577_v7, %s4747_s25 }
 0xb96   :  { %v4579_v53 = vpop.eup %4578 }
 0xb97   :  { %v3907_v30 = vadd.f32 1.0, %v4579_v53 }
 0xb99   :  { %4580 = vrcp.f32 %v3907_v30  ;;  %v3919_v47 = vand.u32 2147483648, %v3907_v30  ;;  %vm3913_vm10 = vweird.f32 %v3907_v30  ;;  %v3917_v58 = vand.u32 2147483647, %v3907_v30 }
 0xb9b   :  { %v3920_v55 = vor.u32 1.1754944e-38, %v3919_v47  ;;  %vm3918_vm12 = vcmp.eq.f32.partialorder %v3917_v58, 8.507059e+37 }
 0xb9f   :  { %v4581_v26 = vpop.eup %4580 }
 0xba0   :  { %v3909_v3 = vmul.f32 %v4581_v26, %v3907_v30  ;;  %vm3914_vm7 = vweird.f32 %v4581_v26 }
 0xba1   :  { %vm3915_vm11 = vmor %vm3913_vm10, %vm3914_vm7 }
 0xba2   :  { %v3910_v17 = vsub.f32 1.0, %v3909_v3 }
 0xba4   :  { %v3911_v29 = vmul.f32 %v4581_v26, %v3910_v17 }
 0xba6   :  { %v3912_v13 = vadd.f32 %v4581_v26, %v3911_v29 }
 0xba8   :  { %v3916_v62 = vsel %vm3915_vm11, %v4581_v26, %v3912_v13 }
 0xba9   :  { %v3921_v36 = vsel %vm3918_vm12, %v3920_v55, %v3916_v62 }
 0xbaa   :  { %v3927_v40 = vmul.f32 %v3925_v37, %v3921_v36 }
 0xc07   :  { %v3930_v23 = vpop.permute.xlu1 %3929 }
 0xc08   :  { %v3932_v12 = vmul.f32 %v3930_v23, %v3921_v36 }
 0xc0a   :  { %3934 = vrot.lane.b32.xlu2 %v3932_v12, %s4748_s21 }
 0xc64   :  { %v3935_v0 = vpop.permute.xlu2 %3934 }
 0xc65   :  { %v3937_v25 = vadd.f32 %v3935_v0, %v3927_v40 }
 0xc67   :  { %4582 = vtanh.f32 %v3937_v25  ;;  %v3992_v57 = vrot.slane %v3937_v25, 6 }
 0xc6d   :  { %v4583_v27 = vpop.eup %4582 }
 0xc6e   :  { %3940 = vrot.lane.b32.xlu0 %v4583_v27, %s4747_s25 }
 0xce0   :  { %v3941_v15 = vpop.permute.xlu0 %3940 }
 0xce1   :  { %v3943_v61 = vmul.f32 %v3941_v15, %v3921_v36 }
 0xce3   :  { %v3945_v14 = vrot.slane %v3943_v61, 6 }
 0xce5   :  { %3946 = vrot.lane.b32.xlu1 %v3945_v14, %s4748_s21 }
 0xd57   :  { %v3947_v20 = vpop.permute.xlu1 %3946 }
 0xd58   :  { %4435 = vmatmul.msk.f32.vlgmr.msrb.gmra.mxu2 %vm3506_vm13, %v3947_v20 }
 0xddb   :  { %v3967_v9 = vpop.f32.mrf.mxu2 }
 0xddc   :  { %v3970_v35 = vadd.f32 %v3967_v9, %v9750_v5 }
 0xdde   :  { %4584 = vtanh.f32 %v3970_v35  ;;  %v4436_v44 = vmul.f32 -1.442695, %v3970_v35 }
 0xde0   :  { %4586 = vpow2.f32 %v4436_v44 }
 0xde4   :  { %v4585_v48 = vpop.eup %4584 }
 0xde5   :  { %3996 = vrot.lane.b32.xlu2 %v4585_v48, %s4747_s25 }
 0xde6   :  { %v4587_v42 = vpop.eup %4586 }
 0xde7   :  { %v3974_v31 = vadd.f32 1.0, %v4587_v42 }
 0xde9   :  { %4588 = vrcp.f32 %v3974_v31  ;;  %v3986_v11 = vand.u32 2147483648, %v3974_v31  ;;  %vm3980_vm15 = vweird.f32 %v3974_v31  ;;  %v3984_v52 = vand.u32 2147483647, %v3974_v31 }
 0xdeb   :  { %v3987_v16 = vor.u32 1.1754944e-38, %v3986_v11  ;;  %vm3985_vm1 = vcmp.eq.f32.partialorder %v3984_v52, 8.507059e+37 }
 0xdef   :  { %v4589_v38 = vpop.eup %4588 }
 0xdf0   :  { %v3976_v56 = vmul.f32 %v4589_v38, %v3974_v31  ;;  %vm3981_vm14 = vweird.f32 %v4589_v38 }
 0xdf1   :  { %vm3982_vm0 = vmor %vm3980_vm15, %vm3981_vm14 }
 0xdf2   :  { %v3977_v34 = vsub.f32 1.0, %v3976_v56 }
 0xdf4   :  { %v3978_v4 = vmul.f32 %v4589_v38, %v3977_v34 }
 0xdf6   :  { %v3979_v28 = vadd.f32 %v4589_v38, %v3978_v4 }
 0xdf8   :  { %v3983_v22 = vsel %vm3982_vm0, %v4589_v38, %v3979_v28  ;;  %vm4341_vm0 = vcmask 261126  }
 0xdf9   :  { %v3988_v54 = vsel %vm3985_vm1, %v3987_v16, %v3983_v22 }
 0xdfa   :  { %v3994_v19 = vmul.f32 %v3992_v57, %v3988_v54 }
 0xe3f   :  { %v3997_v21 = vpop.permute.xlu2 %3996 }
 0xe40   :  { %v3999_v6 = vmul.f32 %v3997_v21, %v3988_v54 }
 0xe42   :  { %4001 = vrot.lane.b32.xlu0 %v3999_v6, %s4748_s21 }
 0xeb4   :  { %v4002_v49 = vpop.permute.xlu0 %4001 }
 0xeb5   :  { %v4004_v63 = vadd.f32 %v4002_v49, %v3994_v19 }
 0xeb7   :  { %4590 = vtanh.f32 %v4004_v63  ;;  %v4061_v29 = vrot.slane %v4004_v63, 6 }
 0xebd   :  { %v4591_v41 = vpop.eup %4590 }
 0xebe   :  { %4007 = vrot.lane.b32.xlu1 %v4591_v41, %s4747_s25 }
 0xf30   :  { %v4008_v43 = vpop.permute.xlu1 %4007 }
 0xf31   :  { %v4010_v51 = vmul.f32 %v4008_v43, %v3988_v54 }
 0xf33   :  { %4012 = vrot.lane.b32.xlu2 %v4010_v51, %s4748_s21 }
 0xf8d   :  { %v4013_v2 = vpop.permute.xlu2 %4012 }
 0xf8e   :  { %4437 = vmatmul.msk.f32.vlgmr.msrb.gmra.mxu3 %vm3506_vm13, %v4013_v2 }
0x1011   :  { %v4033_v1 = vpop.f32.mrf.mxu3 }
0x1012   :  { %v4037_v32 = vrot.slane %v4033_v1, 6 }
0x1014   :  { %v4039_v24 = vadd.f32 %v4037_v32, %v9750_v5 }
0x1016   :  { %4592 = vtanh.f32 %v4039_v24  ;;  %v4438_v45 = vmul.f32 -1.442695, %v4039_v24 }
0x1018   :  { %4594 = vpow2.f32 %v4438_v45 }
0x101c   :  { %v4593_v60 = vpop.eup %4592 }
0x101d   :  { %4065 = vrot.lane.b32.xlu0 %v4593_v60, %s4747_s25 }
0x101e   :  { %v4595_v50 = vpop.eup %4594 }
0x101f   :  { %v4043_v18 = vadd.f32 1.0, %v4595_v50 }
0x1021   :  { %4596 = vrcp.f32 %v4043_v18  ;;  %v4055_v7 = vand.u32 2147483648, %v4043_v18  ;;  %vm4049_vm3 = vweird.f32 %v4043_v18  ;;  %v4053_v33 = vand.u32 2147483647, %v4043_v18 }
0x1023   :  { %v4056_v30 = vor.u32 1.1754944e-38, %v4055_v7  ;;  %vm4054_vm5 = vcmp.eq.f32.partialorder %v4053_v33, 8.507059e+37 }
0x1027   :  { %v4597_v46 = vpop.eup %4596 }
0x1028   :  { %v4045_v39 = vmul.f32 %v4597_v46, %v4043_v18  ;;  %vm4050_vm2 = vweird.f32 %v4597_v46 }
0x1029   :  { %vm4051_vm4 = vmor %vm4049_vm3, %vm4050_vm2 }
0x102a   :  { %v4046_v59 = vsub.f32 1.0, %v4045_v39 }
0x102c   :  { %v4047_v10 = vmul.f32 %v4597_v46, %v4046_v59 }
0x102e   :  { %v4048_v8 = vadd.f32 %v4597_v46, %v4047_v10 }
0x1030   :  { %v4052_v53 = vsel %vm4051_vm4, %v4597_v46, %v4048_v8  ;;  %vm4315_vm4 = vcmask 25600  }
0x1031   :  { %v4057_v3 = vsel %vm4054_vm5, %v4056_v30, %v4052_v53 }
0x1032   :  { %v4063_v13 = vmul.f32 %v4061_v29, %v4057_v3  ;;  %v4220_v29 = vld [vmem:[%s9849_s12] sm:$0xff] }
0x108f   :  { %v4066_v26 = vpop.permute.xlu0 %4065 }
0x1090   :  { %v4068_v17 = vmul.f32 %v4066_v26, %v4057_v3  ;;  %v4223_v26 = vld [vmem:[%s9849_s12 + $0x18] sm:$0xff] }
0x1091   :  { %4246 = vmatpush.msra.mxu2 %v4223_v26 }
0x1092   :  { %4070 = vrot.lane.b32.xlu1 %v4068_v17, %s4748_s21  ;;  %v4221_v17 = vld [vmem:[%s9849_s12 + $0x8] sm:$0xff] }
0x1104   :  { %v4071_v47 = vpop.permute.xlu1 %4070 }
0x1105   :  { %v4073_v58 = vadd.f32 %v4071_v47, %v4063_v13 }
0x1107   :  { %4598 = vtanh.f32 %v4073_v58  ;;  %v4131_v28 = vrot.slane %v4073_v58, 6 }
0x110d   :  { %v4599_v62 = vpop.eup %4598 }
0x110e   :  { %4076 = vrot.lane.b32.xlu2 %v4599_v62, %s4747_s25 }
0x1168   :  { %v4077_v55 = vpop.permute.xlu2 %4076 }
0x1169   :  { %v4079_v23 = vmul.f32 %v4077_v55, %v4057_v3  ;;  %v4222_v3 = vld [vmem:[%s9849_s12 + $0x10] sm:$0xff]  ;;  %s4377_s12 = sshll.u32 %s9855_s18, 4  ;;  %s4754_s18 = smov [#allocation2]   ;;  %s4378_s12 = int_to_ptr.hbm [resolvable:$true] %s4377_s12 }
0x116a   :  { %4247 = vmatpush.msra.mxu2 %v4222_v3  ;;  %s4353_s28 = sshll.u32 %s4754_s18, 4  ;;  %s4354_s28 = int_to_ptr.vmem [resolvable:$true] %s4353_s28 }
0x116b   :  { %v4081_v36 = vrot.slane %v4079_v23, 2  ;;  %v4281_v23 = vld [vmem:[%s9851_s14 + $0x38] sm:$0xff] }
0x116c   :  { %4248 = vmatpush.msra.mxu2 %v4221_v17  ;;  %4297 = vmatpush.msra.mxu3 %v4281_v23 }
0x116d   :  { %4082 = vrot.lane.b32.xlu0 %v4081_v36, %s4748_s21  ;;  %v4280_v36 = vld [vmem:[%s9851_s14 + $0x30] sm:$0xff] }
0x116e   :  { %4249 = vmatpush.msra.mxu2 %v4220_v29  ;;  %4298 = vmatpush.msra.mxu3 %v4280_v36 }
0x11df   :  { %v4083_v12 = vpop.permute.xlu0 %4082 }
0x11e0   :  { %4439 = vmatmul.msk.f32.vlgmr.msrb.gmra.mxu0 %vm3506_vm13, %v4083_v12  ;;  %v4462_v12 = vld [vmem:[%s9850_s13] ss:$0 sm:$0xff] }
0x125d   :  { %v4103_v37 = vpop.f32.mrf.mxu0 }
0x125e   :  { %v4107_v40 = vrot.slane %v4103_v37, 4  ;;  %v4279_v37 = vld [vmem:[%s9851_s14 + $0x28] sm:$0xff] }
0x125f   :  { %4299 = vmatpush.msra.mxu3 %v4279_v37 }
0x1260   :  { %v4109_v0 = vadd.f32 %v4107_v40, %v9750_v5  ;;  %v4278_v40 = vld [vmem:[%s9851_s14 + $0x20] sm:$0xff] }
0x1261   :  { %4300 = vmatpush.msra.mxu3 %v4278_v40 }
0x1262   :  { %4600 = vtanh.f32 %v4109_v0  ;;  %v4440_v27 = vmul.f32 -1.442695, %v4109_v0  ;;  %v4277_v0 = vld [vmem:[%s9851_s14 + $0x18] sm:$0xff] }
0x1263   :  { %4301 = vmatpush.msra.mxu3 %v4277_v0 }
0x1264   :  { %4602 = vpow2.f32 %v4440_v27 }
0x1268   :  { %v4601_v25 = vpop.eup %4600 }
0x1269   :  { %4135 = vrot.lane.b32.xlu1 %v4601_v25, %s4747_s25 }
0x126a   :  { %v4603_v15 = vpop.eup %4602 }
0x126b   :  { %v4113_v61 = vadd.f32 1.0, %v4603_v15  ;;  %v4276_v15 = vld [vmem:[%s9851_s14 + $0x10] sm:$0xff] }
0x126c   :  { %4302 = vmatpush.msra.mxu3 %v4276_v15 }
0x126d   :  { %4604 = vrcp.f32 %v4113_v61  ;;  %v4125_v44 = vand.u32 2147483648, %v4113_v61  ;;  %vm4119_vm9 = vweird.f32 %v4113_v61  ;;  %v4123_v42 = vand.u32 2147483647, %v4113_v61 }
0x126f   :  { %v4126_v38 = vor.u32 1.1754944e-38, %v4125_v44  ;;  %vm4124_vm10 = vcmp.eq.f32.partialorder %v4123_v42, 8.507059e+37 }
0x1273   :  { %v4605_v14 = vpop.eup %4604 }
0x1274   :  { %v4115_v20 = vmul.f32 %v4605_v14, %v4113_v61  ;;  %vm4120_vm8 = vweird.f32 %v4605_v14 }
0x1275   :  { %vm4121_vm7 = vmor %vm4119_vm9, %vm4120_vm8 }
0x1276   :  { %v4116_v9 = vsub.f32 1.0, %v4115_v20  ;;  %v4274_v20 = vld [vmem:[%s9851_s14] sm:$0xff] }
0x1278   :  { %v4117_v35 = vmul.f32 %v4605_v14, %v4116_v9 }
0x127a   :  { %v4118_v48 = vadd.f32 %v4605_v14, %v4117_v35 }
0x127c   :  { %v4122_v31 = vsel %vm4121_vm7, %v4605_v14, %v4118_v48  ;;  %v4275_v14 = vld [vmem:[%s9851_s14 + $0x8] sm:$0xff] }
0x127d   :  { %v4127_v34 = vsel %vm4124_vm10, %v4126_v38, %v4122_v31  ;;  %4303 = vmatpush.msra.mxu3 %v4275_v14 }
0x127e   :  { %v4133_v11 = vmul.f32 %v4131_v28, %v4127_v34 }
0x127f   :  { %4304 = vmatpush.msra.mxu3 %v4274_v20 }
0x12db   :  { %v4136_v56 = vpop.permute.xlu1 %4135 }
0x12dc   :  { %v4138_v4 = vmul.f32 %v4136_v56, %v4127_v34 }
0x12de   :  { %4140 = vrot.lane.b32.xlu2 %v4138_v4, %s4748_s21 }
0x1338   :  { %v4141_v52 = vpop.permute.xlu2 %4140 }
0x1339   :  { %v4143_v22 = vadd.f32 %v4141_v52, %v4133_v11 }
0x133b   :  { %4606 = vtanh.f32 %v4143_v22  ;;  %v4201_v8 = vrot.slane %v4143_v22, 6  ;;  %v4749_v22 = vmov 4  }
0x133c   :  { %4458 = vset.pattern.permute.xlu1 %v4749_v22  ;;  %4459 = vset.pattern.permute.xlu0 %v4749_v22 }
0x1341   :  { %v4607_v16 = vpop.eup %4606 }
0x1342   :  { %4146 = vrot.lane.b32.xlu0 %v4607_v16, %s4747_s25  ;;  %v4463_v16 = vld [vmem:[%s9852_s15] ss:$0 sm:$0xff]  ;;  %s4753_s15 = smov [#allocation6]  }
0x1343   :  { %s4375_s3 = sshll.u32 %s4753_s15, 4  ;;  %s4376_s3 = int_to_ptr.vmem [resolvable:$true] %s4375_s3 }
0x13b4   :  { %v4147_v21 = vpop.permute.xlu0 %4146 }
0x13b5   :  { %v4149_v54 = vmul.f32 %v4147_v21, %v4127_v34 }
0x13b7   :  { %v4151_v6 = vrot.slane %v4149_v54, 4 }
0x13b9   :  { %4152 = vrot.lane.b32.xlu1 %v4151_v6, %s4748_s21 }
0x142b   :  { %v4153_v57 = vpop.permute.xlu1 %4152 }
0x142c   :  { %4441 = vmatmul.msk.f32.vlgmr.msra.gmra.mxu1 %vm3506_vm13, %v4153_v57  ;;  %v4752_v57 = vmov 8.0  }
0x14a9   :  { %v4173_v19 = vpop.f32.mrf.mxu1 }
0x14aa   :  { %v4177_v49 = vrot.slane %v4173_v19, 2 }
0x14ac   :  { %v4179_v63 = vadd.f32 %v4177_v49, %v9750_v5 }
0x14ae   :  { %4608 = vtanh.f32 %v4179_v63  ;;  %v4442_v43 = vmul.f32 -1.442695, %v4179_v63 }
0x14b0   :  { %4610 = vpow2.f32 %v4442_v43 }
0x14b4   :  { %v4609_v41 = vpop.eup %4608 }
0x14b5   :  { %4205 = vrot.lane.b32.xlu2 %v4609_v41, %s4747_s25 }
0x14b6   :  { %v4611_v51 = vpop.eup %4610 }
0x14b7   :  { %v4183_v2 = vadd.f32 1.0, %v4611_v51 }
0x14b9   :  { %4612 = vrcp.f32 %v4183_v2  ;;  %v4195_v50 = vand.u32 2147483648, %v4183_v2  ;;  %vm4189_vm12 = vweird.f32 %v4183_v2  ;;  %v4193_v18 = vand.u32 2147483647, %v4183_v2 }
0x14bb   :  { %v4196_v46 = vor.u32 1.1754944e-38, %v4195_v50  ;;  %vm4194_vm15 = vcmp.eq.f32.partialorder %v4193_v18, 8.507059e+37 }
0x14bf   :  { %v4613_v1 = vpop.eup %4612 }
0x14c0   :  { %v4185_v32 = vmul.f32 %v4613_v1, %v4183_v2  ;;  %vm4190_vm11 = vweird.f32 %v4613_v1 }
0x14c1   :  { %vm4191_vm14 = vmor %vm4189_vm12, %vm4190_vm11 }
0x14c2   :  { %v4186_v24 = vsub.f32 1.0, %v4185_v32 }
0x14c4   :  { %v4187_v60 = vmul.f32 %v4613_v1, %v4186_v24 }
0x14c6   :  { %v4188_v45 = vadd.f32 %v4613_v1, %v4187_v60 }
0x14c8   :  { %v4192_v5 = vsel %vm4191_vm14, %v4613_v1, %v4188_v45 }
0x14c9   :  { %v4197_v59 = vsel %vm4194_vm15, %v4196_v46, %v4192_v5 }
0x14ca   :  { %v4203_v7 = vmul.f32 %v4201_v8, %v4197_v59 }
0x150f   :  { %v4206_v39 = vpop.permute.xlu2 %4205 }
0x1510   :  { %v4208_v10 = vmul.f32 %v4206_v39, %v4197_v59 }
0x1512   :  { %4210 = vrot.lane.b32.xlu0 %v4208_v10, %s4748_s21 }
0x1584   :  { %v4211_v33 = vpop.permute.xlu0 %4210 }
0x1585   :  { %v9773_v53 = vadd.f32 %v4211_v33, %v4203_v7 }
0x1587   :  { %4614 = vtanh.f32 %v9773_v53 }
0x158d   :  { %v4615_v30 = vpop.eup %4614 }
0x158e   :  { %4216 = vrot.lane.b32.xlu1 %v4615_v30, %s4747_s25 }
0x1600   :  { %v4217_v13 = vpop.permute.xlu1 %4216 }
0x1601   :  { %v4219_v47 = vmul.f32 %v4217_v13, %v4197_v59 }
0x1603   :  { %v4229_v58 = vrot.slane %v4219_v47, 6 }
0x1605   :  { %4230 = vrot.lane.b32.xlu2 %v4229_v58, %s4748_s21 }
0x160d   :  { %4338 = vrot.lane.b32.xlu2 %v4219_v47, %s4748_s21 }
0x165f   :  { %v4231_v62 = vpop.permute.xlu2 %4230 }
0x1660   :  { %4443 = vmatmul.msk.f32.vlgmr.msra.gmra.mxu2 %vm3506_vm13, %v4231_v62 }
0x1667   :  { %v4339_v55 = vpop.permute.xlu2 %4338 }
0x1668   :  { %4342 = vst.msk [vmem:[#allocation4 - $0x6] sm:$0xc0] %vm4341_vm0, %v4339_v55 }
0x1669   :  { %4369 = dma.vmem_to_hbm [thread:$0]  %s4365_s24, 32, %s4367_s2, [#allocation5]  }
0x16e3   :  { %v4251_v25 = vpop.f32.mrf.mxu2 }
0x16e4   :  { %v4252_v27 = vadd.f32 %v4462_v12, %v4251_v25 }
0x16e6   :  { %v4444_v61 = vmul.f32 -1.442695, %v4252_v27 }
0x16e8   :  { %4616 = vpow2.f32 %v4444_v61 }
0x16ee   :  { %v4617_v9 = vpop.eup %4616 }
0x16ef   :  { %v4257_v35 = vadd.f32 1.0, %v4617_v9 }
0x16f1   :  { %4618 = vrcp.f32 %v4257_v35  ;;  %v4269_v31 = vand.u32 2147483648, %v4257_v35  ;;  %v4267_v56 = vand.u32 2147483647, %v4257_v35  ;;  %vm4263_vm1 = vweird.f32 %v4257_v35 }
0x16f2   :  { %4620 = vrcp.f32 %v4752_v57 }
0x16f3   :  { %v4270_v4 = vor.u32 1.1754944e-38, %v4269_v31  ;;  %vm4268_vm3 = vcmp.eq.f32.partialorder %v4267_v56, 8.507059e+37 }
0x16f7   :  { %v4619_v48 = vpop.eup %4618 }
0x16f8   :  { %v4259_v44 = vmul.f32 %v4619_v48, %v4257_v35  ;;  %vm4264_vm13 = vweird.f32 %v4619_v48  ;;  %v4621_v19 = vpop.eup %4620 }
0x16f9   :  { %vm4265_vm2 = vmor %vm4263_vm1, %vm4264_vm13  ;;  %v4327_v49 = vmul.f32 8.0, %v4621_v19 }
0x16fa   :  { %v4260_v42 = vsub.f32 1.0, %v4259_v44 }
0x16fb   :  { %v4328_v41 = vsub.f32 1.0, %v4327_v49 }
0x16fc   :  { %v4261_v38 = vmul.f32 %v4619_v48, %v4260_v42 }
0x16fd   :  { %v4329_v1 = vmul.f32 %v4621_v19, %v4328_v41 }
0x16fe   :  { %v4262_v34 = vadd.f32 %v4619_v48, %v4261_v38 }
0x16ff   :  { %v4330_v45 = vadd.f32 %v4621_v19, %v4329_v1 }
0x1700   :  { %v4266_v28 = vsel %vm4265_vm2, %v4619_v48, %v4262_v34 }
0x1701   :  { %v4271_v11 = vsel %vm4268_vm3, %v4270_v4, %v4266_v28 }
0x1702   :  { %v4273_v52 = vmul.f32 %v4271_v11, %v4252_v27 }
0x1704   :  { %4445 = vmatmul.msk.f32.vlgmr.msra.gmra.mxu3 %vm3634_vm6, %v4273_v52  ;;  %vm4331_vm6 = vweird.f32 %v4621_v19 }
0x1705   :  { %v4332_v5 = vsel %vm4331_vm6, %v4621_v19, %v4330_v45 }
0x1787   :  { %v4306_v21 = vpop.f32.mrf.mxu3 }
0x1788   :  { %v4307_v54 = vadd.f32 %v4463_v16, %v4306_v21 }
0x178a   :  { %4311 = vperm.xlu1 %4458, %v4307_v54   ;;  %v4316_v6 = vsel %vm4315_vm4, %v4307_v54, 0.0 }
0x178b   :  { %4317 = vadd.xlane.f32.xlu0 %v4316_v6 }
0x1792   :  { %4344 = vrot.lane.b32.xlu1 %v9773_v53, %s4750_s11 }
0x17fc   :  { %v4312_v63 = vpop.permute.xlu1 %4311 }
0x17fd   :  { %v4314_v46 = vadd.f32 %v4312_v63, %v4307_v54 }
0x17fe   :  { %v4318_v43 = vpop.xlane.xlu0 %4317 }
0x17ff   :  { %v4319_v51 = vrot.slane %v4318_v43, 4 }
0x1801   :  { %v4320_v2 = vadd.f32 %v4319_v51, %v4318_v43 }
0x1803   :  { %v4321_v32 = vrot.slane %v4320_v2, 2 }
0x1804   :  { %v4345_v24 = vpop.permute.xlu1 %4344 }
0x1805   :  { %4347 = vst.msk [vmem:[#allocation6 - $0x6] sm:$0xc0] %vm4341_vm0, %v4345_v24  ;;  %v4322_v60 = vadd.f32 %v4321_v32, %v4320_v2 }
0x1806   :  { %4380 = dma.vmem_to_hbm [thread:$0]  %s4376_s3, 32, %s4378_s12, [#allocation5]  }
0x1807   :  { %v4323_v50 = vrot.slane %v4322_v60, 1 }
0x1809   :  { %v4324_v18 = vadd.f32 %v4323_v50, %v4322_v60 }
0x180b   :  { %4446 = vpush %v4324_v18 }
0x180c   :  { %4448 = vpush %v4332_v5 }
0x183c   :  { %s4447_s17 = spop %4446 }
0x183d   :  { %s4449_s27 = spop %4448 }
0x183e   :  { %s4334_s4 = smul.f32 %s4449_s27, %s4447_s17 }
0x1840   :  { %v4335_v39 = vstv %s4334_s4 }
0x1841   :  { %v4336_v59 = vsub.f32 %v4314_v46, %v4335_v39 }
0x1843   :  { %4337 = vst.msk [vmem:[#allocation2] sm:$0x3] %vm4315_vm4, %v4336_v59 }
0x1844   :  { %4358 = dma.vmem_to_hbm [thread:$0]  %s4354_s28, 32, %s4356_s0, [#allocation3]  }
0x1845   :  { %4743 = dma.done.wait [#allocation3], 32  }
0x1846   :  { %4744 = vsyncadd [#allocation3], 4294967264 }
0x1847   :  { %4745 = dma.done.wait [#allocation5], 64  }
0x1848   :  { %4746 = vsyncadd [#allocation5], 4294967232 }
0x1849   :  { %4393 = vsyncpa [#allocation3], 1 }
0x184a   :  { %4394 = vsyncpa [#allocation5], 1 }

</bundles_post_ra>
